<compile_context>
chip_gen: v6e
topology: v6e:2x2x1
jax: 0.10.0
libtpu: 0.0.40
codegen_flags: <defaults>
</compile_context>

<pallas_src>
import functools

import jax
import jax.numpy as jnp
from jax.experimental import pallas as pl
from jax.experimental.pallas import tpu as pltpu


# ------------------------------ Pallas kernel -------------------------------

def _make_kernel(*, mode, row_w, mg, h_out, w_out, normalize, lrelu, has_bias,
                 out_off, out_total, eps=1e-5):
    """Fused Conv2d(3x3) [+ InstanceNorm] [+ LeakyReLU] for one sample / C_out block."""

    def kernel(*refs):
        if has_bias:
            x_ref, w_ref, b_ref, o_ref = refs
        else:
            x_ref, w_ref, o_ref = refs
            b_ref = None
        c_blk = o_ref.shape[-1]

        # ---- 3x3 conv on the MXU (bf16/f32 inputs, f32 accumulation) ----
        if mode == "im2col":
            # taps pre-folded into K = 9*C_in: one deep matmul.
            acc = jnp.dot(x_ref[0], w_ref[...], preferred_element_type=jnp.float32)
        else:
            acc = jnp.zeros((mg, c_blk), jnp.float32)
            for kh in range(3):
                for kw in range(3):
                    if mode == "s1":       # flat padded slab, stride 1
                        lhs = x_ref[0, pl.ds(kh * row_w + kw, mg), :]
                    else:                  # "s2": parity-split slab, stride 2
                        p = (kh % 2) * 2 + (kw % 2)
                        lhs = x_ref[0, p, pl.ds((kh // 2) * row_w + (kw // 2), mg), :]
                    acc = acc + jnp.dot(lhs, w_ref[kh * 3 + kw],
                                        preferred_element_type=jnp.float32)

        if has_bias:                       # only non-normalized layers (IN cancels bias)
            acc = acc + b_ref[...]

        if normalize:
            # valid-column mask built in-register (garbage cols of the flattened slab)
            col = jax.lax.broadcasted_iota(jnp.int32, (mg, 1), 0) % row_w
            valid = (col < w_out).astype(jnp.float32)
            cnt = float(h_out * w_out)
            masked = acc * valid
            s_sum = jnp.sum(masked, axis=0, keepdims=True)
            s_sq = jnp.sum(masked * masked, axis=0, keepdims=True)
            mean = s_sum * (1.0 / cnt)
            var = jnp.maximum(s_sq * (1.0 / cnt) - mean * mean, 0.0)
            acc = (acc - mean) * jax.lax.rsqrt(var + eps)
            if lrelu:
                acc = jnp.where(acc >= 0, acc, 0.2 * acc)
            acc = acc * valid              # zero garbage so the slab chains cleanly
        elif lrelu:
            acc = jnp.where(acc >= 0, acc, 0.2 * acc)

        y = acc.astype(o_ref.dtype)
        if out_off == 0 and out_total == mg:
            o_ref[0, :, :] = y             # single lane-dense slab store
        else:
            # emit directly in the next (stride-1) layer's padded input layout
            o_ref[0, pl.ds(0, out_off), :] = jnp.zeros((out_off, c_blk), o_ref.dtype)
            o_ref[0, pl.ds(out_off, mg), :] = y
            tail = out_total - out_off - mg
            o_ref[0, pl.ds(out_off + mg, tail), :] = jnp.zeros((tail, c_blk), o_ref.dtype)

    return kernel


# ------------------------------ block wrapper --------------------------------

def _conv_block_call(x_in, w, b, *, mode, row_w, mg, h_out, w_out,
                     normalize, lrelu, out_total, out_off, out_dtype,
                     cout_block=256, vmem_limit=32 * 1024 * 1024):
    """One discriminator block as a single fused pallas_call."""
    N = x_in.shape[0]
    c_out = w.shape[-1]
    cb = min(c_out, cout_block)            # second parallel grid axis over C_out blocks
    nj = c_out // cb
    has_bias = b is not None

    kernel = _make_kernel(mode=mode, row_w=row_w, mg=mg, h_out=h_out, w_out=w_out,
                          normalize=normalize, lrelu=lrelu, has_bias=has_bias,
                          out_off=out_off, out_total=out_total)

    if x_in.ndim == 3:
        x_spec = pl.BlockSpec((1,) + x_in.shape[1:], lambda n, j: (n, 0, 0))
    else:
        x_spec = pl.BlockSpec((1,) + x_in.shape[1:], lambda n, j: (n, 0, 0, 0))

    in_specs = [x_spec]
    args = [x_in]
    if mode == "im2col":
        in_specs.append(pl.BlockSpec((w.shape[0], cb), lambda n, j: (0, j)))
    else:
        in_specs.append(pl.BlockSpec((9, w.shape[1], cb), lambda n, j: (0, 0, j)))
    args.append(w)
    if has_bias:
        in_specs.append(pl.BlockSpec((1, cb), lambda n, j: (0, j)))
        args.append(b)

    return pl.pallas_call(
        kernel,
        out_shape=jax.ShapeDtypeStruct((N, out_total, c_out), out_dtype),
        grid_spec=pltpu.PrefetchScalarGridSpec(
            num_scalar_prefetch=0,
            grid=(N, nj),
            in_specs=in_specs,
            out_specs=pl.BlockSpec((1, out_total, cb), lambda n, j: (n, 0, j)),
        ),
        compiler_params=pltpu.CompilerParams(
            dimension_semantics=("parallel", "parallel"),
            vmem_limit_bytes=vmem_limit),
    )(*args)


def _parity_split(x_nhwc, pad_right):
    """Zero-pad (1,3)x(1,pad_right) and split into the 4 stride-2 parity planes,
    each flattened to (plane_rows * plane_w, C), so every 3x3 tap of a stride-2
    conv becomes a contiguous static slice inside the kernel."""
    N, H, W, Cc = x_nhwc.shape
    xp = jnp.pad(x_nhwc, ((0, 0), (1, 3), (1, pad_right), (0, 0)))
    Hp, Wp = H + 4, W + 1 + pad_right
    planes = [xp[:, ph::2, pw::2, :] for ph in (0, 1) for pw in (0, 1)]
    xs = jnp.stack(planes, axis=1)                 # (N, 4, Hp//2, Wp//2, C)
    r = Wp // 2
    return xs.reshape(N, 4, (Hp // 2) * r, Cc), r


# --------------------------- full discriminator ------------------------------

def discriminator_forward(img_nchw, params, compute_dtype=jnp.bfloat16):
    N, C, H, W = img_nchw.shape
    assert H % 8 == 0 and W % 8 == 0, "this implementation needs H, W divisible by 8"
    cdt = compute_dtype
    x = jnp.transpose(img_nchw, (0, 2, 3, 1)).astype(cdt)        # NHWC, single transpose

    def w_taps(w):                                               # (O,I,3,3) -> (9,I,O)
        o, i = w.shape[0], w.shape[1]
        return jnp.transpose(w, (2, 3, 1, 0)).reshape(9, i, o).astype(cdt)

    # -------- layer 1: stride 2, C -> 64, LeakyReLU (taps K-folded: im2col) --------
    H1, W1 = H // 2, W // 2
    xp = jnp.pad(x, ((0, 0), (1, 1), (1, 1), (0, 0)))
    taps = [xp[:, kh:kh + 2 * H1:2, kw:kw + 2 * W1:2, :]
            for kh in range(3) for kw in range(3)]
    xcol = jnp.concatenate(taps, axis=-1).reshape(N, H1 * W1, 9 * C)
    w1 = jnp.transpose(params["w1"], (2, 3, 1, 0)).reshape(9 * C, 64).astype(cdt)
    b1 = params["b1"].reshape(1, 64).astype(jnp.float32)
    y1 = _conv_block_call(xcol, w1, b1, mode="im2col", row_w=W1, mg=H1 * W1,
                          h_out=H1, w_out=W1, normalize=False, lrelu=True,
                          out_total=H1 * W1, out_off=0, out_dtype=cdt)
    y1 = y1.reshape(N, H1, W1, 64)

    # -------- layer 2: stride 2, 64 -> 128, InstanceNorm + LeakyReLU ---------------
    H2, W2 = H1 // 2, W1 // 2
    x2, r2 = _parity_split(y1, pad_right=1)                      # r2 = W2 + 1
    mg2 = H2 * r2
    y2 = _conv_block_call(x2, w_taps(params["w2"]), None, mode="s2", row_w=r2, mg=mg2,
                          h_out=H2, w_out=W2, normalize=True, lrelu=True,
                          out_total=mg2, out_off=0, out_dtype=cdt)
    y2 = y2.reshape(N, H2, r2, 128)[:, :, :W2, :]

    # -------- layer 3: stride 2, 128 -> 256, InstanceNorm + LeakyReLU --------------
    # Extra right padding makes the output slab row width equal layer 4's padded input
    # width, so this kernel writes layer 4's input slab directly (zero XLA glue).
    H3, W3 = H2 // 2, W2 // 2
    x3, r3 = _parity_split(y2, pad_right=3)                      # r3 = W3 + 2
    mg3 = H3 * r3
    tot3 = (H3 + 3) * r3
    y3 = _conv_block_call(x3, w_taps(params["w3"]), None, mode="s2", row_w=r3, mg=mg3,
                          h_out=H3, w_out=W3, normalize=True, lrelu=True,
                          out_total=tot3, out_off=r3 + 1, out_dtype=cdt)

    # -------- layer 4: stride 1, 256 -> 512, InstanceNorm + LeakyReLU --------------
    H4, W4, r4 = H3, W3, W3 + 2                                  # r4 == r3
    mg4 = H4 * r4
    tot4 = (H4 + 3) * r4
    y4 = _conv_block_call(y3, w_taps(params["w4"]), None, mode="s1", row_w=r4, mg=mg4,
                          h_out=H4, w_out=W4, normalize=True, lrelu=True,
                          out_total=tot4, out_off=r4 + 1, out_dtype=cdt)

    # -------- layer 5: stride 1, 512 -> 1, conv + bias (patch logits) --------------
    H5, W5, r5 = H4, W4, W4 + 2                                  # r5 == r4
    mg5 = H5 * r5
    w5 = jnp.transpose(params["w5"], (2, 3, 1, 0)).reshape(9, 512, 1)
    w5 = jnp.pad(w5, ((0, 0), (0, 0), (0, 127))).astype(cdt)     # lane-dense C_out
    b5 = jnp.pad(params["b5"], (0, 127)).reshape(1, 128).astype(jnp.float32)
    y5 = _conv_block_call(y4, w5, b5, mode="s1", row_w=r5, mg=mg5,
                          h_out=H5, w_out=W5, normalize=False, lrelu=False,
                          out_total=mg5, out_off=0, out_dtype=jnp.float32)
    y5 = y5.reshape(N, H5, r5, 128)[:, :, :W5, :1]
    return jnp.transpose(y5, (0, 3, 1, 2))                       # NCHW


# ------------------------------ JAX reference ---------------------------------

def discriminator_ref(img, params):
    def conv(x, w, b, stride):
        y = jax.lax.conv_general_dilated(
            x, w, window_strides=(stride, stride), padding=((1, 1), (1, 1)),
            dimension_numbers=("NCHW", "OIHW", "NCHW"))
        return y + b.reshape(1, -1, 1, 1)

    def inorm(y, eps=1e-5):
        m = jnp.mean(y, axis=(2, 3), keepdims=True)
        v = jnp.mean((y - m) ** 2, axis=(2, 3), keepdims=True)
        return (y - m) / jnp.sqrt(v + eps)

    def lrelu(y):
        return jnp.where(y >= 0, y, 0.2 * y)

    x = lrelu(conv(img, params["w1"], params["b1"], 2))
    x = lrelu(inorm(conv(x, params["w2"], params["b2"], 2)))
    x = lrelu(inorm(conv(x, params["w3"], params["b3"], 2)))
    x = lrelu(inorm(conv(x, params["w4"], params["b4"], 1)))
    return conv(x, params["w5"], params["b5"], 1)


# ----------------------------------- main -------------------------------------

def init_params(key, in_channels):
    dims = [(in_channels, 64), (64, 128), (128, 256), (256, 512), (512, 1)]
    params = {}
    for i, (ci, co) in enumerate(dims, start=1):
        key, kw_, kb_ = jax.random.split(key, 3)
        scale = (2.0 / (ci * 9)) ** 0.5
        params[f"w{i}"] = jax.random.normal(kw_, (co, ci, 3, 3), jnp.float32) * scale
        params[f"b{i}"] = jax.random.normal(kb_, (co,), jnp.float32) * 0.1
    return params


if __name__ == "__main__":
    key = jax.random.PRNGKey(0)
    k_img, k_par = jax.random.split(key)

    N, C, H, W = 2, 2, 16, 16
    img = jax.random.normal(k_img, (N, C, H, W), dtype=jnp.float32)
    params = init_params(k_par, C)

    ref = discriminator_ref(img, params)

    # tight numerical validation on the f32 configuration of the same kernels
    fwd_f32 = jax.jit(functools.partial(discriminator_forward, compute_dtype=jnp.float32))
    out_f32 = jax.block_until_ready(fwd_f32(img, params))
    assert out_f32.shape == ref.shape == (N, 1, H // 8, W // 8), (out_f32.shape, ref.shape)
    assert jnp.allclose(out_f32, ref, rtol=3e-2, atol=3e-2), \
        f"f32 max abs err = {float(jnp.max(jnp.abs(out_f32 - ref)))}"

    # bf16 fast path (the performance configuration): sanity-checked loosely, since
    # bf16 through InstanceNorms over few spatial samples is not tightly bounded
    # against an f32 reference.
    fwd_bf16 = jax.jit(functools.partial(discriminator_forward, compute_dtype=jnp.bfloat16))
    out_bf16 = jax.block_until_ready(fwd_bf16(img, params))
    assert out_bf16.shape == ref.shape
    assert bool(jnp.all(jnp.isfinite(out_bf16)))
    assert jnp.allclose(out_bf16, ref, rtol=2.5e-1, atol=2.5e-1), \
        f"bf16 max abs err = {float(jnp.max(jnp.abs(out_bf16 - ref)))}"

    print("KERNEL_OK")
</pallas_src>

<mosaic_0001>
module attributes {stable_mosaic.version = 11 : i64} {
  func.func @kernel(%arg0: i32, %arg1: i32, %arg2: memref<1x64x18xf32, #tpu.memory_space<vmem>>, %arg3: memref<18x64xf32, #tpu.memory_space<vmem>>, %arg4: memref<1x64xf32, #tpu.memory_space<vmem>>, %arg5: memref<1x64x64xf32, #tpu.memory_space<vmem>>) attributes {dimension_semantics = [#tpu.dimension_semantics<parallel>, #tpu.dimension_semantics<parallel>], iteration_bounds = array<i64: 2, 1>, scalar_prefetch = 0 : i64, scratch_operands = 0 : i64, tpu.core_type = #tpu.core_type<tc>, window_params = [{transform_indices = @transform_0, window_bounds = array<i64: 1, 64, 18>}, {transform_indices = @transform_1, window_bounds = array<i64: 18, 64>}, {transform_indices = @transform_2, window_bounds = array<i64: 1, 64>}, {transform_indices = @transform_3, window_bounds = array<i64: 1, 64, 64>}]} {
    %c0 = arith.constant 0 : index
    %c0_0 = arith.constant 0 : index
    %c0_1 = arith.constant 0 : index
    %0 = vector.load %arg2[%c0, %c0_0, %c0_1] : memref<1x64x18xf32, #tpu.memory_space<vmem>>, vector<1x64x18xf32>
    %1 = vector.shape_cast %0 : vector<1x64x18xf32> to vector<64x18xf32>
    %c0_2 = arith.constant 0 : index
    %c0_3 = arith.constant 0 : index
    %2 = vector.load %arg3[%c0_2, %c0_3] : memref<18x64xf32, #tpu.memory_space<vmem>>, vector<18x64xf32>
    %cst = arith.constant dense<0.000000e+00> : vector<64x64xf32>
    %3 = tpu.matmul %1, %2, %cst {dimension_numbers = #tpu.dot_dimension_numbers<[1], [0], [0], [1], [0, 0, 1, 1], [], []>} : vector<64x18xf32>, vector<18x64xf32>, vector<64x64xf32> -> vector<64x64xf32>
    %c0_4 = arith.constant 0 : index
    %c0_5 = arith.constant 0 : index
    %4 = vector.load %arg4[%c0_4, %c0_5] : memref<1x64xf32, #tpu.memory_space<vmem>>, vector<1x64xf32>
    %5 = vector.broadcast %4 : vector<1x64xf32> to vector<64x64xf32>
    %6 = arith.addf %3, %5 : vector<64x64xf32>
    %cst_6 = arith.constant 0.000000e+00 : f32
    %7 = vector.broadcast %cst_6 : f32 to vector<64x64xf32>
    %8 = arith.cmpf oge, %6, %7 : vector<64x64xf32>
    %cst_7 = arith.constant 2.000000e-01 : f32
    %9 = vector.broadcast %cst_7 : f32 to vector<64x64xf32>
    %10 = arith.mulf %9, %6 : vector<64x64xf32>
    %11 = arith.select %8, %6, %10 : vector<64x64xi1>, vector<64x64xf32>
    %c0_8 = arith.constant 0 : index
    %c0_9 = arith.constant 0 : index
    %c0_10 = arith.constant 0 : index
    %12 = vector.load %arg5[%c0_8, %c0_9, %c0_10] : memref<1x64x64xf32, #tpu.memory_space<vmem>>, vector<1x64x64xf32>
    %13 = vector.shape_cast %12 : vector<1x64x64xf32> to vector<64x64xf32>
    %14 = vector.shape_cast %11 : vector<64x64xf32> to vector<1x64x64xf32>
    tpu.vector_store %arg5[%c0_8, %c0_9, %c0_10], %14 {strides = array<i32>} : memref<1x64x64xf32, #tpu.memory_space<vmem>>, vector<1x64x64xf32>,
    return
  }
  func.func @transform_0(%arg0: i32, %arg1: i32) -> (i32, i32, i32) {
    %c0_i32 = arith.constant 0 : i32
    %c0_i32_0 = arith.constant 0 : i32
    %c0_i32_1 = arith.constant 0 : i32
    return %arg0, %c0_i32, %c0_i32_0 : i32, i32, i32
  }
  func.func @transform_1(%arg0: i32, %arg1: i32) -> (i32, i32) {
    %c0_i32 = arith.constant 0 : i32
    %c0_i32_0 = arith.constant 0 : i32
    return %c0_i32, %arg1 : i32, i32
  }
  func.func @transform_2(%arg0: i32, %arg1: i32) -> (i32, i32) {
    %c0_i32 = arith.constant 0 : i32
    %c0_i32_0 = arith.constant 0 : i32
    return %c0_i32, %arg1 : i32, i32
  }
  func.func @transform_3(%arg0: i32, %arg1: i32) -> (i32, i32, i32) {
    %c0_i32 = arith.constant 0 : i32
    %c0_i32_0 = arith.constant 0 : i32
    return %arg0, %c0_i32, %arg1 : i32, i32, i32
  }
}

module attributes {stable_mosaic.version = 11 : i64} {
  func.func @kernel(%arg0: i32, %arg1: i32, %arg2: memref<1x4x30x64xf32, #tpu.memory_space<vmem>>, %arg3: memref<9x64x128xf32, #tpu.memory_space<vmem>>, %arg4: memref<1x20x128xf32, #tpu.memory_space<vmem>>) attributes {dimension_semantics = [#tpu.dimension_semantics<parallel>, #tpu.dimension_semantics<parallel>], iteration_bounds = array<i64: 2, 1>, scalar_prefetch = 0 : i64, scratch_operands = 0 : i64, tpu.core_type = #tpu.core_type<tc>, window_params = [{transform_indices = @transform_0, window_bounds = array<i64: 1, 4, 30, 64>}, {transform_indices = @transform_1, window_bounds = array<i64: 9, 64, 128>}, {transform_indices = @transform_2, window_bounds = array<i64: 1, 20, 128>}]} {
    %cst = arith.constant 0.000000e+00 : f32
    %0 = vector.broadcast %cst : f32 to vector<20x128xf32>
    %c0 = arith.constant 0 : index
    %c0_0 = arith.constant 0 : index
    %c0_1 = arith.constant 0 : index
    %c0_2 = arith.constant 0 : index
    %1 = vector.load %arg2[%c0, %c0_0, %c0_1, %c0_2] : memref<1x4x30x64xf32, #tpu.memory_space<vmem>>, vector<1x1x20x64xf32>
    %2 = vector.shape_cast %1 : vector<1x1x20x64xf32> to vector<20x64xf32>
    %c0_3 = arith.constant 0 : index
    %c0_4 = arith.constant 0 : index
    %c0_5 = arith.constant 0 : index
    %3 = vector.load %arg3[%c0_3, %c0_4, %c0_5] : memref<9x64x128xf32, #tpu.memory_space<vmem>>, vector<1x64x128xf32>
    %4 = vector.shape_cast %3 : vector<1x64x128xf32> to vector<64x128xf32>
    %cst_6 = arith.constant dense<0.000000e+00> : vector<20x128xf32>
    %5 = tpu.matmul %2, %4, %cst_6 {dimension_numbers = #tpu.dot_dimension_numbers<[1], [0], [0], [1], [0, 0, 1, 1], [], []>} : vector<20x64xf32>, vector<64x128xf32>, vector<20x128xf32> -> vector<20x128xf32>
    %6 = arith.addf %0, %5 : vector<20x128xf32>
    %c0_7 = arith.constant 0 : index
    %c1 = arith.constant 1 : index
    %c0_8 = arith.constant 0 : index
    %c0_9 = arith.constant 0 : index
    %7 = vector.load %arg2[%c0_7, %c1, %c0_8, %c0_9] : memref<1x4x30x64xf32, #tpu.memory_space<vmem>>, vector<1x1x20x64xf32>
    %8 = vector.shape_cast %7 : vector<1x1x20x64xf32> to vector<20x64xf32>
    %c1_10 = arith.constant 1 : index
    %c0_11 = arith.constant 0 : index
    %c0_12 = arith.constant 0 : index
    %9 = vector.load %arg3[%c1_10, %c0_11, %c0_12] : memref<9x64x128xf32, #tpu.memory_space<vmem>>, vector<1x64x128xf32>
    %10 = vector.shape_cast %9 : vector<1x64x128xf32> to vector<64x128xf32>
    %cst_13 = arith.constant dense<0.000000e+00> : vector<20x128xf32>
    %11 = tpu.matmul %8, %10, %cst_13 {dimension_numbers = #tpu.dot_dimension_numbers<[1], [0], [0], [1], [0, 0, 1, 1], [], []>} : vector<20x64xf32>, vector<64x128xf32>, vector<20x128xf32> -> vector<20x128xf32>
    %12 = arith.addf %6, %11 : vector<20x128xf32>
    %c0_14 = arith.constant 0 : index
    %c0_15 = arith.constant 0 : index
    %c1_16 = arith.constant 1 : index
    %c0_17 = arith.constant 0 : index
    %13 = vector.load %arg2[%c0_14, %c0_15, %c1_16, %c0_17] : memref<1x4x30x64xf32, #tpu.memory_space<vmem>>, vector<1x1x20x64xf32>
    %14 = vector.shape_cast %13 : vector<1x1x20x64xf32> to vector<20x64xf32>
    %c2 = arith.constant 2 : index
    %c0_18 = arith.constant 0 : index
    %c0_19 = arith.constant 0 : index
    %15 = vector.load %arg3[%c2, %c0_18, %c0_19] : memref<9x64x128xf32, #tpu.memory_space<vmem>>, vector<1x64x128xf32>
    %16 = vector.shape_cast %15 : vector<1x64x128xf32> to vector<64x128xf32>
    %cst_20 = arith.constant dense<0.000000e+00> : vector<20x128xf32>
    %17 = tpu.matmul %14, %16, %cst_20 {dimension_numbers = #tpu.dot_dimension_numbers<[1], [0], [0], [1], [0, 0, 1, 1], [], []>} : vector<20x64xf32>, vector<64x128xf32>, vector<20x128xf32> -> vector<20x128xf32>
    %18 = arith.addf %12, %17 : vector<20x128xf32>
    %c0_21 = arith.constant 0 : index
    %c2_22 = arith.constant 2 : index
    %c0_23 = arith.constant 0 : index
    %c0_24 = arith.constant 0 : index
    %19 = vector.load %arg2[%c0_21, %c2_22, %c0_23, %c0_24] : memref<1x4x30x64xf32, #tpu.memory_space<vmem>>, vector<1x1x20x64xf32>
    %20 = vector.shape_cast %19 : vector<1x1x20x64xf32> to vector<20x64xf32>
    %c3 = arith.constant 3 : index
    %c0_25 = arith.constant 0 : index
    %c0_26 = arith.constant 0 : index
    %21 = vector.load %arg3[%c3, %c0_25, %c0_26] : memref<9x64x128xf32, #tpu.memory_space<vmem>>, vector<1x64x128xf32>
    %22 = vector.shape_cast %21 : vector<1x64x128xf32> to vector<64x128xf32>
    %cst_27 = arith.constant dense<0.000000e+00> : vector<20x128xf32>
    %23 = tpu.matmul %20, %22, %cst_27 {dimension_numbers = #tpu.dot_dimension_numbers<[1], [0], [0], [1], [0, 0, 1, 1], [], []>} : vector<20x64xf32>, vector<64x128xf32>, vector<20x128xf32> -> vector<20x128xf32>
    %24 = arith.addf %18, %23 : vector<20x128xf32>
    %c0_28 = arith.constant 0 : index
    %c3_29 = arith.constant 3 : index
    %c0_30 = arith.constant 0 : index
    %c0_31 = arith.constant 0 : index
    %25 = vector.load %arg2[%c0_28, %c3_29, %c0_30, %c0_31] : memref<1x4x30x64xf32, #tpu.memory_space<vmem>>, vector<1x1x20x64xf32>
    %26 = vector.shape_cast %25 : vector<1x1x20x64xf32> to vector<20x64xf32>
    %c4 = arith.constant 4 : index
    %c0_32 = arith.constant 0 : index
    %c0_33 = arith.constant 0 : index
    %27 = vector.load %arg3[%c4, %c0_32, %c0_33] : memref<9x64x128xf32, #tpu.memory_space<vmem>>, vector<1x64x128xf32>
    %28 = vector.shape_cast %27 : vector<1x64x128xf32> to vector<64x128xf32>
    %cst_34 = arith.constant dense<0.000000e+00> : vector<20x128xf32>
    %29 = tpu.matmul %26, %28, %cst_34 {dimension_numbers = #tpu.dot_dimension_numbers<[1], [0], [0], [1], [0, 0, 1, 1], [], []>} : vector<20x64xf32>, vector<64x128xf32>, vector<20x128xf32> -> vector<20x128xf32>
    %30 = arith.addf %24, %29 : vector<20x128xf32>
    %c0_35 = arith.constant 0 : index
    %c2_36 = arith.constant 2 : index
    %c1_37 = arith.constant 1 : index
    %c0_38 = arith.constant 0 : index
    %31 = vector.load %arg2[%c0_35, %c2_36, %c1_37, %c0_38] : memref<1x4x30x64xf32, #tpu.memory_space<vmem>>, vector<1x1x20x64xf32>
    %32 = vector.shape_cast %31 : vector<1x1x20x64xf32> to vector<20x64xf32>
    %c5 = arith.constant 5 : index
    %c0_39 = arith.constant 0 : index
    %c0_40 = arith.constant 0 : index
    %33 = vector.load %arg3[%c5, %c0_39, %c0_40] : memref<9x64x128xf32, #tpu.memory_space<vmem>>, vector<1x64x128xf32>
    %34 = vector.shape_cast %33 : vector<1x64x128xf32> to vector<64x128xf32>
    %cst_41 = arith.constant dense<0.000000e+00> : vector<20x128xf32>
    %35 = tpu.matmul %32, %34, %cst_41 {dimension_numbers = #tpu.dot_dimension_numbers<[1], [0], [0], [1], [0, 0, 1, 1], [], []>} : vector<20x64xf32>, vector<64x128xf32>, vector<20x128xf32> -> vector<20x128xf32>
    %36 = arith.addf %30, %35 : vector<20x128xf32>
    %c0_42 = arith.constant 0 : index
    %c0_43 = arith.constant 0 : index
    %c5_44 = arith.constant 5 : index
    %c0_45 = arith.constant 0 : index
    %37 = vector.load %arg2[%c0_42, %c0_43, %c5_44, %c0_45] : memref<1x4x30x64xf32, #tpu.memory_space<vmem>>, vector<1x1x20x64xf32>
    %38 = vector.shape_cast %37 : vector<1x1x20x64xf32> to vector<20x64xf32>
    %c6 = arith.constant 6 : index
    %c0_46 = arith.constant 0 : index
    %c0_47 = arith.constant 0 : index
    %39 = vector.load %arg3[%c6, %c0_46, %c0_47] : memref<9x64x128xf32, #tpu.memory_space<vmem>>, vector<1x64x128xf32>
    %40 = vector.shape_cast %39 : vector<1x64x128xf32> to vector<64x128xf32>
    %cst_48 = arith.constant dense<0.000000e+00> : vector<20x128xf32>
    %41 = tpu.matmul %38, %40, %cst_48 {dimension_numbers = #tpu.dot_dimension_numbers<[1], [0], [0], [1], [0, 0, 1, 1], [], []>} : vector<20x64xf32>, vector<64x128xf32>, vector<20x128xf32> -> vector<20x128xf32>
    %42 = arith.addf %36, %41 : vector<20x128xf32>
    %c0_49 = arith.constant 0 : index
    %c1_50 = arith.constant 1 : index
    %c5_51 = arith.constant 5 : index
    %c0_52 = arith.constant 0 : index
    %43 = vector.load %arg2[%c0_49, %c1_50, %c5_51, %c0_52] : memref<1x4x30x64xf32, #tpu.memory_space<vmem>>, vector<1x1x20x64xf32>
    %44 = vector.shape_cast %43 : vector<1x1x20x64xf32> to vector<20x64xf32>
    %c7 = arith.constant 7 : index
    %c0_53 = arith.constant 0 : index
    %c0_54 = arith.constant 0 : index
    %45 = vector.load %arg3[%c7, %c0_53, %c0_54] : memref<9x64x128xf32, #tpu.memory_space<vmem>>, vector<1x64x128xf32>
    %46 = vector.shape_cast %45 : vector<1x64x128xf32> to vector<64x128xf32>
    %cst_55 = arith.constant dense<0.000000e+00> : vector<20x128xf32>
    %47 = tpu.matmul %44, %46, %cst_55 {dimension_numbers = #tpu.dot_dimension_numbers<[1], [0], [0], [1], [0, 0, 1, 1], [], []>} : vector<20x64xf32>, vector<64x128xf32>, vector<20x128xf32> -> vector<20x128xf32>
    %48 = arith.addf %42, %47 : vector<20x128xf32>
    %c0_56 = arith.constant 0 : index
    %c0_57 = arith.constant 0 : index
    %c6_58 = arith.constant 6 : index
    %c0_59 = arith.constant 0 : index
    %49 = vector.load %arg2[%c0_56, %c0_57, %c6_58, %c0_59] : memref<1x4x30x64xf32, #tpu.memory_space<vmem>>, vector<1x1x20x64xf32>
    %50 = vector.shape_cast %49 : vector<1x1x20x64xf32> to vector<20x64xf32>
    %c8 = arith.constant 8 : index
    %c0_60 = arith.constant 0 : index
    %c0_61 = arith.constant 0 : index
    %51 = vector.load %arg3[%c8, %c0_60, %c0_61] : memref<9x64x128xf32, #tpu.memory_space<vmem>>, vector<1x64x128xf32>
    %52 = vector.shape_cast %51 : vector<1x64x128xf32> to vector<64x128xf32>
    %cst_62 = arith.constant dense<0.000000e+00> : vector<20x128xf32>
    %53 = tpu.matmul %50, %52, %cst_62 {dimension_numbers = #tpu.dot_dimension_numbers<[1], [0], [0], [1], [0, 0, 1, 1], [], []>} : vector<20x64xf32>, vector<64x128xf32>, vector<20x128xf32> -> vector<20x128xf32>
    %54 = arith.addf %48, %53 : vector<20x128xf32>
    %55 = tpu.iota {dimensions = array<i32: 0>} : vector<20x1xi32>
    %c5_i32 = arith.constant 5 : i32
    %c0_i32 = arith.constant 0 : i32
    %56 = arith.cmpi eq, %c5_i32, %c0_i32 : i32
    %c1_i32 = arith.constant 1 : i32
    %57 = arith.select %56, %c1_i32, %c5_i32 : i32
    %58 = vector.broadcast %57 : i32 to vector<20x1xi32>
    %59 = arith.remsi %55, %58 : vector<20x1xi32>
    %c0_i32_63 = arith.constant 0 : i32
    %60 = vector.broadcast %c0_i32_63 : i32 to vector<20x1xi32>
    %61 = arith.cmpi ne, %59, %60 : vector<20x1xi32>
    %c0_i32_64 = arith.constant 0 : i32
    %62 = vector.broadcast %c0_i32_64 : i32 to vector<20x1xi32>
    %63 = arith.cmpi slt, %59, %62 : vector<20x1xi32>
    %c0_i32_65 = arith.constant 0 : i32
    %64 = arith.cmpi slt, %57, %c0_i32_65 : i32
    %65 = vector.broadcast %64 : i1 to vector<20x1xi1>
    %66 = vector.broadcast %65 : vector<20x1xi1> to vector<20x1xi1>
    %67 = arith.xori %63, %66 : vector<20x1xi1>
    %68 = arith.andi %67, %61 : vector<20x1xi1>
    %69 = vector.broadcast %57 : i32 to vector<20x1xi32>
    %70 = arith.addi %59, %69 : vector<20x1xi32>
    %71 = arith.select %68, %70, %59 : vector<20x1xi1>, vector<20x1xi32>
    %c4_i32 = arith.constant 4 : i32
    %72 = vector.broadcast %c4_i32 : i32 to vector<20x1xi32>
    %73 = arith.cmpi slt, %71, %72 : vector<20x1xi32>
    %74 = arith.extui %73 : vector<20x1xi1> to vector<20x1xi32>
    %75 = arith.sitofp %74 : vector<20x1xi32> to vector<20x1xf32>
    %76 = vector.broadcast %75 : vector<20x1xf32> to vector<20x128xf32>
    %77 = arith.mulf %54, %76 : vector<20x128xf32>
    %cst_66 = arith.constant dense<0.000000e+00> : vector<128xf32>
    %78 = vector.multi_reduction <add>, %77, %cst_66 [0] : vector<20x128xf32> to vector<128xf32>
    %79 = vector.shape_cast %78 : vector<128xf32> to vector<1x128xf32>
    %80 = arith.mulf %77, %77 : vector<20x128xf32>
    %cst_67 = arith.constant dense<0.000000e+00> : vector<128xf32>
    %81 = vector.multi_reduction <add>, %80, %cst_67 [0] : vector<20x128xf32> to vector<128xf32>
    %82 = vector.shape_cast %81 : vector<128xf32> to vector<1x128xf32>
    %cst_68 = arith.constant 6.250000e-02 : f32
    %83 = vector.broadcast %cst_68 : f32 to vector<1x128xf32>
    %84 = arith.mulf %79, %83 : vector<1x128xf32>
    %cst_69 = arith.constant 6.250000e-02 : f32
    %85 = vector.broadcast %cst_69 : f32 to vector<1x128xf32>
    %86 = arith.mulf %82, %85 : vector<1x128xf32>
    %87 = arith.mulf %84, %84 : vector<1x128xf32>
    %88 = arith.subf %86, %87 : vector<1x128xf32>
    %cst_70 = arith.constant 0.000000e+00 : f32
    %89 = vector.broadcast %cst_70 : f32 to vector<1x128xf32>
    %90 = arith.maximumf %88, %89 : vector<1x128xf32>
    %91 = vector.broadcast %84 : vector<1x128xf32> to vector<20x128xf32>
    %92 = arith.subf %54, %91 : vector<20x128xf32>
    %cst_71 = arith.constant 9.99999974E-6 : f32
    %93 = vector.broadcast %cst_71 : f32 to vector<1x128xf32>
    %94 = arith.addf %90, %93 : vector<1x128xf32>
    %95 = math.rsqrt %94 : vector<1x128xf32>
    %96 = vector.broadcast %95 : vector<1x128xf32> to vector<20x128xf32>
    %97 = arith.mulf %92, %96 : vector<20x128xf32>
    %cst_72 = arith.constant 0.000000e+00 : f32
    %98 = vector.broadcast %cst_72 : f32 to vector<20x128xf32>
    %99 = arith.cmpf oge, %97, %98 : vector<20x128xf32>
    %cst_73 = arith.constant 2.000000e-01 : f32
    %100 = vector.broadcast %cst_73 : f32 to vector<20x128xf32>
    %101 = arith.mulf %100, %97 : vector<20x128xf32>
    %102 = arith.select %99, %97, %101 : vector<20x128xi1>, vector<20x128xf32>
    %103 = vector.broadcast %75 : vector<20x1xf32> to vector<20x128xf32>
    %104 = arith.mulf %102, %103 : vector<20x128xf32>
    %c0_74 = arith.constant 0 : index
    %c0_75 = arith.constant 0 : index
    %c0_76 = arith.constant 0 : index
    %105 = vector.load %arg4[%c0_74, %c0_75, %c0_76] : memref<1x20x128xf32, #tpu.memory_space<vmem>>, vector<1x20x128xf32>
    %106 = vector.shape_cast %105 : vector<1x20x128xf32> to vector<20x128xf32>
    %107 = vector.shape_cast %104 : vector<20x128xf32> to vector<1x20x128xf32>
    tpu.vector_store %arg4[%c0_74, %c0_75, %c0_76], %107 {strides = array<i32>} : memref<1x20x128xf32, #tpu.memory_space<vmem>>, vector<1x20x128xf32>,
    return
  }
  func.func @transform_0(%arg0: i32, %arg1: i32) -> (i32, i32, i32, i32) {
    %c0_i32 = arith.constant 0 : i32
    %c0_i32_0 = arith.constant 0 : i32
    %c0_i32_1 = arith.constant 0 : i32
    %c0_i32_2 = arith.constant 0 : i32
    return %arg0, %c0_i32, %c0_i32_0, %c0_i32_1 : i32, i32, i32, i32
  }
  func.func @transform_1(%arg0: i32, %arg1: i32) -> (i32, i32, i32) {
    %c0_i32 = arith.constant 0 : i32
    %c0_i32_0 = arith.constant 0 : i32
    %c0_i32_1 = arith.constant 0 : i32
    return %c0_i32, %c0_i32_0, %arg1 : i32, i32, i32
  }
  func.func @transform_2(%arg0: i32, %arg1: i32) -> (i32, i32, i32) {
    %c0_i32 = arith.constant 0 : i32
    %c0_i32_0 = arith.constant 0 : i32
    return %arg0, %c0_i32, %arg1 : i32, i32, i32
  }
}

module attributes {stable_mosaic.version = 11 : i64} {
  func.func @kernel(%arg0: i32, %arg1: i32, %arg2: memref<1x4x16x128xf32, #tpu.memory_space<vmem>>, %arg3: memref<9x128x256xf32, #tpu.memory_space<vmem>>, %arg4: memref<1x20x256xf32, #tpu.memory_space<vmem>>) attributes {dimension_semantics = [#tpu.dimension_semantics<parallel>, #tpu.dimension_semantics<parallel>], iteration_bounds = array<i64: 2, 1>, scalar_prefetch = 0 : i64, scratch_operands = 0 : i64, tpu.core_type = #tpu.core_type<tc>, window_params = [{transform_indices = @transform_0, window_bounds = array<i64: 1, 4, 16, 128>}, {transform_indices = @transform_1, window_bounds = array<i64: 9, 128, 256>}, {transform_indices = @transform_2, window_bounds = array<i64: 1, 20, 256>}]} {
    %cst = arith.constant 0.000000e+00 : f32
    %0 = vector.broadcast %cst : f32 to vector<8x256xf32>
    %c0 = arith.constant 0 : index
    %c0_0 = arith.constant 0 : index
    %c0_1 = arith.constant 0 : index
    %c0_2 = arith.constant 0 : index
    %1 = vector.load %arg2[%c0, %c0_0, %c0_1, %c0_2] : memref<1x4x16x128xf32, #tpu.memory_space<vmem>>, vector<1x1x8x128xf32>
    %2 = vector.shape_cast %1 : vector<1x1x8x128xf32> to vector<8x128xf32>
    %c0_3 = arith.constant 0 : index
    %c0_4 = arith.constant 0 : index
    %c0_5 = arith.constant 0 : index
    %3 = vector.load %arg3[%c0_3, %c0_4, %c0_5] : memref<9x128x256xf32, #tpu.memory_space<vmem>>, vector<1x128x256xf32>
    %4 = vector.shape_cast %3 : vector<1x128x256xf32> to vector<128x256xf32>
    %cst_6 = arith.constant dense<0.000000e+00> : vector<8x256xf32>
    %5 = tpu.matmul %2, %4, %cst_6 {dimension_numbers = #tpu.dot_dimension_numbers<[1], [0], [0], [1], [0, 0, 1, 1], [], []>} : vector<8x128xf32>, vector<128x256xf32>, vector<8x256xf32> -> vector<8x256xf32>
    %6 = arith.addf %0, %5 : vector<8x256xf32>
    %c0_7 = arith.constant 0 : index
    %c1 = arith.constant 1 : index
    %c0_8 = arith.constant 0 : index
    %c0_9 = arith.constant 0 : index
    %7 = vector.load %arg2[%c0_7, %c1, %c0_8, %c0_9] : memref<1x4x16x128xf32, #tpu.memory_space<vmem>>, vector<1x1x8x128xf32>
    %8 = vector.shape_cast %7 : vector<1x1x8x128xf32> to vector<8x128xf32>
    %c1_10 = arith.constant 1 : index
    %c0_11 = arith.constant 0 : index
    %c0_12 = arith.constant 0 : index
    %9 = vector.load %arg3[%c1_10, %c0_11, %c0_12] : memref<9x128x256xf32, #tpu.memory_space<vmem>>, vector<1x128x256xf32>
    %10 = vector.shape_cast %9 : vector<1x128x256xf32> to vector<128x256xf32>
    %cst_13 = arith.constant dense<0.000000e+00> : vector<8x256xf32>
    %11 = tpu.matmul %8, %10, %cst_13 {dimension_numbers = #tpu.dot_dimension_numbers<[1], [0], [0], [1], [0, 0, 1, 1], [], []>} : vector<8x128xf32>, vector<128x256xf32>, vector<8x256xf32> -> vector<8x256xf32>
    %12 = arith.addf %6, %11 : vector<8x256xf32>
    %c0_14 = arith.constant 0 : index
    %c0_15 = arith.constant 0 : index
    %c1_16 = arith.constant 1 : index
    %c0_17 = arith.constant 0 : index
    %13 = vector.load %arg2[%c0_14, %c0_15, %c1_16, %c0_17] : memref<1x4x16x128xf32, #tpu.memory_space<vmem>>, vector<1x1x8x128xf32>
    %14 = vector.shape_cast %13 : vector<1x1x8x128xf32> to vector<8x128xf32>
    %c2 = arith.constant 2 : index
    %c0_18 = arith.constant 0 : index
    %c0_19 = arith.constant 0 : index
    %15 = vector.load %arg3[%c2, %c0_18, %c0_19] : memref<9x128x256xf32, #tpu.memory_space<vmem>>, vector<1x128x256xf32>
    %16 = vector.shape_cast %15 : vector<1x128x256xf32> to vector<128x256xf32>
    %cst_20 = arith.constant dense<0.000000e+00> : vector<8x256xf32>
    %17 = tpu.matmul %14, %16, %cst_20 {dimension_numbers = #tpu.dot_dimension_numbers<[1], [0], [0], [1], [0, 0, 1, 1], [], []>} : vector<8x128xf32>, vector<128x256xf32>, vector<8x256xf32> -> vector<8x256xf32>
    %18 = arith.addf %12, %17 : vector<8x256xf32>
    %c0_21 = arith.constant 0 : index
    %c2_22 = arith.constant 2 : index
    %c0_23 = arith.constant 0 : index
    %c0_24 = arith.constant 0 : index
    %19 = vector.load %arg2[%c0_21, %c2_22, %c0_23, %c0_24] : memref<1x4x16x128xf32, #tpu.memory_space<vmem>>, vector<1x1x8x128xf32>
    %20 = vector.shape_cast %19 : vector<1x1x8x128xf32> to vector<8x128xf32>
    %c3 = arith.constant 3 : index
    %c0_25 = arith.constant 0 : index
    %c0_26 = arith.constant 0 : index
    %21 = vector.load %arg3[%c3, %c0_25, %c0_26] : memref<9x128x256xf32, #tpu.memory_space<vmem>>, vector<1x128x256xf32>
    %22 = vector.shape_cast %21 : vector<1x128x256xf32> to vector<128x256xf32>
    %cst_27 = arith.constant dense<0.000000e+00> : vector<8x256xf32>
    %23 = tpu.matmul %20, %22, %cst_27 {dimension_numbers = #tpu.dot_dimension_numbers<[1], [0], [0], [1], [0, 0, 1, 1], [], []>} : vector<8x128xf32>, vector<128x256xf32>, vector<8x256xf32> -> vector<8x256xf32>
    %24 = arith.addf %18, %23 : vector<8x256xf32>
    %c0_28 = arith.constant 0 : index
    %c3_29 = arith.constant 3 : index
    %c0_30 = arith.constant 0 : index
    %c0_31 = arith.constant 0 : index
    %25 = vector.load %arg2[%c0_28, %c3_29, %c0_30, %c0_31] : memref<1x4x16x128xf32, #tpu.memory_space<vmem>>, vector<1x1x8x128xf32>
    %26 = vector.shape_cast %25 : vector<1x1x8x128xf32> to vector<8x128xf32>
    %c4 = arith.constant 4 : index
    %c0_32 = arith.constant 0 : index
    %c0_33 = arith.constant 0 : index
    %27 = vector.load %arg3[%c4, %c0_32, %c0_33] : memref<9x128x256xf32, #tpu.memory_space<vmem>>, vector<1x128x256xf32>
    %28 = vector.shape_cast %27 : vector<1x128x256xf32> to vector<128x256xf32>
    %cst_34 = arith.constant dense<0.000000e+00> : vector<8x256xf32>
    %29 = tpu.matmul %26, %28, %cst_34 {dimension_numbers = #tpu.dot_dimension_numbers<[1], [0], [0], [1], [0, 0, 1, 1], [], []>} : vector<8x128xf32>, vector<128x256xf32>, vector<8x256xf32> -> vector<8x256xf32>
    %30 = arith.addf %24, %29 : vector<8x256xf32>
    %c0_35 = arith.constant 0 : index
    %c2_36 = arith.constant 2 : index
    %c1_37 = arith.constant 1 : index
    %c0_38 = arith.constant 0 : index
    %31 = vector.load %arg2[%c0_35, %c2_36, %c1_37, %c0_38] : memref<1x4x16x128xf32, #tpu.memory_space<vmem>>, vector<1x1x8x128xf32>
    %32 = vector.shape_cast %31 : vector<1x1x8x128xf32> to vector<8x128xf32>
    %c5 = arith.constant 5 : index
    %c0_39 = arith.constant 0 : index
    %c0_40 = arith.constant 0 : index
    %33 = vector.load %arg3[%c5, %c0_39, %c0_40] : memref<9x128x256xf32, #tpu.memory_space<vmem>>, vector<1x128x256xf32>
    %34 = vector.shape_cast %33 : vector<1x128x256xf32> to vector<128x256xf32>
    %cst_41 = arith.constant dense<0.000000e+00> : vector<8x256xf32>
    %35 = tpu.matmul %32, %34, %cst_41 {dimension_numbers = #tpu.dot_dimension_numbers<[1], [0], [0], [1], [0, 0, 1, 1], [], []>} : vector<8x128xf32>, vector<128x256xf32>, vector<8x256xf32> -> vector<8x256xf32>
    %36 = arith.addf %30, %35 : vector<8x256xf32>
    %c0_42 = arith.constant 0 : index
    %c0_43 = arith.constant 0 : index
    %c4_44 = arith.constant 4 : index
    %c0_45 = arith.constant 0 : index
    %37 = vector.load %arg2[%c0_42, %c0_43, %c4_44, %c0_45] : memref<1x4x16x128xf32, #tpu.memory_space<vmem>>, vector<1x1x8x128xf32>
    %38 = vector.shape_cast %37 : vector<1x1x8x128xf32> to vector<8x128xf32>
    %c6 = arith.constant 6 : index
    %c0_46 = arith.constant 0 : index
    %c0_47 = arith.constant 0 : index
    %39 = vector.load %arg3[%c6, %c0_46, %c0_47] : memref<9x128x256xf32, #tpu.memory_space<vmem>>, vector<1x128x256xf32>
    %40 = vector.shape_cast %39 : vector<1x128x256xf32> to vector<128x256xf32>
    %cst_48 = arith.constant dense<0.000000e+00> : vector<8x256xf32>
    %41 = tpu.matmul %38, %40, %cst_48 {dimension_numbers = #tpu.dot_dimension_numbers<[1], [0], [0], [1], [0, 0, 1, 1], [], []>} : vector<8x128xf32>, vector<128x256xf32>, vector<8x256xf32> -> vector<8x256xf32>
    %42 = arith.addf %36, %41 : vector<8x256xf32>
    %c0_49 = arith.constant 0 : index
    %c1_50 = arith.constant 1 : index
    %c4_51 = arith.constant 4 : index
    %c0_52 = arith.constant 0 : index
    %43 = vector.load %arg2[%c0_49, %c1_50, %c4_51, %c0_52] : memref<1x4x16x128xf32, #tpu.memory_space<vmem>>, vector<1x1x8x128xf32>
    %44 = vector.shape_cast %43 : vector<1x1x8x128xf32> to vector<8x128xf32>
    %c7 = arith.constant 7 : index
    %c0_53 = arith.constant 0 : index
    %c0_54 = arith.constant 0 : index
    %45 = vector.load %arg3[%c7, %c0_53, %c0_54] : memref<9x128x256xf32, #tpu.memory_space<vmem>>, vector<1x128x256xf32>
    %46 = vector.shape_cast %45 : vector<1x128x256xf32> to vector<128x256xf32>
    %cst_55 = arith.constant dense<0.000000e+00> : vector<8x256xf32>
    %47 = tpu.matmul %44, %46, %cst_55 {dimension_numbers = #tpu.dot_dimension_numbers<[1], [0], [0], [1], [0, 0, 1, 1], [], []>} : vector<8x128xf32>, vector<128x256xf32>, vector<8x256xf32> -> vector<8x256xf32>
    %48 = arith.addf %42, %47 : vector<8x256xf32>
    %c0_56 = arith.constant 0 : index
    %c0_57 = arith.constant 0 : index
    %c5_58 = arith.constant 5 : index
    %c0_59 = arith.constant 0 : index
    %49 = vector.load %arg2[%c0_56, %c0_57, %c5_58, %c0_59] : memref<1x4x16x128xf32, #tpu.memory_space<vmem>>, vector<1x1x8x128xf32>
    %50 = vector.shape_cast %49 : vector<1x1x8x128xf32> to vector<8x128xf32>
    %c8 = arith.constant 8 : index
    %c0_60 = arith.constant 0 : index
    %c0_61 = arith.constant 0 : index
    %51 = vector.load %arg3[%c8, %c0_60, %c0_61] : memref<9x128x256xf32, #tpu.memory_space<vmem>>, vector<1x128x256xf32>
    %52 = vector.shape_cast %51 : vector<1x128x256xf32> to vector<128x256xf32>
    %cst_62 = arith.constant dense<0.000000e+00> : vector<8x256xf32>
    %53 = tpu.matmul %50, %52, %cst_62 {dimension_numbers = #tpu.dot_dimension_numbers<[1], [0], [0], [1], [0, 0, 1, 1], [], []>} : vector<8x128xf32>, vector<128x256xf32>, vector<8x256xf32> -> vector<8x256xf32>
    %54 = arith.addf %48, %53 : vector<8x256xf32>
    %55 = tpu.iota {dimensions = array<i32: 0>} : vector<8x1xi32>
    %c4_i32 = arith.constant 4 : i32
    %c0_i32 = arith.constant 0 : i32
    %56 = arith.cmpi eq, %c4_i32, %c0_i32 : i32
    %c1_i32 = arith.constant 1 : i32
    %57 = arith.select %56, %c1_i32, %c4_i32 : i32
    %58 = vector.broadcast %57 : i32 to vector<8x1xi32>
    %59 = arith.remsi %55, %58 : vector<8x1xi32>
    %c0_i32_63 = arith.constant 0 : i32
    %60 = vector.broadcast %c0_i32_63 : i32 to vector<8x1xi32>
    %61 = arith.cmpi ne, %59, %60 : vector<8x1xi32>
    %c0_i32_64 = arith.constant 0 : i32
    %62 = vector.broadcast %c0_i32_64 : i32 to vector<8x1xi32>
    %63 = arith.cmpi slt, %59, %62 : vector<8x1xi32>
    %c0_i32_65 = arith.constant 0 : i32
    %64 = arith.cmpi slt, %57, %c0_i32_65 : i32
    %65 = vector.broadcast %64 : i1 to vector<8x1xi1>
    %66 = vector.broadcast %65 : vector<8x1xi1> to vector<8x1xi1>
    %67 = arith.xori %63, %66 : vector<8x1xi1>
    %68 = arith.andi %67, %61 : vector<8x1xi1>
    %69 = vector.broadcast %57 : i32 to vector<8x1xi32>
    %70 = arith.addi %59, %69 : vector<8x1xi32>
    %71 = arith.select %68, %70, %59 : vector<8x1xi1>, vector<8x1xi32>
    %c2_i32 = arith.constant 2 : i32
    %72 = vector.broadcast %c2_i32 : i32 to vector<8x1xi32>
    %73 = arith.cmpi slt, %71, %72 : vector<8x1xi32>
    %74 = arith.extui %73 : vector<8x1xi1> to vector<8x1xi32>
    %75 = arith.sitofp %74 : vector<8x1xi32> to vector<8x1xf32>
    %76 = vector.broadcast %75 : vector<8x1xf32> to vector<8x256xf32>
    %77 = arith.mulf %54, %76 : vector<8x256xf32>
    %cst_66 = arith.constant dense<0.000000e+00> : vector<256xf32>
    %78 = vector.multi_reduction <add>, %77, %cst_66 [0] : vector<8x256xf32> to vector<256xf32>
    %79 = vector.shape_cast %78 : vector<256xf32> to vector<1x256xf32>
    %80 = arith.mulf %77, %77 : vector<8x256xf32>
    %cst_67 = arith.constant dense<0.000000e+00> : vector<256xf32>
    %81 = vector.multi_reduction <add>, %80, %cst_67 [0] : vector<8x256xf32> to vector<256xf32>
    %82 = vector.shape_cast %81 : vector<256xf32> to vector<1x256xf32>
    %cst_68 = arith.constant 2.500000e-01 : f32
    %83 = vector.broadcast %cst_68 : f32 to vector<1x256xf32>
    %84 = arith.mulf %79, %83 : vector<1x256xf32>
    %cst_69 = arith.constant 2.500000e-01 : f32
    %85 = vector.broadcast %cst_69 : f32 to vector<1x256xf32>
    %86 = arith.mulf %82, %85 : vector<1x256xf32>
    %87 = arith.mulf %84, %84 : vector<1x256xf32>
    %88 = arith.subf %86, %87 : vector<1x256xf32>
    %cst_70 = arith.constant 0.000000e+00 : f32
    %89 = vector.broadcast %cst_70 : f32 to vector<1x256xf32>
    %90 = arith.maximumf %88, %89 : vector<1x256xf32>
    %91 = vector.broadcast %84 : vector<1x256xf32> to vector<8x256xf32>
    %92 = arith.subf %54, %91 : vector<8x256xf32>
    %cst_71 = arith.constant 9.99999974E-6 : f32
    %93 = vector.broadcast %cst_71 : f32 to vector<1x256xf32>
    %94 = arith.addf %90, %93 : vector<1x256xf32>
    %95 = math.rsqrt %94 : vector<1x256xf32>
    %96 = vector.broadcast %95 : vector<1x256xf32> to vector<8x256xf32>
    %97 = arith.mulf %92, %96 : vector<8x256xf32>
    %cst_72 = arith.constant 0.000000e+00 : f32
    %98 = vector.broadcast %cst_72 : f32 to vector<8x256xf32>
    %99 = arith.cmpf oge, %97, %98 : vector<8x256xf32>
    %cst_73 = arith.constant 2.000000e-01 : f32
    %100 = vector.broadcast %cst_73 : f32 to vector<8x256xf32>
    %101 = arith.mulf %100, %97 : vector<8x256xf32>
    %102 = arith.select %99, %97, %101 : vector<8x256xi1>, vector<8x256xf32>
    %103 = vector.broadcast %75 : vector<8x1xf32> to vector<8x256xf32>
    %104 = arith.mulf %102, %103 : vector<8x256xf32>
    %cst_74 = arith.constant 0.000000e+00 : f32
    %105 = vector.broadcast %cst_74 : f32 to vector<5x256xf32>
    %c0_75 = arith.constant 0 : index
    %c0_76 = arith.constant 0 : index
    %c0_77 = arith.constant 0 : index
    %106 = vector.load %arg4[%c0_75, %c0_76, %c0_77] : memref<1x20x256xf32, #tpu.memory_space<vmem>>, vector<1x5x256xf32>
    %107 = vector.shape_cast %106 : vector<1x5x256xf32> to vector<5x256xf32>
    %108 = vector.shape_cast %105 : vector<5x256xf32> to vector<1x5x256xf32>
    tpu.vector_store %arg4[%c0_75, %c0_76, %c0_77], %108 {strides = array<i32>} : memref<1x20x256xf32, #tpu.memory_space<vmem>>, vector<1x5x256xf32>,
    %c0_78 = arith.constant 0 : index
    %c5_79 = arith.constant 5 : index
    %c0_80 = arith.constant 0 : index
    %109 = vector.load %arg4[%c0_78, %c5_79, %c0_80] : memref<1x20x256xf32, #tpu.memory_space<vmem>>, vector<1x8x256xf32>
    %110 = vector.shape_cast %109 : vector<1x8x256xf32> to vector<8x256xf32>
    %111 = vector.shape_cast %104 : vector<8x256xf32> to vector<1x8x256xf32>
    tpu.vector_store %arg4[%c0_78, %c5_79, %c0_80], %111 {strides = array<i32>} : memref<1x20x256xf32, #tpu.memory_space<vmem>>, vector<1x8x256xf32>,
    %cst_81 = arith.constant 0.000000e+00 : f32
    %112 = vector.broadcast %cst_81 : f32 to vector<7x256xf32>
    %c0_82 = arith.constant 0 : index
    %c13 = arith.constant 13 : index
    %c0_83 = arith.constant 0 : index
    %113 = vector.load %arg4[%c0_82, %c13, %c0_83] : memref<1x20x256xf32, #tpu.memory_space<vmem>>, vector<1x7x256xf32>
    %114 = vector.shape_cast %113 : vector<1x7x256xf32> to vector<7x256xf32>
    %115 = vector.shape_cast %112 : vector<7x256xf32> to vector<1x7x256xf32>
    tpu.vector_store %arg4[%c0_82, %c13, %c0_83], %115 {strides = array<i32>} : memref<1x20x256xf32, #tpu.memory_space<vmem>>, vector<1x7x256xf32>,
    return
  }
  func.func @transform_0(%arg0: i32, %arg1: i32) -> (i32, i32, i32, i32) {
    %c0_i32 = arith.constant 0 : i32
    %c0_i32_0 = arith.constant 0 : i32
    %c0_i32_1 = arith.constant 0 : i32
    %c0_i32_2 = arith.constant 0 : i32
    return %arg0, %c0_i32, %c0_i32_0, %c0_i32_1 : i32, i32, i32, i32
  }
  func.func @transform_1(%arg0: i32, %arg1: i32) -> (i32, i32, i32) {
    %c0_i32 = arith.constant 0 : i32
    %c0_i32_0 = arith.constant 0 : i32
    %c0_i32_1 = arith.constant 0 : i32
    return %c0_i32, %c0_i32_0, %arg1 : i32, i32, i32
  }
  func.func @transform_2(%arg0: i32, %arg1: i32) -> (i32, i32, i32) {
    %c0_i32 = arith.constant 0 : i32
    %c0_i32_0 = arith.constant 0 : i32
    return %arg0, %c0_i32, %arg1 : i32, i32, i32
  }
}

module attributes {stable_mosaic.version = 11 : i64} {
  func.func @kernel(%arg0: i32, %arg1: i32, %arg2: memref<1x20x256xf32, #tpu.memory_space<vmem>>, %arg3: memref<9x256x256xf32, #tpu.memory_space<vmem>>, %arg4: memref<1x20x256xf32, #tpu.memory_space<vmem>>) attributes {dimension_semantics = [#tpu.dimension_semantics<parallel>, #tpu.dimension_semantics<parallel>], iteration_bounds = array<i64: 2, 2>, scalar_prefetch = 0 : i64, scratch_operands = 0 : i64, tpu.core_type = #tpu.core_type<tc>, window_params = [{transform_indices = @transform_0, window_bounds = array<i64: 1, 20, 256>}, {transform_indices = @transform_1, window_bounds = array<i64: 9, 256, 256>}, {transform_indices = @transform_2, window_bounds = array<i64: 1, 20, 256>}]} {
    %cst = arith.constant 0.000000e+00 : f32
    %0 = vector.broadcast %cst : f32 to vector<8x256xf32>
    %c0 = arith.constant 0 : index
    %c0_0 = arith.constant 0 : index
    %c0_1 = arith.constant 0 : index
    %1 = vector.load %arg2[%c0, %c0_0, %c0_1] : memref<1x20x256xf32, #tpu.memory_space<vmem>>, vector<1x8x256xf32>
    %2 = vector.shape_cast %1 : vector<1x8x256xf32> to vector<8x256xf32>
    %c0_2 = arith.constant 0 : index
    %c0_3 = arith.constant 0 : index
    %c0_4 = arith.constant 0 : index
    %3 = vector.load %arg3[%c0_2, %c0_3, %c0_4] : memref<9x256x256xf32, #tpu.memory_space<vmem>>, vector<1x256x256xf32>
    %4 = vector.shape_cast %3 : vector<1x256x256xf32> to vector<256x256xf32>
    %cst_5 = arith.constant dense<0.000000e+00> : vector<8x256xf32>
    %5 = tpu.matmul %2, %4, %cst_5 {dimension_numbers = #tpu.dot_dimension_numbers<[1], [0], [0], [1], [0, 0, 1, 1], [], []>} : vector<8x256xf32>, vector<256x256xf32>, vector<8x256xf32> -> vector<8x256xf32>
    %6 = arith.addf %0, %5 : vector<8x256xf32>
    %c0_6 = arith.constant 0 : index
    %c1 = arith.constant 1 : index
    %c0_7 = arith.constant 0 : index
    %7 = vector.load %arg2[%c0_6, %c1, %c0_7] : memref<1x20x256xf32, #tpu.memory_space<vmem>>, vector<1x8x256xf32>
    %8 = vector.shape_cast %7 : vector<1x8x256xf32> to vector<8x256xf32>
    %c1_8 = arith.constant 1 : index
    %c0_9 = arith.constant 0 : index
    %c0_10 = arith.constant 0 : index
    %9 = vector.load %arg3[%c1_8, %c0_9, %c0_10] : memref<9x256x256xf32, #tpu.memory_space<vmem>>, vector<1x256x256xf32>
    %10 = vector.shape_cast %9 : vector<1x256x256xf32> to vector<256x256xf32>
    %cst_11 = arith.constant dense<0.000000e+00> : vector<8x256xf32>
    %11 = tpu.matmul %8, %10, %cst_11 {dimension_numbers = #tpu.dot_dimension_numbers<[1], [0], [0], [1], [0, 0, 1, 1], [], []>} : vector<8x256xf32>, vector<256x256xf32>, vector<8x256xf32> -> vector<8x256xf32>
    %12 = arith.addf %6, %11 : vector<8x256xf32>
    %c0_12 = arith.constant 0 : index
    %c2 = arith.constant 2 : index
    %c0_13 = arith.constant 0 : index
    %13 = vector.load %arg2[%c0_12, %c2, %c0_13] : memref<1x20x256xf32, #tpu.memory_space<vmem>>, vector<1x8x256xf32>
    %14 = vector.shape_cast %13 : vector<1x8x256xf32> to vector<8x256xf32>
    %c2_14 = arith.constant 2 : index
    %c0_15 = arith.constant 0 : index
    %c0_16 = arith.constant 0 : index
    %15 = vector.load %arg3[%c2_14, %c0_15, %c0_16] : memref<9x256x256xf32, #tpu.memory_space<vmem>>, vector<1x256x256xf32>
    %16 = vector.shape_cast %15 : vector<1x256x256xf32> to vector<256x256xf32>
    %cst_17 = arith.constant dense<0.000000e+00> : vector<8x256xf32>
    %17 = tpu.matmul %14, %16, %cst_17 {dimension_numbers = #tpu.dot_dimension_numbers<[1], [0], [0], [1], [0, 0, 1, 1], [], []>} : vector<8x256xf32>, vector<256x256xf32>, vector<8x256xf32> -> vector<8x256xf32>
    %18 = arith.addf %12, %17 : vector<8x256xf32>
    %c0_18 = arith.constant 0 : index
    %c4 = arith.constant 4 : index
    %c0_19 = arith.constant 0 : index
    %19 = vector.load %arg2[%c0_18, %c4, %c0_19] : memref<1x20x256xf32, #tpu.memory_space<vmem>>, vector<1x8x256xf32>
    %20 = vector.shape_cast %19 : vector<1x8x256xf32> to vector<8x256xf32>
    %c3 = arith.constant 3 : index
    %c0_20 = arith.constant 0 : index
    %c0_21 = arith.constant 0 : index
    %21 = vector.load %arg3[%c3, %c0_20, %c0_21] : memref<9x256x256xf32, #tpu.memory_space<vmem>>, vector<1x256x256xf32>
    %22 = vector.shape_cast %21 : vector<1x256x256xf32> to vector<256x256xf32>
    %cst_22 = arith.constant dense<0.000000e+00> : vector<8x256xf32>
    %23 = tpu.matmul %20, %22, %cst_22 {dimension_numbers = #tpu.dot_dimension_numbers<[1], [0], [0], [1], [0, 0, 1, 1], [], []>} : vector<8x256xf32>, vector<256x256xf32>, vector<8x256xf32> -> vector<8x256xf32>
    %24 = arith.addf %18, %23 : vector<8x256xf32>
    %c0_23 = arith.constant 0 : index
    %c5 = arith.constant 5 : index
    %c0_24 = arith.constant 0 : index
    %25 = vector.load %arg2[%c0_23, %c5, %c0_24] : memref<1x20x256xf32, #tpu.memory_space<vmem>>, vector<1x8x256xf32>
    %26 = vector.shape_cast %25 : vector<1x8x256xf32> to vector<8x256xf32>
    %c4_25 = arith.constant 4 : index
    %c0_26 = arith.constant 0 : index
    %c0_27 = arith.constant 0 : index
    %27 = vector.load %arg3[%c4_25, %c0_26, %c0_27] : memref<9x256x256xf32, #tpu.memory_space<vmem>>, vector<1x256x256xf32>
    %28 = vector.shape_cast %27 : vector<1x256x256xf32> to vector<256x256xf32>
    %cst_28 = arith.constant dense<0.000000e+00> : vector<8x256xf32>
    %29 = tpu.matmul %26, %28, %cst_28 {dimension_numbers = #tpu.dot_dimension_numbers<[1], [0], [0], [1], [0, 0, 1, 1], [], []>} : vector<8x256xf32>, vector<256x256xf32>, vector<8x256xf32> -> vector<8x256xf32>
    %30 = arith.addf %24, %29 : vector<8x256xf32>
    %c0_29 = arith.constant 0 : index
    %c6 = arith.constant 6 : index
    %c0_30 = arith.constant 0 : index
    %31 = vector.load %arg2[%c0_29, %c6, %c0_30] : memref<1x20x256xf32, #tpu.memory_space<vmem>>, vector<1x8x256xf32>
    %32 = vector.shape_cast %31 : vector<1x8x256xf32> to vector<8x256xf32>
    %c5_31 = arith.constant 5 : index
    %c0_32 = arith.constant 0 : index
    %c0_33 = arith.constant 0 : index
    %33 = vector.load %arg3[%c5_31, %c0_32, %c0_33] : memref<9x256x256xf32, #tpu.memory_space<vmem>>, vector<1x256x256xf32>
    %34 = vector.shape_cast %33 : vector<1x256x256xf32> to vector<256x256xf32>
    %cst_34 = arith.constant dense<0.000000e+00> : vector<8x256xf32>
    %35 = tpu.matmul %32, %34, %cst_34 {dimension_numbers = #tpu.dot_dimension_numbers<[1], [0], [0], [1], [0, 0, 1, 1], [], []>} : vector<8x256xf32>, vector<256x256xf32>, vector<8x256xf32> -> vector<8x256xf32>
    %36 = arith.addf %30, %35 : vector<8x256xf32>
    %c0_35 = arith.constant 0 : index
    %c8 = arith.constant 8 : index
    %c0_36 = arith.constant 0 : index
    %37 = vector.load %arg2[%c0_35, %c8, %c0_36] : memref<1x20x256xf32, #tpu.memory_space<vmem>>, vector<1x8x256xf32>
    %38 = vector.shape_cast %37 : vector<1x8x256xf32> to vector<8x256xf32>
    %c6_37 = arith.constant 6 : index
    %c0_38 = arith.constant 0 : index
    %c0_39 = arith.constant 0 : index
    %39 = vector.load %arg3[%c6_37, %c0_38, %c0_39] : memref<9x256x256xf32, #tpu.memory_space<vmem>>, vector<1x256x256xf32>
    %40 = vector.shape_cast %39 : vector<1x256x256xf32> to vector<256x256xf32>
    %cst_40 = arith.constant dense<0.000000e+00> : vector<8x256xf32>
    %41 = tpu.matmul %38, %40, %cst_40 {dimension_numbers = #tpu.dot_dimension_numbers<[1], [0], [0], [1], [0, 0, 1, 1], [], []>} : vector<8x256xf32>, vector<256x256xf32>, vector<8x256xf32> -> vector<8x256xf32>
    %42 = arith.addf %36, %41 : vector<8x256xf32>
    %c0_41 = arith.constant 0 : index
    %c9 = arith.constant 9 : index
    %c0_42 = arith.constant 0 : index
    %43 = vector.load %arg2[%c0_41, %c9, %c0_42] : memref<1x20x256xf32, #tpu.memory_space<vmem>>, vector<1x8x256xf32>
    %44 = vector.shape_cast %43 : vector<1x8x256xf32> to vector<8x256xf32>
    %c7 = arith.constant 7 : index
    %c0_43 = arith.constant 0 : index
    %c0_44 = arith.constant 0 : index
    %45 = vector.load %arg3[%c7, %c0_43, %c0_44] : memref<9x256x256xf32, #tpu.memory_space<vmem>>, vector<1x256x256xf32>
    %46 = vector.shape_cast %45 : vector<1x256x256xf32> to vector<256x256xf32>
    %cst_45 = arith.constant dense<0.000000e+00> : vector<8x256xf32>
    %47 = tpu.matmul %44, %46, %cst_45 {dimension_numbers = #tpu.dot_dimension_numbers<[1], [0], [0], [1], [0, 0, 1, 1], [], []>} : vector<8x256xf32>, vector<256x256xf32>, vector<8x256xf32> -> vector<8x256xf32>
    %48 = arith.addf %42, %47 : vector<8x256xf32>
    %c0_46 = arith.constant 0 : index
    %c10 = arith.constant 10 : index
    %c0_47 = arith.constant 0 : index
    %49 = vector.load %arg2[%c0_46, %c10, %c0_47] : memref<1x20x256xf32, #tpu.memory_space<vmem>>, vector<1x8x256xf32>
    %50 = vector.shape_cast %49 : vector<1x8x256xf32> to vector<8x256xf32>
    %c8_48 = arith.constant 8 : index
    %c0_49 = arith.constant 0 : index
    %c0_50 = arith.constant 0 : index
    %51 = vector.load %arg3[%c8_48, %c0_49, %c0_50] : memref<9x256x256xf32, #tpu.memory_space<vmem>>, vector<1x256x256xf32>
    %52 = vector.shape_cast %51 : vector<1x256x256xf32> to vector<256x256xf32>
    %cst_51 = arith.constant dense<0.000000e+00> : vector<8x256xf32>
    %53 = tpu.matmul %50, %52, %cst_51 {dimension_numbers = #tpu.dot_dimension_numbers<[1], [0], [0], [1], [0, 0, 1, 1], [], []>} : vector<8x256xf32>, vector<256x256xf32>, vector<8x256xf32> -> vector<8x256xf32>
    %54 = arith.addf %48, %53 : vector<8x256xf32>
    %55 = tpu.iota {dimensions = array<i32: 0>} : vector<8x1xi32>
    %c4_i32 = arith.constant 4 : i32
    %c0_i32 = arith.constant 0 : i32
    %56 = arith.cmpi eq, %c4_i32, %c0_i32 : i32
    %c1_i32 = arith.constant 1 : i32
    %57 = arith.select %56, %c1_i32, %c4_i32 : i32
    %58 = vector.broadcast %57 : i32 to vector<8x1xi32>
    %59 = arith.remsi %55, %58 : vector<8x1xi32>
    %c0_i32_52 = arith.constant 0 : i32
    %60 = vector.broadcast %c0_i32_52 : i32 to vector<8x1xi32>
    %61 = arith.cmpi ne, %59, %60 : vector<8x1xi32>
    %c0_i32_53 = arith.constant 0 : i32
    %62 = vector.broadcast %c0_i32_53 : i32 to vector<8x1xi32>
    %63 = arith.cmpi slt, %59, %62 : vector<8x1xi32>
    %c0_i32_54 = arith.constant 0 : i32
    %64 = arith.cmpi slt, %57, %c0_i32_54 : i32
    %65 = vector.broadcast %64 : i1 to vector<8x1xi1>
    %66 = vector.broadcast %65 : vector<8x1xi1> to vector<8x1xi1>
    %67 = arith.xori %63, %66 : vector<8x1xi1>
    %68 = arith.andi %67, %61 : vector<8x1xi1>
    %69 = vector.broadcast %57 : i32 to vector<8x1xi32>
    %70 = arith.addi %59, %69 : vector<8x1xi32>
    %71 = arith.select %68, %70, %59 : vector<8x1xi1>, vector<8x1xi32>
    %c2_i32 = arith.constant 2 : i32
    %72 = vector.broadcast %c2_i32 : i32 to vector<8x1xi32>
    %73 = arith.cmpi slt, %71, %72 : vector<8x1xi32>
    %74 = arith.extui %73 : vector<8x1xi1> to vector<8x1xi32>
    %75 = arith.sitofp %74 : vector<8x1xi32> to vector<8x1xf32>
    %76 = vector.broadcast %75 : vector<8x1xf32> to vector<8x256xf32>
    %77 = arith.mulf %54, %76 : vector<8x256xf32>
    %cst_55 = arith.constant dense<0.000000e+00> : vector<256xf32>
    %78 = vector.multi_reduction <add>, %77, %cst_55 [0] : vector<8x256xf32> to vector<256xf32>
    %79 = vector.shape_cast %78 : vector<256xf32> to vector<1x256xf32>
    %80 = arith.mulf %77, %77 : vector<8x256xf32>
    %cst_56 = arith.constant dense<0.000000e+00> : vector<256xf32>
    %81 = vector.multi_reduction <add>, %80, %cst_56 [0] : vector<8x256xf32> to vector<256xf32>
    %82 = vector.shape_cast %81 : vector<256xf32> to vector<1x256xf32>
    %cst_57 = arith.constant 2.500000e-01 : f32
    %83 = vector.broadcast %cst_57 : f32 to vector<1x256xf32>
    %84 = arith.mulf %79, %83 : vector<1x256xf32>
    %cst_58 = arith.constant 2.500000e-01 : f32
    %85 = vector.broadcast %cst_58 : f32 to vector<1x256xf32>
    %86 = arith.mulf %82, %85 : vector<1x256xf32>
    %87 = arith.mulf %84, %84 : vector<1x256xf32>
    %88 = arith.subf %86, %87 : vector<1x256xf32>
    %cst_59 = arith.constant 0.000000e+00 : f32
    %89 = vector.broadcast %cst_59 : f32 to vector<1x256xf32>
    %90 = arith.maximumf %88, %89 : vector<1x256xf32>
    %91 = vector.broadcast %84 : vector<1x256xf32> to vector<8x256xf32>
    %92 = arith.subf %54, %91 : vector<8x256xf32>
    %cst_60 = arith.constant 9.99999974E-6 : f32
    %93 = vector.broadcast %cst_60 : f32 to vector<1x256xf32>
    %94 = arith.addf %90, %93 : vector<1x256xf32>
    %95 = math.rsqrt %94 : vector<1x256xf32>
    %96 = vector.broadcast %95 : vector<1x256xf32> to vector<8x256xf32>
    %97 = arith.mulf %92, %96 : vector<8x256xf32>
    %cst_61 = arith.constant 0.000000e+00 : f32
    %98 = vector.broadcast %cst_61 : f32 to vector<8x256xf32>
    %99 = arith.cmpf oge, %97, %98 : vector<8x256xf32>
    %cst_62 = arith.constant 2.000000e-01 : f32
    %100 = vector.broadcast %cst_62 : f32 to vector<8x256xf32>
    %101 = arith.mulf %100, %97 : vector<8x256xf32>
    %102 = arith.select %99, %97, %101 : vector<8x256xi1>, vector<8x256xf32>
    %103 = vector.broadcast %75 : vector<8x1xf32> to vector<8x256xf32>
    %104 = arith.mulf %102, %103 : vector<8x256xf32>
    %cst_63 = arith.constant 0.000000e+00 : f32
    %105 = vector.broadcast %cst_63 : f32 to vector<5x256xf32>
    %c0_64 = arith.constant 0 : index
    %c0_65 = arith.constant 0 : index
    %c0_66 = arith.constant 0 : index
    %106 = vector.load %arg4[%c0_64, %c0_65, %c0_66] : memref<1x20x256xf32, #tpu.memory_space<vmem>>, vector<1x5x256xf32>
    %107 = vector.shape_cast %106 : vector<1x5x256xf32> to vector<5x256xf32>
    %108 = vector.shape_cast %105 : vector<5x256xf32> to vector<1x5x256xf32>
    tpu.vector_store %arg4[%c0_64, %c0_65, %c0_66], %108 {strides = array<i32>} : memref<1x20x256xf32, #tpu.memory_space<vmem>>, vector<1x5x256xf32>,
    %c0_67 = arith.constant 0 : index
    %c5_68 = arith.constant 5 : index
    %c0_69 = arith.constant 0 : index
    %109 = vector.load %arg4[%c0_67, %c5_68, %c0_69] : memref<1x20x256xf32, #tpu.memory_space<vmem>>, vector<1x8x256xf32>
    %110 = vector.shape_cast %109 : vector<1x8x256xf32> to vector<8x256xf32>
    %111 = vector.shape_cast %104 : vector<8x256xf32> to vector<1x8x256xf32>
    tpu.vector_store %arg4[%c0_67, %c5_68, %c0_69], %111 {strides = array<i32>} : memref<1x20x256xf32, #tpu.memory_space<vmem>>, vector<1x8x256xf32>,
    %cst_70 = arith.constant 0.000000e+00 : f32
    %112 = vector.broadcast %cst_70 : f32 to vector<7x256xf32>
    %c0_71 = arith.constant 0 : index
    %c13 = arith.constant 13 : index
    %c0_72 = arith.constant 0 : index
    %113 = vector.load %arg4[%c0_71, %c13, %c0_72] : memref<1x20x256xf32, #tpu.memory_space<vmem>>, vector<1x7x256xf32>
    %114 = vector.shape_cast %113 : vector<1x7x256xf32> to vector<7x256xf32>
    %115 = vector.shape_cast %112 : vector<7x256xf32> to vector<1x7x256xf32>
    tpu.vector_store %arg4[%c0_71, %c13, %c0_72], %115 {strides = array<i32>} : memref<1x20x256xf32, #tpu.memory_space<vmem>>, vector<1x7x256xf32>,
    return
  }
  func.func @transform_0(%arg0: i32, %arg1: i32) -> (i32, i32, i32) {
    %c0_i32 = arith.constant 0 : i32
    %c0_i32_0 = arith.constant 0 : i32
    %c0_i32_1 = arith.constant 0 : i32
    return %arg0, %c0_i32, %c0_i32_0 : i32, i32, i32
  }
  func.func @transform_1(%arg0: i32, %arg1: i32) -> (i32, i32, i32) {
    %c0_i32 = arith.constant 0 : i32
    %c0_i32_0 = arith.constant 0 : i32
    %c0_i32_1 = arith.constant 0 : i32
    return %c0_i32, %c0_i32_0, %arg1 : i32, i32, i32
  }
  func.func @transform_2(%arg0: i32, %arg1: i32) -> (i32, i32, i32) {
    %c0_i32 = arith.constant 0 : i32
    %c0_i32_0 = arith.constant 0 : i32
    return %arg0, %c0_i32, %arg1 : i32, i32, i32
  }
}

module attributes {stable_mosaic.version = 11 : i64} {
  func.func @kernel(%arg0: i32, %arg1: i32, %arg2: memref<1x20x512xf32, #tpu.memory_space<vmem>>, %arg3: memref<9x512x128xf32, #tpu.memory_space<vmem>>, %arg4: memref<1x128xf32, #tpu.memory_space<vmem>>, %arg5: memref<1x8x128xf32, #tpu.memory_space<vmem>>) attributes {dimension_semantics = [#tpu.dimension_semantics<parallel>, #tpu.dimension_semantics<parallel>], iteration_bounds = array<i64: 2, 1>, scalar_prefetch = 0 : i64, scratch_operands = 0 : i64, tpu.core_type = #tpu.core_type<tc>, window_params = [{transform_indices = @transform_0, window_bounds = array<i64: 1, 20, 512>}, {transform_indices = @transform_1, window_bounds = array<i64: 9, 512, 128>}, {transform_indices = @transform_2, window_bounds = array<i64: 1, 128>}, {transform_indices = @transform_3, window_bounds = array<i64: 1, 8, 128>}]} {
    %cst = arith.constant 0.000000e+00 : f32
    %0 = vector.broadcast %cst : f32 to vector<8x128xf32>
    %c0 = arith.constant 0 : index
    %c0_0 = arith.constant 0 : index
    %c0_1 = arith.constant 0 : index
    %1 = vector.load %arg2[%c0, %c0_0, %c0_1] : memref<1x20x512xf32, #tpu.memory_space<vmem>>, vector<1x8x512xf32>
    %2 = vector.shape_cast %1 : vector<1x8x512xf32> to vector<8x512xf32>
    %c0_2 = arith.constant 0 : index
    %c0_3 = arith.constant 0 : index
    %c0_4 = arith.constant 0 : index
    %3 = vector.load %arg3[%c0_2, %c0_3, %c0_4] : memref<9x512x128xf32, #tpu.memory_space<vmem>>, vector<1x512x128xf32>
    %4 = vector.shape_cast %3 : vector<1x512x128xf32> to vector<512x128xf32>
    %cst_5 = arith.constant dense<0.000000e+00> : vector<8x128xf32>
    %5 = tpu.matmul %2, %4, %cst_5 {dimension_numbers = #tpu.dot_dimension_numbers<[1], [0], [0], [1], [0, 0, 1, 1], [], []>} : vector<8x512xf32>, vector<512x128xf32>, vector<8x128xf32> -> vector<8x128xf32>
    %6 = arith.addf %0, %5 : vector<8x128xf32>
    %c0_6 = arith.constant 0 : index
    %c1 = arith.constant 1 : index
    %c0_7 = arith.constant 0 : index
    %7 = vector.load %arg2[%c0_6, %c1, %c0_7] : memref<1x20x512xf32, #tpu.memory_space<vmem>>, vector<1x8x512xf32>
    %8 = vector.shape_cast %7 : vector<1x8x512xf32> to vector<8x512xf32>
    %c1_8 = arith.constant 1 : index
    %c0_9 = arith.constant 0 : index
    %c0_10 = arith.constant 0 : index
    %9 = vector.load %arg3[%c1_8, %c0_9, %c0_10] : memref<9x512x128xf32, #tpu.memory_space<vmem>>, vector<1x512x128xf32>
    %10 = vector.shape_cast %9 : vector<1x512x128xf32> to vector<512x128xf32>
    %cst_11 = arith.constant dense<0.000000e+00> : vector<8x128xf32>
    %11 = tpu.matmul %8, %10, %cst_11 {dimension_numbers = #tpu.dot_dimension_numbers<[1], [0], [0], [1], [0, 0, 1, 1], [], []>} : vector<8x512xf32>, vector<512x128xf32>, vector<8x128xf32> -> vector<8x128xf32>
    %12 = arith.addf %6, %11 : vector<8x128xf32>
    %c0_12 = arith.constant 0 : index
    %c2 = arith.constant 2 : index
    %c0_13 = arith.constant 0 : index
    %13 = vector.load %arg2[%c0_12, %c2, %c0_13] : memref<1x20x512xf32, #tpu.memory_space<vmem>>, vector<1x8x512xf32>
    %14 = vector.shape_cast %13 : vector<1x8x512xf32> to vector<8x512xf32>
    %c2_14 = arith.constant 2 : index
    %c0_15 = arith.constant 0 : index
    %c0_16 = arith.constant 0 : index
    %15 = vector.load %arg3[%c2_14, %c0_15, %c0_16] : memref<9x512x128xf32, #tpu.memory_space<vmem>>, vector<1x512x128xf32>
    %16 = vector.shape_cast %15 : vector<1x512x128xf32> to vector<512x128xf32>
    %cst_17 = arith.constant dense<0.000000e+00> : vector<8x128xf32>
    %17 = tpu.matmul %14, %16, %cst_17 {dimension_numbers = #tpu.dot_dimension_numbers<[1], [0], [0], [1], [0, 0, 1, 1], [], []>} : vector<8x512xf32>, vector<512x128xf32>, vector<8x128xf32> -> vector<8x128xf32>
    %18 = arith.addf %12, %17 : vector<8x128xf32>
    %c0_18 = arith.constant 0 : index
    %c4 = arith.constant 4 : index
    %c0_19 = arith.constant 0 : index
    %19 = vector.load %arg2[%c0_18, %c4, %c0_19] : memref<1x20x512xf32, #tpu.memory_space<vmem>>, vector<1x8x512xf32>
    %20 = vector.shape_cast %19 : vector<1x8x512xf32> to vector<8x512xf32>
    %c3 = arith.constant 3 : index
    %c0_20 = arith.constant 0 : index
    %c0_21 = arith.constant 0 : index
    %21 = vector.load %arg3[%c3, %c0_20, %c0_21] : memref<9x512x128xf32, #tpu.memory_space<vmem>>, vector<1x512x128xf32>
    %22 = vector.shape_cast %21 : vector<1x512x128xf32> to vector<512x128xf32>
    %cst_22 = arith.constant dense<0.000000e+00> : vector<8x128xf32>
    %23 = tpu.matmul %20, %22, %cst_22 {dimension_numbers = #tpu.dot_dimension_numbers<[1], [0], [0], [1], [0, 0, 1, 1], [], []>} : vector<8x512xf32>, vector<512x128xf32>, vector<8x128xf32> -> vector<8x128xf32>
    %24 = arith.addf %18, %23 : vector<8x128xf32>
    %c0_23 = arith.constant 0 : index
    %c5 = arith.constant 5 : index
    %c0_24 = arith.constant 0 : index
    %25 = vector.load %arg2[%c0_23, %c5, %c0_24] : memref<1x20x512xf32, #tpu.memory_space<vmem>>, vector<1x8x512xf32>
    %26 = vector.shape_cast %25 : vector<1x8x512xf32> to vector<8x512xf32>
    %c4_25 = arith.constant 4 : index
    %c0_26 = arith.constant 0 : index
    %c0_27 = arith.constant 0 : index
    %27 = vector.load %arg3[%c4_25, %c0_26, %c0_27] : memref<9x512x128xf32, #tpu.memory_space<vmem>>, vector<1x512x128xf32>
    %28 = vector.shape_cast %27 : vector<1x512x128xf32> to vector<512x128xf32>
    %cst_28 = arith.constant dense<0.000000e+00> : vector<8x128xf32>
    %29 = tpu.matmul %26, %28, %cst_28 {dimension_numbers = #tpu.dot_dimension_numbers<[1], [0], [0], [1], [0, 0, 1, 1], [], []>} : vector<8x512xf32>, vector<512x128xf32>, vector<8x128xf32> -> vector<8x128xf32>
    %30 = arith.addf %24, %29 : vector<8x128xf32>
    %c0_29 = arith.constant 0 : index
    %c6 = arith.constant 6 : index
    %c0_30 = arith.constant 0 : index
    %31 = vector.load %arg2[%c0_29, %c6, %c0_30] : memref<1x20x512xf32, #tpu.memory_space<vmem>>, vector<1x8x512xf32>
    %32 = vector.shape_cast %31 : vector<1x8x512xf32> to vector<8x512xf32>
    %c5_31 = arith.constant 5 : index
    %c0_32 = arith.constant 0 : index
    %c0_33 = arith.constant 0 : index
    %33 = vector.load %arg3[%c5_31, %c0_32, %c0_33] : memref<9x512x128xf32, #tpu.memory_space<vmem>>, vector<1x512x128xf32>
    %34 = vector.shape_cast %33 : vector<1x512x128xf32> to vector<512x128xf32>
    %cst_34 = arith.constant dense<0.000000e+00> : vector<8x128xf32>
    %35 = tpu.matmul %32, %34, %cst_34 {dimension_numbers = #tpu.dot_dimension_numbers<[1], [0], [0], [1], [0, 0, 1, 1], [], []>} : vector<8x512xf32>, vector<512x128xf32>, vector<8x128xf32> -> vector<8x128xf32>
    %36 = arith.addf %30, %35 : vector<8x128xf32>
    %c0_35 = arith.constant 0 : index
    %c8 = arith.constant 8 : index
    %c0_36 = arith.constant 0 : index
    %37 = vector.load %arg2[%c0_35, %c8, %c0_36] : memref<1x20x512xf32, #tpu.memory_space<vmem>>, vector<1x8x512xf32>
    %38 = vector.shape_cast %37 : vector<1x8x512xf32> to vector<8x512xf32>
    %c6_37 = arith.constant 6 : index
    %c0_38 = arith.constant 0 : index
    %c0_39 = arith.constant 0 : index
    %39 = vector.load %arg3[%c6_37, %c0_38, %c0_39] : memref<9x512x128xf32, #tpu.memory_space<vmem>>, vector<1x512x128xf32>
    %40 = vector.shape_cast %39 : vector<1x512x128xf32> to vector<512x128xf32>
    %cst_40 = arith.constant dense<0.000000e+00> : vector<8x128xf32>
    %41 = tpu.matmul %38, %40, %cst_40 {dimension_numbers = #tpu.dot_dimension_numbers<[1], [0], [0], [1], [0, 0, 1, 1], [], []>} : vector<8x512xf32>, vector<512x128xf32>, vector<8x128xf32> -> vector<8x128xf32>
    %42 = arith.addf %36, %41 : vector<8x128xf32>
    %c0_41 = arith.constant 0 : index
    %c9 = arith.constant 9 : index
    %c0_42 = arith.constant 0 : index
    %43 = vector.load %arg2[%c0_41, %c9, %c0_42] : memref<1x20x512xf32, #tpu.memory_space<vmem>>, vector<1x8x512xf32>
    %44 = vector.shape_cast %43 : vector<1x8x512xf32> to vector<8x512xf32>
    %c7 = arith.constant 7 : index
    %c0_43 = arith.constant 0 : index
    %c0_44 = arith.constant 0 : index
    %45 = vector.load %arg3[%c7, %c0_43, %c0_44] : memref<9x512x128xf32, #tpu.memory_space<vmem>>, vector<1x512x128xf32>
    %46 = vector.shape_cast %45 : vector<1x512x128xf32> to vector<512x128xf32>
    %cst_45 = arith.constant dense<0.000000e+00> : vector<8x128xf32>
    %47 = tpu.matmul %44, %46, %cst_45 {dimension_numbers = #tpu.dot_dimension_numbers<[1], [0], [0], [1], [0, 0, 1, 1], [], []>} : vector<8x512xf32>, vector<512x128xf32>, vector<8x128xf32> -> vector<8x128xf32>
    %48 = arith.addf %42, %47 : vector<8x128xf32>
    %c0_46 = arith.constant 0 : index
    %c10 = arith.constant 10 : index
    %c0_47 = arith.constant 0 : index
    %49 = vector.load %arg2[%c0_46, %c10, %c0_47] : memref<1x20x512xf32, #tpu.memory_space<vmem>>, vector<1x8x512xf32>
    %50 = vector.shape_cast %49 : vector<1x8x512xf32> to vector<8x512xf32>
    %c8_48 = arith.constant 8 : index
    %c0_49 = arith.constant 0 : index
    %c0_50 = arith.constant 0 : index
    %51 = vector.load %arg3[%c8_48, %c0_49, %c0_50] : memref<9x512x128xf32, #tpu.memory_space<vmem>>, vector<1x512x128xf32>
    %52 = vector.shape_cast %51 : vector<1x512x128xf32> to vector<512x128xf32>
    %cst_51 = arith.constant dense<0.000000e+00> : vector<8x128xf32>
    %53 = tpu.matmul %50, %52, %cst_51 {dimension_numbers = #tpu.dot_dimension_numbers<[1], [0], [0], [1], [0, 0, 1, 1], [], []>} : vector<8x512xf32>, vector<512x128xf32>, vector<8x128xf32> -> vector<8x128xf32>
    %54 = arith.addf %48, %53 : vector<8x128xf32>
    %c0_52 = arith.constant 0 : index
    %c0_53 = arith.constant 0 : index
    %55 = vector.load %arg4[%c0_52, %c0_53] : memref<1x128xf32, #tpu.memory_space<vmem>>, vector<1x128xf32>
    %56 = vector.broadcast %55 : vector<1x128xf32> to vector<8x128xf32>
    %57 = arith.addf %54, %56 : vector<8x128xf32>
    %c0_54 = arith.constant 0 : index
    %c0_55 = arith.constant 0 : index
    %c0_56 = arith.constant 0 : index
    %58 = vector.load %arg5[%c0_54, %c0_55, %c0_56] : memref<1x8x128xf32, #tpu.memory_space<vmem>>, vector<1x8x128xf32>
    %59 = vector.shape_cast %58 : vector<1x8x128xf32> to vector<8x128xf32>
    %60 = vector.shape_cast %57 : vector<8x128xf32> to vector<1x8x128xf32>
    tpu.vector_store %arg5[%c0_54, %c0_55, %c0_56], %60 {strides = array<i32>} : memref<1x8x128xf32, #tpu.memory_space<vmem>>, vector<1x8x128xf32>,
    return
  }
  func.func @transform_0(%arg0: i32, %arg1: i32) -> (i32, i32, i32) {
    %c0_i32 = arith.constant 0 : i32
    %c0_i32_0 = arith.constant 0 : i32
    %c0_i32_1 = arith.constant 0 : i32
    return %arg0, %c0_i32, %c0_i32_0 : i32, i32, i32
  }
  func.func @transform_1(%arg0: i32, %arg1: i32) -> (i32, i32, i32) {
    %c0_i32 = arith.constant 0 : i32
    %c0_i32_0 = arith.constant 0 : i32
    %c0_i32_1 = arith.constant 0 : i32
    return %c0_i32, %c0_i32_0, %arg1 : i32, i32, i32
  }
  func.func @transform_2(%arg0: i32, %arg1: i32) -> (i32, i32) {
    %c0_i32 = arith.constant 0 : i32
    %c0_i32_0 = arith.constant 0 : i32
    return %c0_i32, %arg1 : i32, i32
  }
  func.func @transform_3(%arg0: i32, %arg1: i32) -> (i32, i32, i32) {
    %c0_i32 = arith.constant 0 : i32
    %c0_i32_0 = arith.constant 0 : i32
    return %arg0, %c0_i32, %arg1 : i32, i32, i32
  }
}

</mosaic_0001>

<bundles_post_ra>
// kernel: discriminator_forward.5
= control target key start
LH: loop header
LB: loop body
LE: loop exit
PB: predicated region body
PF: predicated region fallthrough
CT: control target
= control target key end

     0   :  { %s640_s12 = smov 0   ;;  %s642_s13 = smov 0   ;;  %s718_s0 = inlined_call_operand.vmem [shape: f32[2,64,18], index: 0, kind: input, shape index: {}]   ;;  %s719_s1 = inlined_call_operand.vmem [shape: f32[18,64], index: 1, kind: input, shape index: {}]   ;;  %s720_s2 = inlined_call_operand.vmem [shape: f32[1,64], index: 2, kind: input, shape index: {}]   ;;  %s721_s3 = inlined_call_operand.vmem [shape: f32[2,64,64], index: 3, kind: output, shape index: {}]  }
   0x1   :  { %s644_s14 = smov 0  }
   0x2 LB: > { %s25_s15 = sadd.s32 1, %s614_s13  ;;  %p518_p0 = scmp.ge.s32.totalorder %s618_s14, 1  ;;  %s618_s14 = sphi %s644_s14, %s13_s14   ;;  %s614_s13 = sphi %s642_s13, %s723_s13   ;;  %s610_s12 = sphi %s640_s12, %s722_s12  }
   0x3   : > { %p27_p1 = scmp.ge.s32.totalorder %s25_s15, 2  ;;  %p168_p2 = scmp.lt.s32.totalorder %s618_s14, 3 }
   0x5   : > { %s725_s15 = smov (%p27_p1, %s25_s15), 0  ;;  %p169_p3 = pnand %p518_p0, %p168_p2 }
   0x6   : > { %p202_p4 = scmp.lt.s32.totalorder (!%p169_p3), %s610_s12, 1 }
   0x7   : > { %172 = sbr.rel (%p169_p3) target bundleno = 227 (0xe3), region = 32 }
   0xc   : > { %v232_v0 = vld [vmem:[%s719_s1 + $0x10] sm:$0x3]  ;;  %vm265_vm0 = vcmask 1041408   ;;  %v231_v1 = vld [vmem:[%s719_s1 + $0x8] sm:$0xff]  ;;  %v230_v2 = vld [vmem:[%s719_s1] sm:$0xff]  ;;  %s727_s12 = smov (!%p202_p4, %s610_s12), 1 }
   0xd   : > { %548 = vmatprep.subr.msk.mxu0 %vm265_vm0, %v232_v0  ;;  %566 = vmatprep.subr.msk.mxu1 %vm265_vm0, %v232_v0  ;;  %s535_s22 = sshll.u32 %s727_s12, 6  ;;  %vm240_vm1 = vcmask 146432   ;;  %v523_v11 = vld [vmem:[%s720_s2] ss:$0 sm:$0xff]  ;;  %vm398_vm2 = vcmask 523264  }
   0xe   : > { %549 = vmatpush3.msk.msra.mxu0 %vm265_vm0, %v232_v0  ;;  %569 = vmatpush3.msk.msra.mxu1 %vm265_vm0, %v232_v0  ;;  %s206_s25 = scalar_lea.vmem %s718_s0, %s535_s22  ;;  %s691_s30 = scalar_lea.vmem %s721_s3, %s535_s22 }
   0xf   : > { %550 = vmatprep.subr.mxu0 %v231_v1  ;;  %567 = vmatprep.subr.mxu1 %v231_v1  ;;  %v222_v3 = vld [vmem:[%s206_s25] sm:$0xff]  ;;  %v223_v5 = vld [vmem:[%s206_s25 + $0x8] sm:$0xff]  ;;  %v224_v7 = vld [vmem:[%s206_s25 + $0x10] sm:$0xff] }
  0x10   : > { %551 = vmatpush3.msra.mxu0 %v231_v1  ;;  %570 = vmatpush3.msra.mxu1 %v231_v1  ;;  %v226_v4 = vld [vmem:[%s206_s25 + $0x20] sm:$0xff]  ;;  %v227_v6 = vld [vmem:[%s206_s25 + $0x28] sm:$0xff]  ;;  %v228_v8 = vld [vmem:[%s206_s25 + $0x30] sm:$0xff] }
  0x11   : > { %552 = vmatprep.subr.mxu0 %v230_v2  ;;  %568 = vmatprep.subr.mxu1 %v230_v2  ;;  %v225_v9 = vld [vmem:[%s206_s25 + $0x18] sm:$0xff] }
  0x12   : > { %553 = vmatpush3.msra.mxu0 %v230_v2  ;;  %571 = vmatpush3.msra.mxu1 %v230_v2  ;;  %v229_v10 = vld [vmem:[%s206_s25 + $0x38] sm:$0xff] }
  0x13   : > { %554 = vmatprep.mubr.msk.f32.mxu0 %vm240_vm1, %v222_v3  ;;  %560 = vmatprep.mubr.msk.f32.mxu1 %vm240_vm1, %v226_v4 }
  0x14   : > { %555 = vmatmul.mubr.msk.f32.vlgmr.msra.gmra.mxu0 %vm240_vm1, %v223_v5  ;;  %561 = vmatmul.mubr.msk.f32.vlgmr.msra.gmra.mxu1 %vm240_vm1, %v227_v6 }
  0x15   : > { %557 = vmatprep.mubr.msk.f32.mxu0 %vm240_vm1, %v224_v7  ;;  %563 = vmatprep.mubr.msk.f32.mxu1 %vm240_vm1, %v228_v8 }
  0x18   : > { %558 = vmatmul.mubr.msk.f32.gmra.mxu0 %vm240_vm1, %v225_v9  ;;  %564 = vmatmul.mubr.msk.f32.gmra.mxu1 %vm240_vm1, %v229_v10 }
  0xd4   : > { %v556_v12 = vpop.f32.mrf.mxu0  ;;  %v562_v13 = vpop.f32.mrf.mxu1 }
  0xd5   : > { %v341_v14 = vadd.f32 %v556_v12, %v523_v11  ;;  %v361_v15 = vadd.f32 %v562_v13, %v523_v11 }
  0xd6   : > { %v335_v16 = vpop.f32.mrf.mxu0  ;;  %v355_v17 = vpop.f32.mrf.mxu1 }
  0xd7   : > { %vm375_vm3 = vcmp.ge.f32.partialorder %v341_v14, 0.0  ;;  %v383_v18 = vmul.f32 0.2, %v341_v14  ;;  %vm379_vm4 = vcmp.ge.f32.partialorder %v361_v15, 0.0  ;;  %v387_v19 = vmul.f32 0.2, %v361_v15 }
  0xd8   : > { %v336_v20 = vadd.f32 %v523_v11, %v335_v16  ;;  %v356_v21 = vadd.f32 %v523_v11, %v355_v17  ;;  %v559_v22 = vpop.f32.mrf.mxu0  ;;  %v565_v23 = vpop.f32.mrf.mxu1 }
  0xd9   : > { %v391_v24 = vsel %vm375_vm3, %v341_v14, %v383_v18  ;;  %v395_v25 = vsel %vm379_vm4, %v361_v15, %v387_v19  ;;  %v351_v26 = vadd.f32 %v559_v22, %v523_v11  ;;  %v371_v27 = vadd.f32 %v565_v23, %v523_v11 }
  0xda   : > { %400 = vst.msk [vmem:[%s691_s30 + $0x8] sm:$0xff] %vm398_vm2, %v391_v24  ;;  %404 = vst.msk [vmem:[%s691_s30 + $0x28] sm:$0xff] %vm398_vm2, %v395_v25  ;;  %vm374_vm5 = vcmp.ge.f32.partialorder %v336_v20, 0.0  ;;  %v382_v28 = vmul.f32 0.2, %v336_v20  ;;  %vm378_vm6 = vcmp.ge.f32.partialorder %v356_v21, 0.0  ;;  %v345_v30 = vpop.f32.mrf.mxu0  ;;  %v365_v31 = vpop.f32.mrf.mxu1 }
  0xdb   : > { %v386_v29 = vmul.f32 0.2, %v356_v21  ;;  %vm377_vm7 = vcmp.ge.f32.partialorder %v351_v26, 0.0  ;;  %v385_v32 = vmul.f32 0.2, %v351_v26  ;;  %vm381_vm8 = vcmp.ge.f32.partialorder %v371_v27, 0.0 }
  0xdc   : > { %v389_v33 = vmul.f32 0.2, %v371_v27  ;;  %v390_v34 = vsel %vm374_vm5, %v336_v20, %v382_v28  ;;  %v346_v36 = vadd.f32 %v523_v11, %v345_v30  ;;  %v366_v37 = vadd.f32 %v523_v11, %v365_v31 }
  0xdd   : > { %v394_v35 = vsel %vm378_vm6, %v356_v21, %v386_v29  ;;  %399 = vst.msk [vmem:[%s691_s30] sm:$0xff] %vm398_vm2, %v390_v34  ;;  %v393_v38 = vsel %vm377_vm7, %v351_v26, %v385_v32 }
  0xde   : > { %403 = vst.msk [vmem:[%s691_s30 + $0x20] sm:$0xff] %vm398_vm2, %v394_v35  ;;  %v397_v39 = vsel %vm381_vm8, %v371_v27, %v389_v33  ;;  %402 = vst.msk [vmem:[%s691_s30 + $0x18] sm:$0xff] %vm398_vm2, %v393_v38  ;;  %vm376_vm9 = vcmp.ge.f32.partialorder %v346_v36, 0.0  ;;  %v384_v40 = vmul.f32 0.2, %v346_v36  ;;  %vm380_vm10 = vcmp.ge.f32.partialorder %v366_v37, 0.0 }
  0xdf   : > { %406 = vst.msk [vmem:[%s691_s30 + $0x38] sm:$0xff] %vm398_vm2, %v397_v39  ;;  %v388_v41 = vmul.f32 0.2, %v366_v37 }
  0xe0   : > { %v392_v42 = vsel %vm376_vm9, %v346_v36, %v384_v40 }
  0xe1   : > { %v396_v43 = vsel %vm380_vm10, %v366_v37, %v388_v41  ;;  %401 = vst.msk [vmem:[%s691_s30 + $0x10] sm:$0xff] %vm398_vm2, %v392_v42 }
  0xe2   : > { %405 = vst.msk [vmem:[%s691_s30 + $0x30] sm:$0xff] %vm398_vm2, %v396_v43 }
  0xe3 PF: > { %s13_s14 = sadd.s32 1, %s618_s14   ;;  %s722_s12 = smov %s614_s13 }
  0xe4   : > { %p10_p5 = scmp.ge.s32.totalorder %s13_s14, 4   ;;  %s723_s13 = smov %s725_s15 }
  0xe6   :  { %12 = sbr.rel (!%p10_p5) target bundleno = 2 (0x2), region = 68 }

// kernel: discriminator_forward.6
= control target key start
LH: loop header
LB: loop body
LE: loop exit
PB: predicated region body
PF: predicated region fallthrough
CT: control target
= control target key end

     0   :  { %s1858_s9 = smov 0   ;;  %s1860_s10 = smov 0   ;;  %s2336_s0 = inlined_call_operand.vmem [shape: f32[2,4,30,64], index: 0, kind: input, shape index: {}]   ;;  %s2337_s1 = inlined_call_operand.vmem [shape: f32[9,64,128], index: 1, kind: input, shape index: {}]   ;;  %s2338_s2 = inlined_call_operand.vmem [shape: f32[2,20,128], index: 2, kind: output, shape index: {}]  }
   0x1   :  { %s1862_s11 = smov 0  }
   0x2 LB: > { %s24_s12 = sadd.s32 1, %s1835_s10  ;;  %p1326_p0 = scmp.ge.s32.totalorder %s1839_s11, 1  ;;  %s1839_s11 = sphi %s1862_s11, %s12_s11   ;;  %s1835_s10 = sphi %s1860_s10, %s2344_s10   ;;  %s1831_s9 = sphi %s1858_s9, %s2343_s9  }
   0x3   : > { %p26_p1 = scmp.ge.s32.totalorder %s24_s12, 2  ;;  %p135_p2 = scmp.lt.s32.totalorder %s1839_s11, 3 }
   0x5   : > { %s2346_s12 = smov (%p26_p1, %s24_s12), 0  ;;  %p136_p3 = pnand %p1326_p0, %p135_p2 }
   0x6   : > { %p164_p4 = scmp.lt.s32.totalorder (!%p136_p3), %s1831_s9, 1 }
   0x7   : > { %139 = sbr.rel (%p136_p3) target bundleno = 367 (0x16f), region = 28 }
   0xc   : > { %v1340_v0 = vld [vmem:[%s2337_s1 + $0x78] sm:$0xff]  ;;  %v1841_v2 = vmov 0.0   ;;  %v1339_v3 = vld [vmem:[%s2337_s1 + $0x70] sm:$0xff]  ;;  %v1338_v5 = vld [vmem:[%s2337_s1 + $0x68] sm:$0xff]  ;;  %s2348_s9 = smov (!%p164_p4, %s1831_s9), 1  ;;  %vm205_vm0 = vcmask 523264  }
   0xd   : > { %v191_v1 = vld [vmem:[%s2337_s1 + $0x38] sm:$0xff]  ;;  %1541 = vmatprep.subr.mxu0 %v1841_v2  ;;  %1566 = vmatprep.subr.mxu1 %v1841_v2  ;;  %v190_v4 = vld [vmem:[%s2337_s1 + $0x30] sm:$0xff]  ;;  %v189_v6 = vld [vmem:[%s2337_s1 + $0x28] sm:$0xff]  ;;  %s1441_s13 = sshll.u32 %s2348_s9, 7  ;;  %vm1842_vm1 = vmmov 0   ;;  %vm1179_vm14 = vcmask 1043456  }
   0xe   : > { %1542 = vmatpush3.msra.mxu0 %v1340_v0  ;;  %1567 = vmatpush3.msra.mxu1 %v191_v1  ;;  %v1337_v7 = vld [vmem:[%s2337_s1 + $0x60] sm:$0xff]  ;;  %v1336_v9 = vld [vmem:[%s2337_s1 + $0x58] sm:$0xff]  ;;  %v1335_v11 = vld [vmem:[%s2337_s1 + $0x50] sm:$0xff]  ;;  %s1940_s20 = scalar_lea.vmem %s2336_s0, %s1441_s13 }
   0xf   : > { %1543 = vmatprep.subr.mxu0 %v1841_v2  ;;  %1568 = vmatprep.subr.mxu1 %v1841_v2  ;;  %v188_v8 = vld [vmem:[%s2337_s1 + $0x20] sm:$0xff]  ;;  %v187_v10 = vld [vmem:[%s2337_s1 + $0x18] sm:$0xff]  ;;  %v186_v12 = vld [vmem:[%s2337_s1 + $0x10] sm:$0xff] }
  0x10   : > { %1544 = vmatpush3.msra.mxu0 %v1339_v3  ;;  %1569 = vmatpush3.msra.mxu1 %v190_v4  ;;  %v1334_v13 = vld [vmem:[%s2337_s1 + $0x48] sm:$0xff]  ;;  %v1333_v15 = vld [vmem:[%s2337_s1 + $0x40] sm:$0xff]  ;;  %v1354_v19 = vld [vmem:[%s2337_s1 + $0xb8] sm:$0xff] }
  0x11   : > { %1545 = vmatprep.subr.mxu0 %v1841_v2  ;;  %1570 = vmatprep.subr.mxu1 %v1841_v2  ;;  %v185_v14 = vld [vmem:[%s2337_s1 + $0x8] sm:$0xff]  ;;  %v184_v16 = vld [vmem:[%s2337_s1] sm:$0xff]  ;;  %v1368_v20 = vld [vmem:[%s2337_s1 + $0xf8] sm:$0xff] }
  0x12   : > { %1546 = vmatpush3.msra.mxu0 %v1338_v5  ;;  %1571 = vmatpush3.msra.mxu1 %v189_v6  ;;  %v181_v17 = vld [vmem:[%s1940_s20] sm:$0xff]  ;;  %v1353_v21 = vld [vmem:[%s2337_s1 + $0xb0] sm:$0xff]  ;;  %v1352_v23 = vld [vmem:[%s2337_s1 + $0xa8] sm:$0xff] }
  0x13   : > { %1547 = vmatprep.subr.mxu0 %v1841_v2  ;;  %1572 = vmatprep.subr.mxu1 %v1841_v2  ;;  %v1330_v18 = vld [vmem:[%s1940_s20 + $0x20] sm:$0xff]  ;;  %v1367_v22 = vld [vmem:[%s2337_s1 + $0xf0] sm:$0xff]  ;;  %v1366_v24 = vld [vmem:[%s2337_s1 + $0xe8] sm:$0xff] }
  0x14   : > { %1548 = vmatpush3.msra.mxu0 %v1337_v7  ;;  %1573 = vmatpush3.msra.mxu1 %v188_v8  ;;  %v182_v25 = vld [vmem:[%s1940_s20 + $0x8] sm:$0xff]  ;;  %v1351_v26 = vld [vmem:[%s2337_s1 + $0xa0] sm:$0xff]  ;;  %v1350_v29 = vld [vmem:[%s2337_s1 + $0x98] sm:$0xff] }
  0x15   : > { %1549 = vmatprep.subr.mxu0 %v1841_v2  ;;  %1574 = vmatprep.subr.mxu1 %v1841_v2  ;;  %v1365_v27 = vld [vmem:[%s2337_s1 + $0xe0] sm:$0xff]  ;;  %v1331_v28 = vld [vmem:[%s1940_s20 + $0x28] sm:$0xff]  ;;  %v1364_v30 = vld [vmem:[%s2337_s1 + $0xd8] sm:$0xff] }
  0x16   : > { %1550 = vmatpush3.msra.mxu0 %v1336_v9  ;;  %1575 = vmatpush3.msra.mxu1 %v187_v10  ;;  %v183_v31 = vld [vmem:[%s1940_s20 + $0x10] sm:$0xf]  ;;  %v1348_v35 = vld [vmem:[%s2337_s1 + $0x88] sm:$0xff]  ;;  %v1347_v37 = vld [vmem:[%s2337_s1 + $0x80] sm:$0xff] }
  0x17   : > { %1551 = vmatprep.subr.mxu0 %v1841_v2  ;;  %1576 = vmatprep.subr.mxu1 %v1841_v2  ;;  %v1349_v32 = vld [vmem:[%s2337_s1 + $0x90] sm:$0xff]  ;;  %v1362_v36 = vld [vmem:[%s2337_s1 + $0xc8] sm:$0xff]  ;;  %v1361_v38 = vld [vmem:[%s2337_s1 + $0xc0] sm:$0xff] }
  0x18   : > { %1552 = vmatpush3.msra.mxu0 %v1335_v11  ;;  %1577 = vmatpush3.msra.mxu1 %v186_v12  ;;  %v1363_v33 = vld [vmem:[%s2337_s1 + $0xd0] sm:$0xff]  ;;  %v384_v39 = vld [vmem:[%s1940_s20 + $0x1] sm:$0xff]  ;;  %v1382_v41 = vld [vmem:[%s2337_s1 + $0x138] sm:$0xff] }
  0x19   : > { %1553 = vmatprep.subr.mxu0 %v1841_v2  ;;  %1578 = vmatprep.subr.mxu1 %v1841_v2  ;;  %v1332_v34 = vld [vmem:[%s1940_s20 + $0x30] sm:$0xf]  ;;  %v1358_v40 = vld [vmem:[%s1940_s20 + $0x40] sm:$0xff]  ;;  %v1396_v42 = vld [vmem:[%s2337_s1 + $0x178] sm:$0xff] }
  0x1a   : > { %1554 = vmatpush3.msra.mxu0 %v1334_v13  ;;  %1579 = vmatpush3.msra.mxu1 %v185_v14  ;;  %v1381_v43 = vld [vmem:[%s2337_s1 + $0x130] sm:$0xff]  ;;  %v1380_v46 = vld [vmem:[%s2337_s1 + $0x128] sm:$0xff]  ;;  %v1379_v49 = vld [vmem:[%s2337_s1 + $0x120] sm:$0xff] }
  0x1b   : > { %1555 = vmatprep.subr.mxu0 %v1841_v2  ;;  %1580 = vmatprep.subr.mxu1 %v1841_v2  ;;  %v1395_v44 = vld [vmem:[%s2337_s1 + $0x170] sm:$0xff]  ;;  %v1394_v47 = vld [vmem:[%s2337_s1 + $0x168] sm:$0xff]  ;;  %v1393_v50 = vld [vmem:[%s2337_s1 + $0x160] sm:$0xff] }
  0x1c   : > { %1556 = vmatpush3.msra.mxu0 %v1333_v15  ;;  %1581 = vmatpush3.msra.mxu1 %v184_v16  ;;  %v385_v45 = vld [vmem:[%s1940_s20 + $0x9] sm:$0xff]  ;;  %v386_v51 = vld [vmem:[%s1940_s20 + $0x11] sm:$0xf]  ;;  %v1378_v52 = vld [vmem:[%s2337_s1 + $0x118] sm:$0xff] }
  0x1d   : > { %1582 = vmatprep.mubr.msk.f32.mxu1 %vm1842_vm1, %v1841_v2  ;;  %1557 = vmatprep.mubr.msk.f32.mxu0 %vm1842_vm1, %v1841_v2  ;;  %v1359_v48 = vld [vmem:[%s1940_s20 + $0x48] sm:$0xff]  ;;  %v1392_v53 = vld [vmem:[%s2337_s1 + $0x158] sm:$0xff]  ;;  %v1360_v54 = vld [vmem:[%s1940_s20 + $0x50] sm:$0xf] }
  0x1e   : > { %1583 = vmatmul.mubr.msk.f32.vlgmr.msra.gmra.mxu1 %vm205_vm0, %v181_v17  ;;  %1591 = vmatprep.subr.mxu0 %v1841_v2  ;;  %v1377_v55 = vld [vmem:[%s2337_s1 + $0x110] sm:$0xff]  ;;  %v1376_v57 = vld [vmem:[%s2337_s1 + $0x108] sm:$0xff]  ;;  %v1375_v59 = vld [vmem:[%s2337_s1 + $0x100] sm:$0xff] }
  0x1f   : > { %1616 = vmatprep.subr.mxu1 %v1841_v2  ;;  %1558 = vmatmul.mubr.msk.f32.vlgmr.msra.gmra.mxu0 %vm205_vm0, %v1330_v18  ;;  %v1391_v56 = vld [vmem:[%s2337_s1 + $0x150] sm:$0xff]  ;;  %v1390_v58 = vld [vmem:[%s2337_s1 + $0x148] sm:$0xff]  ;;  %v1389_v60 = vld [vmem:[%s2337_s1 + $0x140] sm:$0xff] }
  0x20   : > { %1592 = vmatpush3.msra.mxu0 %v1354_v19  ;;  %1617 = vmatpush3.msra.mxu1 %v1368_v20  ;;  %v1372_v61 = vld [vmem:[%s1940_s20 + $0x60] sm:$0xff]  ;;  %v1407_v63 = vld [vmem:[%s2337_s1 + $0x1b8] sm:$0xff]  ;;  %v1406_v1 = vld [vmem:[%s2337_s1 + $0x1b0] sm:$0xff] }
  0x21   : > { %1593 = vmatprep.subr.mxu0 %v1841_v2  ;;  %1618 = vmatprep.subr.mxu1 %v1841_v2  ;;  %v1386_v62 = vld [vmem:[%s1940_s20 + $0x41] sm:$0xff]  ;;  %v1421_v0 = vld [vmem:[%s2337_s1 + $0x1f8] sm:$0xff]  ;;  %v1420_v3 = vld [vmem:[%s2337_s1 + $0x1f0] sm:$0xff] }
  0x22   : > { %1594 = vmatpush3.msra.mxu0 %v1353_v21  ;;  %1619 = vmatpush3.msra.mxu1 %v1367_v22  ;;  %v1373_v4 = vld [vmem:[%s1940_s20 + $0x68] sm:$0xff]  ;;  %v1404_v8 = vld [vmem:[%s2337_s1 + $0x1a0] sm:$0xff]  ;;  %v1374_v10 = vld [vmem:[%s1940_s20 + $0x70] sm:$0xf] }
  0x23   : > { %1595 = vmatprep.subr.mxu0 %v1841_v2  ;;  %1620 = vmatprep.subr.mxu1 %v1841_v2  ;;  %v1405_v5 = vld [vmem:[%s2337_s1 + $0x1a8] sm:$0xff]  ;;  %v1418_v9 = vld [vmem:[%s2337_s1 + $0x1e0] sm:$0xff]  ;;  %v1403_v11 = vld [vmem:[%s2337_s1 + $0x198] sm:$0xff] }
  0x24   : > { %1596 = vmatpush3.msra.mxu0 %v1352_v23  ;;  %1621 = vmatpush3.msra.mxu1 %v1366_v24  ;;  %v1419_v6 = vld [vmem:[%s2337_s1 + $0x1e8] sm:$0xff]  ;;  %v1417_v12 = vld [vmem:[%s2337_s1 + $0x1d8] sm:$0xff]  ;;  %v1388_v13 = vld [vmem:[%s1940_s20 + $0x51] sm:$0xf] }
  0x25   : > { %1585 = vmatprep.mubr.msk.f32.mxu1 %vm1842_vm1, %v1841_v2  ;;  %1597 = vmatprep.subr.mxu0 %v1841_v2  ;;  %v1387_v7 = vld [vmem:[%s1940_s20 + $0x49] sm:$0xff]  ;;  %v1400_v18 = vld [vmem:[%s2337_s1 + $0x180] sm:$0xff]  ;;  %v1432_v22 = vld [vmem:[%s2337_s1 + $0x238] sm:$0xff] }
  0x26   : > { %1622 = vmatprep.subr.mxu1 %v1841_v2  ;;  %1560 = vmatprep.mubr.msk.f32.mxu0 %vm1842_vm1, %v1841_v2  ;;  %v1402_v14 = vld [vmem:[%s2337_s1 + $0x190] sm:$0xff]  ;;  %v1401_v16 = vld [vmem:[%s2337_s1 + $0x188] sm:$0xff]  ;;  %v1414_v19 = vld [vmem:[%s2337_s1 + $0x1c0] sm:$0xff] }
  0x27   : > { %1586 = vmatmul.mubr.msk.f32.gmra.mxu1 %vm205_vm0, %v182_v25  ;;  %1598 = vmatpush3.msra.mxu0 %v1351_v26  ;;  %v1416_v15 = vld [vmem:[%s2337_s1 + $0x1d0] sm:$0xff]  ;;  %v1415_v17 = vld [vmem:[%s2337_s1 + $0x1c8] sm:$0xff] }
  0x28   : > { %1623 = vmatpush3.msra.mxu1 %v1365_v27  ;;  %1561 = vmatmul.mubr.msk.f32.gmra.mxu0 %vm205_vm0, %v1331_v28  ;;  %v802_v20 = vld [vmem:[%s1940_s20 + $0x5] sm:$0xff]  ;;  %v1431_v23 = vld [vmem:[%s2337_s1 + $0x230] sm:$0xff] }
  0x29   : > { %1599 = vmatprep.subr.mxu0 %v1841_v2  ;;  %1624 = vmatprep.subr.mxu1 %v1841_v2  ;;  %v1411_v21 = vld [vmem:[%s1940_s20 + $0x25] sm:$0xff]  ;;  %v803_v24 = vld [vmem:[%s1940_s20 + $0xd] sm:$0xff]  ;;  %v804_v28 = vld [vmem:[%s1940_s20 + $0x15] sm:$0xf] }
  0x2a   : > { %1600 = vmatpush3.msra.mxu0 %v1350_v29  ;;  %1625 = vmatpush3.msra.mxu1 %v1364_v30  ;;  %v1430_v25 = vld [vmem:[%s2337_s1 + $0x228] sm:$0xff]  ;;  %v1429_v27 = vld [vmem:[%s2337_s1 + $0x220] sm:$0xff]  ;;  %v1428_v29 = vld [vmem:[%s2337_s1 + $0x218] sm:$0xff] }
  0x2b   : > { %1588 = vmatprep.mubr.msk.f32.mxu1 %vm1842_vm1, %v1841_v2  ;;  %1601 = vmatprep.subr.mxu0 %v1841_v2  ;;  %v1412_v26 = vld [vmem:[%s1940_s20 + $0x2d] sm:$0xff]  ;;  %v1413_v30 = vld [vmem:[%s1940_s20 + $0x35] sm:$0xf] }
  0x2c   : > { %1626 = vmatprep.subr.mxu1 %v1841_v2  ;;  %1563 = vmatprep.mubr.msk.f32.mxu0 %vm1842_vm1, %v1841_v2 }
  0x2d   : > { %1589 = vmatmul.mubr.msk.f32.gmra.mxu1 %vm205_vm0, %v183_v31  ;;  %1602 = vmatpush3.msra.mxu0 %v1349_v32  ;;  %v1427_v31 = vld [vmem:[%s2337_s1 + $0x210] sm:$0xff]  ;;  %v1426_v32 = vld [vmem:[%s2337_s1 + $0x208] sm:$0xff] }
  0x2e   : > { %1627 = vmatpush3.msra.mxu1 %v1363_v33  ;;  %1564 = vmatmul.mubr.msk.f32.gmra.mxu0 %vm205_vm0, %v1332_v34  ;;  %v1425_v33 = vld [vmem:[%s2337_s1 + $0x200] sm:$0xff] }
  0x2f   : > { %1603 = vmatprep.subr.mxu0 %v1841_v2  ;;  %1628 = vmatprep.subr.mxu1 %v1841_v2  ;;  %v1010_v34 = vld [vmem:[%s1940_s20 + $0x6] sm:$0xff] }
  0x30   : > { %1604 = vmatpush3.msra.mxu0 %v1348_v35  ;;  %1629 = vmatpush3.msra.mxu1 %v1362_v36  ;;  %v1011_v35 = vld [vmem:[%s1940_s20 + $0xe] sm:$0xff]  ;;  %v1012_v36 = vld [vmem:[%s1940_s20 + $0x16] sm:$0xf]  ;;  %s1782_s20 = smul.u32 24, %s2348_s9 }
  0x31   : > { %1605 = vmatprep.subr.mxu0 %v1841_v2  ;;  %1630 = vmatprep.subr.mxu1 %v1841_v2 }
  0x32   : > { %1606 = vmatpush3.msra.mxu0 %v1347_v37  ;;  %1607 = vmatprep.mubr.msk.f32.mxu0 %vm1842_vm1, %v1841_v2  ;;  %s180_s24 = scalar_lea.vmem %s2338_s2, %s1782_s20 }
  0x33   : > { %1631 = vmatpush3.msra.mxu1 %v1361_v38  ;;  %1632 = vmatprep.mubr.msk.f32.mxu1 %vm1842_vm1, %v1841_v2 }
  0x34   : > { %1608 = vmatmul.mubr.msk.f32.vlgmr.msra.gmra.mxu0 %vm205_vm0, %v384_v39  ;;  %1633 = vmatmul.mubr.msk.f32.vlgmr.msra.gmra.mxu1 %vm205_vm0, %v1358_v40 }
  0x35   : > { %1641 = vmatprep.subr.mxu0 %v1841_v2  ;;  %1666 = vmatprep.subr.mxu1 %v1841_v2 }
  0x36   : > { %1642 = vmatpush3.msra.mxu0 %v1382_v41  ;;  %1667 = vmatpush3.msra.mxu1 %v1396_v42 }
  0x37   : > { %1643 = vmatprep.subr.mxu0 %v1841_v2  ;;  %1668 = vmatprep.subr.mxu1 %v1841_v2 }
  0x38   : > { %1610 = vmatprep.mubr.msk.f32.mxu0 %vm1842_vm1, %v1841_v2  ;;  %1644 = vmatpush3.msra.mxu0 %v1381_v43 }
  0x39   : > { %1669 = vmatpush3.msra.mxu1 %v1395_v44  ;;  %1611 = vmatmul.mubr.msk.f32.gmra.mxu0 %vm205_vm0, %v385_v45 }
  0x3a   : > { %1645 = vmatprep.subr.mxu0 %v1841_v2  ;;  %1670 = vmatprep.subr.mxu1 %v1841_v2 }
  0x3b   : > { %1635 = vmatprep.mubr.msk.f32.mxu1 %vm1842_vm1, %v1841_v2  ;;  %1646 = vmatpush3.msra.mxu0 %v1380_v46 }
  0x3c   : > { %1671 = vmatpush3.msra.mxu1 %v1394_v47  ;;  %1647 = vmatprep.subr.mxu0 %v1841_v2 }
  0x3d   : > { %1636 = vmatmul.mubr.msk.f32.gmra.mxu1 %vm205_vm0, %v1359_v48  ;;  %1672 = vmatprep.subr.mxu1 %v1841_v2 }
  0x3e   : > { %1613 = vmatprep.mubr.msk.f32.mxu0 %vm1842_vm1, %v1841_v2  ;;  %1648 = vmatpush3.msra.mxu0 %v1379_v49 }
  0x3f   : > { %1673 = vmatpush3.msra.mxu1 %v1393_v50  ;;  %1614 = vmatmul.mubr.msk.f32.gmra.mxu0 %vm205_vm0, %v386_v51 }
  0x40   : > { %1649 = vmatprep.subr.mxu0 %v1841_v2  ;;  %1674 = vmatprep.subr.mxu1 %v1841_v2 }
  0x41   : > { %1638 = vmatprep.mubr.msk.f32.mxu1 %vm1842_vm1, %v1841_v2  ;;  %1650 = vmatpush3.msra.mxu0 %v1378_v52 }
  0x42   : > { %1675 = vmatpush3.msra.mxu1 %v1392_v53  ;;  %1651 = vmatprep.subr.mxu0 %v1841_v2 }
  0x43   : > { %1639 = vmatmul.mubr.msk.f32.gmra.mxu1 %vm205_vm0, %v1360_v54  ;;  %1676 = vmatprep.subr.mxu1 %v1841_v2 }
  0x44   : > { %1652 = vmatpush3.msra.mxu0 %v1377_v55  ;;  %1677 = vmatpush3.msra.mxu1 %v1391_v56 }
  0x45   : > { %1653 = vmatprep.subr.mxu0 %v1841_v2  ;;  %1678 = vmatprep.subr.mxu1 %v1841_v2 }
  0x46   : > { %1654 = vmatpush3.msra.mxu0 %v1376_v57  ;;  %1679 = vmatpush3.msra.mxu1 %v1390_v58 }
  0x47   : > { %1655 = vmatprep.subr.mxu0 %v1841_v2  ;;  %1680 = vmatprep.subr.mxu1 %v1841_v2 }
  0x48   : > { %1656 = vmatpush3.msra.mxu0 %v1375_v59  ;;  %1657 = vmatprep.mubr.msk.f32.mxu0 %vm1842_vm1, %v1841_v2 }
  0x49   : > { %1681 = vmatpush3.msra.mxu1 %v1389_v60  ;;  %1682 = vmatprep.mubr.msk.f32.mxu1 %vm1842_vm1, %v1841_v2 }
  0x4a   : > { %1658 = vmatmul.mubr.msk.f32.vlgmr.msra.gmra.mxu0 %vm205_vm0, %v1372_v61  ;;  %1683 = vmatmul.mubr.msk.f32.vlgmr.msra.gmra.mxu1 %vm205_vm0, %v1386_v62 }
  0x4b   : > { %1691 = vmatprep.subr.mxu0 %v1841_v2  ;;  %1716 = vmatprep.subr.mxu1 %v1841_v2 }
  0x4c   : > { %1692 = vmatpush3.msra.mxu0 %v1407_v63  ;;  %1717 = vmatpush3.msra.mxu1 %v1421_v0 }
  0x4d   : > { %1693 = vmatprep.subr.mxu0 %v1841_v2  ;;  %1718 = vmatprep.subr.mxu1 %v1841_v2 }
  0x4e   : > { %1660 = vmatprep.mubr.msk.f32.mxu0 %vm1842_vm1, %v1841_v2  ;;  %1694 = vmatpush3.msra.mxu0 %v1406_v1  ;;  %v1114_v1 = vlaneseq }
  0x4f   : > { %1719 = vmatpush3.msra.mxu1 %v1420_v3  ;;  %1661 = vmatmul.mubr.msk.f32.gmra.mxu0 %vm205_vm0, %v1373_v4 }
  0x50   : > { %1695 = vmatprep.subr.mxu0 %v1841_v2  ;;  %1720 = vmatprep.subr.mxu1 %v1841_v2 }
  0x51   : > { %1685 = vmatprep.mubr.msk.f32.mxu1 %vm1842_vm1, %v1841_v2  ;;  %1696 = vmatpush3.msra.mxu0 %v1405_v5  ;;  %v1115_v5 = vshrl.u32 %v1114_v1, 7 }
  0x52   : > { %1721 = vmatpush3.msra.mxu1 %v1419_v6  ;;  %1697 = vmatprep.subr.mxu0 %v1841_v2 }
  0x53   : > { %1686 = vmatmul.mubr.msk.f32.gmra.mxu1 %vm205_vm0, %v1387_v7  ;;  %1722 = vmatprep.subr.mxu1 %v1841_v2 }
  0x54   : > { %1663 = vmatprep.mubr.msk.f32.mxu0 %vm1842_vm1, %v1841_v2  ;;  %1698 = vmatpush3.msra.mxu0 %v1404_v8  ;;  %v1116_v8 = vadd.s32 8, %v1115_v5 }
  0x55   : > { %1723 = vmatpush3.msra.mxu1 %v1418_v9  ;;  %1664 = vmatmul.mubr.msk.f32.gmra.mxu0 %vm205_vm0, %v1374_v10 }
  0x56   : > { %1699 = vmatprep.subr.mxu0 %v1841_v2  ;;  %1724 = vmatprep.subr.mxu1 %v1841_v2 }
  0x57   : > { %1688 = vmatprep.mubr.msk.f32.mxu1 %vm1842_vm1, %v1841_v2  ;;  %1700 = vmatpush3.msra.mxu0 %v1403_v11  ;;  %v2292_v10 = vmul.u32.u64.low 3435973837, %v1115_v5  ;;  %v2293_v11 = vmul.u32.u64.high 3435973837, %v1115_v5, %v2292_v10 }
  0x58   : > { %1725 = vmatpush3.msra.mxu1 %v1417_v12  ;;  %1701 = vmatprep.subr.mxu0 %v1841_v2 }
  0x59   : > { %1689 = vmatmul.mubr.msk.f32.gmra.mxu1 %vm205_vm0, %v1388_v13  ;;  %1726 = vmatprep.subr.mxu1 %v1841_v2 }
  0x5a   : > { %1702 = vmatpush3.msra.mxu0 %v1402_v14  ;;  %1727 = vmatpush3.msra.mxu1 %v1416_v15  ;;  %v2295_v14 = vmul.u32.u64.low 3435973837, %v1116_v8  ;;  %v2296_v15 = vmul.u32.u64.high 3435973837, %v1116_v8, %v2295_v14 }
  0x5b   : > { %1703 = vmatprep.subr.mxu0 %v1841_v2  ;;  %1728 = vmatprep.subr.mxu1 %v1841_v2 }
  0x5c   : > { %1704 = vmatpush3.msra.mxu0 %v1401_v16  ;;  %1729 = vmatpush3.msra.mxu1 %v1415_v17  ;;  %v1117_v16 = vadd.s32 16, %v1115_v5 }
  0x5d   : > { %1705 = vmatprep.subr.mxu0 %v1841_v2  ;;  %1730 = vmatprep.subr.mxu1 %v1841_v2 }
  0x5e   : > { %1706 = vmatpush3.msra.mxu0 %v1400_v18  ;;  %1707 = vmatprep.mubr.msk.f32.mxu0 %vm1842_vm1, %v1841_v2 }
  0x5f   : > { %1731 = vmatpush3.msra.mxu1 %v1414_v19  ;;  %1732 = vmatprep.mubr.msk.f32.mxu1 %vm1842_vm1, %v1841_v2 }
  0x60   : > { %1708 = vmatmul.mubr.msk.f32.vlgmr.msra.gmra.mxu0 %vm205_vm0, %v802_v20  ;;  %1733 = vmatmul.mubr.msk.f32.vlgmr.msra.gmra.mxu1 %vm205_vm0, %v1411_v21  ;;  %v2298_v19 = vmul.u32.u64.low 3435973837, %v1117_v16  ;;  %v2299_v20 = vmul.u32.u64.high 3435973837, %v1117_v16, %v2298_v19 }
  0x61   : > { %1741 = vmatprep.subr.mxu0 %v1841_v2  ;;  %1766 = vmatprep.subr.mxu1 %v1841_v2 }
  0x62   : > { %1742 = vmatpush3.msra.mxu0 %v1432_v22  ;;  %1774 = vmatpush3.msra.mxu1 %v1432_v22  ;;  %v1124_v22 = vshrl.u32 %v2293_v11, 2 }
  0x63   : > { %1743 = vmatprep.subr.mxu0 %v1841_v2  ;;  %1767 = vmatprep.subr.mxu1 %v1841_v2 }
  0x64   : > { %1710 = vmatprep.mubr.msk.f32.mxu0 %vm1842_vm1, %v1841_v2  ;;  %1744 = vmatpush3.msra.mxu0 %v1431_v23 }
  0x65   : > { %1775 = vmatpush3.msra.mxu1 %v1431_v23  ;;  %1711 = vmatmul.mubr.msk.f32.gmra.mxu0 %vm205_vm0, %v803_v24  ;;  %v1135_v23 = vshrl.u32 %v2296_v15, 2 }
  0x66   : > { %1745 = vmatprep.subr.mxu0 %v1841_v2  ;;  %1768 = vmatprep.subr.mxu1 %v1841_v2 }
  0x67   : > { %1735 = vmatprep.mubr.msk.f32.mxu1 %vm1842_vm1, %v1841_v2  ;;  %1746 = vmatpush3.msra.mxu0 %v1430_v25 }
  0x68   : > { %1776 = vmatpush3.msra.mxu1 %v1430_v25  ;;  %1747 = vmatprep.subr.mxu0 %v1841_v2 }
  0x69   : > { %1736 = vmatmul.mubr.msk.f32.gmra.mxu1 %vm205_vm0, %v1412_v26  ;;  %1769 = vmatprep.subr.mxu1 %v1841_v2  ;;  %v1125_v26 = vmul.u32 5, %v1124_v22 }
  0x6a   : > { %1713 = vmatprep.mubr.msk.f32.mxu0 %vm1842_vm1, %v1841_v2  ;;  %1748 = vmatpush3.msra.mxu0 %v1429_v27 }
  0x6b   : > { %1777 = vmatpush3.msra.mxu1 %v1429_v27  ;;  %1714 = vmatmul.mubr.msk.f32.gmra.mxu0 %vm205_vm0, %v804_v28 }
  0x6c   : > { %1749 = vmatprep.subr.mxu0 %v1841_v2  ;;  %1770 = vmatprep.subr.mxu1 %v1841_v2 }
  0x6d   : > { %1738 = vmatprep.mubr.msk.f32.mxu1 %vm1842_vm1, %v1841_v2  ;;  %1750 = vmatpush3.msra.mxu0 %v1428_v29 }
  0x6e   : > { %1778 = vmatpush3.msra.mxu1 %v1428_v29  ;;  %1751 = vmatprep.subr.mxu0 %v1841_v2  ;;  %v1136_v29 = vmul.u32 5, %v1135_v23 }
  0x6f   : > { %1739 = vmatmul.mubr.msk.f32.gmra.mxu1 %vm205_vm0, %v1413_v30  ;;  %1771 = vmatprep.subr.mxu1 %v1841_v2  ;;  %v1146_v30 = vshrl.u32 %v2299_v20, 2 }
  0x70   : > { %1752 = vmatpush3.msra.mxu0 %v1427_v31  ;;  %1779 = vmatpush3.msra.mxu1 %v1427_v31  ;;  %v1126_v31 = vsub.s32 %v1115_v5, %v1125_v26 }
  0x71   : > { %1753 = vmatprep.subr.mxu0 %v1841_v2  ;;  %1772 = vmatprep.subr.mxu1 %v1841_v2 }
  0x72   : > { %1754 = vmatpush3.msra.mxu0 %v1426_v32  ;;  %1780 = vmatpush3.msra.mxu1 %v1426_v32  ;;  %vm1151_vm2 = vcmp.ne.s32.totalorder %v1126_v31, 0  ;;  %vm1154_vm3 = vcmp.lt.s32.totalorder %v1126_v31, 0 }
  0x73   : > { %1755 = vmatprep.subr.mxu0 %v1841_v2  ;;  %1773 = vmatprep.subr.mxu1 %v1841_v2  ;;  %vm2304_vm6 = vmand %vm1154_vm3, %vm1151_vm2 }
  0x74   : > { %1756 = vmatpush3.msra.mxu0 %v1425_v33  ;;  %1781 = vmatpush3.msra.mxu1 %v1425_v33 }
  0x75   : > { %1757 = vmatprep.mubr.msk.f32.mxu0 %vm1842_vm1, %v1841_v2  ;;  %1760 = vmatprep.mubr.msk.f32.mxu1 %vm1842_vm1, %v1841_v2 }
  0x76   : > { %1758 = vmatmul.mubr.msk.f32.vlgmr.msra.gmra.mxu0 %vm205_vm0, %v1010_v34  ;;  %1761 = vmatmul.mubr.msk.f32.vlgmr.msra.gmra.mxu1 %vm205_vm0, %v1011_v35  ;;  %v1137_v35 = vsub.s32 %v1116_v8, %v1136_v29 }
  0x77   : > { %1763 = vmatprep.mubr.msk.f32.mxu1 %vm1842_vm1, %v1841_v2 }
  0x78   : > { %vm1152_vm4 = vcmp.ne.s32.totalorder %v1137_v35, 0  ;;  %vm1155_vm5 = vcmp.lt.s32.totalorder %v1137_v35, 0 }
  0x79   : > { %vm2308_vm7 = vmand %vm1155_vm5, %vm1152_vm4 }
  0x7a   : > { %1764 = vmatmul.mubr.msk.f32.gmra.mxu1 %vm205_vm0, %v1012_v36  ;;  %v1147_v36 = vmul.u32 5, %v1146_v30 }
  0xde   : > { %v370_v37 = vpop.f32.mrf.mxu1 }
  0xdf   : > { %v281_v38 = vpop.f32.mrf.mxu0 }
  0xe0   : > { %v371_v39 = vadd.f32 %v370_v37, %v281_v38  ;;  %v1584_v40 = vpop.f32.mrf.mxu1 }
  0xe1   : > { %v1559_v41 = vpop.f32.mrf.mxu0 }
  0xe7   : > { %v375_v42 = vpop.f32.mrf.mxu1 }
  0xe8   : > { %v286_v43 = vpop.f32.mrf.mxu0 }
  0xe9   : > { %v376_v44 = vadd.f32 %v375_v42, %v286_v43  ;;  %v1587_v45 = vpop.f32.mrf.mxu1 }
  0xea   : > { %v1562_v46 = vpop.f32.mrf.mxu0  ;;  %v1148_v45 = vsub.s32 %v1117_v16, %v1147_v36 }
  0xec   : > { %vm1153_vm8 = vcmp.ne.s32.totalorder %v1148_v45, 0  ;;  %vm1156_vm9 = vcmp.lt.s32.totalorder %v1148_v45, 0 }
  0xed   : > { %v380_v47 = vpop.f32.mrf.mxu1  ;;  %vm1159_vm10 = vmand %vm1156_vm9, %vm1153_vm8 }
  0xee   : > { %v291_v48 = vpop.f32.mrf.mxu0 }
  0xef   : > { %v1590_v49 = vpop.f32.mrf.mxu1  ;;  %v381_v37 = vadd.f32 %v380_v47, %v291_v48  ;;  %v1161_v47 = vadd.s32 5, %v1137_v35 }
  0xf0   : > { %v1565_v50 = vpop.f32.mrf.mxu0 }
  0xf4   : > { %v471_v51 = vpop.f32.mrf.mxu0  ;;  %v576_v52 = vpop.f32.mrf.mxu1 }
  0xf5   : > { %v485_v32 = vadd.f32 %v471_v51, %v371_v39 }
  0xf6   : > { %v1609_v53 = vpop.f32.mrf.mxu0  ;;  %v1634_v54 = vpop.f32.mrf.mxu1 }
  0xf7   : > { %v590_v40 = vadd.f32 %v576_v52, %v485_v32 }
  0xf9   : > { %v476_v55 = vpop.f32.mrf.mxu0 }
  0xfa   : > { %v486_v33 = vadd.f32 %v476_v55, %v376_v44  ;;  %v1160_v44 = vadd.s32 5, %v1126_v31 }
  0xfb   : > { %v1612_v56 = vpop.f32.mrf.mxu0 }
  0xfd   : > { %v581_v57 = vpop.f32.mrf.mxu1 }
  0xfe   : > { %v591_v41 = vadd.f32 %v581_v57, %v486_v33 }
  0xff   : > { %v481_v58 = vpop.f32.mrf.mxu0  ;;  %v1637_v59 = vpop.f32.mrf.mxu1 }
 0x100   : > { %v487_v42 = vadd.f32 %v481_v58, %v381_v37  ;;  %v1163_v58 = vsel %vm2304_vm6, %v1160_v44, %v1126_v31  ;;  %v1164_v59 = vsel %vm2308_vm7, %v1161_v47, %v1137_v35 }
 0x101   : > { %v1615_v60 = vpop.f32.mrf.mxu0  ;;  %vm1166_vm11 = vcmp.lt.s32.totalorder %v1163_v58, 4  ;;  %vm1167_vm12 = vcmp.lt.s32.totalorder %v1164_v59, 4 }
 0x102   : > { %v1162_v60 = vadd.s32 5, %v1148_v45 }
 0x103   : > { %v586_v61 = vpop.f32.mrf.mxu1 }
 0x104   : > { %v592_v48 = vadd.f32 %v586_v61, %v487_v42 }
 0x105   : > { %v1640_v62 = vpop.f32.mrf.mxu1 }
 0x10a   : > { %v681_v63 = vpop.f32.mrf.mxu0  ;;  %v785_v0 = vpop.f32.mrf.mxu1 }
 0x10b   : > { %v695_v46 = vadd.f32 %v681_v63, %v590_v40 }
 0x10c   : > { %v1659_v3 = vpop.f32.mrf.mxu0  ;;  %v1684_v4 = vpop.f32.mrf.mxu1 }
 0x10d   : > { %v799_v54 = vadd.f32 %v785_v0, %v695_v46  ;;  %v1165_v3 = vsel %vm1159_vm10, %v1162_v60, %v1148_v45 }
 0x10e   : > { %vm1168_vm13 = vcmp.lt.s32.totalorder %v1165_v3, 4 }
 0x10f   : > { %v686_v6 = vpop.f32.mrf.mxu0 }
 0x110   : > { %v696_v49 = vadd.f32 %v686_v6, %v591_v41 }
 0x111   : > { %v1662_v7 = vpop.f32.mrf.mxu0 }
 0x112   : > { %v2317_v7 = vsel %vm1166_vm11, 1.0, %v1841_v2 }
 0x113   : > { %v790_v9 = vpop.f32.mrf.mxu1 }
 0x114   : > { %v800_v55 = vadd.f32 %v790_v9, %v696_v49  ;;  %v1437_v9 = vsel %vm1167_vm12, 1.0, %v1841_v2 }
 0x115   : > { %v691_v12 = vpop.f32.mrf.mxu0  ;;  %v1687_v13 = vpop.f32.mrf.mxu1 }
 0x116   : > { %v697_v56 = vadd.f32 %v691_v12, %v592_v48 }
 0x117   : > { %v1665_v17 = vpop.f32.mrf.mxu0 }
 0x119   : > { %v795_v18 = vpop.f32.mrf.mxu1 }
 0x11a   : > { %v801_v1 = vadd.f32 %v795_v18, %v697_v56  ;;  %v1438_v18 = vsel %vm1168_vm13, 1.0, %v1841_v2 }
 0x11b   : > { %v1690_v21 = vpop.f32.mrf.mxu1 }
 0x120   : > { %v889_v24 = vpop.f32.mrf.mxu0  ;;  %v993_v25 = vpop.f32.mrf.mxu1 }
 0x121   : > { %v903_v62 = vadd.f32 %v889_v24, %v799_v54 }
 0x122   : > { %v1709_v27 = vpop.f32.mrf.mxu0  ;;  %v1734_v28 = vpop.f32.mrf.mxu1 }
 0x123   : > { %v1007_v4 = vadd.f32 %v993_v25, %v903_v62 }
 0x125   : > { %v894_v34 = vpop.f32.mrf.mxu0 }
 0x126   : > { %v904_v61 = vadd.f32 %v894_v34, %v800_v55 }
 0x127   : > { %v1712_v38 = vpop.f32.mrf.mxu0 }
 0x129   : > { %v998_v43 = vpop.f32.mrf.mxu1 }
 0x12a   : > { %v1008_v0 = vadd.f32 %v998_v43, %v904_v61 }
 0x12b   : > { %v899_v50 = vpop.f32.mrf.mxu0  ;;  %v1737_v53 = vpop.f32.mrf.mxu1 }
 0x12c   : > { %v905_v5 = vadd.f32 %v899_v50, %v801_v1 }
 0x12d   : > { %v1715_v51 = vpop.f32.mrf.mxu0 }
 0x12f   : > { %v1003_v57 = vpop.f32.mrf.mxu1 }
 0x130   : > { %v1009_v14 = vadd.f32 %v1003_v57, %v905_v5 }
 0x131   : > { %v1740_v63 = vpop.f32.mrf.mxu1 }
 0x136   : > { %v1097_v6 = vpop.f32.mrf.mxu0  ;;  %v1102_v8 = vpop.f32.mrf.mxu1 }
 0x137   : > { %v1111_v10 = vadd.f32 %v1097_v6, %v1007_v4  ;;  %v1112_v11 = vadd.f32 %v1102_v8, %v1008_v0 }
 0x138   : > { %v1762_v12 = vpop.f32.mrf.mxu1  ;;  %v1759_v13 = vpop.f32.mrf.mxu0 }
 0x139   : > { %v1175_v15 = vmul.f32 %v2317_v7, %v1111_v10  ;;  %v1176_v16 = vmul.f32 %v1437_v9, %v1112_v11 }
 0x13a   : > { %v1107_v17 = vpop.f32.mrf.mxu1 }
 0x13b   : > { %v1188_v19 = vmul.f32 %v1175_v15, %v1175_v15  ;;  %v1178_v20 = vadd.f32 %v1176_v16, %v1175_v15  ;;  %v1189_v21 = vmul.f32 %v1176_v16, %v1176_v16  ;;  %v1113_v22 = vadd.f32 %v1107_v17, %v1009_v14 }
 0x13c   : > { %v1765_v23 = vpop.f32.mrf.mxu1 }
 0x13d   : > { %v1191_v24 = vadd.f32 %v1189_v21, %v1188_v19  ;;  %v1177_v25 = vmul.f32 %v1438_v18, %v1113_v22 }
 0x13f   : > { %v1180_v26 = vsel %vm1179_vm14, %v1177_v25, 0.0  ;;  %v1190_v27 = vmul.f32 %v1177_v25, %v1177_v25 }
 0x140   : > { %v1181_v28 = vadd.f32 %v1180_v26, %v1178_v20 }
 0x141   : > { %v1192_v29 = vsel %vm1179_vm14, %v1190_v27, 0.0 }
 0x142   : > { %v1182_v30 = vrot.slane %v1181_v28, 4  ;;  %v1193_v31 = vadd.f32 %v1192_v29, %v1191_v24 }
 0x144   : > { %v1183_v32 = vadd.f32 %v1182_v30, %v1181_v28  ;;  %v1194_v33 = vrot.slane %v1193_v31, 4 }
 0x146   : > { %v1184_v34 = vrot.slane %v1183_v32, 2  ;;  %v1195_v35 = vadd.f32 %v1194_v33, %v1193_v31 }
 0x148   : > { %v1185_v36 = vadd.f32 %v1184_v34, %v1183_v32  ;;  %v1196_v2 = vrot.slane %v1195_v35, 2 }
 0x14a   : > { %v1186_v37 = vrot.slane %v1185_v36, 1  ;;  %v1197_v38 = vadd.f32 %v1196_v2, %v1195_v35 }
 0x14c   : > { %v1187_v40 = vadd.f32 %v1186_v37, %v1185_v36  ;;  %v1198_v41 = vrot.slane %v1197_v38, 1 }
 0x14e   : > { %v1199_v42 = vadd.f32 %v1198_v41, %v1197_v38  ;;  %v1200_v43 = vmul.f32 0.0625, %v1187_v40 }
 0x150   : > { %v1201_v45 = vmul.f32 0.0625, %v1199_v42  ;;  %v1202_v46 = vmul.f32 %v1200_v43, %v1200_v43  ;;  %v1205_v49 = vsub.f32 %v1111_v10, %v1200_v43  ;;  %v1206_v50 = vsub.f32 %v1112_v11, %v1200_v43 }
 0x151   : > { %v1207_v47 = vsub.f32 %v1113_v22, %v1200_v43 }
 0x152   : > { %v1203_v53 = vsub.f32 %v1201_v45, %v1202_v46 }
 0x154   : > { %v1204_v39 = vmax.f32 %v1203_v53, 0.0 }
 0x156   : > { %v1208_v44 = vadd.f32 1e-05, %v1204_v39 }
 0x158   : > { %1815 = vrsqrt.f32 %v1208_v44 }
 0x165   : > { %v1816_v48 = vpop.eup %1815 }
 0x166   : > { %v1210_v51 = vmul.f32 %v1816_v48, %v1205_v49  ;;  %v1211_v52 = vmul.f32 %v1816_v48, %v1206_v50  ;;  %v1212_v54 = vmul.f32 %v1816_v48, %v1207_v47 }
 0x168   : > { %vm1213_vm15 = vcmp.ge.f32.partialorder %v1210_v51, 0.0  ;;  %vm1214_vm0 = vcmp.ge.f32.partialorder %v1211_v52, 0.0  ;;  %vm1215_vm1 = vcmp.ge.f32.partialorder %v1212_v54, 0.0  ;;  %v1216_v55 = vmul.f32 0.2, %v1210_v51 }
 0x169   : > { %v1217_v56 = vmul.f32 0.2, %v1211_v52  ;;  %v1218_v57 = vmul.f32 0.2, %v1212_v54 }
 0x16a   : > { %v1219_v58 = vsel %vm1213_vm15, %v1210_v51, %v1216_v55 }
 0x16b   : > { %v1220_v59 = vsel %vm1214_vm0, %v1211_v52, %v1217_v56  ;;  %v1221_v60 = vsel %vm1215_vm1, %v1212_v54, %v1218_v57  ;;  %v1222_v62 = vmul.f32 %v2317_v7, %v1219_v58 }
 0x16c   : > { %v1223_v61 = vmul.f32 %v1437_v9, %v1220_v59  ;;  %v1224_v63 = vmul.f32 %v1438_v18, %v1221_v60 }
 0x16d   : > { %1225 = vst [vmem:[%s180_s24] sm:$0xff] %v1222_v62 }
 0x16e   : > { %1226 = vst [vmem:[%s180_s24 + $0x8] sm:$0xff] %v1223_v61  ;;  %1227 = vst [vmem:[%s180_s24 + $0x10] sm:$0xf] %v1224_v63 }
 0x16f PF: > { %s12_s11 = sadd.s32 1, %s1839_s11   ;;  %s2343_s9 = smov %s1835_s10 }
 0x170   : > { %p9_p5 = scmp.ge.s32.totalorder %s12_s11, 4   ;;  %s2344_s10 = smov %s2346_s12 }
 0x172   :  { %11 = sbr.rel (!%p9_p5) target bundleno = 2 (0x2), region = 72 }

// kernel: discriminator_forward.7
= control target key start
LH: loop header
LB: loop body
LE: loop exit
PB: predicated region body
PF: predicated region fallthrough
CT: control target
= control target key end

     0   :  { %s1677_s9 = smov 0   ;;  %s1679_s10 = smov 0   ;;  %s2617_s0 = inlined_call_operand.vmem [shape: f32[2,4,16,128], index: 0, kind: input, shape index: {}]   ;;  %s2618_s1 = inlined_call_operand.vmem [shape: f32[9,128,256], index: 1, kind: input, shape index: {}]   ;;  %s2619_s2 = inlined_call_operand.vmem [shape: f32[2,20,256], index: 2, kind: output, shape index: {}]  }
   0x1   :  { %s1681_s11 = smov 0  }
   0x2 LB: > { %s24_s12 = sadd.s32 1, %s1655_s10  ;;  %p1338_p0 = scmp.ge.s32.totalorder %s1659_s11, 1  ;;  %s1659_s11 = sphi %s1681_s11, %s12_s11   ;;  %s1655_s10 = sphi %s1679_s10, %s2621_s10   ;;  %s1651_s9 = sphi %s1677_s9, %s2620_s9  }
   0x3   : > { %p26_p1 = scmp.ge.s32.totalorder %s24_s12, 2  ;;  %p137_p2 = scmp.lt.s32.totalorder %s1659_s11, 3 }
   0x5   : > { %s2623_s12 = smov (%p26_p1, %s24_s12), 0  ;;  %p138_p3 = pnand %p1338_p0, %p137_p2 }
   0x6   : > { %p168_p4 = scmp.lt.s32.totalorder (!%p138_p3), %s1651_s9, 1 }
   0x7   : > { %141 = sbr.rel (%p138_p3) target bundleno = 425 (0x1a9), region = 28 }
   0xc   : > { %v1374_v0 = vld [vmem:[%s2618_s1 + $0x1f8] sm:$0xff]  ;;  %v1373_v2 = vld [vmem:[%s2618_s1 + $0x1f0] sm:$0xff]  ;;  %v1372_v4 = vld [vmem:[%s2618_s1 + $0x1e8] sm:$0xff]  ;;  %s2625_s9 = smov (!%p168_p4, %s1651_s9), 1  ;;  %v1661_v20 = vmov 0.0  }
   0xd   : > { %v221_v1 = vld [vmem:[%s2618_s1 + $0xf8] sm:$0xff]  ;;  %257 = vmatprep.subr.mxu0 %v1374_v0  ;;  %v220_v3 = vld [vmem:[%s2618_s1 + $0xf0] sm:$0xff]  ;;  %v219_v5 = vld [vmem:[%s2618_s1 + $0xe8] sm:$0xff]  ;;  %s1607_s17 = smul.u32 48, %s2625_s9  ;;  %s1606_s8 = sshll.u32 %s2625_s9, 6  ;;  %321 = vmatprep.mubr.f32.mxu0 %v1661_v20 }
   0xe   : > { %328 = vmatprep.subr.mxu1 %v221_v1  ;;  %258 = vmatpush1.msra.mxu0 %v1373_v2  ;;  %v1371_v6 = vld [vmem:[%s2618_s1 + $0x1e0] sm:$0xff]  ;;  %v1370_v8 = vld [vmem:[%s2618_s1 + $0x1d8] sm:$0xff]  ;;  %v1369_v10 = vld [vmem:[%s2618_s1 + $0x1d0] sm:$0xff]  ;;  %s1905_s26 = scalar_lea.vmem %s2617_s0, %s1606_s8 }
   0xf   : > { %329 = vmatpush1.msra.mxu1 %v220_v3  ;;  %v218_v7 = vld [vmem:[%s2618_s1 + $0xe0] sm:$0xff]  ;;  %259 = vmatprep.subr.mxu0 %v1372_v4  ;;  %v217_v9 = vld [vmem:[%s2618_s1 + $0xd8] sm:$0xff]  ;;  %v216_v11 = vld [vmem:[%s2618_s1 + $0xd0] sm:$0xff]  ;;  %s1755_s28 = scalar_lea.vmem %s2619_s2, %s1607_s17 }
  0x10   : > { %330 = vmatprep.subr.mxu1 %v219_v5  ;;  %260 = vmatpush1.msra.mxu0 %v1371_v6  ;;  %v1368_v12 = vld [vmem:[%s2618_s1 + $0x1c8] sm:$0xff]  ;;  %v1367_v14 = vld [vmem:[%s2618_s1 + $0x1c0] sm:$0xff]  ;;  %v1366_v16 = vld [vmem:[%s2618_s1 + $0x1b8] sm:$0xff]  ;;  %1221 = vst [vmem:[%s1755_s28] sm:$0x1f] %v1661_v20 }
  0x11   : > { %331 = vmatpush1.msra.mxu1 %v218_v7  ;;  %v215_v13 = vld [vmem:[%s2618_s1 + $0xc8] sm:$0xff]  ;;  %261 = vmatprep.subr.mxu0 %v1370_v8  ;;  %v214_v15 = vld [vmem:[%s2618_s1 + $0xc0] sm:$0xff]  ;;  %v213_v17 = vld [vmem:[%s2618_s1 + $0xb8] sm:$0xff]  ;;  %1222 = vst [vmem:[%s1755_s28 + $0x8] sm:$0x1f] %v1661_v20 }
  0x12   : > { %332 = vmatprep.subr.mxu1 %v217_v9  ;;  %262 = vmatpush1.msra.mxu0 %v1369_v10  ;;  %v1365_v18 = vld [vmem:[%s2618_s1 + $0x1b0] sm:$0xff]  ;;  %1233 = vst [vmem:[%s1755_s28 + $0x10] sm:$0xe0] %v1661_v20  ;;  %1234 = vst [vmem:[%s1755_s28 + $0x18] sm:$0xe0] %v1661_v20  ;;  %v1364_v21 = vld [vmem:[%s2618_s1 + $0x1a8] sm:$0xff] }
  0x13   : > { %333 = vmatpush1.msra.mxu1 %v216_v11  ;;  %263 = vmatprep.subr.mxu0 %v1368_v12  ;;  %v212_v19 = vld [vmem:[%s2618_s1 + $0xb0] sm:$0xff]  ;;  %1235 = vst [vmem:[%s1755_s28 + $0x20] sm:$0xf] %v1661_v20  ;;  %1236 = vst [vmem:[%s1755_s28 + $0x28] sm:$0xf] %v1661_v20  ;;  %v211_v22 = vld [vmem:[%s2618_s1 + $0xa8] sm:$0xff] }
  0x14   : > { %334 = vmatprep.subr.mxu1 %v215_v13  ;;  %264 = vmatpush1.msra.mxu0 %v1367_v14  ;;  %v1363_v23 = vld [vmem:[%s2618_s1 + $0x1a0] sm:$0xff]  ;;  %v1362_v25 = vld [vmem:[%s2618_s1 + $0x198] sm:$0xff]  ;;  %v1361_v27 = vld [vmem:[%s2618_s1 + $0x190] sm:$0xff] }
  0x15   : > { %335 = vmatpush1.msra.mxu1 %v214_v15  ;;  %265 = vmatprep.subr.mxu0 %v1366_v16  ;;  %v210_v24 = vld [vmem:[%s2618_s1 + $0xa0] sm:$0xff]  ;;  %v209_v26 = vld [vmem:[%s2618_s1 + $0x98] sm:$0xff]  ;;  %v208_v28 = vld [vmem:[%s2618_s1 + $0x90] sm:$0xff] }
  0x16   : > { %336 = vmatprep.subr.mxu1 %v213_v17  ;;  %266 = vmatpush1.msra.mxu0 %v1365_v18  ;;  %v1360_v29 = vld [vmem:[%s2618_s1 + $0x188] sm:$0xff]  ;;  %v1359_v31 = vld [vmem:[%s2618_s1 + $0x180] sm:$0xff]  ;;  %v1358_v33 = vld [vmem:[%s2618_s1 + $0x178] sm:$0xff] }
  0x17   : > { %337 = vmatpush1.msra.mxu1 %v212_v19  ;;  %267 = vmatprep.subr.mxu0 %v1364_v21  ;;  %v207_v30 = vld [vmem:[%s2618_s1 + $0x88] sm:$0xff]  ;;  %v206_v32 = vld [vmem:[%s2618_s1 + $0x80] sm:$0xff]  ;;  %v205_v34 = vld [vmem:[%s2618_s1 + $0x78] sm:$0xff] }
  0x18   : > { %338 = vmatprep.subr.mxu1 %v211_v22  ;;  %268 = vmatpush1.msra.mxu0 %v1363_v23  ;;  %v1357_v35 = vld [vmem:[%s2618_s1 + $0x170] sm:$0xff]  ;;  %v1356_v37 = vld [vmem:[%s2618_s1 + $0x168] sm:$0xff]  ;;  %v1355_v39 = vld [vmem:[%s2618_s1 + $0x160] sm:$0xff] }
  0x19   : > { %339 = vmatpush1.msra.mxu1 %v210_v24  ;;  %269 = vmatprep.subr.mxu0 %v1362_v25  ;;  %v204_v36 = vld [vmem:[%s2618_s1 + $0x70] sm:$0xff]  ;;  %v203_v38 = vld [vmem:[%s2618_s1 + $0x68] sm:$0xff]  ;;  %v202_v40 = vld [vmem:[%s2618_s1 + $0x60] sm:$0xff] }
  0x1a   : > { %340 = vmatprep.subr.mxu1 %v209_v26  ;;  %270 = vmatpush1.msra.mxu0 %v1361_v27  ;;  %v1354_v41 = vld [vmem:[%s2618_s1 + $0x158] sm:$0xff]  ;;  %v1353_v43 = vld [vmem:[%s2618_s1 + $0x150] sm:$0xff]  ;;  %v1352_v45 = vld [vmem:[%s2618_s1 + $0x148] sm:$0xff] }
  0x1b   : > { %341 = vmatpush1.msra.mxu1 %v208_v28  ;;  %271 = vmatprep.subr.mxu0 %v1360_v29  ;;  %v201_v42 = vld [vmem:[%s2618_s1 + $0x58] sm:$0xff]  ;;  %v200_v44 = vld [vmem:[%s2618_s1 + $0x50] sm:$0xff]  ;;  %v199_v46 = vld [vmem:[%s2618_s1 + $0x48] sm:$0xff] }
  0x1c   : > { %342 = vmatprep.subr.mxu1 %v207_v30  ;;  %272 = vmatpush1.msra.mxu0 %v1359_v31  ;;  %v1351_v47 = vld [vmem:[%s2618_s1 + $0x140] sm:$0xff]  ;;  %v1350_v49 = vld [vmem:[%s2618_s1 + $0x138] sm:$0xff]  ;;  %v1349_v51 = vld [vmem:[%s2618_s1 + $0x130] sm:$0xff] }
  0x1d   : > { %343 = vmatpush1.msra.mxu1 %v206_v32  ;;  %273 = vmatprep.subr.mxu0 %v1358_v33  ;;  %v198_v48 = vld [vmem:[%s2618_s1 + $0x40] sm:$0xff]  ;;  %v197_v50 = vld [vmem:[%s2618_s1 + $0x38] sm:$0xff]  ;;  %v196_v52 = vld [vmem:[%s2618_s1 + $0x30] sm:$0xff] }
  0x1e   : > { %344 = vmatprep.subr.mxu1 %v205_v34  ;;  %274 = vmatpush1.msra.mxu0 %v1357_v35  ;;  %v1348_v53 = vld [vmem:[%s2618_s1 + $0x128] sm:$0xff]  ;;  %v1347_v55 = vld [vmem:[%s2618_s1 + $0x120] sm:$0xff]  ;;  %v1346_v57 = vld [vmem:[%s2618_s1 + $0x118] sm:$0xff] }
  0x1f   : > { %345 = vmatpush1.msra.mxu1 %v204_v36  ;;  %275 = vmatprep.subr.mxu0 %v1356_v37  ;;  %v195_v54 = vld [vmem:[%s2618_s1 + $0x28] sm:$0xff]  ;;  %v194_v56 = vld [vmem:[%s2618_s1 + $0x20] sm:$0xff]  ;;  %v193_v58 = vld [vmem:[%s2618_s1 + $0x18] sm:$0xff] }
  0x20   : > { %346 = vmatprep.subr.mxu1 %v203_v38  ;;  %276 = vmatpush1.msra.mxu0 %v1355_v39  ;;  %v1345_v59 = vld [vmem:[%s2618_s1 + $0x110] sm:$0xff]  ;;  %v1344_v61 = vld [vmem:[%s2618_s1 + $0x108] sm:$0xff]  ;;  %v1343_v63 = vld [vmem:[%s2618_s1 + $0x100] sm:$0xff] }
  0x21   : > { %347 = vmatpush1.msra.mxu1 %v202_v40  ;;  %277 = vmatprep.subr.mxu0 %v1354_v41  ;;  %v192_v60 = vld [vmem:[%s2618_s1 + $0x10] sm:$0xff]  ;;  %v191_v62 = vld [vmem:[%s2618_s1 + $0x8] sm:$0xff]  ;;  %v190_v0 = vld [vmem:[%s2618_s1] sm:$0xff] }
  0x22   : > { %348 = vmatprep.subr.mxu1 %v201_v42  ;;  %278 = vmatpush1.msra.mxu0 %v1353_v43  ;;  %v1342_v1 = vld [vmem:[%s1905_s26 + $0x10] sm:$0xff]  ;;  %v189_v2 = vld [vmem:[%s1905_s26] sm:$0xff]  ;;  %v1406_v3 = vld [vmem:[%s2618_s1 + $0x2f8] sm:$0xff] }
  0x23   : > { %349 = vmatpush1.msra.mxu1 %v200_v44  ;;  %279 = vmatprep.subr.mxu0 %v1352_v45  ;;  %v1439_v4 = vld [vmem:[%s2618_s1 + $0x3f8] sm:$0xff]  ;;  %v1405_v5 = vld [vmem:[%s2618_s1 + $0x2f0] sm:$0xff]  ;;  %v1404_v7 = vld [vmem:[%s2618_s1 + $0x2e8] sm:$0xff] }
  0x24   : > { %350 = vmatprep.subr.mxu1 %v199_v46  ;;  %280 = vmatpush1.msra.mxu0 %v1351_v47  ;;  %v1438_v6 = vld [vmem:[%s2618_s1 + $0x3f0] sm:$0xff]  ;;  %v1437_v8 = vld [vmem:[%s2618_s1 + $0x3e8] sm:$0xff]  ;;  %v1403_v9 = vld [vmem:[%s2618_s1 + $0x2e0] sm:$0xff] }
  0x25   : > { %351 = vmatpush1.msra.mxu1 %v198_v48  ;;  %281 = vmatprep.subr.mxu0 %v1350_v49  ;;  %v1436_v10 = vld [vmem:[%s2618_s1 + $0x3e0] sm:$0xff]  ;;  %v1402_v11 = vld [vmem:[%s2618_s1 + $0x2d8] sm:$0xff]  ;;  %v1401_v13 = vld [vmem:[%s2618_s1 + $0x2d0] sm:$0xff] }
  0x26   : > { %352 = vmatprep.subr.mxu1 %v197_v50  ;;  %282 = vmatpush1.msra.mxu0 %v1349_v51  ;;  %v1435_v12 = vld [vmem:[%s2618_s1 + $0x3d8] sm:$0xff]  ;;  %v1434_v14 = vld [vmem:[%s2618_s1 + $0x3d0] sm:$0xff]  ;;  %v1400_v15 = vld [vmem:[%s2618_s1 + $0x2c8] sm:$0xff] }
  0x27   : > { %353 = vmatpush1.msra.mxu1 %v196_v52  ;;  %283 = vmatprep.subr.mxu0 %v1348_v53  ;;  %v1433_v16 = vld [vmem:[%s2618_s1 + $0x3c8] sm:$0xff]  ;;  %v1399_v17 = vld [vmem:[%s2618_s1 + $0x2c0] sm:$0xff]  ;;  %v1398_v19 = vld [vmem:[%s2618_s1 + $0x2b8] sm:$0xff] }
  0x28   : > { %354 = vmatprep.subr.mxu1 %v195_v54  ;;  %284 = vmatpush1.msra.mxu0 %v1347_v55  ;;  %v1432_v18 = vld [vmem:[%s2618_s1 + $0x3c0] sm:$0xff]  ;;  %v1431_v21 = vld [vmem:[%s2618_s1 + $0x3b8] sm:$0xff]  ;;  %v1397_v22 = vld [vmem:[%s2618_s1 + $0x2b0] sm:$0xff] }
  0x29   : > { %355 = vmatpush1.msra.mxu1 %v194_v56  ;;  %285 = vmatprep.subr.mxu0 %v1346_v57  ;;  %v1430_v23 = vld [vmem:[%s2618_s1 + $0x3b0] sm:$0xff]  ;;  %v1396_v24 = vld [vmem:[%s2618_s1 + $0x2a8] sm:$0xff]  ;;  %v1395_v26 = vld [vmem:[%s2618_s1 + $0x2a0] sm:$0xff] }
  0x2a   : > { %356 = vmatprep.subr.mxu1 %v193_v58  ;;  %286 = vmatpush1.msra.mxu0 %v1345_v59  ;;  %v1429_v25 = vld [vmem:[%s2618_s1 + $0x3a8] sm:$0xff]  ;;  %v1428_v27 = vld [vmem:[%s2618_s1 + $0x3a0] sm:$0xff]  ;;  %v1394_v28 = vld [vmem:[%s2618_s1 + $0x298] sm:$0xff] }
  0x2b   : > { %357 = vmatpush1.msra.mxu1 %v192_v60  ;;  %287 = vmatprep.subr.mxu0 %v1344_v61  ;;  %v1427_v29 = vld [vmem:[%s2618_s1 + $0x398] sm:$0xff]  ;;  %v1393_v30 = vld [vmem:[%s2618_s1 + $0x290] sm:$0xff]  ;;  %v1392_v32 = vld [vmem:[%s2618_s1 + $0x288] sm:$0xff] }
  0x2c   : > { %358 = vmatprep.subr.mxu1 %v191_v62  ;;  %288 = vmatpush1.msra.mxu0 %v1343_v63  ;;  %v1426_v31 = vld [vmem:[%s2618_s1 + $0x390] sm:$0xff]  ;;  %v1425_v33 = vld [vmem:[%s2618_s1 + $0x388] sm:$0xff]  ;;  %v1391_v34 = vld [vmem:[%s2618_s1 + $0x280] sm:$0xff] }
  0x2d   : > { %359 = vmatpush1.msra.mxu1 %v190_v0  ;;  %392 = vmatprep.mubr.f32.mxu1 %v1661_v20  ;;  %v1424_v35 = vld [vmem:[%s2618_s1 + $0x380] sm:$0xff]  ;;  %v1390_v36 = vld [vmem:[%s2618_s1 + $0x278] sm:$0xff]  ;;  %v1389_v38 = vld [vmem:[%s2618_s1 + $0x270] sm:$0xff] }
  0x2e   : > { %322 = vmatmul.mubr.f32.vlgmr.msra.gmra.mxu0 %v1342_v1  ;;  %393 = vmatmul.mubr.f32.vlgmr.msra.gmra.mxu1 %v189_v2  ;;  %v1423_v37 = vld [vmem:[%s2618_s1 + $0x378] sm:$0xff]  ;;  %v1422_v39 = vld [vmem:[%s2618_s1 + $0x370] sm:$0xff]  ;;  %v1388_v40 = vld [vmem:[%s2618_s1 + $0x268] sm:$0xff] }
  0x2f   : > { %433 = vmatprep.subr.mxu0 %v1406_v3  ;;  %541 = vmatprep.subr.mxu1 %v1439_v4  ;;  %v1421_v41 = vld [vmem:[%s2618_s1 + $0x368] sm:$0xff]  ;;  %v1387_v42 = vld [vmem:[%s2618_s1 + $0x260] sm:$0xff]  ;;  %v1386_v44 = vld [vmem:[%s2618_s1 + $0x258] sm:$0xff] }
  0x30   : > { %434 = vmatpush1.msra.mxu0 %v1405_v5  ;;  %542 = vmatpush1.msra.mxu1 %v1438_v6  ;;  %v1420_v43 = vld [vmem:[%s2618_s1 + $0x360] sm:$0xff]  ;;  %v1419_v45 = vld [vmem:[%s2618_s1 + $0x358] sm:$0xff]  ;;  %v1385_v46 = vld [vmem:[%s2618_s1 + $0x250] sm:$0xff] }
  0x31   : > { %435 = vmatprep.subr.mxu0 %v1404_v7  ;;  %543 = vmatprep.subr.mxu1 %v1437_v8  ;;  %v1418_v47 = vld [vmem:[%s2618_s1 + $0x350] sm:$0xff]  ;;  %v1384_v48 = vld [vmem:[%s2618_s1 + $0x248] sm:$0xff]  ;;  %v1383_v50 = vld [vmem:[%s2618_s1 + $0x240] sm:$0xff] }
  0x32   : > { %436 = vmatpush1.msra.mxu0 %v1403_v9  ;;  %544 = vmatpush1.msra.mxu1 %v1436_v10  ;;  %v1417_v49 = vld [vmem:[%s2618_s1 + $0x348] sm:$0xff]  ;;  %v1416_v51 = vld [vmem:[%s2618_s1 + $0x340] sm:$0xff]  ;;  %v1382_v52 = vld [vmem:[%s2618_s1 + $0x238] sm:$0xff] }
  0x33   : > { %437 = vmatprep.subr.mxu0 %v1402_v11  ;;  %545 = vmatprep.subr.mxu1 %v1435_v12  ;;  %v1415_v53 = vld [vmem:[%s2618_s1 + $0x338] sm:$0xff]  ;;  %v1381_v54 = vld [vmem:[%s2618_s1 + $0x230] sm:$0xff]  ;;  %v1380_v56 = vld [vmem:[%s2618_s1 + $0x228] sm:$0xff] }
  0x34   : > { %438 = vmatpush1.msra.mxu0 %v1401_v13  ;;  %546 = vmatpush1.msra.mxu1 %v1434_v14  ;;  %v1414_v55 = vld [vmem:[%s2618_s1 + $0x330] sm:$0xff]  ;;  %v1413_v57 = vld [vmem:[%s2618_s1 + $0x328] sm:$0xff]  ;;  %v1379_v58 = vld [vmem:[%s2618_s1 + $0x220] sm:$0xff] }
  0x35   : > { %439 = vmatprep.subr.mxu0 %v1400_v15  ;;  %547 = vmatprep.subr.mxu1 %v1433_v16  ;;  %v1412_v59 = vld [vmem:[%s2618_s1 + $0x320] sm:$0xff]  ;;  %v1378_v60 = vld [vmem:[%s2618_s1 + $0x218] sm:$0xff]  ;;  %v1377_v62 = vld [vmem:[%s2618_s1 + $0x210] sm:$0xff] }
  0x36   : > { %440 = vmatpush1.msra.mxu0 %v1399_v17  ;;  %548 = vmatpush1.msra.mxu1 %v1432_v18  ;;  %v1411_v61 = vld [vmem:[%s2618_s1 + $0x318] sm:$0xff]  ;;  %v1376_v63 = vld [vmem:[%s2618_s1 + $0x208] sm:$0xff]  ;;  %v1410_v0 = vld [vmem:[%s2618_s1 + $0x310] sm:$0xff] }
  0x37   : > { %441 = vmatprep.subr.mxu0 %v1398_v19  ;;  %549 = vmatprep.subr.mxu1 %v1431_v21  ;;  %v1375_v1 = vld [vmem:[%s2618_s1 + $0x200] sm:$0xff]  ;;  %v1409_v2 = vld [vmem:[%s2618_s1 + $0x308] sm:$0xff]  ;;  %v1472_v4 = vld [vmem:[%s2618_s1 + $0x4f8] sm:$0xff] }
  0x38   : > { %442 = vmatpush1.msra.mxu0 %v1397_v22  ;;  %550 = vmatpush1.msra.mxu1 %v1430_v23  ;;  %v399_v3 = vld [vmem:[%s1905_s26 + $0x1] sm:$0xff]  ;;  %v1471_v6 = vld [vmem:[%s2618_s1 + $0x4f0] sm:$0xff]  ;;  %v1505_v9 = vld [vmem:[%s2618_s1 + $0x5f8] sm:$0xff] }
  0x39   : > { %443 = vmatprep.subr.mxu0 %v1396_v24  ;;  %551 = vmatprep.subr.mxu1 %v1429_v25  ;;  %v1408_v5 = vld [vmem:[%s2618_s1 + $0x300] sm:$0xff]  ;;  %v1470_v8 = vld [vmem:[%s2618_s1 + $0x4e8] sm:$0xff]  ;;  %v1504_v11 = vld [vmem:[%s2618_s1 + $0x5f0] sm:$0xff] }
  0x3a   : > { %444 = vmatpush1.msra.mxu0 %v1395_v26  ;;  %552 = vmatpush1.msra.mxu1 %v1428_v27  ;;  %v1407_v7 = vld [vmem:[%s1905_s26 + $0x20] sm:$0xff]  ;;  %v1468_v12 = vld [vmem:[%s2618_s1 + $0x4d8] sm:$0xff]  ;;  %v1503_v13 = vld [vmem:[%s2618_s1 + $0x5e8] sm:$0xff] }
  0x3b   : > { %445 = vmatprep.subr.mxu0 %v1394_v28  ;;  %553 = vmatprep.subr.mxu1 %v1427_v29  ;;  %v1469_v10 = vld [vmem:[%s2618_s1 + $0x4e0] sm:$0xff]  ;;  %v1467_v14 = vld [vmem:[%s2618_s1 + $0x4d0] sm:$0xff]  ;;  %v1466_v16 = vld [vmem:[%s2618_s1 + $0x4c8] sm:$0xff] }
  0x3c   : > { %446 = vmatpush1.msra.mxu0 %v1393_v30  ;;  %554 = vmatpush1.msra.mxu1 %v1426_v31  ;;  %v1502_v15 = vld [vmem:[%s2618_s1 + $0x5e0] sm:$0xff]  ;;  %v1501_v17 = vld [vmem:[%s2618_s1 + $0x5d8] sm:$0xff]  ;;  %v1500_v19 = vld [vmem:[%s2618_s1 + $0x5d0] sm:$0xff] }
  0x3d   : > { %447 = vmatprep.subr.mxu0 %v1392_v32  ;;  %555 = vmatprep.subr.mxu1 %v1425_v33  ;;  %v1465_v18 = vld [vmem:[%s2618_s1 + $0x4c0] sm:$0xff]  ;;  %v1464_v21 = vld [vmem:[%s2618_s1 + $0x4b8] sm:$0xff]  ;;  %v1499_v22 = vld [vmem:[%s2618_s1 + $0x5c8] sm:$0xff] }
  0x3e   : > { %448 = vmatpush1.msra.mxu0 %v1391_v34  ;;  %556 = vmatpush1.msra.mxu1 %v1424_v35  ;;  %v1463_v23 = vld [vmem:[%s2618_s1 + $0x4b0] sm:$0xff]  ;;  %v1498_v24 = vld [vmem:[%s2618_s1 + $0x5c0] sm:$0xff]  ;;  %v1462_v25 = vld [vmem:[%s2618_s1 + $0x4a8] sm:$0xff] }
  0x3f   : > { %449 = vmatprep.subr.mxu0 %v1390_v36  ;;  %557 = vmatprep.subr.mxu1 %v1423_v37  ;;  %v1497_v26 = vld [vmem:[%s2618_s1 + $0x5b8] sm:$0xff]  ;;  %v1461_v27 = vld [vmem:[%s2618_s1 + $0x4a0] sm:$0xff]  ;;  %v1496_v28 = vld [vmem:[%s2618_s1 + $0x5b0] sm:$0xff] }
  0x40   : > { %450 = vmatpush1.msra.mxu0 %v1389_v38  ;;  %558 = vmatpush1.msra.mxu1 %v1422_v39  ;;  %v1460_v29 = vld [vmem:[%s2618_s1 + $0x498] sm:$0xff]  ;;  %v1495_v30 = vld [vmem:[%s2618_s1 + $0x5a8] sm:$0xff]  ;;  %v1459_v31 = vld [vmem:[%s2618_s1 + $0x490] sm:$0xff] }
  0x41   : > { %451 = vmatprep.subr.mxu0 %v1388_v40  ;;  %559 = vmatprep.subr.mxu1 %v1421_v41  ;;  %v1494_v32 = vld [vmem:[%s2618_s1 + $0x5a0] sm:$0xff]  ;;  %v1458_v33 = vld [vmem:[%s2618_s1 + $0x488] sm:$0xff]  ;;  %v1493_v34 = vld [vmem:[%s2618_s1 + $0x598] sm:$0xff] }
  0x42   : > { %452 = vmatpush1.msra.mxu0 %v1387_v42  ;;  %560 = vmatpush1.msra.mxu1 %v1420_v43  ;;  %v1457_v35 = vld [vmem:[%s2618_s1 + $0x480] sm:$0xff]  ;;  %v1492_v36 = vld [vmem:[%s2618_s1 + $0x590] sm:$0xff]  ;;  %v1456_v37 = vld [vmem:[%s2618_s1 + $0x478] sm:$0xff] }
  0x43   : > { %453 = vmatprep.subr.mxu0 %v1386_v44  ;;  %561 = vmatprep.subr.mxu1 %v1419_v45  ;;  %v1491_v38 = vld [vmem:[%s2618_s1 + $0x588] sm:$0xff]  ;;  %v1455_v39 = vld [vmem:[%s2618_s1 + $0x470] sm:$0xff]  ;;  %v1490_v40 = vld [vmem:[%s2618_s1 + $0x580] sm:$0xff] }
  0x44   : > { %454 = vmatpush1.msra.mxu0 %v1385_v46  ;;  %562 = vmatpush1.msra.mxu1 %v1418_v47  ;;  %v1454_v41 = vld [vmem:[%s2618_s1 + $0x468] sm:$0xff]  ;;  %v1489_v42 = vld [vmem:[%s2618_s1 + $0x578] sm:$0xff]  ;;  %v1453_v43 = vld [vmem:[%s2618_s1 + $0x460] sm:$0xff] }
  0x45   : > { %455 = vmatprep.subr.mxu0 %v1384_v48  ;;  %563 = vmatprep.subr.mxu1 %v1417_v49  ;;  %v1488_v44 = vld [vmem:[%s2618_s1 + $0x570] sm:$0xff]  ;;  %v1452_v45 = vld [vmem:[%s2618_s1 + $0x458] sm:$0xff]  ;;  %v1487_v46 = vld [vmem:[%s2618_s1 + $0x568] sm:$0xff] }
  0x46   : > { %456 = vmatpush1.msra.mxu0 %v1383_v50  ;;  %564 = vmatpush1.msra.mxu1 %v1416_v51  ;;  %v1451_v47 = vld [vmem:[%s2618_s1 + $0x450] sm:$0xff]  ;;  %v1486_v48 = vld [vmem:[%s2618_s1 + $0x560] sm:$0xff]  ;;  %v1450_v49 = vld [vmem:[%s2618_s1 + $0x448] sm:$0xff] }
  0x47   : > { %457 = vmatprep.subr.mxu0 %v1382_v52  ;;  %565 = vmatprep.subr.mxu1 %v1415_v53  ;;  %v1485_v50 = vld [vmem:[%s2618_s1 + $0x558] sm:$0xff]  ;;  %v1449_v51 = vld [vmem:[%s2618_s1 + $0x440] sm:$0xff]  ;;  %v1484_v52 = vld [vmem:[%s2618_s1 + $0x550] sm:$0xff] }
  0x48   : > { %458 = vmatpush1.msra.mxu0 %v1381_v54  ;;  %566 = vmatpush1.msra.mxu1 %v1414_v55  ;;  %v1448_v53 = vld [vmem:[%s2618_s1 + $0x438] sm:$0xff]  ;;  %v1483_v54 = vld [vmem:[%s2618_s1 + $0x548] sm:$0xff]  ;;  %v1447_v55 = vld [vmem:[%s2618_s1 + $0x430] sm:$0xff] }
  0x49   : > { %459 = vmatprep.subr.mxu0 %v1380_v56  ;;  %567 = vmatprep.subr.mxu1 %v1413_v57  ;;  %v1482_v56 = vld [vmem:[%s2618_s1 + $0x540] sm:$0xff]  ;;  %v1446_v57 = vld [vmem:[%s2618_s1 + $0x428] sm:$0xff] }
  0x4a   : > { %460 = vmatpush1.msra.mxu0 %v1379_v58  ;;  %568 = vmatpush1.msra.mxu1 %v1412_v59  ;;  %v1481_v58 = vld [vmem:[%s2618_s1 + $0x538] sm:$0xff]  ;;  %v1445_v59 = vld [vmem:[%s2618_s1 + $0x420] sm:$0xff] }
  0x4b   : > { %461 = vmatprep.subr.mxu0 %v1378_v60  ;;  %569 = vmatprep.subr.mxu1 %v1411_v61  ;;  %v1480_v60 = vld [vmem:[%s2618_s1 + $0x530] sm:$0xff]  ;;  %v1444_v61 = vld [vmem:[%s2618_s1 + $0x418] sm:$0xff] }
  0x4c   : > { %462 = vmatpush1.msra.mxu0 %v1377_v62  ;;  %497 = vmatprep.mubr.f32.mxu0 %v1661_v20  ;;  %v1479_v62 = vld [vmem:[%s2618_s1 + $0x528] sm:$0xff] }
  0x4d   : > { %463 = vmatprep.subr.mxu0 %v1376_v63  ;;  %570 = vmatpush1.msra.mxu1 %v1410_v0  ;;  %v1443_v63 = vld [vmem:[%s2618_s1 + $0x410] sm:$0xff]  ;;  %v1478_v0 = vld [vmem:[%s2618_s1 + $0x520] sm:$0xff] }
  0x4e   : > { %464 = vmatpush1.msra.mxu0 %v1375_v1  ;;  %571 = vmatprep.subr.mxu1 %v1409_v2  ;;  %v1442_v1 = vld [vmem:[%s2618_s1 + $0x408] sm:$0xff]  ;;  %v1477_v2 = vld [vmem:[%s2618_s1 + $0x518] sm:$0xff] }
  0x4f   : > { %498 = vmatmul.mubr.f32.vlgmr.msra.gmra.mxu0 %v399_v3  ;;  %649 = vmatprep.subr.mxu0 %v1472_v4  ;;  %v1441_v3 = vld [vmem:[%s2618_s1 + $0x400] sm:$0xff]  ;;  %v1476_v4 = vld [vmem:[%s2618_s1 + $0x510] sm:$0xff] }
  0x50   : > { %572 = vmatpush1.msra.mxu1 %v1408_v5  ;;  %605 = vmatprep.mubr.f32.mxu1 %v1661_v20  ;;  %v1440_v5 = vld [vmem:[%s1905_s26 + $0x30] sm:$0xff] }
  0x51   : > { %650 = vmatpush1.msra.mxu0 %v1471_v6  ;;  %606 = vmatmul.mubr.f32.vlgmr.msra.gmra.mxu1 %v1407_v7  ;;  %v1475_v6 = vld [vmem:[%s2618_s1 + $0x508] sm:$0xff]  ;;  %v1537_v7 = vld [vmem:[%s2618_s1 + $0x6f8] sm:$0xff] }
  0x52   : > { %651 = vmatprep.subr.mxu0 %v1470_v8  ;;  %756 = vmatprep.subr.mxu1 %v1505_v9  ;;  %v1474_v8 = vld [vmem:[%s2618_s1 + $0x500] sm:$0xff]  ;;  %v1536_v9 = vld [vmem:[%s2618_s1 + $0x6f0] sm:$0xff] }
  0x53   : > { %652 = vmatpush1.msra.mxu0 %v1469_v10  ;;  %757 = vmatpush1.msra.mxu1 %v1504_v11  ;;  %v1473_v10 = vld [vmem:[%s1905_s26 + $0x21] sm:$0xff] }
  0x54   : > { %653 = vmatprep.subr.mxu0 %v1468_v12  ;;  %758 = vmatprep.subr.mxu1 %v1503_v13  ;;  %v1535_v11 = vld [vmem:[%s2618_s1 + $0x6e8] sm:$0xff]  ;;  %v1570_v12 = vld [vmem:[%s2618_s1 + $0x7f8] sm:$0xff]  ;;  %v1534_v13 = vld [vmem:[%s2618_s1 + $0x6e0] sm:$0xff] }
  0x55   : > { %654 = vmatpush1.msra.mxu0 %v1467_v14  ;;  %759 = vmatpush1.msra.mxu1 %v1502_v15  ;;  %v1569_v14 = vld [vmem:[%s2618_s1 + $0x7f0] sm:$0xff]  ;;  %v1533_v15 = vld [vmem:[%s2618_s1 + $0x6d8] sm:$0xff] }
  0x56   : > { %655 = vmatprep.subr.mxu0 %v1466_v16  ;;  %760 = vmatprep.subr.mxu1 %v1501_v17  ;;  %v1568_v16 = vld [vmem:[%s2618_s1 + $0x7e8] sm:$0xff]  ;;  %v1532_v17 = vld [vmem:[%s2618_s1 + $0x6d0] sm:$0xff] }
  0x57   : > { %656 = vmatpush1.msra.mxu0 %v1465_v18  ;;  %761 = vmatpush1.msra.mxu1 %v1500_v19  ;;  %v1567_v18 = vld [vmem:[%s2618_s1 + $0x7e0] sm:$0xff]  ;;  %v1531_v19 = vld [vmem:[%s2618_s1 + $0x6c8] sm:$0xff] }
  0x58   : > { %657 = vmatprep.subr.mxu0 %v1464_v21  ;;  %762 = vmatprep.subr.mxu1 %v1499_v22  ;;  %v1566_v21 = vld [vmem:[%s2618_s1 + $0x7d8] sm:$0xff]  ;;  %v1530_v22 = vld [vmem:[%s2618_s1 + $0x6c0] sm:$0xff] }
  0x59   : > { %658 = vmatpush1.msra.mxu0 %v1463_v23  ;;  %763 = vmatpush1.msra.mxu1 %v1498_v24  ;;  %v1565_v23 = vld [vmem:[%s2618_s1 + $0x7d0] sm:$0xff]  ;;  %v1529_v24 = vld [vmem:[%s2618_s1 + $0x6b8] sm:$0xff] }
  0x5a   : > { %659 = vmatprep.subr.mxu0 %v1462_v25  ;;  %764 = vmatprep.subr.mxu1 %v1497_v26  ;;  %v1564_v25 = vld [vmem:[%s2618_s1 + $0x7c8] sm:$0xff]  ;;  %v1528_v26 = vld [vmem:[%s2618_s1 + $0x6b0] sm:$0xff] }
  0x5b   : > { %660 = vmatpush1.msra.mxu0 %v1461_v27  ;;  %765 = vmatpush1.msra.mxu1 %v1496_v28  ;;  %v1563_v27 = vld [vmem:[%s2618_s1 + $0x7c0] sm:$0xff]  ;;  %v1527_v28 = vld [vmem:[%s2618_s1 + $0x6a8] sm:$0xff] }
  0x5c   : > { %661 = vmatprep.subr.mxu0 %v1460_v29  ;;  %766 = vmatprep.subr.mxu1 %v1495_v30  ;;  %v1562_v29 = vld [vmem:[%s2618_s1 + $0x7b8] sm:$0xff]  ;;  %v1526_v30 = vld [vmem:[%s2618_s1 + $0x6a0] sm:$0xff] }
  0x5d   : > { %662 = vmatpush1.msra.mxu0 %v1459_v31  ;;  %767 = vmatpush1.msra.mxu1 %v1494_v32  ;;  %v1561_v31 = vld [vmem:[%s2618_s1 + $0x7b0] sm:$0xff]  ;;  %v1525_v32 = vld [vmem:[%s2618_s1 + $0x698] sm:$0xff] }
  0x5e   : > { %663 = vmatprep.subr.mxu0 %v1458_v33  ;;  %768 = vmatprep.subr.mxu1 %v1493_v34  ;;  %v1560_v33 = vld [vmem:[%s2618_s1 + $0x7a8] sm:$0xff]  ;;  %v1524_v34 = vld [vmem:[%s2618_s1 + $0x690] sm:$0xff] }
  0x5f   : > { %664 = vmatpush1.msra.mxu0 %v1457_v35  ;;  %769 = vmatpush1.msra.mxu1 %v1492_v36  ;;  %v1559_v35 = vld [vmem:[%s2618_s1 + $0x7a0] sm:$0xff]  ;;  %v1523_v36 = vld [vmem:[%s2618_s1 + $0x688] sm:$0xff] }
  0x60   : > { %665 = vmatprep.subr.mxu0 %v1456_v37  ;;  %770 = vmatprep.subr.mxu1 %v1491_v38  ;;  %v1558_v37 = vld [vmem:[%s2618_s1 + $0x798] sm:$0xff]  ;;  %v1522_v38 = vld [vmem:[%s2618_s1 + $0x680] sm:$0xff] }
  0x61   : > { %666 = vmatpush1.msra.mxu0 %v1455_v39  ;;  %771 = vmatpush1.msra.mxu1 %v1490_v40  ;;  %v1557_v39 = vld [vmem:[%s2618_s1 + $0x790] sm:$0xff]  ;;  %v1521_v40 = vld [vmem:[%s2618_s1 + $0x678] sm:$0xff] }
  0x62   : > { %667 = vmatprep.subr.mxu0 %v1454_v41  ;;  %772 = vmatprep.subr.mxu1 %v1489_v42  ;;  %v1556_v41 = vld [vmem:[%s2618_s1 + $0x788] sm:$0xff]  ;;  %v1520_v42 = vld [vmem:[%s2618_s1 + $0x670] sm:$0xff] }
  0x63   : > { %668 = vmatpush1.msra.mxu0 %v1453_v43  ;;  %773 = vmatpush1.msra.mxu1 %v1488_v44  ;;  %v1555_v43 = vld [vmem:[%s2618_s1 + $0x780] sm:$0xff]  ;;  %v1519_v44 = vld [vmem:[%s2618_s1 + $0x668] sm:$0xff] }
  0x64   : > { %669 = vmatprep.subr.mxu0 %v1452_v45  ;;  %774 = vmatprep.subr.mxu1 %v1487_v46  ;;  %v1554_v45 = vld [vmem:[%s2618_s1 + $0x778] sm:$0xff]  ;;  %v1518_v46 = vld [vmem:[%s2618_s1 + $0x660] sm:$0xff] }
  0x65   : > { %670 = vmatpush1.msra.mxu0 %v1451_v47  ;;  %775 = vmatpush1.msra.mxu1 %v1486_v48  ;;  %v1553_v47 = vld [vmem:[%s2618_s1 + $0x770] sm:$0xff]  ;;  %v1517_v48 = vld [vmem:[%s2618_s1 + $0x658] sm:$0xff] }
  0x66   : > { %671 = vmatprep.subr.mxu0 %v1450_v49  ;;  %776 = vmatprep.subr.mxu1 %v1485_v50  ;;  %v1552_v49 = vld [vmem:[%s2618_s1 + $0x768] sm:$0xff]  ;;  %v1516_v50 = vld [vmem:[%s2618_s1 + $0x650] sm:$0xff] }
  0x67   : > { %672 = vmatpush1.msra.mxu0 %v1449_v51  ;;  %777 = vmatpush1.msra.mxu1 %v1484_v52  ;;  %v1551_v51 = vld [vmem:[%s2618_s1 + $0x760] sm:$0xff]  ;;  %v1515_v52 = vld [vmem:[%s2618_s1 + $0x648] sm:$0xff] }
  0x68   : > { %673 = vmatprep.subr.mxu0 %v1448_v53  ;;  %778 = vmatprep.subr.mxu1 %v1483_v54  ;;  %v1550_v53 = vld [vmem:[%s2618_s1 + $0x758] sm:$0xff]  ;;  %v1514_v54 = vld [vmem:[%s2618_s1 + $0x640] sm:$0xff] }
  0x69   : > { %674 = vmatpush1.msra.mxu0 %v1447_v55  ;;  %779 = vmatpush1.msra.mxu1 %v1482_v56  ;;  %v1549_v55 = vld [vmem:[%s2618_s1 + $0x750] sm:$0xff]  ;;  %v1513_v56 = vld [vmem:[%s2618_s1 + $0x638] sm:$0xff] }
  0x6a   : > { %675 = vmatprep.subr.mxu0 %v1446_v57  ;;  %780 = vmatprep.subr.mxu1 %v1481_v58  ;;  %v1548_v57 = vld [vmem:[%s2618_s1 + $0x748] sm:$0xff]  ;;  %v1512_v58 = vld [vmem:[%s2618_s1 + $0x630] sm:$0xff] }
  0x6b   : > { %676 = vmatpush1.msra.mxu0 %v1445_v59  ;;  %781 = vmatpush1.msra.mxu1 %v1480_v60  ;;  %v1547_v59 = vld [vmem:[%s2618_s1 + $0x740] sm:$0xff]  ;;  %v1511_v60 = vld [vmem:[%s2618_s1 + $0x628] sm:$0xff] }
  0x6c   : > { %677 = vmatprep.subr.mxu0 %v1444_v61  ;;  %782 = vmatprep.subr.mxu1 %v1479_v62  ;;  %v1546_v61 = vld [vmem:[%s2618_s1 + $0x738] sm:$0xff]  ;;  %v1510_v62 = vld [vmem:[%s2618_s1 + $0x620] sm:$0xff] }
  0x6d   : > { %678 = vmatpush1.msra.mxu0 %v1443_v63  ;;  %783 = vmatpush1.msra.mxu1 %v1478_v0  ;;  %v1545_v63 = vld [vmem:[%s2618_s1 + $0x730] sm:$0xff]  ;;  %v1509_v0 = vld [vmem:[%s2618_s1 + $0x618] sm:$0xff] }
  0x6e   : > { %679 = vmatprep.subr.mxu0 %v1442_v1  ;;  %784 = vmatprep.subr.mxu1 %v1477_v2  ;;  %v1544_v1 = vld [vmem:[%s2618_s1 + $0x728] sm:$0xff]  ;;  %v1508_v2 = vld [vmem:[%s2618_s1 + $0x610] sm:$0xff] }
  0x6f   : > { %680 = vmatpush1.msra.mxu0 %v1441_v3  ;;  %713 = vmatprep.mubr.f32.mxu0 %v1661_v20  ;;  %v1543_v3 = vld [vmem:[%s2618_s1 + $0x720] sm:$0xff] }
  0x70   : > { %785 = vmatpush1.msra.mxu1 %v1476_v4  ;;  %714 = vmatmul.mubr.f32.vlgmr.msra.gmra.mxu0 %v1440_v5  ;;  %v1507_v4 = vld [vmem:[%s2618_s1 + $0x608] sm:$0xff]  ;;  %v1542_v5 = vld [vmem:[%s2618_s1 + $0x718] sm:$0xff] }
  0x71   : > { %786 = vmatprep.subr.mxu1 %v1475_v6  ;;  %863 = vmatprep.subr.mxu0 %v1537_v7  ;;  %v1506_v6 = vld [vmem:[%s2618_s1 + $0x600] sm:$0xff]  ;;  %v1541_v7 = vld [vmem:[%s2618_s1 + $0x710] sm:$0xff] }
  0x72   : > { %787 = vmatpush1.msra.mxu1 %v1474_v8  ;;  %820 = vmatprep.mubr.f32.mxu1 %v1661_v20  ;;  %v829_v8 = vld [vmem:[%s1905_s26 + $0x4] sm:$0xff] }
  0x73   : > { %864 = vmatpush1.msra.mxu0 %v1536_v9  ;;  %821 = vmatmul.mubr.f32.vlgmr.msra.gmra.mxu1 %v1473_v10  ;;  %v1540_v9 = vld [vmem:[%s2618_s1 + $0x708] sm:$0xff]  ;;  %v1602_v10 = vld [vmem:[%s2618_s1 + $0x8f8] sm:$0xff] }
  0x74   : > { %865 = vmatprep.subr.mxu0 %v1535_v11  ;;  %970 = vmatprep.subr.mxu1 %v1570_v12  ;;  %v1539_v11 = vld [vmem:[%s2618_s1 + $0x700] sm:$0xff]  ;;  %v1601_v12 = vld [vmem:[%s2618_s1 + $0x8f0] sm:$0xff] }
  0x75   : > { %866 = vmatpush1.msra.mxu0 %v1534_v13  ;;  %971 = vmatpush1.msra.mxu1 %v1569_v14  ;;  %v1538_v13 = vld [vmem:[%s1905_s26 + $0x14] sm:$0xff]  ;;  %v1600_v14 = vld [vmem:[%s2618_s1 + $0x8e8] sm:$0xff] }
  0x76   : > { %867 = vmatprep.subr.mxu0 %v1533_v15  ;;  %972 = vmatprep.subr.mxu1 %v1568_v16  ;;  %v1599_v15 = vld [vmem:[%s2618_s1 + $0x8e0] sm:$0xff]  ;;  %v1598_v16 = vld [vmem:[%s2618_s1 + $0x8d8] sm:$0xff] }
  0x77   : > { %868 = vmatpush1.msra.mxu0 %v1532_v17  ;;  %973 = vmatpush1.msra.mxu1 %v1567_v18  ;;  %v1597_v17 = vld [vmem:[%s2618_s1 + $0x8d0] sm:$0xff]  ;;  %v1596_v18 = vld [vmem:[%s2618_s1 + $0x8c8] sm:$0xff] }
  0x78   : > { %869 = vmatprep.subr.mxu0 %v1531_v19  ;;  %974 = vmatprep.subr.mxu1 %v1566_v21  ;;  %v1595_v19 = vld [vmem:[%s2618_s1 + $0x8c0] sm:$0xff]  ;;  %v1594_v21 = vld [vmem:[%s2618_s1 + $0x8b8] sm:$0xff] }
  0x79   : > { %870 = vmatpush1.msra.mxu0 %v1530_v22  ;;  %975 = vmatpush1.msra.mxu1 %v1565_v23  ;;  %v1593_v22 = vld [vmem:[%s2618_s1 + $0x8b0] sm:$0xff]  ;;  %v1592_v23 = vld [vmem:[%s2618_s1 + $0x8a8] sm:$0xff] }
  0x7a   : > { %871 = vmatprep.subr.mxu0 %v1529_v24  ;;  %976 = vmatprep.subr.mxu1 %v1564_v25  ;;  %v1591_v24 = vld [vmem:[%s2618_s1 + $0x8a0] sm:$0xff]  ;;  %v1590_v25 = vld [vmem:[%s2618_s1 + $0x898] sm:$0xff] }
  0x7b   : > { %872 = vmatpush1.msra.mxu0 %v1528_v26  ;;  %977 = vmatpush1.msra.mxu1 %v1563_v27  ;;  %v1589_v26 = vld [vmem:[%s2618_s1 + $0x890] sm:$0xff]  ;;  %v1588_v27 = vld [vmem:[%s2618_s1 + $0x888] sm:$0xff] }
  0x7c   : > { %873 = vmatprep.subr.mxu0 %v1527_v28  ;;  %978 = vmatprep.subr.mxu1 %v1562_v29  ;;  %v1587_v28 = vld [vmem:[%s2618_s1 + $0x880] sm:$0xff]  ;;  %v1586_v29 = vld [vmem:[%s2618_s1 + $0x878] sm:$0xff] }
  0x7d   : > { %874 = vmatpush1.msra.mxu0 %v1526_v30  ;;  %979 = vmatpush1.msra.mxu1 %v1561_v31  ;;  %v1585_v30 = vld [vmem:[%s2618_s1 + $0x870] sm:$0xff]  ;;  %v1584_v31 = vld [vmem:[%s2618_s1 + $0x868] sm:$0xff] }
  0x7e   : > { %875 = vmatprep.subr.mxu0 %v1525_v32  ;;  %980 = vmatprep.subr.mxu1 %v1560_v33  ;;  %v1583_v32 = vld [vmem:[%s2618_s1 + $0x860] sm:$0xff]  ;;  %v1582_v33 = vld [vmem:[%s2618_s1 + $0x858] sm:$0xff] }
  0x7f   : > { %876 = vmatpush1.msra.mxu0 %v1524_v34  ;;  %981 = vmatpush1.msra.mxu1 %v1559_v35  ;;  %v1581_v34 = vld [vmem:[%s2618_s1 + $0x850] sm:$0xff]  ;;  %v1580_v35 = vld [vmem:[%s2618_s1 + $0x848] sm:$0xff] }
  0x80   : > { %877 = vmatprep.subr.mxu0 %v1523_v36  ;;  %982 = vmatprep.subr.mxu1 %v1558_v37  ;;  %v1579_v36 = vld [vmem:[%s2618_s1 + $0x840] sm:$0xff]  ;;  %v1578_v37 = vld [vmem:[%s2618_s1 + $0x838] sm:$0xff] }
  0x81   : > { %878 = vmatpush1.msra.mxu0 %v1522_v38  ;;  %983 = vmatpush1.msra.mxu1 %v1557_v39  ;;  %v1577_v38 = vld [vmem:[%s2618_s1 + $0x830] sm:$0xff]  ;;  %v1576_v39 = vld [vmem:[%s2618_s1 + $0x828] sm:$0xff] }
  0x82   : > { %879 = vmatprep.subr.mxu0 %v1521_v40  ;;  %984 = vmatprep.subr.mxu1 %v1556_v41  ;;  %v1575_v40 = vld [vmem:[%s2618_s1 + $0x820] sm:$0xff]  ;;  %v1574_v41 = vld [vmem:[%s2618_s1 + $0x818] sm:$0xff] }
  0x83   : > { %880 = vmatpush1.msra.mxu0 %v1520_v42  ;;  %985 = vmatpush1.msra.mxu1 %v1555_v43  ;;  %v1573_v42 = vld [vmem:[%s2618_s1 + $0x810] sm:$0xff]  ;;  %v1572_v43 = vld [vmem:[%s2618_s1 + $0x808] sm:$0xff] }
  0x84   : > { %881 = vmatprep.subr.mxu0 %v1519_v44  ;;  %986 = vmatprep.subr.mxu1 %v1554_v45  ;;  %v1571_v44 = vld [vmem:[%s2618_s1 + $0x800] sm:$0xff] }
  0x85   : > { %882 = vmatpush1.msra.mxu0 %v1518_v46  ;;  %987 = vmatpush1.msra.mxu1 %v1553_v47  ;;  %v1043_v45 = vld [vmem:[%s1905_s26 + $0x5] sm:$0xff] }
  0x86   : > { %883 = vmatprep.subr.mxu0 %v1517_v48  ;;  %988 = vmatprep.subr.mxu1 %v1552_v49 }
  0x87   : > { %884 = vmatpush1.msra.mxu0 %v1516_v50  ;;  %989 = vmatpush1.msra.mxu1 %v1551_v51 }
  0x88   : > { %885 = vmatprep.subr.mxu0 %v1515_v52  ;;  %990 = vmatprep.subr.mxu1 %v1550_v53 }
  0x89   : > { %886 = vmatpush1.msra.mxu0 %v1514_v54  ;;  %991 = vmatpush1.msra.mxu1 %v1549_v55 }
  0x8a   : > { %887 = vmatprep.subr.mxu0 %v1513_v56  ;;  %992 = vmatprep.subr.mxu1 %v1548_v57 }
  0x8b   : > { %888 = vmatpush1.msra.mxu0 %v1512_v58  ;;  %993 = vmatpush1.msra.mxu1 %v1547_v59  ;;  %v1150_v58 = vlaneseq }
  0x8c   : > { %889 = vmatprep.subr.mxu0 %v1511_v60  ;;  %994 = vmatprep.subr.mxu1 %v1546_v61 }
  0x8d   : > { %890 = vmatpush1.msra.mxu0 %v1510_v62  ;;  %995 = vmatpush1.msra.mxu1 %v1545_v63 }
  0x8e   : > { %891 = vmatprep.subr.mxu0 %v1509_v0  ;;  %996 = vmatprep.subr.mxu1 %v1544_v1  ;;  %v1151_v1 = vshrl.u32 %v1150_v58, 7 }
  0x8f   : > { %892 = vmatpush1.msra.mxu0 %v1508_v2  ;;  %997 = vmatpush1.msra.mxu1 %v1543_v3 }
  0x90   : > { %893 = vmatprep.subr.mxu0 %v1507_v4  ;;  %998 = vmatprep.subr.mxu1 %v1542_v5 }
  0x91   : > { %894 = vmatpush1.msra.mxu0 %v1506_v6  ;;  %927 = vmatprep.mubr.f32.mxu0 %v1661_v20  ;;  %v1156_v6 = vand.u32 3, %v1151_v1 }
  0x92   : > { %999 = vmatpush1.msra.mxu1 %v1541_v7  ;;  %928 = vmatmul.mubr.f32.vlgmr.msra.gmra.mxu0 %v829_v8 }
  0x93   : > { %1000 = vmatprep.subr.mxu1 %v1540_v9  ;;  %1077 = vmatprep.subr.mxu0 %v1602_v10  ;;  %vm1164_vm0 = vcmp.lt.s32.totalorder %v1156_v6, 2 }
  0x94   : > { %1001 = vmatpush1.msra.mxu1 %v1539_v11  ;;  %1034 = vmatprep.mubr.f32.mxu1 %v1661_v20 }
  0x95   : > { %1078 = vmatpush1.msra.mxu0 %v1601_v12  ;;  %1035 = vmatmul.mubr.f32.vlgmr.msra.gmra.mxu1 %v1538_v13 }
  0x96   : > { %1079 = vmatprep.subr.mxu0 %v1600_v14  ;;  %1141 = vmatprep.mubr.f32.mxu0 %v1661_v20 }
  0x97   : > { %1080 = vmatpush1.msra.mxu0 %v1599_v15  ;;  %v1603_v15 = vsel %vm1164_vm0, 1.0, %v1661_v20 }
  0x98   : > { %1081 = vmatprep.subr.mxu0 %v1598_v16 }
  0x99   : > { %1082 = vmatpush1.msra.mxu0 %v1597_v17 }
  0x9a   : > { %1083 = vmatprep.subr.mxu0 %v1596_v18 }
  0x9b   : > { %1084 = vmatpush1.msra.mxu0 %v1595_v19 }
  0x9c   : > { %1085 = vmatprep.subr.mxu0 %v1594_v21 }
  0x9d   : > { %1086 = vmatpush1.msra.mxu0 %v1593_v22 }
  0x9e   : > { %1087 = vmatprep.subr.mxu0 %v1592_v23 }
  0x9f   : > { %1088 = vmatpush1.msra.mxu0 %v1591_v24 }
  0xa0   : > { %1089 = vmatprep.subr.mxu0 %v1590_v25 }
  0xa1   : > { %1090 = vmatpush1.msra.mxu0 %v1589_v26 }
  0xa2   : > { %1091 = vmatprep.subr.mxu0 %v1588_v27 }
  0xa3   : > { %1092 = vmatpush1.msra.mxu0 %v1587_v28 }
  0xa4   : > { %1093 = vmatprep.subr.mxu0 %v1586_v29 }
  0xa5   : > { %1094 = vmatpush1.msra.mxu0 %v1585_v30 }
  0xa6   : > { %1095 = vmatprep.subr.mxu0 %v1584_v31 }
  0xa7   : > { %1096 = vmatpush1.msra.mxu0 %v1583_v32 }
  0xa8   : > { %1097 = vmatprep.subr.mxu0 %v1582_v33 }
  0xa9   : > { %1098 = vmatpush1.msra.mxu0 %v1581_v34 }
  0xaa   : > { %1099 = vmatprep.subr.mxu0 %v1580_v35 }
  0xab   : > { %1100 = vmatpush1.msra.mxu0 %v1579_v36 }
  0xac   : > { %1101 = vmatprep.subr.mxu0 %v1578_v37 }
  0xad   : > { %1102 = vmatpush1.msra.mxu0 %v1577_v38 }
  0xae   : > { %1103 = vmatprep.subr.mxu0 %v1576_v39 }
  0xaf   : > { %1104 = vmatpush1.msra.mxu0 %v1575_v40 }
  0xb0   : > { %1105 = vmatprep.subr.mxu0 %v1574_v41 }
  0xb1   : > { %1106 = vmatpush1.msra.mxu0 %v1573_v42 }
  0xb2   : > { %1107 = vmatprep.subr.mxu0 %v1572_v43 }
  0xb3   : > { %1108 = vmatpush1.msra.mxu0 %v1571_v44 }
  0xb4   : > { %1142 = vmatmul.mubr.f32.vlgmr.msra.gmra.mxu0 %v1043_v45 }
  0xee   : > { %v323_v46 = vpop.f32.mrf.mxu0  ;;  %v394_v47 = vpop.f32.mrf.mxu1 }
  0xef   : > { %v395_v51 = vadd.f32 %v394_v47, %v323_v46 }
  0xf0   : > { %v325_v48 = vpop.f32.mrf.mxu0  ;;  %v396_v50 = vpop.f32.mrf.mxu1 }
  0xf1   : > { %v397_v54 = vadd.f32 %v396_v50, %v325_v48 }
 0x10f   : > { %v499_v49 = vpop.f32.mrf.mxu0 }
 0x110   : > { %v504_v55 = vadd.f32 %v499_v49, %v395_v51 }
 0x111   : > { %v501_v52 = vpop.f32.mrf.mxu0  ;;  %v607_v53 = vpop.f32.mrf.mxu1 }
 0x112   : > { %v505_v57 = vadd.f32 %v501_v52, %v397_v54  ;;  %v612_v60 = vadd.f32 %v607_v53, %v504_v55 }
 0x113   : > { %v609_v59 = vpop.f32.mrf.mxu1 }
 0x114   : > { %v613_v63 = vadd.f32 %v609_v59, %v505_v57 }
 0x130   : > { %v715_v56 = vpop.f32.mrf.mxu0 }
 0x131   : > { %v720_v0 = vadd.f32 %v715_v56, %v612_v60 }
 0x132   : > { %v717_v61 = vpop.f32.mrf.mxu0 }
 0x133   : > { %v822_v62 = vpop.f32.mrf.mxu1  ;;  %v721_v3 = vadd.f32 %v717_v61, %v613_v63 }
 0x134   : > { %v827_v5 = vadd.f32 %v822_v62, %v720_v0 }
 0x135   : > { %v824_v4 = vpop.f32.mrf.mxu1 }
 0x136   : > { %v828_v9 = vadd.f32 %v824_v4, %v721_v3 }
 0x152   : > { %v929_v2 = vpop.f32.mrf.mxu0 }
 0x153   : > { %v934_v10 = vadd.f32 %v929_v2, %v827_v5 }
 0x154   : > { %v931_v7 = vpop.f32.mrf.mxu0 }
 0x155   : > { %v1036_v8 = vpop.f32.mrf.mxu1  ;;  %v935_v11 = vadd.f32 %v931_v7, %v828_v9 }
 0x156   : > { %v1041_v13 = vadd.f32 %v1036_v8, %v934_v10 }
 0x157   : > { %v1038_v12 = vpop.f32.mrf.mxu1 }
 0x158   : > { %v1042_v16 = vadd.f32 %v1038_v12, %v935_v11 }
 0x174   : > { %v1143_v14 = vpop.f32.mrf.mxu0 }
 0x175   : > { %v1148_v17 = vadd.f32 %v1143_v14, %v1041_v13 }
 0x176   : > { %v1145_v18 = vpop.f32.mrf.mxu0 }
 0x177   : > { %v1167_v19 = vmul.f32 %v1603_v15, %v1148_v17  ;;  %v1149_v21 = vadd.f32 %v1145_v18, %v1042_v16 }
 0x179   : > { %v1169_v22 = vrot.slane %v1167_v19, 4  ;;  %v1181_v23 = vmul.f32 %v1167_v19, %v1167_v19  ;;  %v1168_v24 = vmul.f32 %v1603_v15, %v1149_v21 }
 0x17b   : > { %v1170_v25 = vadd.f32 %v1169_v22, %v1167_v19  ;;  %v1183_v26 = vrot.slane %v1181_v23, 4  ;;  %v1175_v27 = vrot.slane %v1168_v24, 4  ;;  %v1182_v28 = vmul.f32 %v1168_v24, %v1168_v24 }
 0x17d   : > { %v1171_v29 = vrot.slane %v1170_v25, 2  ;;  %v1184_v30 = vadd.f32 %v1183_v26, %v1181_v23  ;;  %v1176_v31 = vadd.f32 %v1175_v27, %v1168_v24  ;;  %v1189_v32 = vrot.slane %v1182_v28, 4 }
 0x17f   : > { %v1172_v33 = vadd.f32 %v1171_v29, %v1170_v25  ;;  %v1185_v34 = vrot.slane %v1184_v30, 2  ;;  %v1177_v35 = vrot.slane %v1176_v31, 2  ;;  %v1190_v20 = vadd.f32 %v1189_v32, %v1182_v28 }
 0x181   : > { %v1173_v36 = vrot.slane %v1172_v33, 1  ;;  %v1186_v37 = vadd.f32 %v1185_v34, %v1184_v30  ;;  %v1178_v38 = vadd.f32 %v1177_v35, %v1176_v31  ;;  %v1191_v39 = vrot.slane %v1190_v20, 2 }
 0x183   : > { %v1174_v40 = vadd.f32 %v1173_v36, %v1172_v33  ;;  %v1187_v41 = vrot.slane %v1186_v37, 1  ;;  %v1179_v42 = vrot.slane %v1178_v38, 1  ;;  %v1192_v43 = vadd.f32 %v1191_v39, %v1190_v20 }
 0x185   : > { %v1188_v44 = vadd.f32 %v1187_v41, %v1186_v37  ;;  %v1195_v45 = vmul.f32 0.25, %v1174_v40  ;;  %v1180_v46 = vadd.f32 %v1179_v42, %v1178_v38  ;;  %v1193_v47 = vrot.slane %v1192_v43, 1 }
 0x187   : > { %v1197_v48 = vmul.f32 0.25, %v1188_v44  ;;  %v1199_v49 = vmul.f32 %v1195_v45, %v1195_v45  ;;  %v1194_v50 = vadd.f32 %v1193_v47, %v1192_v43  ;;  %v1196_v51 = vmul.f32 0.25, %v1180_v46 }
 0x188   : > { %v1205_v60 = vsub.f32 %v1148_v17, %v1195_v45 }
 0x189   : > { %v1201_v52 = vsub.f32 %v1197_v48, %v1199_v49  ;;  %v1198_v53 = vmul.f32 0.25, %v1194_v50  ;;  %v1200_v54 = vmul.f32 %v1196_v51, %v1196_v51  ;;  %v1206_v63 = vsub.f32 %v1149_v21, %v1196_v51 }
 0x18b   : > { %v1203_v55 = vmax.f32 %v1201_v52, 0.0  ;;  %v1202_v56 = vsub.f32 %v1198_v53, %v1200_v54 }
 0x18d   : > { %v1207_v57 = vadd.f32 1e-05, %v1203_v55  ;;  %v1204_v58 = vmax.f32 %v1202_v56, 0.0 }
 0x18f   : > { %1633 = vrsqrt.f32 %v1207_v57  ;;  %v1208_v59 = vadd.f32 1e-05, %v1204_v58 }
 0x191   : > { %1635 = vrsqrt.f32 %v1208_v59 }
 0x19c   : > { %v1634_v61 = vpop.eup %1633 }
 0x19d   : > { %v1211_v62 = vmul.f32 %v1634_v61, %v1205_v60 }
 0x19e   : > { %v1636_v0 = vpop.eup %1635 }
 0x19f   : > { %vm1213_vm1 = vcmp.ge.f32.partialorder %v1211_v62, 0.0  ;;  %v1215_v1 = vmul.f32 0.2, %v1211_v62  ;;  %v1212_v2 = vmul.f32 %v1636_v0, %v1206_v63 }
 0x1a1   : > { %v1217_v3 = vsel %vm1213_vm1, %v1211_v62, %v1215_v1  ;;  %vm1214_vm2 = vcmp.ge.f32.partialorder %v1212_v2, 0.0  ;;  %v1216_v5 = vmul.f32 0.2, %v1212_v2 }
 0x1a2   : > { %v1219_v4 = vmul.f32 %v1603_v15, %v1217_v3 }
 0x1a3   : > { %v1218_v7 = vsel %vm1214_vm2, %v1212_v2, %v1216_v5 }
 0x1a4   : > { %v1225_v6 = vrot.slane %v1219_v4, 3  ;;  %v1220_v8 = vmul.f32 %v1603_v15, %v1218_v7 }
 0x1a6   : > { %1229 = vst [vmem:[%s1755_s28] sm:$0xe0] %v1225_v6  ;;  %1231 = vst [vmem:[%s1755_s28 + $0x10] sm:$0x1f] %v1225_v6  ;;  %v1226_v9 = vrot.slane %v1220_v8, 3 }
 0x1a8   : > { %1230 = vst [vmem:[%s1755_s28 + $0x8] sm:$0xe0] %v1226_v9  ;;  %1232 = vst [vmem:[%s1755_s28 + $0x18] sm:$0x1f] %v1226_v9 }
 0x1a9 PF: > { %s12_s11 = sadd.s32 1, %s1659_s11   ;;  %s2620_s9 = smov %s1655_s10 }
 0x1aa   : > { %p9_p5 = scmp.ge.s32.totalorder %s12_s11, 4   ;;  %s2621_s10 = smov %s2623_s12 }
 0x1ac   :  { %11 = sbr.rel (!%p9_p5) target bundleno = 2 (0x2), region = 72 }

// kernel: discriminator_forward.8
= control target key start
LH: loop header
LB: loop body
LE: loop exit
PB: predicated region body
PF: predicated region fallthrough
CT: control target
= control target key end

     0   :  { %s3607_s9 = smov 0   ;;  %s3609_s10 = smov 0   ;;  %s5535_s0 = inlined_call_operand.vmem [shape: f32[2,20,256], index: 0, kind: input, shape index: {}]   ;;  %s5536_s1 = inlined_call_operand.vmem [shape: f32[9,256,512], index: 1, kind: input, shape index: {}]   ;;  %s5537_s2 = inlined_call_operand.vmem [shape: f32[2,20,512], index: 2, kind: output, shape index: {}]  }
   0x1   :  { %s3611_s11 = smov 0   ;;  %s3613_s12 = smov 0  }
   0x2   :  { %s3615_s13 = smov 0   ;;  %s3617_s14 = smov 0  }
   0x3   :  { %s3619_s15 = smov 0   ;;  %s3621_s16 = smov 0  }
   0x4   :  { %s3623_s17 = smov 0  }
   0x5 LB: > { %s2911_s18 = sadd.s32 4294967295, %s3589_s17   ;;  %s21_s19 = sadd.s32 1, %s3581_s15  ;;  %s3589_s17 = sphi %s3623_s17, %s12_s17   ;;  %s3585_s16 = sphi %s3621_s16, %s5546_s16   ;;  %s3581_s15 = sphi %s3619_s15, %s5545_s15   ;;  %s3577_s14 = sphi %s3617_s14, %s5544_s14   ;;  %s3573_s13 = sphi %s3615_s13, %s5543_s13   ;;  %s3569_s12 = sphi %s3613_s12, %s5542_s12   ;;  %s3565_s11 = sphi %s3611_s11, %s5541_s11   ;;  %s3561_s10 = sphi %s3609_s10, %s5540_s10   ;;  %s3557_s9 = sphi %s3607_s9, %s5539_s9  }
   0x6   : > { %p22_p0 = scmp.ge.s32.totalorder %s21_s19, 2  ;;  %s24_s20 = sadd.s32 1, %s3585_s16 }
   0x7   : > { %s57_s21 = sadd.s32 1, %s3569_s12  ;;  %p64_p1 = scmp.ne.s32.totalorder %s3569_s12, %s3565_s11 }
   0x8   : > { %s5548_s19 = smov (%p22_p0, %s21_s19), 0  ;;  %s5550_s20 = smov (!%p22_p0, %s24_s20), %s3585_s16 }
   0x9   : > { %s54_s22 = ssub.s32 %s3581_s15, %s5548_s19  ;;  %p65_p2 = scmp.eq.s32.totalorder %s3589_s17, 0 }
   0xa   : > { %p26_p3 = scmp.ge.s32.totalorder %s5550_s20, 2  ;;  %p55_p4 = scmp.eq.s32.totalorder %s54_s22, 0 }
   0xb   : > { %p66_p5 = por %p65_p2, %p64_p1  ;;  %s85_s23 = sadd.s32 1, %s3561_s10 }
   0xc   : > { %s5552_s20 = smov (%p26_p3, %s5550_s20), 0  ;;  %p95_p6 = scmp.ne.s32.totalorder %s3561_s10, %s3557_s9 }
   0xd   : > { %s3668_s24 = scalar_select %p55_p4, %s3569_s12, %s57_s21  }
   0xe   : > { %s80_s25 = ssub.s32 %s3585_s16, %s5552_s20  ;;  %p96_p7 = scmp.eq.s32.totalorder %s2911_s18, 3 }
   0xf   : > { %s82_s26 = sor.u32 %s80_s25, %s54_s22  ;;  %p2914_p10 = scmp.ge.s32.totalorder %s3589_s17, 4 }
  0x10   : > { %p83_p8 = scmp.eq.s32.totalorder %s82_s26, 0  ;;  %p3674_p9 = por %p96_p7, %p95_p6 }
  0x11   : > { %118 = sbr.rel (%p2914_p10) target bundleno = 314 (0x13a), region = 16 }
  0x12   : > { %s3679_s28 = scalar_select %p83_p8, %s3561_s10, %s85_s23  }
  0x16   : > { %129 = sbr.rel (!%p66_p5) target bundleno = 314 (0x13a), region = 24  ;;  %s131_s29 = sand.u32 (%p66_p5), 1, %s3569_s12  }
  0x17   : > { %s3436_s30 = sshll.u32 (%p66_p5), %s3581_s15, 4  ;;  %s3437_s3 = smul.u32 (%p66_p5), 4608, %s131_s29 }
  0x18   : > { %s3687_s6 = scalar_lea.vmem (%p66_p5), %s5536_s1, %s3436_s30 }
  0x19   : > { %v149_v0 = vld [vmem:[%s3687_s6] sm:$0xff] (%p66_p5)  ;;  %v151_v1 = vld [vmem:[%s3687_s6 + $0x8] sm:$0xff] (%p66_p5)  ;;  %s3695_s7 = scalar_lea.vmem (%p66_p5), [#allocation2], %s3437_s3 }
  0x1a   : > { %v153_v2 = vld [vmem:[%s3687_s6 + $0x20] sm:$0xff] (%p66_p5)  ;;  %v155_v3 = vld [vmem:[%s3687_s6 + $0x28] sm:$0xff] (%p66_p5)  ;;  %150 = vst [vmem:[%s3695_s7] sm:$0xff] (%p66_p5), %v149_v0  ;;  %152 = vst [vmem:[%s3695_s7 + $0x8] sm:$0xff] (%p66_p5), %v151_v1 }
  0x1b   : > { %v157_v4 = vld [vmem:[%s3687_s6 + $0x40] sm:$0xff]  ;;  %v159_v5 = vld [vmem:[%s3687_s6 + $0x48] sm:$0xff]  ;;  %154 = vst [vmem:[%s3695_s7 + $0x10] sm:$0xff] %v153_v2  ;;  %156 = vst [vmem:[%s3695_s7 + $0x18] sm:$0xff] %v155_v3 }
  0x1c   : > { %158 = vst [vmem:[%s3695_s7 + $0x20] sm:$0xff] %v157_v4  ;;  %160 = vst [vmem:[%s3695_s7 + $0x28] sm:$0xff] %v159_v5  ;;  %v161_v6 = vld [vmem:[%s3687_s6 + $0x60] sm:$0xff]  ;;  %v163_v7 = vld [vmem:[%s3687_s6 + $0x68] sm:$0xff] }
  0x1d   : > { %v165_v8 = vld [vmem:[%s3687_s6 + $0x80] sm:$0xff]  ;;  %162 = vst [vmem:[%s3695_s7 + $0x30] sm:$0xff] %v161_v6  ;;  %164 = vst [vmem:[%s3695_s7 + $0x38] sm:$0xff] %v163_v7  ;;  %v167_v9 = vld [vmem:[%s3687_s6 + $0x88] sm:$0xff] }
  0x1e   : > { %166 = vst [vmem:[%s3695_s7 + $0x40] sm:$0xff] %v165_v8  ;;  %v169_v10 = vld [vmem:[%s3687_s6 + $0xa0] sm:$0xff]  ;;  %v171_v11 = vld [vmem:[%s3687_s6 + $0xa8] sm:$0xff]  ;;  %168 = vst [vmem:[%s3695_s7 + $0x48] sm:$0xff] %v167_v9 }
  0x1f   : > { %170 = vst [vmem:[%s3695_s7 + $0x50] sm:$0xff] %v169_v10  ;;  %172 = vst [vmem:[%s3695_s7 + $0x58] sm:$0xff] %v171_v11  ;;  %v173_v12 = vld [vmem:[%s3687_s6 + $0xc0] sm:$0xff]  ;;  %v175_v13 = vld [vmem:[%s3687_s6 + $0xc8] sm:$0xff] }
  0x20   : > { %v177_v14 = vld [vmem:[%s3687_s6 + $0xe0] sm:$0xff]  ;;  %174 = vst [vmem:[%s3695_s7 + $0x60] sm:$0xff] %v173_v12  ;;  %176 = vst [vmem:[%s3695_s7 + $0x68] sm:$0xff] %v175_v13  ;;  %v179_v15 = vld [vmem:[%s3687_s6 + $0xe8] sm:$0xff] }
  0x21   : > { %178 = vst [vmem:[%s3695_s7 + $0x70] sm:$0xff] %v177_v14  ;;  %v181_v16 = vld [vmem:[%s3687_s6 + $0x100] sm:$0xff]  ;;  %v183_v17 = vld [vmem:[%s3687_s6 + $0x108] sm:$0xff]  ;;  %180 = vst [vmem:[%s3695_s7 + $0x78] sm:$0xff] %v179_v15 }
  0x22   : > { %182 = vst [vmem:[%s3695_s7 + $0x80] sm:$0xff] %v181_v16  ;;  %184 = vst [vmem:[%s3695_s7 + $0x88] sm:$0xff] %v183_v17  ;;  %v185_v18 = vld [vmem:[%s3687_s6 + $0x120] sm:$0xff]  ;;  %v187_v19 = vld [vmem:[%s3687_s6 + $0x128] sm:$0xff] }
  0x23   : > { %v189_v20 = vld [vmem:[%s3687_s6 + $0x140] sm:$0xff]  ;;  %186 = vst [vmem:[%s3695_s7 + $0x90] sm:$0xff] %v185_v18  ;;  %188 = vst [vmem:[%s3695_s7 + $0x98] sm:$0xff] %v187_v19  ;;  %v191_v21 = vld [vmem:[%s3687_s6 + $0x148] sm:$0xff] }
  0x24   : > { %190 = vst [vmem:[%s3695_s7 + $0xa0] sm:$0xff] %v189_v20  ;;  %v193_v22 = vld [vmem:[%s3687_s6 + $0x160] sm:$0xff]  ;;  %v195_v23 = vld [vmem:[%s3687_s6 + $0x168] sm:$0xff]  ;;  %192 = vst [vmem:[%s3695_s7 + $0xa8] sm:$0xff] %v191_v21 }
  0x25   : > { %194 = vst [vmem:[%s3695_s7 + $0xb0] sm:$0xff] %v193_v22  ;;  %196 = vst [vmem:[%s3695_s7 + $0xb8] sm:$0xff] %v195_v23  ;;  %v197_v24 = vld [vmem:[%s3687_s6 + $0x180] sm:$0xff]  ;;  %v199_v25 = vld [vmem:[%s3687_s6 + $0x188] sm:$0xff] }
  0x26   : > { %v201_v26 = vld [vmem:[%s3687_s6 + $0x1a0] sm:$0xff]  ;;  %198 = vst [vmem:[%s3695_s7 + $0xc0] sm:$0xff] %v197_v24  ;;  %200 = vst [vmem:[%s3695_s7 + $0xc8] sm:$0xff] %v199_v25  ;;  %v203_v27 = vld [vmem:[%s3687_s6 + $0x1a8] sm:$0xff] }
  0x27   : > { %202 = vst [vmem:[%s3695_s7 + $0xd0] sm:$0xff] %v201_v26  ;;  %v205_v28 = vld [vmem:[%s3687_s6 + $0x1c0] sm:$0xff]  ;;  %v207_v29 = vld [vmem:[%s3687_s6 + $0x1c8] sm:$0xff]  ;;  %204 = vst [vmem:[%s3695_s7 + $0xd8] sm:$0xff] %v203_v27 }
  0x28   : > { %206 = vst [vmem:[%s3695_s7 + $0xe0] sm:$0xff] %v205_v28  ;;  %208 = vst [vmem:[%s3695_s7 + $0xe8] sm:$0xff] %v207_v29  ;;  %v209_v30 = vld [vmem:[%s3687_s6 + $0x1e0] sm:$0xff]  ;;  %v211_v31 = vld [vmem:[%s3687_s6 + $0x1e8] sm:$0xff] }
  0x29   : > { %v213_v32 = vld [vmem:[%s3687_s6 + $0x200] sm:$0xff]  ;;  %210 = vst [vmem:[%s3695_s7 + $0xf0] sm:$0xff] %v209_v30  ;;  %212 = vst [vmem:[%s3695_s7 + $0xf8] sm:$0xff] %v211_v31  ;;  %v215_v33 = vld [vmem:[%s3687_s6 + $0x208] sm:$0xff] }
  0x2a   : > { %214 = vst [vmem:[%s3695_s7 + $0x100] sm:$0xff] %v213_v32  ;;  %v217_v34 = vld [vmem:[%s3687_s6 + $0x220] sm:$0xff]  ;;  %v219_v35 = vld [vmem:[%s3687_s6 + $0x228] sm:$0xff]  ;;  %216 = vst [vmem:[%s3695_s7 + $0x108] sm:$0xff] %v215_v33 }
  0x2b   : > { %218 = vst [vmem:[%s3695_s7 + $0x110] sm:$0xff] %v217_v34  ;;  %220 = vst [vmem:[%s3695_s7 + $0x118] sm:$0xff] %v219_v35  ;;  %v221_v36 = vld [vmem:[%s3687_s6 + $0x240] sm:$0xff]  ;;  %v223_v37 = vld [vmem:[%s3687_s6 + $0x248] sm:$0xff] }
  0x2c   : > { %v225_v38 = vld [vmem:[%s3687_s6 + $0x260] sm:$0xff]  ;;  %222 = vst [vmem:[%s3695_s7 + $0x120] sm:$0xff] %v221_v36  ;;  %224 = vst [vmem:[%s3695_s7 + $0x128] sm:$0xff] %v223_v37  ;;  %v227_v39 = vld [vmem:[%s3687_s6 + $0x268] sm:$0xff] }
  0x2d   : > { %226 = vst [vmem:[%s3695_s7 + $0x130] sm:$0xff] %v225_v38  ;;  %v229_v40 = vld [vmem:[%s3687_s6 + $0x280] sm:$0xff]  ;;  %v231_v41 = vld [vmem:[%s3687_s6 + $0x288] sm:$0xff]  ;;  %228 = vst [vmem:[%s3695_s7 + $0x138] sm:$0xff] %v227_v39 }
  0x2e   : > { %230 = vst [vmem:[%s3695_s7 + $0x140] sm:$0xff] %v229_v40  ;;  %232 = vst [vmem:[%s3695_s7 + $0x148] sm:$0xff] %v231_v41  ;;  %v233_v42 = vld [vmem:[%s3687_s6 + $0x2a0] sm:$0xff]  ;;  %v235_v43 = vld [vmem:[%s3687_s6 + $0x2a8] sm:$0xff] }
  0x2f   : > { %v237_v44 = vld [vmem:[%s3687_s6 + $0x2c0] sm:$0xff]  ;;  %234 = vst [vmem:[%s3695_s7 + $0x150] sm:$0xff] %v233_v42  ;;  %236 = vst [vmem:[%s3695_s7 + $0x158] sm:$0xff] %v235_v43  ;;  %v239_v45 = vld [vmem:[%s3687_s6 + $0x2c8] sm:$0xff] }
  0x30   : > { %238 = vst [vmem:[%s3695_s7 + $0x160] sm:$0xff] %v237_v44  ;;  %v241_v46 = vld [vmem:[%s3687_s6 + $0x2e0] sm:$0xff]  ;;  %v243_v47 = vld [vmem:[%s3687_s6 + $0x2e8] sm:$0xff]  ;;  %240 = vst [vmem:[%s3695_s7 + $0x168] sm:$0xff] %v239_v45 }
  0x31   : > { %242 = vst [vmem:[%s3695_s7 + $0x170] sm:$0xff] %v241_v46  ;;  %244 = vst [vmem:[%s3695_s7 + $0x178] sm:$0xff] %v243_v47  ;;  %v245_v48 = vld [vmem:[%s3687_s6 + $0x300] sm:$0xff]  ;;  %v247_v49 = vld [vmem:[%s3687_s6 + $0x308] sm:$0xff] }
  0x32   : > { %v249_v50 = vld [vmem:[%s3687_s6 + $0x320] sm:$0xff]  ;;  %246 = vst [vmem:[%s3695_s7 + $0x180] sm:$0xff] %v245_v48  ;;  %248 = vst [vmem:[%s3695_s7 + $0x188] sm:$0xff] %v247_v49  ;;  %v251_v51 = vld [vmem:[%s3687_s6 + $0x328] sm:$0xff] }
  0x33   : > { %250 = vst [vmem:[%s3695_s7 + $0x190] sm:$0xff] %v249_v50  ;;  %v253_v52 = vld [vmem:[%s3687_s6 + $0x340] sm:$0xff]  ;;  %v255_v53 = vld [vmem:[%s3687_s6 + $0x348] sm:$0xff]  ;;  %252 = vst [vmem:[%s3695_s7 + $0x198] sm:$0xff] %v251_v51 }
  0x34   : > { %254 = vst [vmem:[%s3695_s7 + $0x1a0] sm:$0xff] %v253_v52  ;;  %256 = vst [vmem:[%s3695_s7 + $0x1a8] sm:$0xff] %v255_v53  ;;  %v257_v54 = vld [vmem:[%s3687_s6 + $0x360] sm:$0xff]  ;;  %v259_v55 = vld [vmem:[%s3687_s6 + $0x368] sm:$0xff] }
  0x35   : > { %v261_v56 = vld [vmem:[%s3687_s6 + $0x380] sm:$0xff]  ;;  %258 = vst [vmem:[%s3695_s7 + $0x1b0] sm:$0xff] %v257_v54  ;;  %260 = vst [vmem:[%s3695_s7 + $0x1b8] sm:$0xff] %v259_v55  ;;  %v263_v57 = vld [vmem:[%s3687_s6 + $0x388] sm:$0xff] }
  0x36   : > { %262 = vst [vmem:[%s3695_s7 + $0x1c0] sm:$0xff] %v261_v56  ;;  %v265_v58 = vld [vmem:[%s3687_s6 + $0x3a0] sm:$0xff]  ;;  %v267_v59 = vld [vmem:[%s3687_s6 + $0x3a8] sm:$0xff]  ;;  %264 = vst [vmem:[%s3695_s7 + $0x1c8] sm:$0xff] %v263_v57 }
  0x37   : > { %266 = vst [vmem:[%s3695_s7 + $0x1d0] sm:$0xff] %v265_v58  ;;  %268 = vst [vmem:[%s3695_s7 + $0x1d8] sm:$0xff] %v267_v59  ;;  %v269_v60 = vld [vmem:[%s3687_s6 + $0x3c0] sm:$0xff]  ;;  %v271_v61 = vld [vmem:[%s3687_s6 + $0x3c8] sm:$0xff] }
  0x38   : > { %v273_v62 = vld [vmem:[%s3687_s6 + $0x3e0] sm:$0xff]  ;;  %270 = vst [vmem:[%s3695_s7 + $0x1e0] sm:$0xff] %v269_v60  ;;  %272 = vst [vmem:[%s3695_s7 + $0x1e8] sm:$0xff] %v271_v61  ;;  %v275_v63 = vld [vmem:[%s3687_s6 + $0x3e8] sm:$0xff] }
  0x39   : > { %274 = vst [vmem:[%s3695_s7 + $0x1f0] sm:$0xff] %v273_v62  ;;  %v277_v0 = vld [vmem:[%s3687_s6 + $0x400] sm:$0xff]  ;;  %v279_v1 = vld [vmem:[%s3687_s6 + $0x408] sm:$0xff]  ;;  %276 = vst [vmem:[%s3695_s7 + $0x1f8] sm:$0xff] %v275_v63 }
  0x3a   : > { %278 = vst [vmem:[%s3695_s7 + $0x200] sm:$0xff] %v277_v0  ;;  %280 = vst [vmem:[%s3695_s7 + $0x208] sm:$0xff] %v279_v1  ;;  %v281_v2 = vld [vmem:[%s3687_s6 + $0x420] sm:$0xff]  ;;  %v283_v3 = vld [vmem:[%s3687_s6 + $0x428] sm:$0xff] }
  0x3b   : > { %v285_v4 = vld [vmem:[%s3687_s6 + $0x440] sm:$0xff]  ;;  %282 = vst [vmem:[%s3695_s7 + $0x210] sm:$0xff] %v281_v2  ;;  %284 = vst [vmem:[%s3695_s7 + $0x218] sm:$0xff] %v283_v3  ;;  %v287_v5 = vld [vmem:[%s3687_s6 + $0x448] sm:$0xff] }
  0x3c   : > { %286 = vst [vmem:[%s3695_s7 + $0x220] sm:$0xff] %v285_v4  ;;  %v289_v6 = vld [vmem:[%s3687_s6 + $0x460] sm:$0xff]  ;;  %v291_v7 = vld [vmem:[%s3687_s6 + $0x468] sm:$0xff]  ;;  %288 = vst [vmem:[%s3695_s7 + $0x228] sm:$0xff] %v287_v5 }
  0x3d   : > { %290 = vst [vmem:[%s3695_s7 + $0x230] sm:$0xff] %v289_v6  ;;  %292 = vst [vmem:[%s3695_s7 + $0x238] sm:$0xff] %v291_v7  ;;  %v293_v8 = vld [vmem:[%s3687_s6 + $0x480] sm:$0xff]  ;;  %v295_v9 = vld [vmem:[%s3687_s6 + $0x488] sm:$0xff] }
  0x3e   : > { %v297_v10 = vld [vmem:[%s3687_s6 + $0x4a0] sm:$0xff]  ;;  %294 = vst [vmem:[%s3695_s7 + $0x240] sm:$0xff] %v293_v8  ;;  %296 = vst [vmem:[%s3695_s7 + $0x248] sm:$0xff] %v295_v9  ;;  %v299_v11 = vld [vmem:[%s3687_s6 + $0x4a8] sm:$0xff] }
  0x3f   : > { %298 = vst [vmem:[%s3695_s7 + $0x250] sm:$0xff] %v297_v10  ;;  %v301_v12 = vld [vmem:[%s3687_s6 + $0x4c0] sm:$0xff]  ;;  %v303_v13 = vld [vmem:[%s3687_s6 + $0x4c8] sm:$0xff]  ;;  %300 = vst [vmem:[%s3695_s7 + $0x258] sm:$0xff] %v299_v11 }
  0x40   : > { %302 = vst [vmem:[%s3695_s7 + $0x260] sm:$0xff] %v301_v12  ;;  %304 = vst [vmem:[%s3695_s7 + $0x268] sm:$0xff] %v303_v13  ;;  %v305_v14 = vld [vmem:[%s3687_s6 + $0x4e0] sm:$0xff]  ;;  %v307_v15 = vld [vmem:[%s3687_s6 + $0x4e8] sm:$0xff] }
  0x41   : > { %v309_v16 = vld [vmem:[%s3687_s6 + $0x500] sm:$0xff]  ;;  %306 = vst [vmem:[%s3695_s7 + $0x270] sm:$0xff] %v305_v14  ;;  %308 = vst [vmem:[%s3695_s7 + $0x278] sm:$0xff] %v307_v15  ;;  %v311_v17 = vld [vmem:[%s3687_s6 + $0x508] sm:$0xff] }
  0x42   : > { %310 = vst [vmem:[%s3695_s7 + $0x280] sm:$0xff] %v309_v16  ;;  %v313_v18 = vld [vmem:[%s3687_s6 + $0x520] sm:$0xff]  ;;  %v315_v19 = vld [vmem:[%s3687_s6 + $0x528] sm:$0xff]  ;;  %312 = vst [vmem:[%s3695_s7 + $0x288] sm:$0xff] %v311_v17 }
  0x43   : > { %314 = vst [vmem:[%s3695_s7 + $0x290] sm:$0xff] %v313_v18  ;;  %316 = vst [vmem:[%s3695_s7 + $0x298] sm:$0xff] %v315_v19  ;;  %v317_v20 = vld [vmem:[%s3687_s6 + $0x540] sm:$0xff]  ;;  %v319_v21 = vld [vmem:[%s3687_s6 + $0x548] sm:$0xff] }
  0x44   : > { %v321_v22 = vld [vmem:[%s3687_s6 + $0x560] sm:$0xff]  ;;  %318 = vst [vmem:[%s3695_s7 + $0x2a0] sm:$0xff] %v317_v20  ;;  %320 = vst [vmem:[%s3695_s7 + $0x2a8] sm:$0xff] %v319_v21  ;;  %v323_v23 = vld [vmem:[%s3687_s6 + $0x568] sm:$0xff] }
  0x45   : > { %322 = vst [vmem:[%s3695_s7 + $0x2b0] sm:$0xff] %v321_v22  ;;  %v325_v24 = vld [vmem:[%s3687_s6 + $0x580] sm:$0xff]  ;;  %v327_v25 = vld [vmem:[%s3687_s6 + $0x588] sm:$0xff]  ;;  %324 = vst [vmem:[%s3695_s7 + $0x2b8] sm:$0xff] %v323_v23 }
  0x46   : > { %326 = vst [vmem:[%s3695_s7 + $0x2c0] sm:$0xff] %v325_v24  ;;  %328 = vst [vmem:[%s3695_s7 + $0x2c8] sm:$0xff] %v327_v25  ;;  %v329_v26 = vld [vmem:[%s3687_s6 + $0x5a0] sm:$0xff]  ;;  %v331_v27 = vld [vmem:[%s3687_s6 + $0x5a8] sm:$0xff] }
  0x47   : > { %v333_v28 = vld [vmem:[%s3687_s6 + $0x5c0] sm:$0xff]  ;;  %330 = vst [vmem:[%s3695_s7 + $0x2d0] sm:$0xff] %v329_v26  ;;  %332 = vst [vmem:[%s3695_s7 + $0x2d8] sm:$0xff] %v331_v27  ;;  %v335_v29 = vld [vmem:[%s3687_s6 + $0x5c8] sm:$0xff] }
  0x48   : > { %334 = vst [vmem:[%s3695_s7 + $0x2e0] sm:$0xff] %v333_v28  ;;  %v337_v30 = vld [vmem:[%s3687_s6 + $0x5e0] sm:$0xff]  ;;  %v339_v31 = vld [vmem:[%s3687_s6 + $0x5e8] sm:$0xff]  ;;  %336 = vst [vmem:[%s3695_s7 + $0x2e8] sm:$0xff] %v335_v29 }
  0x49   : > { %338 = vst [vmem:[%s3695_s7 + $0x2f0] sm:$0xff] %v337_v30  ;;  %340 = vst [vmem:[%s3695_s7 + $0x2f8] sm:$0xff] %v339_v31  ;;  %v341_v32 = vld [vmem:[%s3687_s6 + $0x600] sm:$0xff]  ;;  %v343_v33 = vld [vmem:[%s3687_s6 + $0x608] sm:$0xff] }
  0x4a   : > { %v345_v34 = vld [vmem:[%s3687_s6 + $0x620] sm:$0xff]  ;;  %342 = vst [vmem:[%s3695_s7 + $0x300] sm:$0xff] %v341_v32  ;;  %344 = vst [vmem:[%s3695_s7 + $0x308] sm:$0xff] %v343_v33  ;;  %v347_v35 = vld [vmem:[%s3687_s6 + $0x628] sm:$0xff] }
  0x4b   : > { %346 = vst [vmem:[%s3695_s7 + $0x310] sm:$0xff] %v345_v34  ;;  %v349_v36 = vld [vmem:[%s3687_s6 + $0x640] sm:$0xff]  ;;  %v351_v37 = vld [vmem:[%s3687_s6 + $0x648] sm:$0xff]  ;;  %348 = vst [vmem:[%s3695_s7 + $0x318] sm:$0xff] %v347_v35 }
  0x4c   : > { %350 = vst [vmem:[%s3695_s7 + $0x320] sm:$0xff] %v349_v36  ;;  %352 = vst [vmem:[%s3695_s7 + $0x328] sm:$0xff] %v351_v37  ;;  %v353_v38 = vld [vmem:[%s3687_s6 + $0x660] sm:$0xff]  ;;  %v355_v39 = vld [vmem:[%s3687_s6 + $0x668] sm:$0xff] }
  0x4d   : > { %v357_v40 = vld [vmem:[%s3687_s6 + $0x680] sm:$0xff]  ;;  %354 = vst [vmem:[%s3695_s7 + $0x330] sm:$0xff] %v353_v38  ;;  %356 = vst [vmem:[%s3695_s7 + $0x338] sm:$0xff] %v355_v39  ;;  %v359_v41 = vld [vmem:[%s3687_s6 + $0x688] sm:$0xff] }
  0x4e   : > { %358 = vst [vmem:[%s3695_s7 + $0x340] sm:$0xff] %v357_v40  ;;  %v361_v42 = vld [vmem:[%s3687_s6 + $0x6a0] sm:$0xff]  ;;  %v363_v43 = vld [vmem:[%s3687_s6 + $0x6a8] sm:$0xff]  ;;  %360 = vst [vmem:[%s3695_s7 + $0x348] sm:$0xff] %v359_v41 }
  0x4f   : > { %362 = vst [vmem:[%s3695_s7 + $0x350] sm:$0xff] %v361_v42  ;;  %364 = vst [vmem:[%s3695_s7 + $0x358] sm:$0xff] %v363_v43  ;;  %v365_v44 = vld [vmem:[%s3687_s6 + $0x6c0] sm:$0xff]  ;;  %v367_v45 = vld [vmem:[%s3687_s6 + $0x6c8] sm:$0xff] }
  0x50   : > { %v369_v46 = vld [vmem:[%s3687_s6 + $0x6e0] sm:$0xff]  ;;  %366 = vst [vmem:[%s3695_s7 + $0x360] sm:$0xff] %v365_v44  ;;  %368 = vst [vmem:[%s3695_s7 + $0x368] sm:$0xff] %v367_v45  ;;  %v371_v47 = vld [vmem:[%s3687_s6 + $0x6e8] sm:$0xff] }
  0x51   : > { %370 = vst [vmem:[%s3695_s7 + $0x370] sm:$0xff] %v369_v46  ;;  %v373_v48 = vld [vmem:[%s3687_s6 + $0x700] sm:$0xff]  ;;  %v375_v49 = vld [vmem:[%s3687_s6 + $0x708] sm:$0xff]  ;;  %372 = vst [vmem:[%s3695_s7 + $0x378] sm:$0xff] %v371_v47 }
  0x52   : > { %374 = vst [vmem:[%s3695_s7 + $0x380] sm:$0xff] %v373_v48  ;;  %376 = vst [vmem:[%s3695_s7 + $0x388] sm:$0xff] %v375_v49  ;;  %v377_v50 = vld [vmem:[%s3687_s6 + $0x720] sm:$0xff]  ;;  %v379_v51 = vld [vmem:[%s3687_s6 + $0x728] sm:$0xff] }
  0x53   : > { %v381_v52 = vld [vmem:[%s3687_s6 + $0x740] sm:$0xff]  ;;  %378 = vst [vmem:[%s3695_s7 + $0x390] sm:$0xff] %v377_v50  ;;  %380 = vst [vmem:[%s3695_s7 + $0x398] sm:$0xff] %v379_v51  ;;  %v383_v53 = vld [vmem:[%s3687_s6 + $0x748] sm:$0xff] }
  0x54   : > { %382 = vst [vmem:[%s3695_s7 + $0x3a0] sm:$0xff] %v381_v52  ;;  %v385_v54 = vld [vmem:[%s3687_s6 + $0x760] sm:$0xff]  ;;  %v387_v55 = vld [vmem:[%s3687_s6 + $0x768] sm:$0xff]  ;;  %384 = vst [vmem:[%s3695_s7 + $0x3a8] sm:$0xff] %v383_v53 }
  0x55   : > { %386 = vst [vmem:[%s3695_s7 + $0x3b0] sm:$0xff] %v385_v54  ;;  %388 = vst [vmem:[%s3695_s7 + $0x3b8] sm:$0xff] %v387_v55  ;;  %v389_v56 = vld [vmem:[%s3687_s6 + $0x780] sm:$0xff]  ;;  %v391_v57 = vld [vmem:[%s3687_s6 + $0x788] sm:$0xff] }
  0x56   : > { %v393_v58 = vld [vmem:[%s3687_s6 + $0x7a0] sm:$0xff]  ;;  %390 = vst [vmem:[%s3695_s7 + $0x3c0] sm:$0xff] %v389_v56  ;;  %392 = vst [vmem:[%s3695_s7 + $0x3c8] sm:$0xff] %v391_v57  ;;  %v395_v59 = vld [vmem:[%s3687_s6 + $0x7a8] sm:$0xff] }
  0x57   : > { %394 = vst [vmem:[%s3695_s7 + $0x3d0] sm:$0xff] %v393_v58  ;;  %v397_v60 = vld [vmem:[%s3687_s6 + $0x7c0] sm:$0xff]  ;;  %v399_v61 = vld [vmem:[%s3687_s6 + $0x7c8] sm:$0xff]  ;;  %396 = vst [vmem:[%s3695_s7 + $0x3d8] sm:$0xff] %v395_v59 }
  0x58   : > { %398 = vst [vmem:[%s3695_s7 + $0x3e0] sm:$0xff] %v397_v60  ;;  %400 = vst [vmem:[%s3695_s7 + $0x3e8] sm:$0xff] %v399_v61  ;;  %v401_v62 = vld [vmem:[%s3687_s6 + $0x7e0] sm:$0xff]  ;;  %v403_v63 = vld [vmem:[%s3687_s6 + $0x7e8] sm:$0xff] }
  0x59   : > { %v405_v0 = vld [vmem:[%s3687_s6 + $0x800] sm:$0xff]  ;;  %402 = vst [vmem:[%s3695_s7 + $0x3f0] sm:$0xff] %v401_v62  ;;  %404 = vst [vmem:[%s3695_s7 + $0x3f8] sm:$0xff] %v403_v63  ;;  %v407_v1 = vld [vmem:[%s3687_s6 + $0x808] sm:$0xff] }
  0x5a   : > { %406 = vst [vmem:[%s3695_s7 + $0x400] sm:$0xff] %v405_v0  ;;  %v409_v2 = vld [vmem:[%s3687_s6 + $0x820] sm:$0xff]  ;;  %v411_v3 = vld [vmem:[%s3687_s6 + $0x828] sm:$0xff]  ;;  %408 = vst [vmem:[%s3695_s7 + $0x408] sm:$0xff] %v407_v1 }
  0x5b   : > { %410 = vst [vmem:[%s3695_s7 + $0x410] sm:$0xff] %v409_v2  ;;  %412 = vst [vmem:[%s3695_s7 + $0x418] sm:$0xff] %v411_v3  ;;  %v413_v4 = vld [vmem:[%s3687_s6 + $0x840] sm:$0xff]  ;;  %v415_v5 = vld [vmem:[%s3687_s6 + $0x848] sm:$0xff] }
  0x5c   : > { %v417_v6 = vld [vmem:[%s3687_s6 + $0x860] sm:$0xff]  ;;  %414 = vst [vmem:[%s3695_s7 + $0x420] sm:$0xff] %v413_v4  ;;  %416 = vst [vmem:[%s3695_s7 + $0x428] sm:$0xff] %v415_v5  ;;  %v419_v7 = vld [vmem:[%s3687_s6 + $0x868] sm:$0xff] }
  0x5d   : > { %418 = vst [vmem:[%s3695_s7 + $0x430] sm:$0xff] %v417_v6  ;;  %v421_v8 = vld [vmem:[%s3687_s6 + $0x880] sm:$0xff]  ;;  %v423_v9 = vld [vmem:[%s3687_s6 + $0x888] sm:$0xff]  ;;  %420 = vst [vmem:[%s3695_s7 + $0x438] sm:$0xff] %v419_v7 }
  0x5e   : > { %422 = vst [vmem:[%s3695_s7 + $0x440] sm:$0xff] %v421_v8  ;;  %424 = vst [vmem:[%s3695_s7 + $0x448] sm:$0xff] %v423_v9  ;;  %v425_v10 = vld [vmem:[%s3687_s6 + $0x8a0] sm:$0xff]  ;;  %v427_v11 = vld [vmem:[%s3687_s6 + $0x8a8] sm:$0xff] }
  0x5f   : > { %v429_v12 = vld [vmem:[%s3687_s6 + $0x8c0] sm:$0xff]  ;;  %426 = vst [vmem:[%s3695_s7 + $0x450] sm:$0xff] %v425_v10  ;;  %428 = vst [vmem:[%s3695_s7 + $0x458] sm:$0xff] %v427_v11  ;;  %v431_v13 = vld [vmem:[%s3687_s6 + $0x8c8] sm:$0xff] }
  0x60   : > { %430 = vst [vmem:[%s3695_s7 + $0x460] sm:$0xff] %v429_v12  ;;  %v433_v14 = vld [vmem:[%s3687_s6 + $0x8e0] sm:$0xff]  ;;  %v435_v15 = vld [vmem:[%s3687_s6 + $0x8e8] sm:$0xff]  ;;  %432 = vst [vmem:[%s3695_s7 + $0x468] sm:$0xff] %v431_v13 }
  0x61   : > { %434 = vst [vmem:[%s3695_s7 + $0x470] sm:$0xff] %v433_v14  ;;  %436 = vst [vmem:[%s3695_s7 + $0x478] sm:$0xff] %v435_v15  ;;  %v437_v16 = vld [vmem:[%s3687_s6 + $0x900] sm:$0xff]  ;;  %v439_v17 = vld [vmem:[%s3687_s6 + $0x908] sm:$0xff] }
  0x62   : > { %v441_v18 = vld [vmem:[%s3687_s6 + $0x920] sm:$0xff]  ;;  %438 = vst [vmem:[%s3695_s7 + $0x480] sm:$0xff] %v437_v16  ;;  %440 = vst [vmem:[%s3695_s7 + $0x488] sm:$0xff] %v439_v17  ;;  %v443_v19 = vld [vmem:[%s3687_s6 + $0x928] sm:$0xff] }
  0x63   : > { %442 = vst [vmem:[%s3695_s7 + $0x490] sm:$0xff] %v441_v18  ;;  %v445_v20 = vld [vmem:[%s3687_s6 + $0x940] sm:$0xff]  ;;  %v447_v21 = vld [vmem:[%s3687_s6 + $0x948] sm:$0xff]  ;;  %444 = vst [vmem:[%s3695_s7 + $0x498] sm:$0xff] %v443_v19 }
  0x64   : > { %446 = vst [vmem:[%s3695_s7 + $0x4a0] sm:$0xff] %v445_v20  ;;  %448 = vst [vmem:[%s3695_s7 + $0x4a8] sm:$0xff] %v447_v21  ;;  %v449_v22 = vld [vmem:[%s3687_s6 + $0x960] sm:$0xff]  ;;  %v451_v23 = vld [vmem:[%s3687_s6 + $0x968] sm:$0xff] }
  0x65   : > { %v453_v24 = vld [vmem:[%s3687_s6 + $0x980] sm:$0xff]  ;;  %450 = vst [vmem:[%s3695_s7 + $0x4b0] sm:$0xff] %v449_v22  ;;  %452 = vst [vmem:[%s3695_s7 + $0x4b8] sm:$0xff] %v451_v23  ;;  %v455_v25 = vld [vmem:[%s3687_s6 + $0x988] sm:$0xff] }
  0x66   : > { %454 = vst [vmem:[%s3695_s7 + $0x4c0] sm:$0xff] %v453_v24  ;;  %v457_v26 = vld [vmem:[%s3687_s6 + $0x9a0] sm:$0xff]  ;;  %v459_v27 = vld [vmem:[%s3687_s6 + $0x9a8] sm:$0xff]  ;;  %456 = vst [vmem:[%s3695_s7 + $0x4c8] sm:$0xff] %v455_v25 }
  0x67   : > { %458 = vst [vmem:[%s3695_s7 + $0x4d0] sm:$0xff] %v457_v26  ;;  %460 = vst [vmem:[%s3695_s7 + $0x4d8] sm:$0xff] %v459_v27  ;;  %v461_v28 = vld [vmem:[%s3687_s6 + $0x9c0] sm:$0xff]  ;;  %v463_v29 = vld [vmem:[%s3687_s6 + $0x9c8] sm:$0xff] }
  0x68   : > { %v465_v30 = vld [vmem:[%s3687_s6 + $0x9e0] sm:$0xff]  ;;  %462 = vst [vmem:[%s3695_s7 + $0x4e0] sm:$0xff] %v461_v28  ;;  %464 = vst [vmem:[%s3695_s7 + $0x4e8] sm:$0xff] %v463_v29  ;;  %v467_v31 = vld [vmem:[%s3687_s6 + $0x9e8] sm:$0xff] }
  0x69   : > { %466 = vst [vmem:[%s3695_s7 + $0x4f0] sm:$0xff] %v465_v30  ;;  %v469_v32 = vld [vmem:[%s3687_s6 + $0xa00] sm:$0xff]  ;;  %v471_v33 = vld [vmem:[%s3687_s6 + $0xa08] sm:$0xff]  ;;  %468 = vst [vmem:[%s3695_s7 + $0x4f8] sm:$0xff] %v467_v31 }
  0x6a   : > { %470 = vst [vmem:[%s3695_s7 + $0x500] sm:$0xff] %v469_v32  ;;  %472 = vst [vmem:[%s3695_s7 + $0x508] sm:$0xff] %v471_v33  ;;  %v473_v34 = vld [vmem:[%s3687_s6 + $0xa20] sm:$0xff]  ;;  %v475_v35 = vld [vmem:[%s3687_s6 + $0xa28] sm:$0xff] }
  0x6b   : > { %v477_v36 = vld [vmem:[%s3687_s6 + $0xa40] sm:$0xff]  ;;  %474 = vst [vmem:[%s3695_s7 + $0x510] sm:$0xff] %v473_v34  ;;  %476 = vst [vmem:[%s3695_s7 + $0x518] sm:$0xff] %v475_v35  ;;  %v479_v37 = vld [vmem:[%s3687_s6 + $0xa48] sm:$0xff] }
  0x6c   : > { %478 = vst [vmem:[%s3695_s7 + $0x520] sm:$0xff] %v477_v36  ;;  %v481_v38 = vld [vmem:[%s3687_s6 + $0xa60] sm:$0xff]  ;;  %v483_v39 = vld [vmem:[%s3687_s6 + $0xa68] sm:$0xff]  ;;  %480 = vst [vmem:[%s3695_s7 + $0x528] sm:$0xff] %v479_v37 }
  0x6d   : > { %482 = vst [vmem:[%s3695_s7 + $0x530] sm:$0xff] %v481_v38  ;;  %484 = vst [vmem:[%s3695_s7 + $0x538] sm:$0xff] %v483_v39  ;;  %v485_v40 = vld [vmem:[%s3687_s6 + $0xa80] sm:$0xff]  ;;  %v487_v41 = vld [vmem:[%s3687_s6 + $0xa88] sm:$0xff] }
  0x6e   : > { %v489_v42 = vld [vmem:[%s3687_s6 + $0xaa0] sm:$0xff]  ;;  %486 = vst [vmem:[%s3695_s7 + $0x540] sm:$0xff] %v485_v40  ;;  %488 = vst [vmem:[%s3695_s7 + $0x548] sm:$0xff] %v487_v41  ;;  %v491_v43 = vld [vmem:[%s3687_s6 + $0xaa8] sm:$0xff] }
  0x6f   : > { %490 = vst [vmem:[%s3695_s7 + $0x550] sm:$0xff] %v489_v42  ;;  %v493_v44 = vld [vmem:[%s3687_s6 + $0xac0] sm:$0xff]  ;;  %v495_v45 = vld [vmem:[%s3687_s6 + $0xac8] sm:$0xff]  ;;  %492 = vst [vmem:[%s3695_s7 + $0x558] sm:$0xff] %v491_v43 }
  0x70   : > { %494 = vst [vmem:[%s3695_s7 + $0x560] sm:$0xff] %v493_v44  ;;  %496 = vst [vmem:[%s3695_s7 + $0x568] sm:$0xff] %v495_v45  ;;  %v497_v46 = vld [vmem:[%s3687_s6 + $0xae0] sm:$0xff]  ;;  %v499_v47 = vld [vmem:[%s3687_s6 + $0xae8] sm:$0xff] }
  0x71   : > { %v501_v48 = vld [vmem:[%s3687_s6 + $0xb00] sm:$0xff]  ;;  %498 = vst [vmem:[%s3695_s7 + $0x570] sm:$0xff] %v497_v46  ;;  %500 = vst [vmem:[%s3695_s7 + $0x578] sm:$0xff] %v499_v47  ;;  %v503_v49 = vld [vmem:[%s3687_s6 + $0xb08] sm:$0xff] }
  0x72   : > { %502 = vst [vmem:[%s3695_s7 + $0x580] sm:$0xff] %v501_v48  ;;  %v505_v50 = vld [vmem:[%s3687_s6 + $0xb20] sm:$0xff]  ;;  %v507_v51 = vld [vmem:[%s3687_s6 + $0xb28] sm:$0xff]  ;;  %504 = vst [vmem:[%s3695_s7 + $0x588] sm:$0xff] %v503_v49 }
  0x73   : > { %506 = vst [vmem:[%s3695_s7 + $0x590] sm:$0xff] %v505_v50  ;;  %508 = vst [vmem:[%s3695_s7 + $0x598] sm:$0xff] %v507_v51  ;;  %v509_v52 = vld [vmem:[%s3687_s6 + $0xb40] sm:$0xff]  ;;  %v511_v53 = vld [vmem:[%s3687_s6 + $0xb48] sm:$0xff] }
  0x74   : > { %v513_v54 = vld [vmem:[%s3687_s6 + $0xb60] sm:$0xff]  ;;  %510 = vst [vmem:[%s3695_s7 + $0x5a0] sm:$0xff] %v509_v52  ;;  %512 = vst [vmem:[%s3695_s7 + $0x5a8] sm:$0xff] %v511_v53  ;;  %v515_v55 = vld [vmem:[%s3687_s6 + $0xb68] sm:$0xff] }
  0x75   : > { %514 = vst [vmem:[%s3695_s7 + $0x5b0] sm:$0xff] %v513_v54  ;;  %v517_v56 = vld [vmem:[%s3687_s6 + $0xb80] sm:$0xff]  ;;  %v519_v57 = vld [vmem:[%s3687_s6 + $0xb88] sm:$0xff]  ;;  %516 = vst [vmem:[%s3695_s7 + $0x5b8] sm:$0xff] %v515_v55 }
  0x76   : > { %518 = vst [vmem:[%s3695_s7 + $0x5c0] sm:$0xff] %v517_v56  ;;  %520 = vst [vmem:[%s3695_s7 + $0x5c8] sm:$0xff] %v519_v57  ;;  %v521_v58 = vld [vmem:[%s3687_s6 + $0xba0] sm:$0xff]  ;;  %v523_v59 = vld [vmem:[%s3687_s6 + $0xba8] sm:$0xff] }
  0x77   : > { %v525_v60 = vld [vmem:[%s3687_s6 + $0xbc0] sm:$0xff]  ;;  %522 = vst [vmem:[%s3695_s7 + $0x5d0] sm:$0xff] %v521_v58  ;;  %524 = vst [vmem:[%s3695_s7 + $0x5d8] sm:$0xff] %v523_v59  ;;  %v527_v61 = vld [vmem:[%s3687_s6 + $0xbc8] sm:$0xff] }
  0x78   : > { %526 = vst [vmem:[%s3695_s7 + $0x5e0] sm:$0xff] %v525_v60  ;;  %v529_v62 = vld [vmem:[%s3687_s6 + $0xbe0] sm:$0xff]  ;;  %v531_v63 = vld [vmem:[%s3687_s6 + $0xbe8] sm:$0xff]  ;;  %528 = vst [vmem:[%s3695_s7 + $0x5e8] sm:$0xff] %v527_v61 }
  0x79   : > { %530 = vst [vmem:[%s3695_s7 + $0x5f0] sm:$0xff] %v529_v62  ;;  %532 = vst [vmem:[%s3695_s7 + $0x5f8] sm:$0xff] %v531_v63  ;;  %v533_v0 = vld [vmem:[%s3687_s6 + $0xc00] sm:$0xff]  ;;  %v535_v1 = vld [vmem:[%s3687_s6 + $0xc08] sm:$0xff] }
  0x7a   : > { %v537_v2 = vld [vmem:[%s3687_s6 + $0xc20] sm:$0xff]  ;;  %534 = vst [vmem:[%s3695_s7 + $0x600] sm:$0xff] %v533_v0  ;;  %536 = vst [vmem:[%s3695_s7 + $0x608] sm:$0xff] %v535_v1  ;;  %v539_v3 = vld [vmem:[%s3687_s6 + $0xc28] sm:$0xff] }
  0x7b   : > { %538 = vst [vmem:[%s3695_s7 + $0x610] sm:$0xff] %v537_v2  ;;  %v541_v4 = vld [vmem:[%s3687_s6 + $0xc40] sm:$0xff]  ;;  %v543_v5 = vld [vmem:[%s3687_s6 + $0xc48] sm:$0xff]  ;;  %540 = vst [vmem:[%s3695_s7 + $0x618] sm:$0xff] %v539_v3 }
  0x7c   : > { %542 = vst [vmem:[%s3695_s7 + $0x620] sm:$0xff] %v541_v4  ;;  %544 = vst [vmem:[%s3695_s7 + $0x628] sm:$0xff] %v543_v5  ;;  %v545_v6 = vld [vmem:[%s3687_s6 + $0xc60] sm:$0xff]  ;;  %v547_v7 = vld [vmem:[%s3687_s6 + $0xc68] sm:$0xff] }
  0x7d   : > { %v549_v8 = vld [vmem:[%s3687_s6 + $0xc80] sm:$0xff]  ;;  %546 = vst [vmem:[%s3695_s7 + $0x630] sm:$0xff] %v545_v6  ;;  %548 = vst [vmem:[%s3695_s7 + $0x638] sm:$0xff] %v547_v7  ;;  %v551_v9 = vld [vmem:[%s3687_s6 + $0xc88] sm:$0xff] }
  0x7e   : > { %550 = vst [vmem:[%s3695_s7 + $0x640] sm:$0xff] %v549_v8  ;;  %v553_v10 = vld [vmem:[%s3687_s6 + $0xca0] sm:$0xff]  ;;  %v555_v11 = vld [vmem:[%s3687_s6 + $0xca8] sm:$0xff]  ;;  %552 = vst [vmem:[%s3695_s7 + $0x648] sm:$0xff] %v551_v9 }
  0x7f   : > { %554 = vst [vmem:[%s3695_s7 + $0x650] sm:$0xff] %v553_v10  ;;  %556 = vst [vmem:[%s3695_s7 + $0x658] sm:$0xff] %v555_v11  ;;  %v557_v12 = vld [vmem:[%s3687_s6 + $0xcc0] sm:$0xff]  ;;  %v559_v13 = vld [vmem:[%s3687_s6 + $0xcc8] sm:$0xff] }
  0x80   : > { %v561_v14 = vld [vmem:[%s3687_s6 + $0xce0] sm:$0xff]  ;;  %558 = vst [vmem:[%s3695_s7 + $0x660] sm:$0xff] %v557_v12  ;;  %560 = vst [vmem:[%s3695_s7 + $0x668] sm:$0xff] %v559_v13  ;;  %v563_v15 = vld [vmem:[%s3687_s6 + $0xce8] sm:$0xff] }
  0x81   : > { %562 = vst [vmem:[%s3695_s7 + $0x670] sm:$0xff] %v561_v14  ;;  %v565_v16 = vld [vmem:[%s3687_s6 + $0xd00] sm:$0xff]  ;;  %v567_v17 = vld [vmem:[%s3687_s6 + $0xd08] sm:$0xff]  ;;  %564 = vst [vmem:[%s3695_s7 + $0x678] sm:$0xff] %v563_v15 }
  0x82   : > { %566 = vst [vmem:[%s3695_s7 + $0x680] sm:$0xff] %v565_v16  ;;  %568 = vst [vmem:[%s3695_s7 + $0x688] sm:$0xff] %v567_v17  ;;  %v569_v18 = vld [vmem:[%s3687_s6 + $0xd20] sm:$0xff]  ;;  %v571_v19 = vld [vmem:[%s3687_s6 + $0xd28] sm:$0xff] }
  0x83   : > { %v573_v20 = vld [vmem:[%s3687_s6 + $0xd40] sm:$0xff]  ;;  %570 = vst [vmem:[%s3695_s7 + $0x690] sm:$0xff] %v569_v18  ;;  %572 = vst [vmem:[%s3695_s7 + $0x698] sm:$0xff] %v571_v19  ;;  %v575_v21 = vld [vmem:[%s3687_s6 + $0xd48] sm:$0xff] }
  0x84   : > { %574 = vst [vmem:[%s3695_s7 + $0x6a0] sm:$0xff] %v573_v20  ;;  %v577_v22 = vld [vmem:[%s3687_s6 + $0xd60] sm:$0xff]  ;;  %v579_v23 = vld [vmem:[%s3687_s6 + $0xd68] sm:$0xff]  ;;  %576 = vst [vmem:[%s3695_s7 + $0x6a8] sm:$0xff] %v575_v21 }
  0x85   : > { %578 = vst [vmem:[%s3695_s7 + $0x6b0] sm:$0xff] %v577_v22  ;;  %580 = vst [vmem:[%s3695_s7 + $0x6b8] sm:$0xff] %v579_v23  ;;  %v581_v24 = vld [vmem:[%s3687_s6 + $0xd80] sm:$0xff]  ;;  %v583_v25 = vld [vmem:[%s3687_s6 + $0xd88] sm:$0xff] }
  0x86   : > { %v585_v26 = vld [vmem:[%s3687_s6 + $0xda0] sm:$0xff]  ;;  %582 = vst [vmem:[%s3695_s7 + $0x6c0] sm:$0xff] %v581_v24  ;;  %584 = vst [vmem:[%s3695_s7 + $0x6c8] sm:$0xff] %v583_v25  ;;  %v587_v27 = vld [vmem:[%s3687_s6 + $0xda8] sm:$0xff] }
  0x87   : > { %586 = vst [vmem:[%s3695_s7 + $0x6d0] sm:$0xff] %v585_v26  ;;  %v589_v28 = vld [vmem:[%s3687_s6 + $0xdc0] sm:$0xff]  ;;  %v591_v29 = vld [vmem:[%s3687_s6 + $0xdc8] sm:$0xff]  ;;  %588 = vst [vmem:[%s3695_s7 + $0x6d8] sm:$0xff] %v587_v27 }
  0x88   : > { %590 = vst [vmem:[%s3695_s7 + $0x6e0] sm:$0xff] %v589_v28  ;;  %592 = vst [vmem:[%s3695_s7 + $0x6e8] sm:$0xff] %v591_v29  ;;  %v593_v30 = vld [vmem:[%s3687_s6 + $0xde0] sm:$0xff]  ;;  %v595_v31 = vld [vmem:[%s3687_s6 + $0xde8] sm:$0xff] }
  0x89   : > { %v597_v32 = vld [vmem:[%s3687_s6 + $0xe00] sm:$0xff]  ;;  %594 = vst [vmem:[%s3695_s7 + $0x6f0] sm:$0xff] %v593_v30  ;;  %596 = vst [vmem:[%s3695_s7 + $0x6f8] sm:$0xff] %v595_v31  ;;  %v599_v33 = vld [vmem:[%s3687_s6 + $0xe08] sm:$0xff] }
  0x8a   : > { %598 = vst [vmem:[%s3695_s7 + $0x700] sm:$0xff] %v597_v32  ;;  %v601_v34 = vld [vmem:[%s3687_s6 + $0xe20] sm:$0xff]  ;;  %v603_v35 = vld [vmem:[%s3687_s6 + $0xe28] sm:$0xff]  ;;  %600 = vst [vmem:[%s3695_s7 + $0x708] sm:$0xff] %v599_v33 }
  0x8b   : > { %602 = vst [vmem:[%s3695_s7 + $0x710] sm:$0xff] %v601_v34  ;;  %604 = vst [vmem:[%s3695_s7 + $0x718] sm:$0xff] %v603_v35  ;;  %v605_v36 = vld [vmem:[%s3687_s6 + $0xe40] sm:$0xff]  ;;  %v607_v37 = vld [vmem:[%s3687_s6 + $0xe48] sm:$0xff] }
  0x8c   : > { %v609_v38 = vld [vmem:[%s3687_s6 + $0xe60] sm:$0xff]  ;;  %606 = vst [vmem:[%s3695_s7 + $0x720] sm:$0xff] %v605_v36  ;;  %608 = vst [vmem:[%s3695_s7 + $0x728] sm:$0xff] %v607_v37  ;;  %v611_v39 = vld [vmem:[%s3687_s6 + $0xe68] sm:$0xff] }
  0x8d   : > { %610 = vst [vmem:[%s3695_s7 + $0x730] sm:$0xff] %v609_v38  ;;  %v613_v40 = vld [vmem:[%s3687_s6 + $0xe80] sm:$0xff]  ;;  %v615_v41 = vld [vmem:[%s3687_s6 + $0xe88] sm:$0xff]  ;;  %612 = vst [vmem:[%s3695_s7 + $0x738] sm:$0xff] %v611_v39 }
  0x8e   : > { %614 = vst [vmem:[%s3695_s7 + $0x740] sm:$0xff] %v613_v40  ;;  %616 = vst [vmem:[%s3695_s7 + $0x748] sm:$0xff] %v615_v41  ;;  %v617_v42 = vld [vmem:[%s3687_s6 + $0xea0] sm:$0xff]  ;;  %v619_v43 = vld [vmem:[%s3687_s6 + $0xea8] sm:$0xff] }
  0x8f   : > { %v621_v44 = vld [vmem:[%s3687_s6 + $0xec0] sm:$0xff]  ;;  %618 = vst [vmem:[%s3695_s7 + $0x750] sm:$0xff] %v617_v42  ;;  %620 = vst [vmem:[%s3695_s7 + $0x758] sm:$0xff] %v619_v43  ;;  %v623_v45 = vld [vmem:[%s3687_s6 + $0xec8] sm:$0xff] }
  0x90   : > { %622 = vst [vmem:[%s3695_s7 + $0x760] sm:$0xff] %v621_v44  ;;  %v625_v46 = vld [vmem:[%s3687_s6 + $0xee0] sm:$0xff]  ;;  %v627_v47 = vld [vmem:[%s3687_s6 + $0xee8] sm:$0xff]  ;;  %624 = vst [vmem:[%s3695_s7 + $0x768] sm:$0xff] %v623_v45 }
  0x91   : > { %626 = vst [vmem:[%s3695_s7 + $0x770] sm:$0xff] %v625_v46  ;;  %628 = vst [vmem:[%s3695_s7 + $0x778] sm:$0xff] %v627_v47  ;;  %v629_v48 = vld [vmem:[%s3687_s6 + $0xf00] sm:$0xff]  ;;  %v631_v49 = vld [vmem:[%s3687_s6 + $0xf08] sm:$0xff] }
  0x92   : > { %v633_v50 = vld [vmem:[%s3687_s6 + $0xf20] sm:$0xff]  ;;  %630 = vst [vmem:[%s3695_s7 + $0x780] sm:$0xff] %v629_v48  ;;  %632 = vst [vmem:[%s3695_s7 + $0x788] sm:$0xff] %v631_v49  ;;  %v635_v51 = vld [vmem:[%s3687_s6 + $0xf28] sm:$0xff] }
  0x93   : > { %634 = vst [vmem:[%s3695_s7 + $0x790] sm:$0xff] %v633_v50  ;;  %v637_v52 = vld [vmem:[%s3687_s6 + $0xf40] sm:$0xff]  ;;  %v639_v53 = vld [vmem:[%s3687_s6 + $0xf48] sm:$0xff]  ;;  %636 = vst [vmem:[%s3695_s7 + $0x798] sm:$0xff] %v635_v51 }
  0x94   : > { %638 = vst [vmem:[%s3695_s7 + $0x7a0] sm:$0xff] %v637_v52  ;;  %640 = vst [vmem:[%s3695_s7 + $0x7a8] sm:$0xff] %v639_v53  ;;  %v641_v54 = vld [vmem:[%s3687_s6 + $0xf60] sm:$0xff]  ;;  %v643_v55 = vld [vmem:[%s3687_s6 + $0xf68] sm:$0xff] }
  0x95   : > { %v645_v56 = vld [vmem:[%s3687_s6 + $0xf80] sm:$0xff]  ;;  %642 = vst [vmem:[%s3695_s7 + $0x7b0] sm:$0xff] %v641_v54  ;;  %644 = vst [vmem:[%s3695_s7 + $0x7b8] sm:$0xff] %v643_v55  ;;  %v647_v57 = vld [vmem:[%s3687_s6 + $0xf88] sm:$0xff] }
  0x96   : > { %646 = vst [vmem:[%s3695_s7 + $0x7c0] sm:$0xff] %v645_v56  ;;  %v649_v58 = vld [vmem:[%s3687_s6 + $0xfa0] sm:$0xff]  ;;  %v651_v59 = vld [vmem:[%s3687_s6 + $0xfa8] sm:$0xff]  ;;  %648 = vst [vmem:[%s3695_s7 + $0x7c8] sm:$0xff] %v647_v57 }
  0x97   : > { %650 = vst [vmem:[%s3695_s7 + $0x7d0] sm:$0xff] %v649_v58  ;;  %652 = vst [vmem:[%s3695_s7 + $0x7d8] sm:$0xff] %v651_v59  ;;  %v653_v60 = vld [vmem:[%s3687_s6 + $0xfc0] sm:$0xff]  ;;  %v655_v61 = vld [vmem:[%s3687_s6 + $0xfc8] sm:$0xff] }
  0x98   : > { %v657_v62 = vld [vmem:[%s3687_s6 + $0xfe0] sm:$0xff]  ;;  %654 = vst [vmem:[%s3695_s7 + $0x7e0] sm:$0xff] %v653_v60  ;;  %656 = vst [vmem:[%s3695_s7 + $0x7e8] sm:$0xff] %v655_v61  ;;  %v659_v63 = vld [vmem:[%s3687_s6 + $0xfe8] sm:$0xff] }
  0x99   : > { %658 = vst [vmem:[%s3695_s7 + $0x7f0] sm:$0xff] %v657_v62  ;;  %v661_v0 = vld [vmem:[%s3687_s6 + $0x1000] sm:$0xff]  ;;  %v663_v1 = vld [vmem:[%s3687_s6 + $0x1008] sm:$0xff]  ;;  %660 = vst [vmem:[%s3695_s7 + $0x7f8] sm:$0xff] %v659_v63 }
  0x9a   : > { %662 = vst [vmem:[%s3695_s7 + $0x800] sm:$0xff] %v661_v0  ;;  %664 = vst [vmem:[%s3695_s7 + $0x808] sm:$0xff] %v663_v1  ;;  %v665_v2 = vld [vmem:[%s3687_s6 + $0x1020] sm:$0xff]  ;;  %v667_v3 = vld [vmem:[%s3687_s6 + $0x1028] sm:$0xff] }
  0x9b   : > { %v669_v4 = vld [vmem:[%s3687_s6 + $0x1040] sm:$0xff]  ;;  %666 = vst [vmem:[%s3695_s7 + $0x810] sm:$0xff] %v665_v2  ;;  %668 = vst [vmem:[%s3695_s7 + $0x818] sm:$0xff] %v667_v3  ;;  %v671_v5 = vld [vmem:[%s3687_s6 + $0x1048] sm:$0xff] }
  0x9c   : > { %670 = vst [vmem:[%s3695_s7 + $0x820] sm:$0xff] %v669_v4  ;;  %v673_v6 = vld [vmem:[%s3687_s6 + $0x1060] sm:$0xff]  ;;  %v675_v7 = vld [vmem:[%s3687_s6 + $0x1068] sm:$0xff]  ;;  %672 = vst [vmem:[%s3695_s7 + $0x828] sm:$0xff] %v671_v5 }
  0x9d   : > { %674 = vst [vmem:[%s3695_s7 + $0x830] sm:$0xff] %v673_v6  ;;  %676 = vst [vmem:[%s3695_s7 + $0x838] sm:$0xff] %v675_v7  ;;  %v677_v8 = vld [vmem:[%s3687_s6 + $0x1080] sm:$0xff]  ;;  %v679_v9 = vld [vmem:[%s3687_s6 + $0x1088] sm:$0xff] }
  0x9e   : > { %v681_v10 = vld [vmem:[%s3687_s6 + $0x10a0] sm:$0xff]  ;;  %678 = vst [vmem:[%s3695_s7 + $0x840] sm:$0xff] %v677_v8  ;;  %680 = vst [vmem:[%s3695_s7 + $0x848] sm:$0xff] %v679_v9  ;;  %v683_v11 = vld [vmem:[%s3687_s6 + $0x10a8] sm:$0xff] }
  0x9f   : > { %682 = vst [vmem:[%s3695_s7 + $0x850] sm:$0xff] %v681_v10  ;;  %v685_v12 = vld [vmem:[%s3687_s6 + $0x10c0] sm:$0xff]  ;;  %v687_v13 = vld [vmem:[%s3687_s6 + $0x10c8] sm:$0xff]  ;;  %684 = vst [vmem:[%s3695_s7 + $0x858] sm:$0xff] %v683_v11 }
  0xa0   : > { %686 = vst [vmem:[%s3695_s7 + $0x860] sm:$0xff] %v685_v12  ;;  %688 = vst [vmem:[%s3695_s7 + $0x868] sm:$0xff] %v687_v13  ;;  %v689_v14 = vld [vmem:[%s3687_s6 + $0x10e0] sm:$0xff]  ;;  %v691_v15 = vld [vmem:[%s3687_s6 + $0x10e8] sm:$0xff] }
  0xa1   : > { %v693_v16 = vld [vmem:[%s3687_s6 + $0x1100] sm:$0xff]  ;;  %690 = vst [vmem:[%s3695_s7 + $0x870] sm:$0xff] %v689_v14  ;;  %692 = vst [vmem:[%s3695_s7 + $0x878] sm:$0xff] %v691_v15  ;;  %v695_v17 = vld [vmem:[%s3687_s6 + $0x1108] sm:$0xff] }
  0xa2   : > { %694 = vst [vmem:[%s3695_s7 + $0x880] sm:$0xff] %v693_v16  ;;  %v697_v18 = vld [vmem:[%s3687_s6 + $0x1120] sm:$0xff]  ;;  %v699_v19 = vld [vmem:[%s3687_s6 + $0x1128] sm:$0xff]  ;;  %696 = vst [vmem:[%s3695_s7 + $0x888] sm:$0xff] %v695_v17 }
  0xa3   : > { %698 = vst [vmem:[%s3695_s7 + $0x890] sm:$0xff] %v697_v18  ;;  %700 = vst [vmem:[%s3695_s7 + $0x898] sm:$0xff] %v699_v19  ;;  %v701_v20 = vld [vmem:[%s3687_s6 + $0x1140] sm:$0xff]  ;;  %v703_v21 = vld [vmem:[%s3687_s6 + $0x1148] sm:$0xff] }
  0xa4   : > { %v705_v22 = vld [vmem:[%s3687_s6 + $0x1160] sm:$0xff]  ;;  %702 = vst [vmem:[%s3695_s7 + $0x8a0] sm:$0xff] %v701_v20  ;;  %704 = vst [vmem:[%s3695_s7 + $0x8a8] sm:$0xff] %v703_v21  ;;  %v707_v23 = vld [vmem:[%s3687_s6 + $0x1168] sm:$0xff] }
  0xa5   : > { %706 = vst [vmem:[%s3695_s7 + $0x8b0] sm:$0xff] %v705_v22  ;;  %v709_v24 = vld [vmem:[%s3687_s6 + $0x1180] sm:$0xff]  ;;  %v711_v25 = vld [vmem:[%s3687_s6 + $0x1188] sm:$0xff]  ;;  %708 = vst [vmem:[%s3695_s7 + $0x8b8] sm:$0xff] %v707_v23 }
  0xa6   : > { %710 = vst [vmem:[%s3695_s7 + $0x8c0] sm:$0xff] %v709_v24  ;;  %712 = vst [vmem:[%s3695_s7 + $0x8c8] sm:$0xff] %v711_v25  ;;  %v713_v26 = vld [vmem:[%s3687_s6 + $0x11a0] sm:$0xff]  ;;  %v715_v27 = vld [vmem:[%s3687_s6 + $0x11a8] sm:$0xff] }
  0xa7   : > { %v717_v28 = vld [vmem:[%s3687_s6 + $0x11c0] sm:$0xff]  ;;  %714 = vst [vmem:[%s3695_s7 + $0x8d0] sm:$0xff] %v713_v26  ;;  %716 = vst [vmem:[%s3695_s7 + $0x8d8] sm:$0xff] %v715_v27  ;;  %v719_v29 = vld [vmem:[%s3687_s6 + $0x11c8] sm:$0xff] }
  0xa8   : > { %718 = vst [vmem:[%s3695_s7 + $0x8e0] sm:$0xff] %v717_v28  ;;  %v721_v30 = vld [vmem:[%s3687_s6 + $0x11e0] sm:$0xff]  ;;  %v723_v31 = vld [vmem:[%s3687_s6 + $0x11e8] sm:$0xff]  ;;  %720 = vst [vmem:[%s3695_s7 + $0x8e8] sm:$0xff] %v719_v29 }
  0xa9   : > { %722 = vst [vmem:[%s3695_s7 + $0x8f0] sm:$0xff] %v721_v30  ;;  %724 = vst [vmem:[%s3695_s7 + $0x8f8] sm:$0xff] %v723_v31  ;;  %v725_v32 = vld [vmem:[%s3687_s6 + $0x1200] sm:$0xff]  ;;  %v727_v33 = vld [vmem:[%s3687_s6 + $0x1208] sm:$0xff] }
  0xaa   : > { %v729_v34 = vld [vmem:[%s3687_s6 + $0x1220] sm:$0xff]  ;;  %726 = vst [vmem:[%s3695_s7 + $0x900] sm:$0xff] %v725_v32  ;;  %728 = vst [vmem:[%s3695_s7 + $0x908] sm:$0xff] %v727_v33  ;;  %v731_v35 = vld [vmem:[%s3687_s6 + $0x1228] sm:$0xff] }
  0xab   : > { %730 = vst [vmem:[%s3695_s7 + $0x910] sm:$0xff] %v729_v34  ;;  %v733_v36 = vld [vmem:[%s3687_s6 + $0x1240] sm:$0xff]  ;;  %v735_v37 = vld [vmem:[%s3687_s6 + $0x1248] sm:$0xff]  ;;  %732 = vst [vmem:[%s3695_s7 + $0x918] sm:$0xff] %v731_v35 }
  0xac   : > { %734 = vst [vmem:[%s3695_s7 + $0x920] sm:$0xff] %v733_v36  ;;  %736 = vst [vmem:[%s3695_s7 + $0x928] sm:$0xff] %v735_v37  ;;  %v737_v38 = vld [vmem:[%s3687_s6 + $0x1260] sm:$0xff]  ;;  %v739_v39 = vld [vmem:[%s3687_s6 + $0x1268] sm:$0xff] }
  0xad   : > { %v741_v40 = vld [vmem:[%s3687_s6 + $0x1280] sm:$0xff]  ;;  %738 = vst [vmem:[%s3695_s7 + $0x930] sm:$0xff] %v737_v38  ;;  %740 = vst [vmem:[%s3695_s7 + $0x938] sm:$0xff] %v739_v39  ;;  %v743_v41 = vld [vmem:[%s3687_s6 + $0x1288] sm:$0xff] }
  0xae   : > { %742 = vst [vmem:[%s3695_s7 + $0x940] sm:$0xff] %v741_v40  ;;  %v745_v42 = vld [vmem:[%s3687_s6 + $0x12a0] sm:$0xff]  ;;  %v747_v43 = vld [vmem:[%s3687_s6 + $0x12a8] sm:$0xff]  ;;  %744 = vst [vmem:[%s3695_s7 + $0x948] sm:$0xff] %v743_v41 }
  0xaf   : > { %746 = vst [vmem:[%s3695_s7 + $0x950] sm:$0xff] %v745_v42  ;;  %748 = vst [vmem:[%s3695_s7 + $0x958] sm:$0xff] %v747_v43  ;;  %v749_v44 = vld [vmem:[%s3687_s6 + $0x12c0] sm:$0xff]  ;;  %v751_v45 = vld [vmem:[%s3687_s6 + $0x12c8] sm:$0xff] }
  0xb0   : > { %v753_v46 = vld [vmem:[%s3687_s6 + $0x12e0] sm:$0xff]  ;;  %750 = vst [vmem:[%s3695_s7 + $0x960] sm:$0xff] %v749_v44  ;;  %752 = vst [vmem:[%s3695_s7 + $0x968] sm:$0xff] %v751_v45  ;;  %v755_v47 = vld [vmem:[%s3687_s6 + $0x12e8] sm:$0xff] }
  0xb1   : > { %754 = vst [vmem:[%s3695_s7 + $0x970] sm:$0xff] %v753_v46  ;;  %v757_v48 = vld [vmem:[%s3687_s6 + $0x1300] sm:$0xff]  ;;  %v759_v49 = vld [vmem:[%s3687_s6 + $0x1308] sm:$0xff]  ;;  %756 = vst [vmem:[%s3695_s7 + $0x978] sm:$0xff] %v755_v47 }
  0xb2   : > { %758 = vst [vmem:[%s3695_s7 + $0x980] sm:$0xff] %v757_v48  ;;  %760 = vst [vmem:[%s3695_s7 + $0x988] sm:$0xff] %v759_v49  ;;  %v761_v50 = vld [vmem:[%s3687_s6 + $0x1320] sm:$0xff]  ;;  %v763_v51 = vld [vmem:[%s3687_s6 + $0x1328] sm:$0xff] }
  0xb3   : > { %v765_v52 = vld [vmem:[%s3687_s6 + $0x1340] sm:$0xff]  ;;  %762 = vst [vmem:[%s3695_s7 + $0x990] sm:$0xff] %v761_v50  ;;  %764 = vst [vmem:[%s3695_s7 + $0x998] sm:$0xff] %v763_v51  ;;  %v767_v53 = vld [vmem:[%s3687_s6 + $0x1348] sm:$0xff] }
  0xb4   : > { %766 = vst [vmem:[%s3695_s7 + $0x9a0] sm:$0xff] %v765_v52  ;;  %v769_v54 = vld [vmem:[%s3687_s6 + $0x1360] sm:$0xff]  ;;  %v771_v55 = vld [vmem:[%s3687_s6 + $0x1368] sm:$0xff]  ;;  %768 = vst [vmem:[%s3695_s7 + $0x9a8] sm:$0xff] %v767_v53 }
  0xb5   : > { %770 = vst [vmem:[%s3695_s7 + $0x9b0] sm:$0xff] %v769_v54  ;;  %772 = vst [vmem:[%s3695_s7 + $0x9b8] sm:$0xff] %v771_v55  ;;  %v773_v56 = vld [vmem:[%s3687_s6 + $0x1380] sm:$0xff]  ;;  %v775_v57 = vld [vmem:[%s3687_s6 + $0x1388] sm:$0xff] }
  0xb6   : > { %v777_v58 = vld [vmem:[%s3687_s6 + $0x13a0] sm:$0xff]  ;;  %774 = vst [vmem:[%s3695_s7 + $0x9c0] sm:$0xff] %v773_v56  ;;  %776 = vst [vmem:[%s3695_s7 + $0x9c8] sm:$0xff] %v775_v57  ;;  %v779_v59 = vld [vmem:[%s3687_s6 + $0x13a8] sm:$0xff] }
  0xb7   : > { %778 = vst [vmem:[%s3695_s7 + $0x9d0] sm:$0xff] %v777_v58  ;;  %v781_v60 = vld [vmem:[%s3687_s6 + $0x13c0] sm:$0xff]  ;;  %v783_v61 = vld [vmem:[%s3687_s6 + $0x13c8] sm:$0xff]  ;;  %780 = vst [vmem:[%s3695_s7 + $0x9d8] sm:$0xff] %v779_v59 }
  0xb8   : > { %782 = vst [vmem:[%s3695_s7 + $0x9e0] sm:$0xff] %v781_v60  ;;  %784 = vst [vmem:[%s3695_s7 + $0x9e8] sm:$0xff] %v783_v61  ;;  %v785_v62 = vld [vmem:[%s3687_s6 + $0x13e0] sm:$0xff]  ;;  %v787_v63 = vld [vmem:[%s3687_s6 + $0x13e8] sm:$0xff] }
  0xb9   : > { %v789_v0 = vld [vmem:[%s3687_s6 + $0x1400] sm:$0xff]  ;;  %786 = vst [vmem:[%s3695_s7 + $0x9f0] sm:$0xff] %v785_v62  ;;  %788 = vst [vmem:[%s3695_s7 + $0x9f8] sm:$0xff] %v787_v63  ;;  %v791_v1 = vld [vmem:[%s3687_s6 + $0x1408] sm:$0xff] }
  0xba   : > { %790 = vst [vmem:[%s3695_s7 + $0xa00] sm:$0xff] %v789_v0  ;;  %v793_v2 = vld [vmem:[%s3687_s6 + $0x1420] sm:$0xff]  ;;  %v795_v3 = vld [vmem:[%s3687_s6 + $0x1428] sm:$0xff]  ;;  %792 = vst [vmem:[%s3695_s7 + $0xa08] sm:$0xff] %v791_v1 }
  0xbb   : > { %794 = vst [vmem:[%s3695_s7 + $0xa10] sm:$0xff] %v793_v2  ;;  %796 = vst [vmem:[%s3695_s7 + $0xa18] sm:$0xff] %v795_v3  ;;  %v797_v4 = vld [vmem:[%s3687_s6 + $0x1440] sm:$0xff]  ;;  %v799_v5 = vld [vmem:[%s3687_s6 + $0x1448] sm:$0xff] }
  0xbc   : > { %v801_v6 = vld [vmem:[%s3687_s6 + $0x1460] sm:$0xff]  ;;  %798 = vst [vmem:[%s3695_s7 + $0xa20] sm:$0xff] %v797_v4  ;;  %800 = vst [vmem:[%s3695_s7 + $0xa28] sm:$0xff] %v799_v5  ;;  %v803_v7 = vld [vmem:[%s3687_s6 + $0x1468] sm:$0xff] }
  0xbd   : > { %802 = vst [vmem:[%s3695_s7 + $0xa30] sm:$0xff] %v801_v6  ;;  %v805_v8 = vld [vmem:[%s3687_s6 + $0x1480] sm:$0xff]  ;;  %v807_v9 = vld [vmem:[%s3687_s6 + $0x1488] sm:$0xff]  ;;  %804 = vst [vmem:[%s3695_s7 + $0xa38] sm:$0xff] %v803_v7 }
  0xbe   : > { %806 = vst [vmem:[%s3695_s7 + $0xa40] sm:$0xff] %v805_v8  ;;  %808 = vst [vmem:[%s3695_s7 + $0xa48] sm:$0xff] %v807_v9  ;;  %v809_v10 = vld [vmem:[%s3687_s6 + $0x14a0] sm:$0xff]  ;;  %v811_v11 = vld [vmem:[%s3687_s6 + $0x14a8] sm:$0xff] }
  0xbf   : > { %v813_v12 = vld [vmem:[%s3687_s6 + $0x14c0] sm:$0xff]  ;;  %810 = vst [vmem:[%s3695_s7 + $0xa50] sm:$0xff] %v809_v10  ;;  %812 = vst [vmem:[%s3695_s7 + $0xa58] sm:$0xff] %v811_v11  ;;  %v815_v13 = vld [vmem:[%s3687_s6 + $0x14c8] sm:$0xff] }
  0xc0   : > { %814 = vst [vmem:[%s3695_s7 + $0xa60] sm:$0xff] %v813_v12  ;;  %v817_v14 = vld [vmem:[%s3687_s6 + $0x14e0] sm:$0xff]  ;;  %v819_v15 = vld [vmem:[%s3687_s6 + $0x14e8] sm:$0xff]  ;;  %816 = vst [vmem:[%s3695_s7 + $0xa68] sm:$0xff] %v815_v13 }
  0xc1   : > { %818 = vst [vmem:[%s3695_s7 + $0xa70] sm:$0xff] %v817_v14  ;;  %820 = vst [vmem:[%s3695_s7 + $0xa78] sm:$0xff] %v819_v15  ;;  %v821_v16 = vld [vmem:[%s3687_s6 + $0x1500] sm:$0xff]  ;;  %v823_v17 = vld [vmem:[%s3687_s6 + $0x1508] sm:$0xff] }
  0xc2   : > { %v825_v18 = vld [vmem:[%s3687_s6 + $0x1520] sm:$0xff]  ;;  %822 = vst [vmem:[%s3695_s7 + $0xa80] sm:$0xff] %v821_v16  ;;  %824 = vst [vmem:[%s3695_s7 + $0xa88] sm:$0xff] %v823_v17  ;;  %v827_v19 = vld [vmem:[%s3687_s6 + $0x1528] sm:$0xff] }
  0xc3   : > { %826 = vst [vmem:[%s3695_s7 + $0xa90] sm:$0xff] %v825_v18  ;;  %v829_v20 = vld [vmem:[%s3687_s6 + $0x1540] sm:$0xff]  ;;  %v831_v21 = vld [vmem:[%s3687_s6 + $0x1548] sm:$0xff]  ;;  %828 = vst [vmem:[%s3695_s7 + $0xa98] sm:$0xff] %v827_v19 }
  0xc4   : > { %830 = vst [vmem:[%s3695_s7 + $0xaa0] sm:$0xff] %v829_v20  ;;  %832 = vst [vmem:[%s3695_s7 + $0xaa8] sm:$0xff] %v831_v21  ;;  %v833_v22 = vld [vmem:[%s3687_s6 + $0x1560] sm:$0xff]  ;;  %v835_v23 = vld [vmem:[%s3687_s6 + $0x1568] sm:$0xff] }
  0xc5   : > { %v837_v24 = vld [vmem:[%s3687_s6 + $0x1580] sm:$0xff]  ;;  %834 = vst [vmem:[%s3695_s7 + $0xab0] sm:$0xff] %v833_v22  ;;  %836 = vst [vmem:[%s3695_s7 + $0xab8] sm:$0xff] %v835_v23  ;;  %v839_v25 = vld [vmem:[%s3687_s6 + $0x1588] sm:$0xff] }
  0xc6   : > { %838 = vst [vmem:[%s3695_s7 + $0xac0] sm:$0xff] %v837_v24  ;;  %v841_v26 = vld [vmem:[%s3687_s6 + $0x15a0] sm:$0xff]  ;;  %v843_v27 = vld [vmem:[%s3687_s6 + $0x15a8] sm:$0xff]  ;;  %840 = vst [vmem:[%s3695_s7 + $0xac8] sm:$0xff] %v839_v25 }
  0xc7   : > { %842 = vst [vmem:[%s3695_s7 + $0xad0] sm:$0xff] %v841_v26  ;;  %844 = vst [vmem:[%s3695_s7 + $0xad8] sm:$0xff] %v843_v27  ;;  %v845_v28 = vld [vmem:[%s3687_s6 + $0x15c0] sm:$0xff]  ;;  %v847_v29 = vld [vmem:[%s3687_s6 + $0x15c8] sm:$0xff] }
  0xc8   : > { %v849_v30 = vld [vmem:[%s3687_s6 + $0x15e0] sm:$0xff]  ;;  %846 = vst [vmem:[%s3695_s7 + $0xae0] sm:$0xff] %v845_v28  ;;  %848 = vst [vmem:[%s3695_s7 + $0xae8] sm:$0xff] %v847_v29  ;;  %v851_v31 = vld [vmem:[%s3687_s6 + $0x15e8] sm:$0xff] }
  0xc9   : > { %850 = vst [vmem:[%s3695_s7 + $0xaf0] sm:$0xff] %v849_v30  ;;  %v853_v32 = vld [vmem:[%s3687_s6 + $0x1600] sm:$0xff]  ;;  %v855_v33 = vld [vmem:[%s3687_s6 + $0x1608] sm:$0xff]  ;;  %852 = vst [vmem:[%s3695_s7 + $0xaf8] sm:$0xff] %v851_v31 }
  0xca   : > { %854 = vst [vmem:[%s3695_s7 + $0xb00] sm:$0xff] %v853_v32  ;;  %856 = vst [vmem:[%s3695_s7 + $0xb08] sm:$0xff] %v855_v33  ;;  %v857_v34 = vld [vmem:[%s3687_s6 + $0x1620] sm:$0xff]  ;;  %v859_v35 = vld [vmem:[%s3687_s6 + $0x1628] sm:$0xff] }
  0xcb   : > { %v861_v36 = vld [vmem:[%s3687_s6 + $0x1640] sm:$0xff]  ;;  %858 = vst [vmem:[%s3695_s7 + $0xb10] sm:$0xff] %v857_v34  ;;  %860 = vst [vmem:[%s3695_s7 + $0xb18] sm:$0xff] %v859_v35  ;;  %v863_v37 = vld [vmem:[%s3687_s6 + $0x1648] sm:$0xff] }
  0xcc   : > { %862 = vst [vmem:[%s3695_s7 + $0xb20] sm:$0xff] %v861_v36  ;;  %v865_v38 = vld [vmem:[%s3687_s6 + $0x1660] sm:$0xff]  ;;  %v867_v39 = vld [vmem:[%s3687_s6 + $0x1668] sm:$0xff]  ;;  %864 = vst [vmem:[%s3695_s7 + $0xb28] sm:$0xff] %v863_v37 }
  0xcd   : > { %866 = vst [vmem:[%s3695_s7 + $0xb30] sm:$0xff] %v865_v38  ;;  %868 = vst [vmem:[%s3695_s7 + $0xb38] sm:$0xff] %v867_v39  ;;  %v869_v40 = vld [vmem:[%s3687_s6 + $0x1680] sm:$0xff]  ;;  %v871_v41 = vld [vmem:[%s3687_s6 + $0x1688] sm:$0xff] }
  0xce   : > { %v873_v42 = vld [vmem:[%s3687_s6 + $0x16a0] sm:$0xff]  ;;  %870 = vst [vmem:[%s3695_s7 + $0xb40] sm:$0xff] %v869_v40  ;;  %872 = vst [vmem:[%s3695_s7 + $0xb48] sm:$0xff] %v871_v41  ;;  %v875_v43 = vld [vmem:[%s3687_s6 + $0x16a8] sm:$0xff] }
  0xcf   : > { %874 = vst [vmem:[%s3695_s7 + $0xb50] sm:$0xff] %v873_v42  ;;  %v877_v44 = vld [vmem:[%s3687_s6 + $0x16c0] sm:$0xff]  ;;  %v879_v45 = vld [vmem:[%s3687_s6 + $0x16c8] sm:$0xff]  ;;  %876 = vst [vmem:[%s3695_s7 + $0xb58] sm:$0xff] %v875_v43 }
  0xd0   : > { %878 = vst [vmem:[%s3695_s7 + $0xb60] sm:$0xff] %v877_v44  ;;  %880 = vst [vmem:[%s3695_s7 + $0xb68] sm:$0xff] %v879_v45  ;;  %v881_v46 = vld [vmem:[%s3687_s6 + $0x16e0] sm:$0xff]  ;;  %v883_v47 = vld [vmem:[%s3687_s6 + $0x16e8] sm:$0xff] }
  0xd1   : > { %v885_v48 = vld [vmem:[%s3687_s6 + $0x1700] sm:$0xff]  ;;  %882 = vst [vmem:[%s3695_s7 + $0xb70] sm:$0xff] %v881_v46  ;;  %884 = vst [vmem:[%s3695_s7 + $0xb78] sm:$0xff] %v883_v47  ;;  %v887_v49 = vld [vmem:[%s3687_s6 + $0x1708] sm:$0xff] }
  0xd2   : > { %886 = vst [vmem:[%s3695_s7 + $0xb80] sm:$0xff] %v885_v48  ;;  %v889_v50 = vld [vmem:[%s3687_s6 + $0x1720] sm:$0xff]  ;;  %v891_v51 = vld [vmem:[%s3687_s6 + $0x1728] sm:$0xff]  ;;  %888 = vst [vmem:[%s3695_s7 + $0xb88] sm:$0xff] %v887_v49 }
  0xd3   : > { %890 = vst [vmem:[%s3695_s7 + $0xb90] sm:$0xff] %v889_v50  ;;  %892 = vst [vmem:[%s3695_s7 + $0xb98] sm:$0xff] %v891_v51  ;;  %v893_v52 = vld [vmem:[%s3687_s6 + $0x1740] sm:$0xff]  ;;  %v895_v53 = vld [vmem:[%s3687_s6 + $0x1748] sm:$0xff] }
  0xd4   : > { %v897_v54 = vld [vmem:[%s3687_s6 + $0x1760] sm:$0xff]  ;;  %894 = vst [vmem:[%s3695_s7 + $0xba0] sm:$0xff] %v893_v52  ;;  %896 = vst [vmem:[%s3695_s7 + $0xba8] sm:$0xff] %v895_v53  ;;  %v899_v55 = vld [vmem:[%s3687_s6 + $0x1768] sm:$0xff] }
  0xd5   : > { %898 = vst [vmem:[%s3695_s7 + $0xbb0] sm:$0xff] %v897_v54  ;;  %v901_v56 = vld [vmem:[%s3687_s6 + $0x1780] sm:$0xff]  ;;  %v903_v57 = vld [vmem:[%s3687_s6 + $0x1788] sm:$0xff]  ;;  %900 = vst [vmem:[%s3695_s7 + $0xbb8] sm:$0xff] %v899_v55 }
  0xd6   : > { %902 = vst [vmem:[%s3695_s7 + $0xbc0] sm:$0xff] %v901_v56  ;;  %904 = vst [vmem:[%s3695_s7 + $0xbc8] sm:$0xff] %v903_v57  ;;  %v905_v58 = vld [vmem:[%s3687_s6 + $0x17a0] sm:$0xff]  ;;  %v907_v59 = vld [vmem:[%s3687_s6 + $0x17a8] sm:$0xff] }
  0xd7   : > { %v909_v60 = vld [vmem:[%s3687_s6 + $0x17c0] sm:$0xff]  ;;  %906 = vst [vmem:[%s3695_s7 + $0xbd0] sm:$0xff] %v905_v58  ;;  %908 = vst [vmem:[%s3695_s7 + $0xbd8] sm:$0xff] %v907_v59  ;;  %v911_v61 = vld [vmem:[%s3687_s6 + $0x17c8] sm:$0xff] }
  0xd8   : > { %910 = vst [vmem:[%s3695_s7 + $0xbe0] sm:$0xff] %v909_v60  ;;  %v913_v62 = vld [vmem:[%s3687_s6 + $0x17e0] sm:$0xff]  ;;  %v915_v63 = vld [vmem:[%s3687_s6 + $0x17e8] sm:$0xff]  ;;  %912 = vst [vmem:[%s3695_s7 + $0xbe8] sm:$0xff] %v911_v61 }
  0xd9   : > { %914 = vst [vmem:[%s3695_s7 + $0xbf0] sm:$0xff] %v913_v62  ;;  %916 = vst [vmem:[%s3695_s7 + $0xbf8] sm:$0xff] %v915_v63  ;;  %v917_v0 = vld [vmem:[%s3687_s6 + $0x1800] sm:$0xff]  ;;  %v919_v1 = vld [vmem:[%s3687_s6 + $0x1808] sm:$0xff] }
  0xda   : > { %v921_v2 = vld [vmem:[%s3687_s6 + $0x1820] sm:$0xff]  ;;  %918 = vst [vmem:[%s3695_s7 + $0xc00] sm:$0xff] %v917_v0  ;;  %920 = vst [vmem:[%s3695_s7 + $0xc08] sm:$0xff] %v919_v1  ;;  %v923_v3 = vld [vmem:[%s3687_s6 + $0x1828] sm:$0xff] }
  0xdb   : > { %922 = vst [vmem:[%s3695_s7 + $0xc10] sm:$0xff] %v921_v2  ;;  %v925_v4 = vld [vmem:[%s3687_s6 + $0x1840] sm:$0xff]  ;;  %v927_v5 = vld [vmem:[%s3687_s6 + $0x1848] sm:$0xff]  ;;  %924 = vst [vmem:[%s3695_s7 + $0xc18] sm:$0xff] %v923_v3 }
  0xdc   : > { %926 = vst [vmem:[%s3695_s7 + $0xc20] sm:$0xff] %v925_v4  ;;  %928 = vst [vmem:[%s3695_s7 + $0xc28] sm:$0xff] %v927_v5  ;;  %v929_v6 = vld [vmem:[%s3687_s6 + $0x1860] sm:$0xff]  ;;  %v931_v7 = vld [vmem:[%s3687_s6 + $0x1868] sm:$0xff] }
  0xdd   : > { %v933_v8 = vld [vmem:[%s3687_s6 + $0x1880] sm:$0xff]  ;;  %930 = vst [vmem:[%s3695_s7 + $0xc30] sm:$0xff] %v929_v6  ;;  %932 = vst [vmem:[%s3695_s7 + $0xc38] sm:$0xff] %v931_v7  ;;  %v935_v9 = vld [vmem:[%s3687_s6 + $0x1888] sm:$0xff] }
  0xde   : > { %934 = vst [vmem:[%s3695_s7 + $0xc40] sm:$0xff] %v933_v8  ;;  %v937_v10 = vld [vmem:[%s3687_s6 + $0x18a0] sm:$0xff]  ;;  %v939_v11 = vld [vmem:[%s3687_s6 + $0x18a8] sm:$0xff]  ;;  %936 = vst [vmem:[%s3695_s7 + $0xc48] sm:$0xff] %v935_v9 }
  0xdf   : > { %938 = vst [vmem:[%s3695_s7 + $0xc50] sm:$0xff] %v937_v10  ;;  %940 = vst [vmem:[%s3695_s7 + $0xc58] sm:$0xff] %v939_v11  ;;  %v941_v12 = vld [vmem:[%s3687_s6 + $0x18c0] sm:$0xff]  ;;  %v943_v13 = vld [vmem:[%s3687_s6 + $0x18c8] sm:$0xff] }
  0xe0   : > { %v945_v14 = vld [vmem:[%s3687_s6 + $0x18e0] sm:$0xff]  ;;  %942 = vst [vmem:[%s3695_s7 + $0xc60] sm:$0xff] %v941_v12  ;;  %944 = vst [vmem:[%s3695_s7 + $0xc68] sm:$0xff] %v943_v13  ;;  %v947_v15 = vld [vmem:[%s3687_s6 + $0x18e8] sm:$0xff] }
  0xe1   : > { %946 = vst [vmem:[%s3695_s7 + $0xc70] sm:$0xff] %v945_v14  ;;  %v949_v16 = vld [vmem:[%s3687_s6 + $0x1900] sm:$0xff]  ;;  %v951_v17 = vld [vmem:[%s3687_s6 + $0x1908] sm:$0xff]  ;;  %948 = vst [vmem:[%s3695_s7 + $0xc78] sm:$0xff] %v947_v15 }
  0xe2   : > { %950 = vst [vmem:[%s3695_s7 + $0xc80] sm:$0xff] %v949_v16  ;;  %952 = vst [vmem:[%s3695_s7 + $0xc88] sm:$0xff] %v951_v17  ;;  %v953_v18 = vld [vmem:[%s3687_s6 + $0x1920] sm:$0xff]  ;;  %v955_v19 = vld [vmem:[%s3687_s6 + $0x1928] sm:$0xff] }
  0xe3   : > { %v957_v20 = vld [vmem:[%s3687_s6 + $0x1940] sm:$0xff]  ;;  %954 = vst [vmem:[%s3695_s7 + $0xc90] sm:$0xff] %v953_v18  ;;  %956 = vst [vmem:[%s3695_s7 + $0xc98] sm:$0xff] %v955_v19  ;;  %v959_v21 = vld [vmem:[%s3687_s6 + $0x1948] sm:$0xff] }
  0xe4   : > { %958 = vst [vmem:[%s3695_s7 + $0xca0] sm:$0xff] %v957_v20  ;;  %v961_v22 = vld [vmem:[%s3687_s6 + $0x1960] sm:$0xff]  ;;  %v963_v23 = vld [vmem:[%s3687_s6 + $0x1968] sm:$0xff]  ;;  %960 = vst [vmem:[%s3695_s7 + $0xca8] sm:$0xff] %v959_v21 }
  0xe5   : > { %962 = vst [vmem:[%s3695_s7 + $0xcb0] sm:$0xff] %v961_v22  ;;  %964 = vst [vmem:[%s3695_s7 + $0xcb8] sm:$0xff] %v963_v23  ;;  %v965_v24 = vld [vmem:[%s3687_s6 + $0x1980] sm:$0xff]  ;;  %v967_v25 = vld [vmem:[%s3687_s6 + $0x1988] sm:$0xff] }
  0xe6   : > { %v969_v26 = vld [vmem:[%s3687_s6 + $0x19a0] sm:$0xff]  ;;  %966 = vst [vmem:[%s3695_s7 + $0xcc0] sm:$0xff] %v965_v24  ;;  %968 = vst [vmem:[%s3695_s7 + $0xcc8] sm:$0xff] %v967_v25  ;;  %v971_v27 = vld [vmem:[%s3687_s6 + $0x19a8] sm:$0xff] }
  0xe7   : > { %970 = vst [vmem:[%s3695_s7 + $0xcd0] sm:$0xff] %v969_v26  ;;  %v973_v28 = vld [vmem:[%s3687_s6 + $0x19c0] sm:$0xff]  ;;  %v975_v29 = vld [vmem:[%s3687_s6 + $0x19c8] sm:$0xff]  ;;  %972 = vst [vmem:[%s3695_s7 + $0xcd8] sm:$0xff] %v971_v27 }
  0xe8   : > { %974 = vst [vmem:[%s3695_s7 + $0xce0] sm:$0xff] %v973_v28  ;;  %976 = vst [vmem:[%s3695_s7 + $0xce8] sm:$0xff] %v975_v29  ;;  %v977_v30 = vld [vmem:[%s3687_s6 + $0x19e0] sm:$0xff]  ;;  %v979_v31 = vld [vmem:[%s3687_s6 + $0x19e8] sm:$0xff] }
  0xe9   : > { %v981_v32 = vld [vmem:[%s3687_s6 + $0x1a00] sm:$0xff]  ;;  %978 = vst [vmem:[%s3695_s7 + $0xcf0] sm:$0xff] %v977_v30  ;;  %980 = vst [vmem:[%s3695_s7 + $0xcf8] sm:$0xff] %v979_v31  ;;  %v983_v33 = vld [vmem:[%s3687_s6 + $0x1a08] sm:$0xff] }
  0xea   : > { %982 = vst [vmem:[%s3695_s7 + $0xd00] sm:$0xff] %v981_v32  ;;  %v985_v34 = vld [vmem:[%s3687_s6 + $0x1a20] sm:$0xff]  ;;  %v987_v35 = vld [vmem:[%s3687_s6 + $0x1a28] sm:$0xff]  ;;  %984 = vst [vmem:[%s3695_s7 + $0xd08] sm:$0xff] %v983_v33 }
  0xeb   : > { %986 = vst [vmem:[%s3695_s7 + $0xd10] sm:$0xff] %v985_v34  ;;  %988 = vst [vmem:[%s3695_s7 + $0xd18] sm:$0xff] %v987_v35  ;;  %v989_v36 = vld [vmem:[%s3687_s6 + $0x1a40] sm:$0xff]  ;;  %v991_v37 = vld [vmem:[%s3687_s6 + $0x1a48] sm:$0xff] }
  0xec   : > { %v993_v38 = vld [vmem:[%s3687_s6 + $0x1a60] sm:$0xff]  ;;  %990 = vst [vmem:[%s3695_s7 + $0xd20] sm:$0xff] %v989_v36  ;;  %992 = vst [vmem:[%s3695_s7 + $0xd28] sm:$0xff] %v991_v37  ;;  %v995_v39 = vld [vmem:[%s3687_s6 + $0x1a68] sm:$0xff] }
  0xed   : > { %994 = vst [vmem:[%s3695_s7 + $0xd30] sm:$0xff] %v993_v38  ;;  %v997_v40 = vld [vmem:[%s3687_s6 + $0x1a80] sm:$0xff]  ;;  %v999_v41 = vld [vmem:[%s3687_s6 + $0x1a88] sm:$0xff]  ;;  %996 = vst [vmem:[%s3695_s7 + $0xd38] sm:$0xff] %v995_v39 }
  0xee   : > { %998 = vst [vmem:[%s3695_s7 + $0xd40] sm:$0xff] %v997_v40  ;;  %1000 = vst [vmem:[%s3695_s7 + $0xd48] sm:$0xff] %v999_v41  ;;  %v1001_v42 = vld [vmem:[%s3687_s6 + $0x1aa0] sm:$0xff]  ;;  %v1003_v43 = vld [vmem:[%s3687_s6 + $0x1aa8] sm:$0xff] }
  0xef   : > { %v1005_v44 = vld [vmem:[%s3687_s6 + $0x1ac0] sm:$0xff]  ;;  %1002 = vst [vmem:[%s3695_s7 + $0xd50] sm:$0xff] %v1001_v42  ;;  %1004 = vst [vmem:[%s3695_s7 + $0xd58] sm:$0xff] %v1003_v43  ;;  %v1007_v45 = vld [vmem:[%s3687_s6 + $0x1ac8] sm:$0xff] }
  0xf0   : > { %1006 = vst [vmem:[%s3695_s7 + $0xd60] sm:$0xff] %v1005_v44  ;;  %v1009_v46 = vld [vmem:[%s3687_s6 + $0x1ae0] sm:$0xff]  ;;  %v1011_v47 = vld [vmem:[%s3687_s6 + $0x1ae8] sm:$0xff]  ;;  %1008 = vst [vmem:[%s3695_s7 + $0xd68] sm:$0xff] %v1007_v45 }
  0xf1   : > { %1010 = vst [vmem:[%s3695_s7 + $0xd70] sm:$0xff] %v1009_v46  ;;  %1012 = vst [vmem:[%s3695_s7 + $0xd78] sm:$0xff] %v1011_v47  ;;  %v1013_v48 = vld [vmem:[%s3687_s6 + $0x1b00] sm:$0xff]  ;;  %v1015_v49 = vld [vmem:[%s3687_s6 + $0x1b08] sm:$0xff] }
  0xf2   : > { %v1017_v50 = vld [vmem:[%s3687_s6 + $0x1b20] sm:$0xff]  ;;  %1014 = vst [vmem:[%s3695_s7 + $0xd80] sm:$0xff] %v1013_v48  ;;  %1016 = vst [vmem:[%s3695_s7 + $0xd88] sm:$0xff] %v1015_v49  ;;  %v1019_v51 = vld [vmem:[%s3687_s6 + $0x1b28] sm:$0xff] }
  0xf3   : > { %1018 = vst [vmem:[%s3695_s7 + $0xd90] sm:$0xff] %v1017_v50  ;;  %v1021_v52 = vld [vmem:[%s3687_s6 + $0x1b40] sm:$0xff]  ;;  %v1023_v53 = vld [vmem:[%s3687_s6 + $0x1b48] sm:$0xff]  ;;  %1020 = vst [vmem:[%s3695_s7 + $0xd98] sm:$0xff] %v1019_v51 }
  0xf4   : > { %1022 = vst [vmem:[%s3695_s7 + $0xda0] sm:$0xff] %v1021_v52  ;;  %1024 = vst [vmem:[%s3695_s7 + $0xda8] sm:$0xff] %v1023_v53  ;;  %v1025_v54 = vld [vmem:[%s3687_s6 + $0x1b60] sm:$0xff]  ;;  %v1027_v55 = vld [vmem:[%s3687_s6 + $0x1b68] sm:$0xff] }
  0xf5   : > { %v1029_v56 = vld [vmem:[%s3687_s6 + $0x1b80] sm:$0xff]  ;;  %1026 = vst [vmem:[%s3695_s7 + $0xdb0] sm:$0xff] %v1025_v54  ;;  %1028 = vst [vmem:[%s3695_s7 + $0xdb8] sm:$0xff] %v1027_v55  ;;  %v1031_v57 = vld [vmem:[%s3687_s6 + $0x1b88] sm:$0xff] }
  0xf6   : > { %1030 = vst [vmem:[%s3695_s7 + $0xdc0] sm:$0xff] %v1029_v56  ;;  %v1033_v58 = vld [vmem:[%s3687_s6 + $0x1ba0] sm:$0xff]  ;;  %v1035_v59 = vld [vmem:[%s3687_s6 + $0x1ba8] sm:$0xff]  ;;  %1032 = vst [vmem:[%s3695_s7 + $0xdc8] sm:$0xff] %v1031_v57 }
  0xf7   : > { %1034 = vst [vmem:[%s3695_s7 + $0xdd0] sm:$0xff] %v1033_v58  ;;  %1036 = vst [vmem:[%s3695_s7 + $0xdd8] sm:$0xff] %v1035_v59  ;;  %v1037_v60 = vld [vmem:[%s3687_s6 + $0x1bc0] sm:$0xff]  ;;  %v1039_v61 = vld [vmem:[%s3687_s6 + $0x1bc8] sm:$0xff] }
  0xf8   : > { %v1041_v62 = vld [vmem:[%s3687_s6 + $0x1be0] sm:$0xff]  ;;  %1038 = vst [vmem:[%s3695_s7 + $0xde0] sm:$0xff] %v1037_v60  ;;  %1040 = vst [vmem:[%s3695_s7 + $0xde8] sm:$0xff] %v1039_v61  ;;  %v1043_v63 = vld [vmem:[%s3687_s6 + $0x1be8] sm:$0xff] }
  0xf9   : > { %1042 = vst [vmem:[%s3695_s7 + $0xdf0] sm:$0xff] %v1041_v62  ;;  %v1045_v0 = vld [vmem:[%s3687_s6 + $0x1c00] sm:$0xff]  ;;  %v1047_v1 = vld [vmem:[%s3687_s6 + $0x1c08] sm:$0xff]  ;;  %1044 = vst [vmem:[%s3695_s7 + $0xdf8] sm:$0xff] %v1043_v63 }
  0xfa   : > { %1046 = vst [vmem:[%s3695_s7 + $0xe00] sm:$0xff] %v1045_v0  ;;  %1048 = vst [vmem:[%s3695_s7 + $0xe08] sm:$0xff] %v1047_v1  ;;  %v1049_v2 = vld [vmem:[%s3687_s6 + $0x1c20] sm:$0xff]  ;;  %v1051_v3 = vld [vmem:[%s3687_s6 + $0x1c28] sm:$0xff] }
  0xfb   : > { %v1053_v4 = vld [vmem:[%s3687_s6 + $0x1c40] sm:$0xff]  ;;  %1050 = vst [vmem:[%s3695_s7 + $0xe10] sm:$0xff] %v1049_v2  ;;  %1052 = vst [vmem:[%s3695_s7 + $0xe18] sm:$0xff] %v1051_v3  ;;  %v1055_v5 = vld [vmem:[%s3687_s6 + $0x1c48] sm:$0xff] }
  0xfc   : > { %1054 = vst [vmem:[%s3695_s7 + $0xe20] sm:$0xff] %v1053_v4  ;;  %v1057_v6 = vld [vmem:[%s3687_s6 + $0x1c60] sm:$0xff]  ;;  %v1059_v7 = vld [vmem:[%s3687_s6 + $0x1c68] sm:$0xff]  ;;  %1056 = vst [vmem:[%s3695_s7 + $0xe28] sm:$0xff] %v1055_v5 }
  0xfd   : > { %1058 = vst [vmem:[%s3695_s7 + $0xe30] sm:$0xff] %v1057_v6  ;;  %1060 = vst [vmem:[%s3695_s7 + $0xe38] sm:$0xff] %v1059_v7  ;;  %v1061_v8 = vld [vmem:[%s3687_s6 + $0x1c80] sm:$0xff]  ;;  %v1063_v9 = vld [vmem:[%s3687_s6 + $0x1c88] sm:$0xff] }
  0xfe   : > { %v1065_v10 = vld [vmem:[%s3687_s6 + $0x1ca0] sm:$0xff]  ;;  %1062 = vst [vmem:[%s3695_s7 + $0xe40] sm:$0xff] %v1061_v8  ;;  %1064 = vst [vmem:[%s3695_s7 + $0xe48] sm:$0xff] %v1063_v9  ;;  %v1067_v11 = vld [vmem:[%s3687_s6 + $0x1ca8] sm:$0xff] }
  0xff   : > { %1066 = vst [vmem:[%s3695_s7 + $0xe50] sm:$0xff] %v1065_v10  ;;  %v1069_v12 = vld [vmem:[%s3687_s6 + $0x1cc0] sm:$0xff]  ;;  %v1071_v13 = vld [vmem:[%s3687_s6 + $0x1cc8] sm:$0xff]  ;;  %1068 = vst [vmem:[%s3695_s7 + $0xe58] sm:$0xff] %v1067_v11 }
 0x100   : > { %1070 = vst [vmem:[%s3695_s7 + $0xe60] sm:$0xff] %v1069_v12  ;;  %1072 = vst [vmem:[%s3695_s7 + $0xe68] sm:$0xff] %v1071_v13  ;;  %v1073_v14 = vld [vmem:[%s3687_s6 + $0x1ce0] sm:$0xff]  ;;  %v1075_v15 = vld [vmem:[%s3687_s6 + $0x1ce8] sm:$0xff] }
 0x101   : > { %v1077_v16 = vld [vmem:[%s3687_s6 + $0x1d00] sm:$0xff]  ;;  %1074 = vst [vmem:[%s3695_s7 + $0xe70] sm:$0xff] %v1073_v14  ;;  %1076 = vst [vmem:[%s3695_s7 + $0xe78] sm:$0xff] %v1075_v15  ;;  %v1079_v17 = vld [vmem:[%s3687_s6 + $0x1d08] sm:$0xff] }
 0x102   : > { %1078 = vst [vmem:[%s3695_s7 + $0xe80] sm:$0xff] %v1077_v16  ;;  %v1081_v18 = vld [vmem:[%s3687_s6 + $0x1d20] sm:$0xff]  ;;  %v1083_v19 = vld [vmem:[%s3687_s6 + $0x1d28] sm:$0xff]  ;;  %1080 = vst [vmem:[%s3695_s7 + $0xe88] sm:$0xff] %v1079_v17 }
 0x103   : > { %1082 = vst [vmem:[%s3695_s7 + $0xe90] sm:$0xff] %v1081_v18  ;;  %1084 = vst [vmem:[%s3695_s7 + $0xe98] sm:$0xff] %v1083_v19  ;;  %v1085_v20 = vld [vmem:[%s3687_s6 + $0x1d40] sm:$0xff]  ;;  %v1087_v21 = vld [vmem:[%s3687_s6 + $0x1d48] sm:$0xff] }
 0x104   : > { %v1089_v22 = vld [vmem:[%s3687_s6 + $0x1d60] sm:$0xff]  ;;  %1086 = vst [vmem:[%s3695_s7 + $0xea0] sm:$0xff] %v1085_v20  ;;  %1088 = vst [vmem:[%s3695_s7 + $0xea8] sm:$0xff] %v1087_v21  ;;  %v1091_v23 = vld [vmem:[%s3687_s6 + $0x1d68] sm:$0xff] }
 0x105   : > { %1090 = vst [vmem:[%s3695_s7 + $0xeb0] sm:$0xff] %v1089_v22  ;;  %v1093_v24 = vld [vmem:[%s3687_s6 + $0x1d80] sm:$0xff]  ;;  %v1095_v25 = vld [vmem:[%s3687_s6 + $0x1d88] sm:$0xff]  ;;  %1092 = vst [vmem:[%s3695_s7 + $0xeb8] sm:$0xff] %v1091_v23 }
 0x106   : > { %1094 = vst [vmem:[%s3695_s7 + $0xec0] sm:$0xff] %v1093_v24  ;;  %1096 = vst [vmem:[%s3695_s7 + $0xec8] sm:$0xff] %v1095_v25  ;;  %v1097_v26 = vld [vmem:[%s3687_s6 + $0x1da0] sm:$0xff]  ;;  %v1099_v27 = vld [vmem:[%s3687_s6 + $0x1da8] sm:$0xff] }
 0x107   : > { %v1101_v28 = vld [vmem:[%s3687_s6 + $0x1dc0] sm:$0xff]  ;;  %1098 = vst [vmem:[%s3695_s7 + $0xed0] sm:$0xff] %v1097_v26  ;;  %1100 = vst [vmem:[%s3695_s7 + $0xed8] sm:$0xff] %v1099_v27  ;;  %v1103_v29 = vld [vmem:[%s3687_s6 + $0x1dc8] sm:$0xff] }
 0x108   : > { %1102 = vst [vmem:[%s3695_s7 + $0xee0] sm:$0xff] %v1101_v28  ;;  %v1105_v30 = vld [vmem:[%s3687_s6 + $0x1de0] sm:$0xff]  ;;  %v1107_v31 = vld [vmem:[%s3687_s6 + $0x1de8] sm:$0xff]  ;;  %1104 = vst [vmem:[%s3695_s7 + $0xee8] sm:$0xff] %v1103_v29 }
 0x109   : > { %1106 = vst [vmem:[%s3695_s7 + $0xef0] sm:$0xff] %v1105_v30  ;;  %1108 = vst [vmem:[%s3695_s7 + $0xef8] sm:$0xff] %v1107_v31  ;;  %v1109_v32 = vld [vmem:[%s3687_s6 + $0x1e00] sm:$0xff]  ;;  %v1111_v33 = vld [vmem:[%s3687_s6 + $0x1e08] sm:$0xff] }
 0x10a   : > { %v1113_v34 = vld [vmem:[%s3687_s6 + $0x1e20] sm:$0xff]  ;;  %1110 = vst [vmem:[%s3695_s7 + $0xf00] sm:$0xff] %v1109_v32  ;;  %1112 = vst [vmem:[%s3695_s7 + $0xf08] sm:$0xff] %v1111_v33  ;;  %v1115_v35 = vld [vmem:[%s3687_s6 + $0x1e28] sm:$0xff] }
 0x10b   : > { %1114 = vst [vmem:[%s3695_s7 + $0xf10] sm:$0xff] %v1113_v34  ;;  %v1117_v36 = vld [vmem:[%s3687_s6 + $0x1e40] sm:$0xff]  ;;  %v1119_v37 = vld [vmem:[%s3687_s6 + $0x1e48] sm:$0xff]  ;;  %1116 = vst [vmem:[%s3695_s7 + $0xf18] sm:$0xff] %v1115_v35 }
 0x10c   : > { %1118 = vst [vmem:[%s3695_s7 + $0xf20] sm:$0xff] %v1117_v36  ;;  %1120 = vst [vmem:[%s3695_s7 + $0xf28] sm:$0xff] %v1119_v37  ;;  %v1121_v38 = vld [vmem:[%s3687_s6 + $0x1e60] sm:$0xff]  ;;  %v1123_v39 = vld [vmem:[%s3687_s6 + $0x1e68] sm:$0xff] }
 0x10d   : > { %v1125_v40 = vld [vmem:[%s3687_s6 + $0x1e80] sm:$0xff]  ;;  %1122 = vst [vmem:[%s3695_s7 + $0xf30] sm:$0xff] %v1121_v38  ;;  %1124 = vst [vmem:[%s3695_s7 + $0xf38] sm:$0xff] %v1123_v39  ;;  %v1127_v41 = vld [vmem:[%s3687_s6 + $0x1e88] sm:$0xff] }
 0x10e   : > { %1126 = vst [vmem:[%s3695_s7 + $0xf40] sm:$0xff] %v1125_v40  ;;  %v1129_v42 = vld [vmem:[%s3687_s6 + $0x1ea0] sm:$0xff]  ;;  %v1131_v43 = vld [vmem:[%s3687_s6 + $0x1ea8] sm:$0xff]  ;;  %1128 = vst [vmem:[%s3695_s7 + $0xf48] sm:$0xff] %v1127_v41 }
 0x10f   : > { %1130 = vst [vmem:[%s3695_s7 + $0xf50] sm:$0xff] %v1129_v42  ;;  %1132 = vst [vmem:[%s3695_s7 + $0xf58] sm:$0xff] %v1131_v43  ;;  %v1133_v44 = vld [vmem:[%s3687_s6 + $0x1ec0] sm:$0xff]  ;;  %v1135_v45 = vld [vmem:[%s3687_s6 + $0x1ec8] sm:$0xff] }
 0x110   : > { %v1137_v46 = vld [vmem:[%s3687_s6 + $0x1ee0] sm:$0xff]  ;;  %1134 = vst [vmem:[%s3695_s7 + $0xf60] sm:$0xff] %v1133_v44  ;;  %1136 = vst [vmem:[%s3695_s7 + $0xf68] sm:$0xff] %v1135_v45  ;;  %v1139_v47 = vld [vmem:[%s3687_s6 + $0x1ee8] sm:$0xff] }
 0x111   : > { %1138 = vst [vmem:[%s3695_s7 + $0xf70] sm:$0xff] %v1137_v46  ;;  %v1141_v48 = vld [vmem:[%s3687_s6 + $0x1f00] sm:$0xff]  ;;  %v1143_v49 = vld [vmem:[%s3687_s6 + $0x1f08] sm:$0xff]  ;;  %1140 = vst [vmem:[%s3695_s7 + $0xf78] sm:$0xff] %v1139_v47 }
 0x112   : > { %1142 = vst [vmem:[%s3695_s7 + $0xf80] sm:$0xff] %v1141_v48  ;;  %1144 = vst [vmem:[%s3695_s7 + $0xf88] sm:$0xff] %v1143_v49  ;;  %v1145_v50 = vld [vmem:[%s3687_s6 + $0x1f20] sm:$0xff]  ;;  %v1147_v51 = vld [vmem:[%s3687_s6 + $0x1f28] sm:$0xff] }
 0x113   : > { %v1149_v52 = vld [vmem:[%s3687_s6 + $0x1f40] sm:$0xff]  ;;  %1146 = vst [vmem:[%s3695_s7 + $0xf90] sm:$0xff] %v1145_v50  ;;  %1148 = vst [vmem:[%s3695_s7 + $0xf98] sm:$0xff] %v1147_v51  ;;  %v1151_v53 = vld [vmem:[%s3687_s6 + $0x1f48] sm:$0xff] }
 0x114   : > { %1150 = vst [vmem:[%s3695_s7 + $0xfa0] sm:$0xff] %v1149_v52  ;;  %v1153_v54 = vld [vmem:[%s3687_s6 + $0x1f60] sm:$0xff]  ;;  %v1155_v55 = vld [vmem:[%s3687_s6 + $0x1f68] sm:$0xff]  ;;  %1152 = vst [vmem:[%s3695_s7 + $0xfa8] sm:$0xff] %v1151_v53 }
 0x115   : > { %1154 = vst [vmem:[%s3695_s7 + $0xfb0] sm:$0xff] %v1153_v54  ;;  %1156 = vst [vmem:[%s3695_s7 + $0xfb8] sm:$0xff] %v1155_v55  ;;  %v1157_v56 = vld [vmem:[%s3687_s6 + $0x1f80] sm:$0xff]  ;;  %v1159_v57 = vld [vmem:[%s3687_s6 + $0x1f88] sm:$0xff] }
 0x116   : > { %v1161_v58 = vld [vmem:[%s3687_s6 + $0x1fa0] sm:$0xff]  ;;  %1158 = vst [vmem:[%s3695_s7 + $0xfc0] sm:$0xff] %v1157_v56  ;;  %1160 = vst [vmem:[%s3695_s7 + $0xfc8] sm:$0xff] %v1159_v57  ;;  %v1163_v59 = vld [vmem:[%s3687_s6 + $0x1fa8] sm:$0xff] }
 0x117   : > { %1162 = vst [vmem:[%s3695_s7 + $0xfd0] sm:$0xff] %v1161_v58  ;;  %v1165_v60 = vld [vmem:[%s3687_s6 + $0x1fc0] sm:$0xff]  ;;  %v1167_v61 = vld [vmem:[%s3687_s6 + $0x1fc8] sm:$0xff]  ;;  %1164 = vst [vmem:[%s3695_s7 + $0xfd8] sm:$0xff] %v1163_v59 }
 0x118   : > { %1166 = vst [vmem:[%s3695_s7 + $0xfe0] sm:$0xff] %v1165_v60  ;;  %1168 = vst [vmem:[%s3695_s7 + $0xfe8] sm:$0xff] %v1167_v61  ;;  %v1169_v62 = vld [vmem:[%s3687_s6 + $0x1fe0] sm:$0xff]  ;;  %v1171_v63 = vld [vmem:[%s3687_s6 + $0x1fe8] sm:$0xff] }
 0x119   : > { %v1173_v0 = vld [vmem:[%s3687_s6 + $0x2000] sm:$0xff]  ;;  %1170 = vst [vmem:[%s3695_s7 + $0xff0] sm:$0xff] %v1169_v62  ;;  %1172 = vst [vmem:[%s3695_s7 + $0xff8] sm:$0xff] %v1171_v63  ;;  %v1175_v1 = vld [vmem:[%s3687_s6 + $0x2008] sm:$0xff] }
 0x11a   : > { %1174 = vst [vmem:[%s3695_s7 + $0x1000] sm:$0xff] %v1173_v0  ;;  %v1177_v2 = vld [vmem:[%s3687_s6 + $0x2020] sm:$0xff]  ;;  %v1179_v3 = vld [vmem:[%s3687_s6 + $0x2028] sm:$0xff]  ;;  %1176 = vst [vmem:[%s3695_s7 + $0x1008] sm:$0xff] %v1175_v1 }
 0x11b   : > { %1178 = vst [vmem:[%s3695_s7 + $0x1010] sm:$0xff] %v1177_v2  ;;  %1180 = vst [vmem:[%s3695_s7 + $0x1018] sm:$0xff] %v1179_v3  ;;  %v1181_v4 = vld [vmem:[%s3687_s6 + $0x2040] sm:$0xff]  ;;  %v1183_v5 = vld [vmem:[%s3687_s6 + $0x2048] sm:$0xff] }
 0x11c   : > { %v1185_v6 = vld [vmem:[%s3687_s6 + $0x2060] sm:$0xff]  ;;  %1182 = vst [vmem:[%s3695_s7 + $0x1020] sm:$0xff] %v1181_v4  ;;  %1184 = vst [vmem:[%s3695_s7 + $0x1028] sm:$0xff] %v1183_v5  ;;  %v1187_v7 = vld [vmem:[%s3687_s6 + $0x2068] sm:$0xff] }
 0x11d   : > { %1186 = vst [vmem:[%s3695_s7 + $0x1030] sm:$0xff] %v1185_v6  ;;  %v1189_v8 = vld [vmem:[%s3687_s6 + $0x2080] sm:$0xff]  ;;  %v1191_v9 = vld [vmem:[%s3687_s6 + $0x2088] sm:$0xff]  ;;  %1188 = vst [vmem:[%s3695_s7 + $0x1038] sm:$0xff] %v1187_v7 }
 0x11e   : > { %1190 = vst [vmem:[%s3695_s7 + $0x1040] sm:$0xff] %v1189_v8  ;;  %1192 = vst [vmem:[%s3695_s7 + $0x1048] sm:$0xff] %v1191_v9  ;;  %v1193_v10 = vld [vmem:[%s3687_s6 + $0x20a0] sm:$0xff]  ;;  %v1195_v11 = vld [vmem:[%s3687_s6 + $0x20a8] sm:$0xff] }
 0x11f   : > { %v1197_v12 = vld [vmem:[%s3687_s6 + $0x20c0] sm:$0xff]  ;;  %1194 = vst [vmem:[%s3695_s7 + $0x1050] sm:$0xff] %v1193_v10  ;;  %1196 = vst [vmem:[%s3695_s7 + $0x1058] sm:$0xff] %v1195_v11  ;;  %v1199_v13 = vld [vmem:[%s3687_s6 + $0x20c8] sm:$0xff] }
 0x120   : > { %1198 = vst [vmem:[%s3695_s7 + $0x1060] sm:$0xff] %v1197_v12  ;;  %v1201_v14 = vld [vmem:[%s3687_s6 + $0x20e0] sm:$0xff]  ;;  %v1203_v15 = vld [vmem:[%s3687_s6 + $0x20e8] sm:$0xff]  ;;  %1200 = vst [vmem:[%s3695_s7 + $0x1068] sm:$0xff] %v1199_v13 }
 0x121   : > { %1202 = vst [vmem:[%s3695_s7 + $0x1070] sm:$0xff] %v1201_v14  ;;  %1204 = vst [vmem:[%s3695_s7 + $0x1078] sm:$0xff] %v1203_v15  ;;  %v1205_v16 = vld [vmem:[%s3687_s6 + $0x2100] sm:$0xff]  ;;  %v1207_v17 = vld [vmem:[%s3687_s6 + $0x2108] sm:$0xff] }
 0x122   : > { %v1209_v18 = vld [vmem:[%s3687_s6 + $0x2120] sm:$0xff]  ;;  %1206 = vst [vmem:[%s3695_s7 + $0x1080] sm:$0xff] %v1205_v16  ;;  %1208 = vst [vmem:[%s3695_s7 + $0x1088] sm:$0xff] %v1207_v17  ;;  %v1211_v19 = vld [vmem:[%s3687_s6 + $0x2128] sm:$0xff] }
 0x123   : > { %1210 = vst [vmem:[%s3695_s7 + $0x1090] sm:$0xff] %v1209_v18  ;;  %v1213_v20 = vld [vmem:[%s3687_s6 + $0x2140] sm:$0xff]  ;;  %v1215_v21 = vld [vmem:[%s3687_s6 + $0x2148] sm:$0xff]  ;;  %1212 = vst [vmem:[%s3695_s7 + $0x1098] sm:$0xff] %v1211_v19 }
 0x124   : > { %1214 = vst [vmem:[%s3695_s7 + $0x10a0] sm:$0xff] %v1213_v20  ;;  %1216 = vst [vmem:[%s3695_s7 + $0x10a8] sm:$0xff] %v1215_v21  ;;  %v1217_v22 = vld [vmem:[%s3687_s6 + $0x2160] sm:$0xff]  ;;  %v1219_v23 = vld [vmem:[%s3687_s6 + $0x2168] sm:$0xff] }
 0x125   : > { %v1221_v24 = vld [vmem:[%s3687_s6 + $0x2180] sm:$0xff]  ;;  %1218 = vst [vmem:[%s3695_s7 + $0x10b0] sm:$0xff] %v1217_v22  ;;  %1220 = vst [vmem:[%s3695_s7 + $0x10b8] sm:$0xff] %v1219_v23  ;;  %v1223_v25 = vld [vmem:[%s3687_s6 + $0x2188] sm:$0xff] }
 0x126   : > { %1222 = vst [vmem:[%s3695_s7 + $0x10c0] sm:$0xff] %v1221_v24  ;;  %v1225_v26 = vld [vmem:[%s3687_s6 + $0x21a0] sm:$0xff]  ;;  %v1227_v27 = vld [vmem:[%s3687_s6 + $0x21a8] sm:$0xff]  ;;  %1224 = vst [vmem:[%s3695_s7 + $0x10c8] sm:$0xff] %v1223_v25 }
 0x127   : > { %1226 = vst [vmem:[%s3695_s7 + $0x10d0] sm:$0xff] %v1225_v26  ;;  %1228 = vst [vmem:[%s3695_s7 + $0x10d8] sm:$0xff] %v1227_v27  ;;  %v1229_v28 = vld [vmem:[%s3687_s6 + $0x21c0] sm:$0xff]  ;;  %v1231_v29 = vld [vmem:[%s3687_s6 + $0x21c8] sm:$0xff] }
 0x128   : > { %v1233_v30 = vld [vmem:[%s3687_s6 + $0x21e0] sm:$0xff]  ;;  %1230 = vst [vmem:[%s3695_s7 + $0x10e0] sm:$0xff] %v1229_v28  ;;  %1232 = vst [vmem:[%s3695_s7 + $0x10e8] sm:$0xff] %v1231_v29  ;;  %v1235_v31 = vld [vmem:[%s3687_s6 + $0x21e8] sm:$0xff] }
 0x129   : > { %1234 = vst [vmem:[%s3695_s7 + $0x10f0] sm:$0xff] %v1233_v30  ;;  %v1237_v32 = vld [vmem:[%s3687_s6 + $0x2200] sm:$0xff]  ;;  %v1239_v33 = vld [vmem:[%s3687_s6 + $0x2208] sm:$0xff]  ;;  %1236 = vst [vmem:[%s3695_s7 + $0x10f8] sm:$0xff] %v1235_v31 }
 0x12a   : > { %1238 = vst [vmem:[%s3695_s7 + $0x1100] sm:$0xff] %v1237_v32  ;;  %1240 = vst [vmem:[%s3695_s7 + $0x1108] sm:$0xff] %v1239_v33  ;;  %v1241_v34 = vld [vmem:[%s3687_s6 + $0x2220] sm:$0xff]  ;;  %v1243_v35 = vld [vmem:[%s3687_s6 + $0x2228] sm:$0xff] }
 0x12b   : > { %v1245_v36 = vld [vmem:[%s3687_s6 + $0x2240] sm:$0xff]  ;;  %1242 = vst [vmem:[%s3695_s7 + $0x1110] sm:$0xff] %v1241_v34  ;;  %1244 = vst [vmem:[%s3695_s7 + $0x1118] sm:$0xff] %v1243_v35  ;;  %v1247_v37 = vld [vmem:[%s3687_s6 + $0x2248] sm:$0xff] }
 0x12c   : > { %1246 = vst [vmem:[%s3695_s7 + $0x1120] sm:$0xff] %v1245_v36  ;;  %v1249_v38 = vld [vmem:[%s3687_s6 + $0x2260] sm:$0xff]  ;;  %v1251_v39 = vld [vmem:[%s3687_s6 + $0x2268] sm:$0xff]  ;;  %1248 = vst [vmem:[%s3695_s7 + $0x1128] sm:$0xff] %v1247_v37 }
 0x12d   : > { %1250 = vst [vmem:[%s3695_s7 + $0x1130] sm:$0xff] %v1249_v38  ;;  %1252 = vst [vmem:[%s3695_s7 + $0x1138] sm:$0xff] %v1251_v39  ;;  %v1253_v40 = vld [vmem:[%s3687_s6 + $0x2280] sm:$0xff]  ;;  %v1255_v41 = vld [vmem:[%s3687_s6 + $0x2288] sm:$0xff] }
 0x12e   : > { %v1257_v42 = vld [vmem:[%s3687_s6 + $0x22a0] sm:$0xff]  ;;  %1254 = vst [vmem:[%s3695_s7 + $0x1140] sm:$0xff] %v1253_v40  ;;  %1256 = vst [vmem:[%s3695_s7 + $0x1148] sm:$0xff] %v1255_v41  ;;  %v1259_v43 = vld [vmem:[%s3687_s6 + $0x22a8] sm:$0xff] }
 0x12f   : > { %1258 = vst [vmem:[%s3695_s7 + $0x1150] sm:$0xff] %v1257_v42  ;;  %v1261_v44 = vld [vmem:[%s3687_s6 + $0x22c0] sm:$0xff]  ;;  %v1263_v45 = vld [vmem:[%s3687_s6 + $0x22c8] sm:$0xff]  ;;  %1260 = vst [vmem:[%s3695_s7 + $0x1158] sm:$0xff] %v1259_v43 }
 0x130   : > { %1262 = vst [vmem:[%s3695_s7 + $0x1160] sm:$0xff] %v1261_v44  ;;  %1264 = vst [vmem:[%s3695_s7 + $0x1168] sm:$0xff] %v1263_v45  ;;  %v1265_v46 = vld [vmem:[%s3687_s6 + $0x22e0] sm:$0xff]  ;;  %v1267_v47 = vld [vmem:[%s3687_s6 + $0x22e8] sm:$0xff] }
 0x131   : > { %v1269_v48 = vld [vmem:[%s3687_s6 + $0x2300] sm:$0xff]  ;;  %1266 = vst [vmem:[%s3695_s7 + $0x1170] sm:$0xff] %v1265_v46  ;;  %1268 = vst [vmem:[%s3695_s7 + $0x1178] sm:$0xff] %v1267_v47  ;;  %v1271_v49 = vld [vmem:[%s3687_s6 + $0x2308] sm:$0xff] }
 0x132   : > { %1270 = vst [vmem:[%s3695_s7 + $0x1180] sm:$0xff] %v1269_v48  ;;  %v1273_v50 = vld [vmem:[%s3687_s6 + $0x2320] sm:$0xff]  ;;  %v1275_v51 = vld [vmem:[%s3687_s6 + $0x2328] sm:$0xff]  ;;  %1272 = vst [vmem:[%s3695_s7 + $0x1188] sm:$0xff] %v1271_v49 }
 0x133   : > { %1274 = vst [vmem:[%s3695_s7 + $0x1190] sm:$0xff] %v1273_v50  ;;  %1276 = vst [vmem:[%s3695_s7 + $0x1198] sm:$0xff] %v1275_v51  ;;  %v1277_v52 = vld [vmem:[%s3687_s6 + $0x2340] sm:$0xff]  ;;  %v1279_v53 = vld [vmem:[%s3687_s6 + $0x2348] sm:$0xff] }
 0x134   : > { %v1281_v54 = vld [vmem:[%s3687_s6 + $0x2360] sm:$0xff]  ;;  %1278 = vst [vmem:[%s3695_s7 + $0x11a0] sm:$0xff] %v1277_v52  ;;  %1280 = vst [vmem:[%s3695_s7 + $0x11a8] sm:$0xff] %v1279_v53  ;;  %v1283_v55 = vld [vmem:[%s3687_s6 + $0x2368] sm:$0xff] }
 0x135   : > { %1282 = vst [vmem:[%s3695_s7 + $0x11b0] sm:$0xff] %v1281_v54  ;;  %v1285_v56 = vld [vmem:[%s3687_s6 + $0x2380] sm:$0xff]  ;;  %v1287_v57 = vld [vmem:[%s3687_s6 + $0x2388] sm:$0xff]  ;;  %1284 = vst [vmem:[%s3695_s7 + $0x11b8] sm:$0xff] %v1283_v55 }
 0x136   : > { %1286 = vst [vmem:[%s3695_s7 + $0x11c0] sm:$0xff] %v1285_v56  ;;  %1288 = vst [vmem:[%s3695_s7 + $0x11c8] sm:$0xff] %v1287_v57  ;;  %v1289_v58 = vld [vmem:[%s3687_s6 + $0x23a0] sm:$0xff]  ;;  %v1291_v59 = vld [vmem:[%s3687_s6 + $0x23a8] sm:$0xff] }
 0x137   : > { %v1293_v60 = vld [vmem:[%s3687_s6 + $0x23c0] sm:$0xff]  ;;  %1290 = vst [vmem:[%s3695_s7 + $0x11d0] sm:$0xff] %v1289_v58  ;;  %1292 = vst [vmem:[%s3695_s7 + $0x11d8] sm:$0xff] %v1291_v59  ;;  %v1295_v61 = vld [vmem:[%s3687_s6 + $0x23c8] sm:$0xff] }
 0x138   : > { %1294 = vst [vmem:[%s3695_s7 + $0x11e0] sm:$0xff] %v1293_v60  ;;  %v1297_v62 = vld [vmem:[%s3687_s6 + $0x23e0] sm:$0xff]  ;;  %v1299_v63 = vld [vmem:[%s3687_s6 + $0x23e8] sm:$0xff]  ;;  %1296 = vst [vmem:[%s3695_s7 + $0x11e8] sm:$0xff] %v1295_v61 }
 0x139   : > { %1298 = vst [vmem:[%s3695_s7 + $0x11f0] sm:$0xff] %v1297_v62  ;;  %1300 = vst [vmem:[%s3695_s7 + $0x11f8] sm:$0xff] %v1299_v63 }
 0x13a PF: > { %p2917_p11 = scmp.ge.s32.totalorder %s3589_s17, 1  ;;  %p1305_p12 = scmp.lt.s32.totalorder %s3589_s17, 5 }
 0x13c   : > { %p1306_p13 = pnand %p2917_p11, %p1305_p12 }
 0x13d   : > { %s1312_s8 = sand.u32 (!%p1306_p13), 1, %s3565_s11   ;;  %p1337_p0 = scmp.lt.s32.totalorder (!%p1306_p13), %s3577_s14, 1 }
 0x13e   : > { %1309 = sbr.rel (%p1306_p13) target bundleno = 904 (0x388), region = 47  ;;  %s1334_s29 = sand.u32 (!%p1306_p13), 1, %s3557_s9  }
 0x13f   : > { %s3438_s18 = smul.u32 (!%p1306_p13), 4608, %s1312_s8 }
 0x140   : > { %s3439_s30 = smul.u32 (!%p1306_p13), 48, %s1334_s29 }
 0x141   : > { %s4846_s21 = scalar_lea.vmem (!%p1306_p13), [#allocation2], %s3438_s18 }
 0x142   : > { %s5483_s3 = scalar_lea.vmem (!%p1306_p13), [#allocation3], %s3439_s30 }
 0x143   : > { %v2950_v0 = vld [vmem:[%s4846_s21 + $0x2f8] sm:$0xff]  ;;  %v2949_v2 = vld [vmem:[%s4846_s21 + $0x2f0] sm:$0xff]  ;;  %v2948_v4 = vld [vmem:[%s4846_s21 + $0x2e8] sm:$0xff]  ;;  %s4944_s11 = scalar_select %p1337_p0, %s3577_s14, 1  ;;  %vm1483_vm0 = vcmask 1046528   ;;  %vm1707_vm1 = vcmask 1045504  }
 0x144   : > { %v1377_v1 = vld [vmem:[%s4846_s21 + $0xf8] sm:$0xff]  ;;  %1492 = vmatprep.subr.mxu0 %v2950_v0  ;;  %v1376_v3 = vld [vmem:[%s4846_s21 + $0xf0] sm:$0xff]  ;;  %v1375_v5 = vld [vmem:[%s4846_s21 + $0xe8] sm:$0xff]  ;;  %vm1862_vm2 = vcmask 1043456   ;;  %vm2017_vm3 = vcmask 1042432   ;;  %vm2172_vm4 = vcmask 1041408  }
 0x145   : > { %1563 = vmatprep.subr.mxu1 %v1377_v1  ;;  %1493 = vmatpush1.msra.mxu0 %v2949_v2  ;;  %v2947_v6 = vld [vmem:[%s4846_s21 + $0x2e0] sm:$0xff]  ;;  %v2946_v8 = vld [vmem:[%s4846_s21 + $0x2d8] sm:$0xff]  ;;  %v2945_v10 = vld [vmem:[%s4846_s21 + $0x2d0] sm:$0xff]  ;;  %s3440_s22 = smul.u32 48, %s4944_s11  ;;  %s3432_s9 = sshll.u32 (%p3674_p9), %s3573_s13, 1 }
 0x146   : > { %1564 = vmatpush1.msra.mxu1 %v1376_v3  ;;  %v1374_v7 = vld [vmem:[%s4846_s21 + $0xe0] sm:$0xff]  ;;  %1494 = vmatprep.subr.mxu0 %v2948_v4  ;;  %v1373_v9 = vld [vmem:[%s4846_s21 + $0xd8] sm:$0xff]  ;;  %v1372_v11 = vld [vmem:[%s4846_s21 + $0xd0] sm:$0xff]  ;;  %s3441_s4 = smul.u32 (%p3674_p9), 12, %s3577_s14 }
 0x147   : > { %1565 = vmatprep.subr.mxu1 %v1375_v5  ;;  %1495 = vmatpush1.msra.mxu0 %v2947_v6  ;;  %v2944_v12 = vld [vmem:[%s4846_s21 + $0x2c8] sm:$0xff]  ;;  %v2943_v14 = vld [vmem:[%s4846_s21 + $0x2c0] sm:$0xff]  ;;  %v2942_v16 = vld [vmem:[%s4846_s21 + $0x2b8] sm:$0xff]  ;;  %s4966_s26 = scalar_lea.vmem %s5535_s0, %s3440_s22 }
 0x148   : > { %1566 = vmatpush1.msra.mxu1 %v1374_v7  ;;  %v1371_v13 = vld [vmem:[%s4846_s21 + $0xc8] sm:$0xff]  ;;  %1496 = vmatprep.subr.mxu0 %v2946_v8  ;;  %v1370_v15 = vld [vmem:[%s4846_s21 + $0xc0] sm:$0xff]  ;;  %v1369_v17 = vld [vmem:[%s4846_s21 + $0xb8] sm:$0xff]  ;;  %s2798_s5 = sadd.s32 (%p3674_p9), %s3441_s4, %s3432_s9 }
 0x149   : > { %1567 = vmatprep.subr.mxu1 %v1373_v9  ;;  %1497 = vmatpush1.msra.mxu0 %v2945_v10  ;;  %v2941_v18 = vld [vmem:[%s4846_s21 + $0x2b0] sm:$0xff]  ;;  %v2940_v20 = vld [vmem:[%s4846_s21 + $0x2a8] sm:$0xff]  ;;  %v2939_v22 = vld [vmem:[%s4846_s21 + $0x2a0] sm:$0xff]  ;;  %s3433_s6 = sshll.u32 (%p3674_p9), %s2798_s5, 3 }
 0x14a   : > { %1568 = vmatpush1.msra.mxu1 %v1372_v11  ;;  %1498 = vmatprep.subr.mxu0 %v2944_v12  ;;  %v1368_v19 = vld [vmem:[%s4846_s21 + $0xb0] sm:$0xff]  ;;  %v1367_v21 = vld [vmem:[%s4846_s21 + $0xa8] sm:$0xff]  ;;  %v1366_v23 = vld [vmem:[%s4846_s21 + $0xa0] sm:$0xff]  ;;  %s2800_s8 = scalar_lea.vmem (%p3674_p9), %s5537_s2, %s3433_s6 }
 0x14b   : > { %1569 = vmatprep.subr.mxu1 %v1371_v13  ;;  %1499 = vmatpush1.msra.mxu0 %v2943_v14  ;;  %v2938_v24 = vld [vmem:[%s4846_s21 + $0x298] sm:$0xff]  ;;  %v2937_v26 = vld [vmem:[%s4846_s21 + $0x290] sm:$0xff]  ;;  %v2936_v28 = vld [vmem:[%s4846_s21 + $0x288] sm:$0xff] }
 0x14c   : > { %1570 = vmatpush1.msra.mxu1 %v1370_v15  ;;  %1500 = vmatprep.subr.mxu0 %v2942_v16  ;;  %v1365_v25 = vld [vmem:[%s4846_s21 + $0x98] sm:$0xff]  ;;  %v1364_v27 = vld [vmem:[%s4846_s21 + $0x90] sm:$0xff]  ;;  %v1363_v29 = vld [vmem:[%s4846_s21 + $0x88] sm:$0xff] }
 0x14d   : > { %1571 = vmatprep.subr.mxu1 %v1369_v17  ;;  %1501 = vmatpush1.msra.mxu0 %v2941_v18  ;;  %v2935_v30 = vld [vmem:[%s4846_s21 + $0x280] sm:$0xff]  ;;  %v2934_v32 = vld [vmem:[%s4846_s21 + $0x278] sm:$0xff]  ;;  %v2933_v34 = vld [vmem:[%s4846_s21 + $0x270] sm:$0xff] }
 0x14e   : > { %1572 = vmatpush1.msra.mxu1 %v1368_v19  ;;  %1502 = vmatprep.subr.mxu0 %v2940_v20  ;;  %v1362_v31 = vld [vmem:[%s4846_s21 + $0x80] sm:$0xff]  ;;  %v1361_v33 = vld [vmem:[%s4846_s21 + $0x78] sm:$0xff]  ;;  %v1360_v35 = vld [vmem:[%s4846_s21 + $0x70] sm:$0xff] }
 0x14f   : > { %1573 = vmatprep.subr.mxu1 %v1367_v21  ;;  %1503 = vmatpush1.msra.mxu0 %v2939_v22  ;;  %v2932_v36 = vld [vmem:[%s4846_s21 + $0x268] sm:$0xff]  ;;  %v2931_v38 = vld [vmem:[%s4846_s21 + $0x260] sm:$0xff]  ;;  %v2930_v40 = vld [vmem:[%s4846_s21 + $0x258] sm:$0xff] }
 0x150   : > { %1574 = vmatpush1.msra.mxu1 %v1366_v23  ;;  %1504 = vmatprep.subr.mxu0 %v2938_v24  ;;  %v1359_v37 = vld [vmem:[%s4846_s21 + $0x68] sm:$0xff]  ;;  %v1358_v39 = vld [vmem:[%s4846_s21 + $0x60] sm:$0xff]  ;;  %v1357_v41 = vld [vmem:[%s4846_s21 + $0x58] sm:$0xff] }
 0x151   : > { %1575 = vmatprep.subr.mxu1 %v1365_v25  ;;  %1505 = vmatpush1.msra.mxu0 %v2937_v26  ;;  %v2929_v42 = vld [vmem:[%s4846_s21 + $0x250] sm:$0xff]  ;;  %v2928_v44 = vld [vmem:[%s4846_s21 + $0x248] sm:$0xff]  ;;  %v2927_v46 = vld [vmem:[%s4846_s21 + $0x240] sm:$0xff] }
 0x152   : > { %1576 = vmatpush1.msra.mxu1 %v1364_v27  ;;  %1506 = vmatprep.subr.mxu0 %v2936_v28  ;;  %v1356_v43 = vld [vmem:[%s4846_s21 + $0x50] sm:$0xff]  ;;  %v1355_v45 = vld [vmem:[%s4846_s21 + $0x48] sm:$0xff]  ;;  %v1354_v47 = vld [vmem:[%s4846_s21 + $0x40] sm:$0xff] }
 0x153   : > { %1577 = vmatprep.subr.mxu1 %v1363_v29  ;;  %1507 = vmatpush1.msra.mxu0 %v2935_v30  ;;  %v2926_v48 = vld [vmem:[%s4846_s21 + $0x238] sm:$0xff]  ;;  %v2925_v50 = vld [vmem:[%s4846_s21 + $0x230] sm:$0xff]  ;;  %v2924_v52 = vld [vmem:[%s4846_s21 + $0x228] sm:$0xff] }
 0x154   : > { %1578 = vmatpush1.msra.mxu1 %v1362_v31  ;;  %1508 = vmatprep.subr.mxu0 %v2934_v32  ;;  %v1353_v49 = vld [vmem:[%s4846_s21 + $0x38] sm:$0xff]  ;;  %v1352_v51 = vld [vmem:[%s4846_s21 + $0x30] sm:$0xff]  ;;  %v1351_v53 = vld [vmem:[%s4846_s21 + $0x28] sm:$0xff] }
 0x155   : > { %1579 = vmatprep.subr.mxu1 %v1361_v33  ;;  %1509 = vmatpush1.msra.mxu0 %v2933_v34  ;;  %v2923_v54 = vld [vmem:[%s4846_s21 + $0x220] sm:$0xff]  ;;  %v2922_v56 = vld [vmem:[%s4846_s21 + $0x218] sm:$0xff]  ;;  %v2921_v58 = vld [vmem:[%s4846_s21 + $0x210] sm:$0xff] }
 0x156   : > { %1580 = vmatpush1.msra.mxu1 %v1360_v35  ;;  %1510 = vmatprep.subr.mxu0 %v2932_v36  ;;  %v1350_v55 = vld [vmem:[%s4846_s21 + $0x20] sm:$0xff]  ;;  %v1349_v57 = vld [vmem:[%s4846_s21 + $0x18] sm:$0xff]  ;;  %v1348_v59 = vld [vmem:[%s4846_s21 + $0x10] sm:$0xff] }
 0x157   : > { %1581 = vmatprep.subr.mxu1 %v1359_v37  ;;  %1511 = vmatpush1.msra.mxu0 %v2931_v38  ;;  %v2920_v60 = vld [vmem:[%s4846_s21 + $0x208] sm:$0xff]  ;;  %v2919_v62 = vld [vmem:[%s4846_s21 + $0x200] sm:$0xff]  ;;  %v2982_v0 = vld [vmem:[%s4846_s21 + $0x3f8] sm:$0xff] }
 0x158   : > { %1582 = vmatpush1.msra.mxu1 %v1358_v39  ;;  %1512 = vmatprep.subr.mxu0 %v2930_v40  ;;  %v1347_v61 = vld [vmem:[%s4846_s21 + $0x8] sm:$0xff]  ;;  %v1346_v63 = vld [vmem:[%s4846_s21] sm:$0xff]  ;;  %v1409_v1 = vld [vmem:[%s4846_s21 + $0x1f8] sm:$0xff] }
 0x159   : > { %1583 = vmatprep.subr.mxu1 %v1357_v41  ;;  %1513 = vmatpush1.msra.mxu0 %v2929_v42  ;;  %v2981_v2 = vld [vmem:[%s4846_s21 + $0x3f0] sm:$0xff]  ;;  %v2980_v4 = vld [vmem:[%s4846_s21 + $0x3e8] sm:$0xff]  ;;  %v2979_v6 = vld [vmem:[%s4846_s21 + $0x3e0] sm:$0xff] }
 0x15a   : > { %1584 = vmatpush1.msra.mxu1 %v1356_v43  ;;  %1514 = vmatprep.subr.mxu0 %v2928_v44  ;;  %v1408_v3 = vld [vmem:[%s4846_s21 + $0x1f0] sm:$0xff]  ;;  %v1407_v5 = vld [vmem:[%s4846_s21 + $0x1e8] sm:$0xff]  ;;  %v1406_v7 = vld [vmem:[%s4846_s21 + $0x1e0] sm:$0xff] }
 0x15b   : > { %1585 = vmatprep.subr.mxu1 %v1355_v45  ;;  %1515 = vmatpush1.msra.mxu0 %v2927_v46  ;;  %v2978_v8 = vld [vmem:[%s4846_s21 + $0x3d8] sm:$0xff]  ;;  %v2977_v10 = vld [vmem:[%s4846_s21 + $0x3d0] sm:$0xff]  ;;  %v2976_v12 = vld [vmem:[%s4846_s21 + $0x3c8] sm:$0xff] }
 0x15c   : > { %1586 = vmatpush1.msra.mxu1 %v1354_v47  ;;  %1516 = vmatprep.subr.mxu0 %v2926_v48  ;;  %v1405_v9 = vld [vmem:[%s4846_s21 + $0x1d8] sm:$0xff]  ;;  %v1404_v11 = vld [vmem:[%s4846_s21 + $0x1d0] sm:$0xff]  ;;  %v1403_v13 = vld [vmem:[%s4846_s21 + $0x1c8] sm:$0xff] }
 0x15d   : > { %1587 = vmatprep.subr.mxu1 %v1353_v49  ;;  %1517 = vmatpush1.msra.mxu0 %v2925_v50  ;;  %v2975_v14 = vld [vmem:[%s4846_s21 + $0x3c0] sm:$0xff]  ;;  %v2974_v16 = vld [vmem:[%s4846_s21 + $0x3b8] sm:$0xff]  ;;  %v2973_v18 = vld [vmem:[%s4846_s21 + $0x3b0] sm:$0xff] }
 0x15e   : > { %1588 = vmatpush1.msra.mxu1 %v1352_v51  ;;  %1518 = vmatprep.subr.mxu0 %v2924_v52  ;;  %v1402_v15 = vld [vmem:[%s4846_s21 + $0x1c0] sm:$0xff]  ;;  %v1401_v17 = vld [vmem:[%s4846_s21 + $0x1b8] sm:$0xff]  ;;  %v1400_v19 = vld [vmem:[%s4846_s21 + $0x1b0] sm:$0xff] }
 0x15f   : > { %1589 = vmatprep.subr.mxu1 %v1351_v53  ;;  %1519 = vmatpush1.msra.mxu0 %v2923_v54  ;;  %v2972_v20 = vld [vmem:[%s4846_s21 + $0x3a8] sm:$0xff]  ;;  %v2971_v22 = vld [vmem:[%s4846_s21 + $0x3a0] sm:$0xff]  ;;  %v2970_v24 = vld [vmem:[%s4846_s21 + $0x398] sm:$0xff] }
 0x160   : > { %1590 = vmatpush1.msra.mxu1 %v1350_v55  ;;  %1520 = vmatprep.subr.mxu0 %v2922_v56  ;;  %v1399_v21 = vld [vmem:[%s4846_s21 + $0x1a8] sm:$0xff]  ;;  %v1398_v23 = vld [vmem:[%s4846_s21 + $0x1a0] sm:$0xff]  ;;  %v1397_v25 = vld [vmem:[%s4846_s21 + $0x198] sm:$0xff] }
 0x161   : > { %1591 = vmatprep.subr.mxu1 %v1349_v57  ;;  %1521 = vmatpush1.msra.mxu0 %v2921_v58  ;;  %v2969_v26 = vld [vmem:[%s4846_s21 + $0x390] sm:$0xff]  ;;  %v2968_v28 = vld [vmem:[%s4846_s21 + $0x388] sm:$0xff]  ;;  %v2967_v30 = vld [vmem:[%s4846_s21 + $0x380] sm:$0xff] }
 0x162   : > { %1592 = vmatpush1.msra.mxu1 %v1348_v59  ;;  %1522 = vmatprep.subr.mxu0 %v2920_v60  ;;  %v1396_v27 = vld [vmem:[%s4846_s21 + $0x190] sm:$0xff]  ;;  %v1395_v29 = vld [vmem:[%s4846_s21 + $0x188] sm:$0xff]  ;;  %v1394_v31 = vld [vmem:[%s4846_s21 + $0x180] sm:$0xff] }
 0x163   : > { %1593 = vmatprep.subr.mxu1 %v1347_v61  ;;  %1523 = vmatpush1.msra.mxu0 %v2919_v62  ;;  %v2966_v32 = vld [vmem:[%s4846_s21 + $0x378] sm:$0xff]  ;;  %v2965_v34 = vld [vmem:[%s4846_s21 + $0x370] sm:$0xff]  ;;  %v2964_v36 = vld [vmem:[%s4846_s21 + $0x368] sm:$0xff] }
 0x164   : > { %1594 = vmatpush1.msra.mxu1 %v1346_v63  ;;  %1524 = vmatprep.subr.mxu0 %v2982_v0  ;;  %v1393_v33 = vld [vmem:[%s4846_s21 + $0x178] sm:$0xff]  ;;  %v1392_v35 = vld [vmem:[%s4846_s21 + $0x170] sm:$0xff]  ;;  %v1391_v37 = vld [vmem:[%s4846_s21 + $0x168] sm:$0xff] }
 0x165   : > { %1595 = vmatprep.subr.mxu1 %v1409_v1  ;;  %1525 = vmatpush2.msra.mxu0 %v2981_v2  ;;  %v2963_v38 = vld [vmem:[%s4846_s21 + $0x360] sm:$0xff]  ;;  %v2962_v40 = vld [vmem:[%s4846_s21 + $0x358] sm:$0xff]  ;;  %v2961_v42 = vld [vmem:[%s4846_s21 + $0x350] sm:$0xff] }
 0x166   : > { %1596 = vmatpush2.msra.mxu1 %v1408_v3  ;;  %1526 = vmatprep.subr.mxu0 %v2980_v4  ;;  %v1390_v39 = vld [vmem:[%s4846_s21 + $0x160] sm:$0xff]  ;;  %v1389_v41 = vld [vmem:[%s4846_s21 + $0x158] sm:$0xff]  ;;  %v1388_v43 = vld [vmem:[%s4846_s21 + $0x150] sm:$0xff] }
 0x167   : > { %1597 = vmatprep.subr.mxu1 %v1407_v5  ;;  %1527 = vmatpush2.msra.mxu0 %v2979_v6  ;;  %v2960_v44 = vld [vmem:[%s4846_s21 + $0x348] sm:$0xff]  ;;  %v2959_v46 = vld [vmem:[%s4846_s21 + $0x340] sm:$0xff]  ;;  %v2958_v48 = vld [vmem:[%s4846_s21 + $0x338] sm:$0xff] }
 0x168   : > { %1598 = vmatpush2.msra.mxu1 %v1406_v7  ;;  %1528 = vmatprep.subr.mxu0 %v2978_v8  ;;  %v1387_v45 = vld [vmem:[%s4846_s21 + $0x148] sm:$0xff]  ;;  %v1386_v47 = vld [vmem:[%s4846_s21 + $0x140] sm:$0xff]  ;;  %v1385_v49 = vld [vmem:[%s4846_s21 + $0x138] sm:$0xff] }
 0x169   : > { %1599 = vmatprep.subr.mxu1 %v1405_v9  ;;  %1529 = vmatpush2.msra.mxu0 %v2977_v10  ;;  %v1411_v50 = vld [vmem:[%s4966_s26 + $0x8] sm:$0xfe]  ;;  %v1413_v51 = vld [vmem:[%s4966_s26 + $0x18] sm:$0x1]  ;;  %v2957_v52 = vld [vmem:[%s4846_s21 + $0x330] sm:$0xff] }
 0x16a   : > { %1600 = vmatpush2.msra.mxu1 %v1404_v11  ;;  %1530 = vmatprep.subr.mxu0 %v2976_v12  ;;  %v1384_v53 = vld [vmem:[%s4846_s21 + $0x130] sm:$0xff]  ;;  %v2956_v54 = vld [vmem:[%s4846_s21 + $0x328] sm:$0xff]  ;;  %v1410_v56 = vld [vmem:[%s4966_s26] sm:$0xfe]  ;;  %v1487_v60 = vrot.slane %v1411_v50, 1  ;;  %v1488_v61 = vrot.slane %v1413_v51, 1 }
 0x16b   : > { %1601 = vmatprep.subr.mxu1 %v1403_v13  ;;  %1531 = vmatpush2.msra.mxu0 %v2975_v14  ;;  %v1383_v55 = vld [vmem:[%s4846_s21 + $0x128] sm:$0xff]  ;;  %v1412_v57 = vld [vmem:[%s4966_s26 + $0x10] sm:$0x1]  ;;  %v2955_v58 = vld [vmem:[%s4846_s21 + $0x320] sm:$0xff]  ;;  %v1484_v2 = vrot.slane %v1410_v56, 1 }
 0x16c   : > { %1602 = vmatpush2.msra.mxu1 %v1402_v15  ;;  %1532 = vmatprep.subr.mxu0 %v2974_v16  ;;  %v1382_v59 = vld [vmem:[%s4846_s21 + $0x120] sm:$0xff]  ;;  %v2954_v62 = vld [vmem:[%s4846_s21 + $0x318] sm:$0xff]  ;;  %v2953_v0 = vld [vmem:[%s4846_s21 + $0x310] sm:$0xff]  ;;  %v1485_v3 = vrot.slane %v1412_v57, 1  ;;  %v1489_v7 = vsel %vm1483_vm0, %v1487_v60, %v1488_v61 }
 0x16d   : > { %1603 = vmatprep.subr.mxu1 %v1401_v17  ;;  %1533 = vmatpush2.msra.mxu0 %v2973_v18  ;;  %v1381_v63 = vld [vmem:[%s4846_s21 + $0x118] sm:$0xff]  ;;  %v1380_v1 = vld [vmem:[%s4846_s21 + $0x110] sm:$0xff]  ;;  %v2952_v4 = vld [vmem:[%s4846_s21 + $0x308] sm:$0xff] }
 0x16e   : > { %1604 = vmatpush2.msra.mxu1 %v1400_v19  ;;  %1534 = vmatprep.subr.mxu0 %v2972_v20  ;;  %v1379_v5 = vld [vmem:[%s4846_s21 + $0x108] sm:$0xff]  ;;  %v2951_v6 = vld [vmem:[%s4846_s21 + $0x300] sm:$0xff]  ;;  %v1486_v10 = vsel %vm1483_vm0, %v1484_v2, %v1485_v3  ;;  %v3014_v12 = vld [vmem:[%s4846_s21 + $0x4f8] sm:$0xff] }
 0x16f   : > { %1605 = vmatprep.subr.mxu1 %v1399_v21  ;;  %1535 = vmatpush2.msra.mxu0 %v2971_v22  ;;  %v1378_v8 = vld [vmem:[%s4846_s21 + $0x100] sm:$0xff]  ;;  %v1345_v9 = vld [vmem:[%s4966_s26 + $0x8] sm:$0xff]  ;;  %v3078_v13 = vld [vmem:[%s4846_s21 + $0x6f8] sm:$0xff] }
 0x170   : > { %1606 = vmatpush2.msra.mxu1 %v1398_v23  ;;  %1536 = vmatprep.subr.mxu0 %v2970_v24  ;;  %v1344_v11 = vld [vmem:[%s4966_s26] sm:$0xff]  ;;  %v3013_v14 = vld [vmem:[%s4846_s21 + $0x4f0] sm:$0xff]  ;;  %v3012_v16 = vld [vmem:[%s4846_s21 + $0x4e8] sm:$0xff] }
 0x171   : > { %1607 = vmatprep.subr.mxu1 %v1397_v25  ;;  %1537 = vmatpush2.msra.mxu0 %v2969_v26  ;;  %v3077_v15 = vld [vmem:[%s4846_s21 + $0x6f0] sm:$0xff]  ;;  %v3076_v17 = vld [vmem:[%s4846_s21 + $0x6e8] sm:$0xff]  ;;  %v3011_v18 = vld [vmem:[%s4846_s21 + $0x4e0] sm:$0xff] }
 0x172   : > { %1608 = vmatpush2.msra.mxu1 %v1396_v27  ;;  %1538 = vmatprep.subr.mxu0 %v2968_v28  ;;  %v3075_v19 = vld [vmem:[%s4846_s21 + $0x6e0] sm:$0xff]  ;;  %v3010_v20 = vld [vmem:[%s4846_s21 + $0x4d8] sm:$0xff]  ;;  %v3009_v22 = vld [vmem:[%s4846_s21 + $0x4d0] sm:$0xff] }
 0x173   : > { %1609 = vmatprep.subr.mxu1 %v1395_v29  ;;  %1539 = vmatpush2.msra.mxu0 %v2967_v30  ;;  %v3074_v21 = vld [vmem:[%s4846_s21 + $0x6d8] sm:$0xff]  ;;  %v3073_v23 = vld [vmem:[%s4846_s21 + $0x6d0] sm:$0xff]  ;;  %v3008_v24 = vld [vmem:[%s4846_s21 + $0x4c8] sm:$0xff] }
 0x174   : > { %1610 = vmatpush2.msra.mxu1 %v1394_v31  ;;  %1540 = vmatprep.subr.mxu0 %v2966_v32  ;;  %v3072_v25 = vld [vmem:[%s4846_s21 + $0x6c8] sm:$0xff]  ;;  %v3007_v26 = vld [vmem:[%s4846_s21 + $0x4c0] sm:$0xff]  ;;  %v3006_v28 = vld [vmem:[%s4846_s21 + $0x4b8] sm:$0xff] }
 0x175   : > { %1611 = vmatprep.subr.mxu1 %v1393_v33  ;;  %1541 = vmatpush2.msra.mxu0 %v2965_v34  ;;  %v3071_v27 = vld [vmem:[%s4846_s21 + $0x6c0] sm:$0xff]  ;;  %v3070_v29 = vld [vmem:[%s4846_s21 + $0x6b8] sm:$0xff]  ;;  %v3005_v30 = vld [vmem:[%s4846_s21 + $0x4b0] sm:$0xff] }
 0x176   : > { %1612 = vmatpush2.msra.mxu1 %v1392_v35  ;;  %1542 = vmatprep.subr.mxu0 %v2964_v36  ;;  %v3069_v31 = vld [vmem:[%s4846_s21 + $0x6b0] sm:$0xff]  ;;  %v3004_v32 = vld [vmem:[%s4846_s21 + $0x4a8] sm:$0xff]  ;;  %v3003_v34 = vld [vmem:[%s4846_s21 + $0x4a0] sm:$0xff] }
 0x177   : > { %1613 = vmatprep.subr.mxu1 %v1391_v37  ;;  %1543 = vmatpush2.msra.mxu0 %v2963_v38  ;;  %v3068_v33 = vld [vmem:[%s4846_s21 + $0x6a8] sm:$0xff]  ;;  %v3067_v35 = vld [vmem:[%s4846_s21 + $0x6a0] sm:$0xff]  ;;  %v3002_v36 = vld [vmem:[%s4846_s21 + $0x498] sm:$0xff] }
 0x178   : > { %1614 = vmatpush2.msra.mxu1 %v1390_v39  ;;  %1544 = vmatprep.subr.mxu0 %v2962_v40  ;;  %v3066_v37 = vld [vmem:[%s4846_s21 + $0x698] sm:$0xff]  ;;  %v3001_v38 = vld [vmem:[%s4846_s21 + $0x490] sm:$0xff]  ;;  %v3000_v40 = vld [vmem:[%s4846_s21 + $0x488] sm:$0xff] }
 0x179   : > { %1615 = vmatprep.subr.mxu1 %v1389_v41  ;;  %1545 = vmatpush2.msra.mxu0 %v2961_v42  ;;  %v3065_v39 = vld [vmem:[%s4846_s21 + $0x690] sm:$0xff]  ;;  %v3064_v41 = vld [vmem:[%s4846_s21 + $0x688] sm:$0xff]  ;;  %v2999_v42 = vld [vmem:[%s4846_s21 + $0x480] sm:$0xff] }
 0x17a   : > { %1616 = vmatpush2.msra.mxu1 %v1388_v43  ;;  %1546 = vmatprep.subr.mxu0 %v2960_v44  ;;  %v3063_v43 = vld [vmem:[%s4846_s21 + $0x680] sm:$0xff]  ;;  %v2998_v44 = vld [vmem:[%s4846_s21 + $0x478] sm:$0xff]  ;;  %v2992_v56 = vld [vmem:[%s4846_s21 + $0x448] sm:$0xff] }
 0x17b   : > { %1617 = vmatprep.subr.mxu1 %v1387_v45  ;;  %1547 = vmatpush2.msra.mxu0 %v2959_v46  ;;  %v3062_v45 = vld [vmem:[%s4846_s21 + $0x678] sm:$0xff]  ;;  %v2997_v46 = vld [vmem:[%s4846_s21 + $0x470] sm:$0xff]  ;;  %v2995_v50 = vld [vmem:[%s4846_s21 + $0x460] sm:$0xff] }
 0x17c   : > { %1618 = vmatpush2.msra.mxu1 %v1386_v47  ;;  %1548 = vmatprep.subr.mxu0 %v2958_v48  ;;  %v3061_v47 = vld [vmem:[%s4846_s21 + $0x670] sm:$0xff]  ;;  %v2996_v48 = vld [vmem:[%s4846_s21 + $0x468] sm:$0xff]  ;;  %v3059_v51 = vld [vmem:[%s4846_s21 + $0x660] sm:$0xff] }
 0x17d   : > { %1619 = vmatprep.subr.mxu1 %v1385_v49  ;;  %1549 = vmatpush2.msra.mxu0 %v2957_v52  ;;  %v3060_v49 = vld [vmem:[%s4846_s21 + $0x668] sm:$0xff]  ;;  %v2994_v52 = vld [vmem:[%s4846_s21 + $0x458] sm:$0xff]  ;;  %v2987_v2 = vld [vmem:[%s4846_s21 + $0x420] sm:$0xff] }
 0x17e   : > { %1620 = vmatpush2.msra.mxu1 %v1384_v53  ;;  %1550 = vmatprep.subr.mxu0 %v2956_v54  ;;  %v3058_v53 = vld [vmem:[%s4846_s21 + $0x658] sm:$0xff]  ;;  %v2993_v54 = vld [vmem:[%s4846_s21 + $0x450] sm:$0xff]  ;;  %v3056_v57 = vld [vmem:[%s4846_s21 + $0x648] sm:$0xff] }
 0x17f   : > { %1621 = vmatprep.subr.mxu1 %v1383_v55  ;;  %1551 = vmatpush2.msra.mxu0 %v2955_v58  ;;  %v3057_v55 = vld [vmem:[%s4846_s21 + $0x650] sm:$0xff]  ;;  %v2991_v58 = vld [vmem:[%s4846_s21 + $0x440] sm:$0xff]  ;;  %v2990_v60 = vld [vmem:[%s4846_s21 + $0x438] sm:$0xff] }
 0x180   : > { %1622 = vmatpush2.msra.mxu1 %v1382_v59  ;;  %1552 = vmatprep.subr.mxu0 %v2954_v62  ;;  %v3055_v59 = vld [vmem:[%s4846_s21 + $0x640] sm:$0xff]  ;;  %v3054_v61 = vld [vmem:[%s4846_s21 + $0x638] sm:$0xff]  ;;  %v2989_v62 = vld [vmem:[%s4846_s21 + $0x430] sm:$0xff] }
 0x181   : > { %1623 = vmatprep.subr.mxu1 %v1381_v63  ;;  %1553 = vmatpush2.msra.mxu0 %v2953_v0  ;;  %v3053_v63 = vld [vmem:[%s4846_s21 + $0x630] sm:$0xff]  ;;  %v2988_v0 = vld [vmem:[%s4846_s21 + $0x428] sm:$0xff]  ;;  %v3051_v3 = vld [vmem:[%s4846_s21 + $0x620] sm:$0xff] }
 0x182   : > { %1624 = vmatpush2.msra.mxu1 %v1380_v1  ;;  %1554 = vmatprep.subr.mxu0 %v2952_v4  ;;  %v3052_v1 = vld [vmem:[%s4846_s21 + $0x628] sm:$0xff]  ;;  %v2986_v4 = vld [vmem:[%s4846_s21 + $0x418] sm:$0xff] }
 0x183   : > { %1625 = vmatprep.subr.mxu1 %v1379_v5  ;;  %1555 = vmatpush2.msra.mxu0 %v2951_v6  ;;  %v3050_v5 = vld [vmem:[%s4846_s21 + $0x618] sm:$0xff]  ;;  %v2985_v6 = vld [vmem:[%s4846_s21 + $0x410] sm:$0xff] }
 0x184   : > { %1556 = vmatprep.mubr.f32.mxu0 %v1489_v7  ;;  %1626 = vmatpush2.msra.mxu1 %v1378_v8  ;;  %v3049_v7 = vld [vmem:[%s4846_s21 + $0x610] sm:$0xff]  ;;  %v2984_v8 = vld [vmem:[%s4846_s21 + $0x408] sm:$0xff] }
 0x185   : > { %1627 = vmatprep.mubr.f32.mxu1 %v1345_v9  ;;  %1557 = vmatmul.mubr.f32.vlgmr.msra.gmra.mxu0 %v1486_v10  ;;  %v3048_v9 = vld [vmem:[%s4846_s21 + $0x608] sm:$0xff]  ;;  %v2983_v10 = vld [vmem:[%s4846_s21 + $0x400] sm:$0xff] }
 0x186   : > { %1628 = vmatmul.mubr.f32.vlgmr.msra.gmra.mxu1 %v1344_v11  ;;  %1716 = vmatprep.subr.mxu0 %v3014_v12  ;;  %v3047_v11 = vld [vmem:[%s4846_s21 + $0x600] sm:$0xff]  ;;  %v3046_v12 = vld [vmem:[%s4846_s21 + $0x5f8] sm:$0xff] }
 0x187   : > { %1871 = vmatprep.subr.mxu1 %v3078_v13  ;;  %1717 = vmatpush1.msra.mxu0 %v3013_v14  ;;  %v3110_v13 = vld [vmem:[%s4846_s21 + $0x7f8] sm:$0xff]  ;;  %v3045_v14 = vld [vmem:[%s4846_s21 + $0x5f0] sm:$0xff] }
 0x188   : > { %1872 = vmatpush1.msra.mxu1 %v3077_v15  ;;  %1718 = vmatprep.subr.mxu0 %v3012_v16  ;;  %v3109_v15 = vld [vmem:[%s4846_s21 + $0x7f0] sm:$0xff]  ;;  %v3044_v16 = vld [vmem:[%s4846_s21 + $0x5e8] sm:$0xff] }
 0x189   : > { %1873 = vmatprep.subr.mxu1 %v3076_v17  ;;  %1719 = vmatpush1.msra.mxu0 %v3011_v18  ;;  %v3108_v17 = vld [vmem:[%s4846_s21 + $0x7e8] sm:$0xff]  ;;  %v3043_v18 = vld [vmem:[%s4846_s21 + $0x5e0] sm:$0xff] }
 0x18a   : > { %1874 = vmatpush1.msra.mxu1 %v3075_v19  ;;  %1720 = vmatprep.subr.mxu0 %v3010_v20  ;;  %v3107_v19 = vld [vmem:[%s4846_s21 + $0x7e0] sm:$0xff]  ;;  %v3042_v20 = vld [vmem:[%s4846_s21 + $0x5d8] sm:$0xff] }
 0x18b   : > { %1875 = vmatprep.subr.mxu1 %v3074_v21  ;;  %1721 = vmatpush1.msra.mxu0 %v3009_v22  ;;  %v3106_v21 = vld [vmem:[%s4846_s21 + $0x7d8] sm:$0xff]  ;;  %v3041_v22 = vld [vmem:[%s4846_s21 + $0x5d0] sm:$0xff] }
 0x18c   : > { %1876 = vmatpush1.msra.mxu1 %v3073_v23  ;;  %1722 = vmatprep.subr.mxu0 %v3008_v24  ;;  %v3105_v23 = vld [vmem:[%s4846_s21 + $0x7d0] sm:$0xff]  ;;  %v3040_v24 = vld [vmem:[%s4846_s21 + $0x5c8] sm:$0xff] }
 0x18d   : > { %1877 = vmatprep.subr.mxu1 %v3072_v25  ;;  %1723 = vmatpush1.msra.mxu0 %v3007_v26  ;;  %v3104_v25 = vld [vmem:[%s4846_s21 + $0x7c8] sm:$0xff]  ;;  %v3039_v26 = vld [vmem:[%s4846_s21 + $0x5c0] sm:$0xff] }
 0x18e   : > { %1878 = vmatpush1.msra.mxu1 %v3071_v27  ;;  %1724 = vmatprep.subr.mxu0 %v3006_v28  ;;  %v3103_v27 = vld [vmem:[%s4846_s21 + $0x7c0] sm:$0xff]  ;;  %v3038_v28 = vld [vmem:[%s4846_s21 + $0x5b8] sm:$0xff] }
 0x18f   : > { %1879 = vmatprep.subr.mxu1 %v3070_v29  ;;  %1725 = vmatpush1.msra.mxu0 %v3005_v30  ;;  %v3102_v29 = vld [vmem:[%s4846_s21 + $0x7b8] sm:$0xff]  ;;  %v3037_v30 = vld [vmem:[%s4846_s21 + $0x5b0] sm:$0xff] }
 0x190   : > { %1880 = vmatpush1.msra.mxu1 %v3069_v31  ;;  %1726 = vmatprep.subr.mxu0 %v3004_v32  ;;  %v3101_v31 = vld [vmem:[%s4846_s21 + $0x7b0] sm:$0xff]  ;;  %v3036_v32 = vld [vmem:[%s4846_s21 + $0x5a8] sm:$0xff] }
 0x191   : > { %1881 = vmatprep.subr.mxu1 %v3068_v33  ;;  %1727 = vmatpush1.msra.mxu0 %v3003_v34  ;;  %v3100_v33 = vld [vmem:[%s4846_s21 + $0x7a8] sm:$0xff]  ;;  %v3035_v34 = vld [vmem:[%s4846_s21 + $0x5a0] sm:$0xff] }
 0x192   : > { %1882 = vmatpush1.msra.mxu1 %v3067_v35  ;;  %1728 = vmatprep.subr.mxu0 %v3002_v36  ;;  %v3099_v35 = vld [vmem:[%s4846_s21 + $0x7a0] sm:$0xff]  ;;  %v3034_v36 = vld [vmem:[%s4846_s21 + $0x598] sm:$0xff] }
 0x193   : > { %1883 = vmatprep.subr.mxu1 %v3066_v37  ;;  %1729 = vmatpush1.msra.mxu0 %v3001_v38  ;;  %v3098_v37 = vld [vmem:[%s4846_s21 + $0x798] sm:$0xff]  ;;  %v3033_v38 = vld [vmem:[%s4846_s21 + $0x590] sm:$0xff] }
 0x194   : > { %1884 = vmatpush1.msra.mxu1 %v3065_v39  ;;  %1730 = vmatprep.subr.mxu0 %v3000_v40  ;;  %v3097_v39 = vld [vmem:[%s4846_s21 + $0x790] sm:$0xff]  ;;  %v3032_v40 = vld [vmem:[%s4846_s21 + $0x588] sm:$0xff] }
 0x195   : > { %1885 = vmatprep.subr.mxu1 %v3064_v41  ;;  %1731 = vmatpush1.msra.mxu0 %v2999_v42  ;;  %v3096_v41 = vld [vmem:[%s4846_s21 + $0x788] sm:$0xff]  ;;  %v3031_v42 = vld [vmem:[%s4846_s21 + $0x580] sm:$0xff] }
 0x196   : > { %1886 = vmatpush1.msra.mxu1 %v3063_v43  ;;  %1732 = vmatprep.subr.mxu0 %v2998_v44  ;;  %v3095_v43 = vld [vmem:[%s4846_s21 + $0x780] sm:$0xff]  ;;  %v3030_v44 = vld [vmem:[%s4846_s21 + $0x578] sm:$0xff] }
 0x197   : > { %1887 = vmatprep.subr.mxu1 %v3062_v45  ;;  %1733 = vmatpush1.msra.mxu0 %v2997_v46  ;;  %v3094_v45 = vld [vmem:[%s4846_s21 + $0x778] sm:$0xff]  ;;  %v3029_v46 = vld [vmem:[%s4846_s21 + $0x570] sm:$0xff] }
 0x198   : > { %1888 = vmatpush1.msra.mxu1 %v3061_v47  ;;  %1734 = vmatprep.subr.mxu0 %v2996_v48  ;;  %v3093_v47 = vld [vmem:[%s4846_s21 + $0x770] sm:$0xff]  ;;  %v3028_v48 = vld [vmem:[%s4846_s21 + $0x568] sm:$0xff] }
 0x199   : > { %1889 = vmatprep.subr.mxu1 %v3060_v49  ;;  %1735 = vmatpush1.msra.mxu0 %v2995_v50  ;;  %v3092_v49 = vld [vmem:[%s4846_s21 + $0x768] sm:$0xff]  ;;  %v3027_v50 = vld [vmem:[%s4846_s21 + $0x560] sm:$0xff] }
 0x19a   : > { %1890 = vmatpush1.msra.mxu1 %v3059_v51  ;;  %1736 = vmatprep.subr.mxu0 %v2994_v52  ;;  %v3091_v51 = vld [vmem:[%s4846_s21 + $0x760] sm:$0xff]  ;;  %v3026_v52 = vld [vmem:[%s4846_s21 + $0x558] sm:$0xff] }
 0x19b   : > { %1891 = vmatprep.subr.mxu1 %v3058_v53  ;;  %1737 = vmatpush1.msra.mxu0 %v2993_v54  ;;  %v3025_v53 = vld [vmem:[%s4846_s21 + $0x550] sm:$0xff]  ;;  %v3090_v54 = vld [vmem:[%s4846_s21 + $0x758] sm:$0xff] }
 0x19c   : > { %1892 = vmatpush1.msra.mxu1 %v3057_v55  ;;  %1738 = vmatprep.subr.mxu0 %v2992_v56  ;;  %v3024_v55 = vld [vmem:[%s4846_s21 + $0x548] sm:$0xff]  ;;  %v3023_v56 = vld [vmem:[%s4846_s21 + $0x540] sm:$0xff] }
 0x19d   : > { %1893 = vmatprep.subr.mxu1 %v3056_v57  ;;  %1739 = vmatpush1.msra.mxu0 %v2991_v58  ;;  %v3089_v57 = vld [vmem:[%s4846_s21 + $0x750] sm:$0xff]  ;;  %v3088_v58 = vld [vmem:[%s4846_s21 + $0x748] sm:$0xff] }
 0x19e   : > { %1894 = vmatpush1.msra.mxu1 %v3055_v59  ;;  %1740 = vmatprep.subr.mxu0 %v2990_v60  ;;  %v1635_v59 = vld [vmem:[%s4966_s26 + $0x8] sm:$0xfc]  ;;  %v1637_v60 = vld [vmem:[%s4966_s26 + $0x18] sm:$0x3] }
 0x19f   : > { %1895 = vmatprep.subr.mxu1 %v3054_v61  ;;  %1741 = vmatpush1.msra.mxu0 %v2989_v62  ;;  %v3022_v61 = vld [vmem:[%s4846_s21 + $0x538] sm:$0xff]  ;;  %v3021_v62 = vld [vmem:[%s4846_s21 + $0x530] sm:$0xff] }
 0x1a0   : > { %1896 = vmatpush1.msra.mxu1 %v3053_v63  ;;  %1742 = vmatprep.subr.mxu0 %v2988_v0  ;;  %v3087_v63 = vld [vmem:[%s4846_s21 + $0x740] sm:$0xff]  ;;  %v3020_v0 = vld [vmem:[%s4846_s21 + $0x528] sm:$0xff] }
 0x1a1   : > { %1897 = vmatprep.subr.mxu1 %v3052_v1  ;;  %1743 = vmatpush1.msra.mxu0 %v2987_v2  ;;  %v3086_v1 = vld [vmem:[%s4846_s21 + $0x738] sm:$0xff]  ;;  %v3085_v2 = vld [vmem:[%s4846_s21 + $0x730] sm:$0xff] }
 0x1a2   : > { %1898 = vmatpush1.msra.mxu1 %v3051_v3  ;;  %1744 = vmatprep.subr.mxu0 %v2986_v4  ;;  %v3019_v3 = vld [vmem:[%s4846_s21 + $0x520] sm:$0xff]  ;;  %v1711_v4 = vrot.slane %v1635_v59, 2  ;;  %v3194_v59 = vld [vmem:[%s4846_s21 + $0xa98] sm:$0xff] }
 0x1a3   : > { %1899 = vmatprep.subr.mxu1 %v3050_v5  ;;  %1745 = vmatpush1.msra.mxu0 %v2985_v6  ;;  %v1712_v5 = vrot.slane %v1637_v60, 2  ;;  %v1634_v6 = vld [vmem:[%s4966_s26] sm:$0xfc] }
 0x1a4   : > { %1900 = vmatpush1.msra.mxu1 %v3049_v7  ;;  %1746 = vmatprep.subr.mxu0 %v2984_v8  ;;  %v1636_v7 = vld [vmem:[%s4966_s26 + $0x10] sm:$0x3]  ;;  %v3084_v8 = vld [vmem:[%s4846_s21 + $0x728] sm:$0xff]  ;;  %v3127_v60 = vld [vmem:[%s4846_s21 + $0x880] sm:$0xff] }
 0x1a5   : > { %1901 = vmatprep.subr.mxu1 %v3048_v9  ;;  %1747 = vmatpush1.msra.mxu0 %v2983_v10  ;;  %v1790_v9 = vld [vmem:[%s4966_s26 + $0x8] sm:$0xf0]  ;;  %v1792_v10 = vld [vmem:[%s4966_s26 + $0x18] sm:$0xf] }
 0x1a6   : > { %1902 = vmatpush1.msra.mxu1 %v3047_v11  ;;  %1748 = vmatprep.subr.mxu0 %v3046_v12  ;;  %v3083_v11 = vld [vmem:[%s4846_s21 + $0x720] sm:$0xff] }
 0x1a7   : > { %1903 = vmatprep.subr.mxu1 %v3110_v13  ;;  %1749 = vmatpush2.msra.mxu0 %v3045_v14  ;;  %v1789_v12 = vld [vmem:[%s4966_s26] sm:$0xf0]  ;;  %v1791_v13 = vld [vmem:[%s4966_s26 + $0x10] sm:$0xf]  ;;  %v3018_v14 = vld [vmem:[%s4846_s21 + $0x518] sm:$0xff] }
 0x1a8   : > { %1904 = vmatpush2.msra.mxu1 %v3109_v15  ;;  %1750 = vmatprep.subr.mxu0 %v3044_v16  ;;  %v3082_v15 = vld [vmem:[%s4846_s21 + $0x718] sm:$0xff]  ;;  %v1708_v16 = vrot.slane %v1634_v6, 2 }
 0x1a9   : > { %1905 = vmatprep.subr.mxu1 %v3108_v17  ;;  %1751 = vmatpush2.msra.mxu0 %v3043_v18  ;;  %v1709_v17 = vrot.slane %v1636_v7, 2  ;;  %v3017_v18 = vld [vmem:[%s4846_s21 + $0x510] sm:$0xff]  ;;  %v3122_v6 = vld [vmem:[%s4846_s21 + $0x858] sm:$0xff]  ;;  %v3188_v7 = vld [vmem:[%s4846_s21 + $0xa68] sm:$0xff] }
 0x1aa   : > { %1906 = vmatpush2.msra.mxu1 %v3107_v19  ;;  %1752 = vmatprep.subr.mxu0 %v3042_v20  ;;  %v1713_v19 = vsel %vm1707_vm1, %v1711_v4, %v1712_v5  ;;  %v1866_v20 = vrot.slane %v1790_v9, 4  ;;  %v3123_v4 = vld [vmem:[%s4846_s21 + $0x860] sm:$0xff]  ;;  %v3189_v5 = vld [vmem:[%s4846_s21 + $0xa70] sm:$0xff] }
 0x1ab   : > { %1907 = vmatprep.subr.mxu1 %v3106_v21  ;;  %1753 = vmatpush2.msra.mxu0 %v3041_v22  ;;  %v1867_v21 = vrot.slane %v1792_v10, 4  ;;  %v3016_v22 = vld [vmem:[%s4846_s21 + $0x508] sm:$0xff]  ;;  %v3187_v9 = vld [vmem:[%s4846_s21 + $0xa60] sm:$0xff] }
 0x1ac   : > { %1908 = vmatpush2.msra.mxu1 %v3105_v23  ;;  %1754 = vmatprep.subr.mxu0 %v3040_v24  ;;  %v3081_v23 = vld [vmem:[%s4846_s21 + $0x710] sm:$0xff]  ;;  %v1863_v24 = vrot.slane %v1789_v12, 4  ;;  %v3120_v10 = vld [vmem:[%s4846_s21 + $0x848] sm:$0xff]  ;;  %v3119_v12 = vld [vmem:[%s4846_s21 + $0x840] sm:$0xff] }
 0x1ad   : > { %1909 = vmatprep.subr.mxu1 %v3104_v25  ;;  %1755 = vmatpush2.msra.mxu0 %v3039_v26  ;;  %v1864_v25 = vrot.slane %v1791_v13, 4  ;;  %v3015_v26 = vld [vmem:[%s4846_s21 + $0x500] sm:$0xff]  ;;  %v3185_v13 = vld [vmem:[%s4846_s21 + $0xa50] sm:$0xff] }
 0x1ae   : > { %1910 = vmatpush2.msra.mxu1 %v3103_v27  ;;  %1756 = vmatprep.subr.mxu0 %v3038_v28  ;;  %v3080_v27 = vld [vmem:[%s4846_s21 + $0x708] sm:$0xff]  ;;  %v1710_v28 = vsel %vm1707_vm1, %v1708_v16, %v1709_v17  ;;  %v3117_v16 = vld [vmem:[%s4846_s21 + $0x830] sm:$0xff]  ;;  %v3183_v17 = vld [vmem:[%s4846_s21 + $0xa40] sm:$0xff] }
 0x1af   : > { %1911 = vmatprep.subr.mxu1 %v3102_v29  ;;  %1757 = vmatpush2.msra.mxu0 %v3037_v30  ;;  %v3142_v29 = vld [vmem:[%s4846_s21 + $0x8f8] sm:$0xff]  ;;  %v3079_v30 = vld [vmem:[%s4846_s21 + $0x700] sm:$0xff] }
 0x1b0   : > { %1912 = vmatpush2.msra.mxu1 %v3101_v31  ;;  %1758 = vmatprep.subr.mxu0 %v3036_v32  ;;  %v1868_v31 = vsel %vm1862_vm2, %v1866_v20, %v1867_v21  ;;  %v3141_v32 = vld [vmem:[%s4846_s21 + $0x8f0] sm:$0xff]  ;;  %v3115_v20 = vld [vmem:[%s4846_s21 + $0x820] sm:$0xff] }
 0x1b1   : > { %1913 = vmatprep.subr.mxu1 %v3100_v33  ;;  %1759 = vmatpush2.msra.mxu0 %v3035_v34  ;;  %v1865_v33 = vsel %vm1862_vm2, %v1863_v24, %v1864_v25  ;;  %v3140_v34 = vld [vmem:[%s4846_s21 + $0x8e8] sm:$0xff]  ;;  %v3181_v21 = vld [vmem:[%s4846_s21 + $0xa30] sm:$0xff]  ;;  %v3179_v25 = vld [vmem:[%s4846_s21 + $0xa20] sm:$0xff] }
 0x1b2   : > { %1914 = vmatpush2.msra.mxu1 %v3099_v35  ;;  %1760 = vmatprep.subr.mxu0 %v3034_v36  ;;  %v3206_v35 = vld [vmem:[%s4846_s21 + $0xaf8] sm:$0xff]  ;;  %v3139_v36 = vld [vmem:[%s4846_s21 + $0x8e0] sm:$0xff]  ;;  %v3113_v24 = vld [vmem:[%s4846_s21 + $0x810] sm:$0xff] }
 0x1b3   : > { %1915 = vmatprep.subr.mxu1 %v3098_v37  ;;  %1761 = vmatpush2.msra.mxu0 %v3033_v38  ;;  %v3205_v37 = vld [vmem:[%s4846_s21 + $0xaf0] sm:$0xff]  ;;  %v3138_v38 = vld [vmem:[%s4846_s21 + $0x8d8] sm:$0xff] }
 0x1b4   : > { %1916 = vmatpush2.msra.mxu1 %v3097_v39  ;;  %1762 = vmatprep.subr.mxu0 %v3032_v40  ;;  %v3204_v39 = vld [vmem:[%s4846_s21 + $0xae8] sm:$0xff]  ;;  %v3137_v40 = vld [vmem:[%s4846_s21 + $0x8d0] sm:$0xff] }
 0x1b5   : > { %1917 = vmatprep.subr.mxu1 %v3096_v41  ;;  %1763 = vmatpush2.msra.mxu0 %v3031_v42  ;;  %v3203_v41 = vld [vmem:[%s4846_s21 + $0xae0] sm:$0xff]  ;;  %v3136_v42 = vld [vmem:[%s4846_s21 + $0x8c8] sm:$0xff] }
 0x1b6   : > { %1918 = vmatpush2.msra.mxu1 %v3095_v43  ;;  %1764 = vmatprep.subr.mxu0 %v3030_v44  ;;  %v3202_v43 = vld [vmem:[%s4846_s21 + $0xad8] sm:$0xff]  ;;  %v3135_v44 = vld [vmem:[%s4846_s21 + $0x8c0] sm:$0xff] }
 0x1b7   : > { %1919 = vmatprep.subr.mxu1 %v3094_v45  ;;  %1765 = vmatpush2.msra.mxu0 %v3029_v46  ;;  %v3201_v45 = vld [vmem:[%s4846_s21 + $0xad0] sm:$0xff]  ;;  %v3134_v46 = vld [vmem:[%s4846_s21 + $0x8b8] sm:$0xff] }
 0x1b8   : > { %1920 = vmatpush2.msra.mxu1 %v3093_v47  ;;  %1766 = vmatprep.subr.mxu0 %v3028_v48  ;;  %v3200_v47 = vld [vmem:[%s4846_s21 + $0xac8] sm:$0xff]  ;;  %v3133_v48 = vld [vmem:[%s4846_s21 + $0x8b0] sm:$0xff] }
 0x1b9   : > { %1921 = vmatprep.subr.mxu1 %v3092_v49  ;;  %1767 = vmatpush2.msra.mxu0 %v3027_v50  ;;  %v3199_v49 = vld [vmem:[%s4846_s21 + $0xac0] sm:$0xff]  ;;  %v3132_v50 = vld [vmem:[%s4846_s21 + $0x8a8] sm:$0xff] }
 0x1ba   : > { %1922 = vmatpush2.msra.mxu1 %v3091_v51  ;;  %1768 = vmatprep.subr.mxu0 %v3026_v52  ;;  %v3198_v51 = vld [vmem:[%s4846_s21 + $0xab8] sm:$0xff]  ;;  %v3131_v52 = vld [vmem:[%s4846_s21 + $0x8a0] sm:$0xff] }
 0x1bb   : > { %1923 = vmatprep.subr.mxu1 %v3090_v54  ;;  %1769 = vmatpush2.msra.mxu0 %v3025_v53  ;;  %v3197_v53 = vld [vmem:[%s4846_s21 + $0xab0] sm:$0xff]  ;;  %v3130_v54 = vld [vmem:[%s4846_s21 + $0x898] sm:$0xff] }
 0x1bc   : > { %1924 = vmatpush2.msra.mxu1 %v3089_v57  ;;  %1770 = vmatprep.subr.mxu0 %v3024_v55  ;;  %v3196_v55 = vld [vmem:[%s4846_s21 + $0xaa8] sm:$0xff]  ;;  %v3195_v57 = vld [vmem:[%s4846_s21 + $0xaa0] sm:$0xff] }
 0x1bd   : > { %1925 = vmatprep.subr.mxu1 %v3088_v58  ;;  %1771 = vmatpush2.msra.mxu0 %v3023_v56  ;;  %v3129_v56 = vld [vmem:[%s4846_s21 + $0x890] sm:$0xff]  ;;  %v3128_v58 = vld [vmem:[%s4846_s21 + $0x888] sm:$0xff] }
 0x1be   : > { %1926 = vmatpush2.msra.mxu1 %v3087_v63  ;;  %1772 = vmatprep.subr.mxu0 %v3022_v61  ;;  %v3193_v61 = vld [vmem:[%s4846_s21 + $0xa90] sm:$0xff]  ;;  %v3192_v63 = vld [vmem:[%s4846_s21 + $0xa88] sm:$0xff] }
 0x1bf   : > { %1927 = vmatprep.subr.mxu1 %v3086_v1  ;;  %1773 = vmatpush2.msra.mxu0 %v3021_v62  ;;  %v3126_v62 = vld [vmem:[%s4846_s21 + $0x878] sm:$0xff]  ;;  %v3191_v1 = vld [vmem:[%s4846_s21 + $0xa80] sm:$0xff] }
 0x1c0   : > { %1928 = vmatpush2.msra.mxu1 %v3085_v2  ;;  %1774 = vmatprep.subr.mxu0 %v3020_v0  ;;  %v3125_v0 = vld [vmem:[%s4846_s21 + $0x870] sm:$0xff]  ;;  %v3124_v2 = vld [vmem:[%s4846_s21 + $0x868] sm:$0xff] }
 0x1c1   : > { %1929 = vmatprep.subr.mxu1 %v3084_v8  ;;  %1775 = vmatpush2.msra.mxu0 %v3019_v3  ;;  %v3190_v3 = vld [vmem:[%s4846_s21 + $0xa78] sm:$0xff]  ;;  %v3121_v8 = vld [vmem:[%s4846_s21 + $0x850] sm:$0xff] }
 0x1c2   : > { %1930 = vmatpush2.msra.mxu1 %v3083_v11  ;;  %1776 = vmatprep.subr.mxu0 %v3018_v14  ;;  %v3186_v11 = vld [vmem:[%s4846_s21 + $0xa58] sm:$0xff] }
 0x1c3   : > { %1931 = vmatprep.subr.mxu1 %v3082_v15  ;;  %1777 = vmatpush2.msra.mxu0 %v3017_v18  ;;  %v3118_v14 = vld [vmem:[%s4846_s21 + $0x838] sm:$0xff]  ;;  %v3184_v15 = vld [vmem:[%s4846_s21 + $0xa48] sm:$0xff] }
 0x1c4   : > { %1780 = vmatprep.mubr.f32.mxu0 %v1713_v19  ;;  %1778 = vmatprep.subr.mxu0 %v3016_v22  ;;  %v3116_v18 = vld [vmem:[%s4846_s21 + $0x828] sm:$0xff]  ;;  %v3182_v19 = vld [vmem:[%s4846_s21 + $0xa38] sm:$0xff] }
 0x1c5   : > { %1932 = vmatpush2.msra.mxu1 %v3081_v23  ;;  %1779 = vmatpush2.msra.mxu0 %v3015_v26  ;;  %v3114_v22 = vld [vmem:[%s4846_s21 + $0x818] sm:$0xff]  ;;  %v3180_v23 = vld [vmem:[%s4846_s21 + $0xa28] sm:$0xff] }
 0x1c6   : > { %1933 = vmatprep.subr.mxu1 %v3080_v27  ;;  %1781 = vmatmul.mubr.f32.vlgmr.msra.gmra.mxu0 %v1710_v28  ;;  %v3112_v26 = vld [vmem:[%s4846_s21 + $0x808] sm:$0xff]  ;;  %v3178_v27 = vld [vmem:[%s4846_s21 + $0xa18] sm:$0xff]  ;;  %v3111_v28 = vld [vmem:[%s4846_s21 + $0x800] sm:$0xff] }
 0x1c7   : > { %2026 = vmatprep.subr.mxu0 %v3142_v29  ;;  %1934 = vmatpush2.msra.mxu1 %v3079_v30  ;;  %v3177_v29 = vld [vmem:[%s4846_s21 + $0xa10] sm:$0xff]  ;;  %v3174_v30 = vld [vmem:[%s4846_s21 + $0x9f8] sm:$0xff] }
 0x1c8   : > { %1935 = vmatprep.mubr.f32.mxu1 %v1868_v31  ;;  %2027 = vmatpush1.msra.mxu0 %v3141_v32  ;;  %v3176_v31 = vld [vmem:[%s4846_s21 + $0xa08] sm:$0xff]  ;;  %v3173_v32 = vld [vmem:[%s4846_s21 + $0x9f0] sm:$0xff] }
 0x1c9   : > { %1936 = vmatmul.mubr.f32.vlgmr.msra.gmra.mxu1 %v1865_v33  ;;  %2028 = vmatprep.subr.mxu0 %v3140_v34  ;;  %v3175_v33 = vld [vmem:[%s4846_s21 + $0xa00] sm:$0xff]  ;;  %v3172_v34 = vld [vmem:[%s4846_s21 + $0x9e8] sm:$0xff] }
 0x1ca   : > { %2181 = vmatprep.subr.mxu1 %v3206_v35  ;;  %2029 = vmatpush1.msra.mxu0 %v3139_v36  ;;  %v3238_v35 = vld [vmem:[%s4846_s21 + $0xbf8] sm:$0xff]  ;;  %v3171_v36 = vld [vmem:[%s4846_s21 + $0x9e0] sm:$0xff] }
 0x1cb   : > { %2182 = vmatpush1.msra.mxu1 %v3205_v37  ;;  %2030 = vmatprep.subr.mxu0 %v3138_v38  ;;  %v3237_v37 = vld [vmem:[%s4846_s21 + $0xbf0] sm:$0xff]  ;;  %v3170_v38 = vld [vmem:[%s4846_s21 + $0x9d8] sm:$0xff] }
 0x1cc   : > { %2183 = vmatprep.subr.mxu1 %v3204_v39  ;;  %2031 = vmatpush1.msra.mxu0 %v3137_v40  ;;  %v3236_v39 = vld [vmem:[%s4846_s21 + $0xbe8] sm:$0xff]  ;;  %v3169_v40 = vld [vmem:[%s4846_s21 + $0x9d0] sm:$0xff] }
 0x1cd   : > { %2184 = vmatpush1.msra.mxu1 %v3203_v41  ;;  %2032 = vmatprep.subr.mxu0 %v3136_v42  ;;  %v3235_v41 = vld [vmem:[%s4846_s21 + $0xbe0] sm:$0xff]  ;;  %v3168_v42 = vld [vmem:[%s4846_s21 + $0x9c8] sm:$0xff] }
 0x1ce   : > { %2185 = vmatprep.subr.mxu1 %v3202_v43  ;;  %2033 = vmatpush1.msra.mxu0 %v3135_v44  ;;  %v3234_v43 = vld [vmem:[%s4846_s21 + $0xbd8] sm:$0xff]  ;;  %v3167_v44 = vld [vmem:[%s4846_s21 + $0x9c0] sm:$0xff] }
 0x1cf   : > { %2186 = vmatpush1.msra.mxu1 %v3201_v45  ;;  %2034 = vmatprep.subr.mxu0 %v3134_v46  ;;  %v3233_v45 = vld [vmem:[%s4846_s21 + $0xbd0] sm:$0xff]  ;;  %v3166_v46 = vld [vmem:[%s4846_s21 + $0x9b8] sm:$0xff] }
 0x1d0   : > { %2187 = vmatprep.subr.mxu1 %v3200_v47  ;;  %2035 = vmatpush1.msra.mxu0 %v3133_v48  ;;  %v3232_v47 = vld [vmem:[%s4846_s21 + $0xbc8] sm:$0xff]  ;;  %v3165_v48 = vld [vmem:[%s4846_s21 + $0x9b0] sm:$0xff] }
 0x1d1   : > { %2188 = vmatpush1.msra.mxu1 %v3199_v49  ;;  %2036 = vmatprep.subr.mxu0 %v3132_v50  ;;  %v3231_v49 = vld [vmem:[%s4846_s21 + $0xbc0] sm:$0xff]  ;;  %v3164_v50 = vld [vmem:[%s4846_s21 + $0x9a8] sm:$0xff] }
 0x1d2   : > { %2189 = vmatprep.subr.mxu1 %v3198_v51  ;;  %2037 = vmatpush1.msra.mxu0 %v3131_v52  ;;  %v3230_v51 = vld [vmem:[%s4846_s21 + $0xbb8] sm:$0xff]  ;;  %v3163_v52 = vld [vmem:[%s4846_s21 + $0x9a0] sm:$0xff] }
 0x1d3   : > { %2190 = vmatpush1.msra.mxu1 %v3197_v53  ;;  %2038 = vmatprep.subr.mxu0 %v3130_v54  ;;  %v3229_v53 = vld [vmem:[%s4846_s21 + $0xbb0] sm:$0xff]  ;;  %v3162_v54 = vld [vmem:[%s4846_s21 + $0x998] sm:$0xff] }
 0x1d4   : > { %2191 = vmatprep.subr.mxu1 %v3196_v55  ;;  %2039 = vmatpush1.msra.mxu0 %v3129_v56  ;;  %v3228_v55 = vld [vmem:[%s4846_s21 + $0xba8] sm:$0xff]  ;;  %v3161_v56 = vld [vmem:[%s4846_s21 + $0x990] sm:$0xff] }
 0x1d5   : > { %2192 = vmatpush1.msra.mxu1 %v3195_v57  ;;  %2040 = vmatprep.subr.mxu0 %v3128_v58  ;;  %v3227_v57 = vld [vmem:[%s4846_s21 + $0xba0] sm:$0xff]  ;;  %v3160_v58 = vld [vmem:[%s4846_s21 + $0x988] sm:$0xff] }
 0x1d6   : > { %2193 = vmatprep.subr.mxu1 %v3194_v59  ;;  %2041 = vmatpush1.msra.mxu0 %v3127_v60  ;;  %v3226_v59 = vld [vmem:[%s4846_s21 + $0xb98] sm:$0xff]  ;;  %v3159_v60 = vld [vmem:[%s4846_s21 + $0x980] sm:$0xff] }
 0x1d7   : > { %2194 = vmatpush1.msra.mxu1 %v3193_v61  ;;  %2042 = vmatprep.subr.mxu0 %v3126_v62  ;;  %v3225_v61 = vld [vmem:[%s4846_s21 + $0xb90] sm:$0xff]  ;;  %v3158_v62 = vld [vmem:[%s4846_s21 + $0x978] sm:$0xff] }
 0x1d8   : > { %2195 = vmatprep.subr.mxu1 %v3192_v63  ;;  %2043 = vmatpush1.msra.mxu0 %v3125_v0  ;;  %v3224_v63 = vld [vmem:[%s4846_s21 + $0xb88] sm:$0xff]  ;;  %v3157_v0 = vld [vmem:[%s4846_s21 + $0x970] sm:$0xff] }
 0x1d9   : > { %2196 = vmatpush1.msra.mxu1 %v3191_v1  ;;  %2044 = vmatprep.subr.mxu0 %v3124_v2  ;;  %v3223_v1 = vld [vmem:[%s4846_s21 + $0xb80] sm:$0xff]  ;;  %v3156_v2 = vld [vmem:[%s4846_s21 + $0x968] sm:$0xff] }
 0x1da   : > { %2197 = vmatprep.subr.mxu1 %v3190_v3  ;;  %2045 = vmatpush1.msra.mxu0 %v3123_v4  ;;  %v3222_v3 = vld [vmem:[%s4846_s21 + $0xb78] sm:$0xff]  ;;  %v3155_v4 = vld [vmem:[%s4846_s21 + $0x960] sm:$0xff] }
 0x1db   : > { %2198 = vmatpush1.msra.mxu1 %v3189_v5  ;;  %2046 = vmatprep.subr.mxu0 %v3122_v6  ;;  %v3221_v5 = vld [vmem:[%s4846_s21 + $0xb70] sm:$0xff]  ;;  %v3154_v6 = vld [vmem:[%s4846_s21 + $0x958] sm:$0xff] }
 0x1dc   : > { %2199 = vmatprep.subr.mxu1 %v3188_v7  ;;  %2047 = vmatpush1.msra.mxu0 %v3121_v8  ;;  %v3220_v7 = vld [vmem:[%s4846_s21 + $0xb68] sm:$0xff]  ;;  %v3153_v8 = vld [vmem:[%s4846_s21 + $0x950] sm:$0xff] }
 0x1dd   : > { %2200 = vmatpush1.msra.mxu1 %v3187_v9  ;;  %2048 = vmatprep.subr.mxu0 %v3120_v10  ;;  %v3219_v9 = vld [vmem:[%s4846_s21 + $0xb60] sm:$0xff]  ;;  %v3152_v10 = vld [vmem:[%s4846_s21 + $0x948] sm:$0xff] }
 0x1de   : > { %2201 = vmatprep.subr.mxu1 %v3186_v11  ;;  %2049 = vmatpush1.msra.mxu0 %v3119_v12  ;;  %v3218_v11 = vld [vmem:[%s4846_s21 + $0xb58] sm:$0xff]  ;;  %v3151_v12 = vld [vmem:[%s4846_s21 + $0x940] sm:$0xff] }
 0x1df   : > { %2202 = vmatpush1.msra.mxu1 %v3185_v13  ;;  %2050 = vmatprep.subr.mxu0 %v3118_v14  ;;  %v3217_v13 = vld [vmem:[%s4846_s21 + $0xb50] sm:$0xff]  ;;  %v3150_v14 = vld [vmem:[%s4846_s21 + $0x938] sm:$0xff] }
 0x1e0   : > { %2203 = vmatprep.subr.mxu1 %v3184_v15  ;;  %2051 = vmatpush1.msra.mxu0 %v3117_v16  ;;  %v3216_v15 = vld [vmem:[%s4846_s21 + $0xb48] sm:$0xff]  ;;  %v3149_v16 = vld [vmem:[%s4846_s21 + $0x930] sm:$0xff] }
 0x1e1   : > { %2204 = vmatpush1.msra.mxu1 %v3183_v17  ;;  %2052 = vmatprep.subr.mxu0 %v3116_v18  ;;  %v3215_v17 = vld [vmem:[%s4846_s21 + $0xb40] sm:$0xff]  ;;  %v3148_v18 = vld [vmem:[%s4846_s21 + $0x928] sm:$0xff] }
 0x1e2   : > { %2205 = vmatprep.subr.mxu1 %v3182_v19  ;;  %2053 = vmatpush1.msra.mxu0 %v3115_v20  ;;  %v3214_v19 = vld [vmem:[%s4846_s21 + $0xb38] sm:$0xff]  ;;  %v1945_v20 = vld [vmem:[%s4966_s26 + $0x8] sm:$0xe0] }
 0x1e3   : > { %2206 = vmatpush1.msra.mxu1 %v3181_v21  ;;  %2054 = vmatprep.subr.mxu0 %v3114_v22  ;;  %v1947_v21 = vld [vmem:[%s4966_s26 + $0x18] sm:$0x1f]  ;;  %v3147_v22 = vld [vmem:[%s4846_s21 + $0x920] sm:$0xff] }
 0x1e4   : > { %2207 = vmatprep.subr.mxu1 %v3180_v23  ;;  %2055 = vmatpush1.msra.mxu0 %v3113_v24  ;;  %v1944_v23 = vld [vmem:[%s4966_s26] sm:$0xe0]  ;;  %v1946_v24 = vld [vmem:[%s4966_s26 + $0x10] sm:$0x1f] }
 0x1e5   : > { %2208 = vmatpush1.msra.mxu1 %v3179_v25  ;;  %2056 = vmatprep.subr.mxu0 %v3112_v26  ;;  %v3213_v25 = vld [vmem:[%s4846_s21 + $0xb30] sm:$0xff]  ;;  %v3146_v26 = vld [vmem:[%s4846_s21 + $0x918] sm:$0xff] }
 0x1e6   : > { %2209 = vmatprep.subr.mxu1 %v3178_v27  ;;  %2057 = vmatpush1.msra.mxu0 %v3111_v28  ;;  %v3212_v27 = vld [vmem:[%s4846_s21 + $0xb28] sm:$0xff]  ;;  %v2021_v28 = vrot.slane %v1945_v20, 5  ;;  %v3253_v20 = vld [vmem:[%s4846_s21 + $0xc70] sm:$0xff] }
 0x1e7   : > { %2210 = vmatpush1.msra.mxu1 %v3177_v29  ;;  %2058 = vmatprep.subr.mxu0 %v3174_v30  ;;  %v2022_v29 = vrot.slane %v1947_v21, 5  ;;  %v2100_v30 = vld [vmem:[%s4966_s26 + $0x8] sm:$0xc0]  ;;  %v3319_v21 = vld [vmem:[%s4846_s21 + $0xe80] sm:$0xff] }
 0x1e8   : > { %2211 = vmatprep.subr.mxu1 %v3176_v31  ;;  %2059 = vmatpush2.msra.mxu0 %v3173_v32  ;;  %v2102_v31 = vld [vmem:[%s4966_s26 + $0x18] sm:$0x3f]  ;;  %v2018_v32 = vrot.slane %v1944_v23, 5 }
 0x1e9   : > { %2212 = vmatpush1.msra.mxu1 %v3175_v33  ;;  %2060 = vmatprep.subr.mxu0 %v3172_v34  ;;  %v2019_v33 = vrot.slane %v1946_v24, 5  ;;  %v2099_v34 = vld [vmem:[%s4966_s26] sm:$0xc0]  ;;  %v3318_v23 = vld [vmem:[%s4846_s21 + $0xe78] sm:$0xff] }
 0x1ea   : > { %2213 = vmatprep.subr.mxu1 %v3238_v35  ;;  %2061 = vmatpush2.msra.mxu0 %v3171_v36  ;;  %v2101_v35 = vld [vmem:[%s4966_s26 + $0x10] sm:$0x3f]  ;;  %v3251_v24 = vld [vmem:[%s4846_s21 + $0xc60] sm:$0xff] }
 0x1eb   : > { %2214 = vmatpush2.msra.mxu1 %v3237_v37  ;;  %2062 = vmatprep.subr.mxu0 %v3170_v38  ;;  %v3145_v36 = vld [vmem:[%s4846_s21 + $0x910] sm:$0xff]  ;;  %v3211_v37 = vld [vmem:[%s4846_s21 + $0xb20] sm:$0xff]  ;;  %v3144_v38 = vld [vmem:[%s4846_s21 + $0x908] sm:$0xff] }
 0x1ec   : > { %2215 = vmatprep.subr.mxu1 %v3236_v39  ;;  %2063 = vmatpush2.msra.mxu0 %v3169_v40  ;;  %v3210_v39 = vld [vmem:[%s4846_s21 + $0xb18] sm:$0xff]  ;;  %v2176_v40 = vrot.slane %v2100_v30, 6  ;;  %v3248_v30 = vld [vmem:[%s4846_s21 + $0xc48] sm:$0xff] }
 0x1ed   : > { %2216 = vmatpush2.msra.mxu1 %v3235_v41  ;;  %2064 = vmatprep.subr.mxu0 %v3168_v42  ;;  %v2177_v41 = vrot.slane %v2102_v31, 6  ;;  %v3143_v42 = vld [vmem:[%s4846_s21 + $0x900] sm:$0xff]  ;;  %v3314_v31 = vld [vmem:[%s4846_s21 + $0xe58] sm:$0xff] }
 0x1ee   : > { %2217 = vmatprep.subr.mxu1 %v3234_v43  ;;  %2065 = vmatpush2.msra.mxu0 %v3167_v44  ;;  %v2023_v43 = vsel %vm2017_vm3, %v2021_v28, %v2022_v29  ;;  %v2173_v44 = vrot.slane %v2099_v34, 6  ;;  %v3249_v28 = vld [vmem:[%s4846_s21 + $0xc50] sm:$0xff]  ;;  %v3315_v29 = vld [vmem:[%s4846_s21 + $0xe60] sm:$0xff]  ;;  %v3246_v34 = vld [vmem:[%s4846_s21 + $0xc38] sm:$0xff] }
 0x1ef   : > { %2218 = vmatpush2.msra.mxu1 %v3233_v45  ;;  %2066 = vmatprep.subr.mxu0 %v3166_v46  ;;  %v2174_v45 = vrot.slane %v2101_v35, 6  ;;  %v3209_v46 = vld [vmem:[%s4846_s21 + $0xb10] sm:$0xff]  ;;  %v3312_v35 = vld [vmem:[%s4846_s21 + $0xe48] sm:$0xff] }
 0x1f0   : > { %2219 = vmatprep.subr.mxu1 %v3232_v47  ;;  %2067 = vmatpush2.msra.mxu0 %v3165_v48  ;;  %v2020_v47 = vsel %vm2017_vm3, %v2018_v32, %v2019_v33  ;;  %v3208_v48 = vld [vmem:[%s4846_s21 + $0xb08] sm:$0xff]  ;;  %v3247_v32 = vld [vmem:[%s4846_s21 + $0xc40] sm:$0xff]  ;;  %v3313_v33 = vld [vmem:[%s4846_s21 + $0xe50] sm:$0xff] }
 0x1f1   : > { %2220 = vmatpush2.msra.mxu1 %v3231_v49  ;;  %2068 = vmatprep.subr.mxu0 %v3164_v50  ;;  %v3270_v49 = vld [vmem:[%s4846_s21 + $0xcf8] sm:$0xff]  ;;  %v3207_v50 = vld [vmem:[%s4846_s21 + $0xb00] sm:$0xff] }
 0x1f2   : > { %2221 = vmatprep.subr.mxu1 %v3230_v51  ;;  %2069 = vmatpush2.msra.mxu0 %v3163_v52  ;;  %v2178_v51 = vsel %vm2172_vm4, %v2176_v40, %v2177_v41  ;;  %v3269_v52 = vld [vmem:[%s4846_s21 + $0xcf0] sm:$0xff]  ;;  %v3243_v40 = vld [vmem:[%s4846_s21 + $0xc20] sm:$0xff] }
 0x1f3   : > { %2222 = vmatpush2.msra.mxu1 %v3229_v53  ;;  %2070 = vmatprep.subr.mxu0 %v3162_v54  ;;  %v2175_v53 = vsel %vm2172_vm4, %v2173_v44, %v2174_v45  ;;  %v3268_v54 = vld [vmem:[%s4846_s21 + $0xce8] sm:$0xff]  ;;  %v3309_v41 = vld [vmem:[%s4846_s21 + $0xe30] sm:$0xff]  ;;  %v3307_v45 = vld [vmem:[%s4846_s21 + $0xe20] sm:$0xff] }
 0x1f4   : > { %2223 = vmatprep.subr.mxu1 %v3228_v55  ;;  %2071 = vmatpush2.msra.mxu0 %v3161_v56  ;;  %v3334_v55 = vld [vmem:[%s4846_s21 + $0xef8] sm:$0xff]  ;;  %v3267_v56 = vld [vmem:[%s4846_s21 + $0xce0] sm:$0xff]  ;;  %v3241_v44 = vld [vmem:[%s4846_s21 + $0xc10] sm:$0xff] }
 0x1f5   : > { %2224 = vmatpush2.msra.mxu1 %v3227_v57  ;;  %2072 = vmatprep.subr.mxu0 %v3160_v58  ;;  %v3333_v57 = vld [vmem:[%s4846_s21 + $0xef0] sm:$0xff]  ;;  %v3266_v58 = vld [vmem:[%s4846_s21 + $0xcd8] sm:$0xff] }
 0x1f6   : > { %2225 = vmatprep.subr.mxu1 %v3226_v59  ;;  %2073 = vmatpush2.msra.mxu0 %v3159_v60  ;;  %v3332_v59 = vld [vmem:[%s4846_s21 + $0xee8] sm:$0xff]  ;;  %v3265_v60 = vld [vmem:[%s4846_s21 + $0xcd0] sm:$0xff] }
 0x1f7   : > { %2226 = vmatpush2.msra.mxu1 %v3225_v61  ;;  %2074 = vmatprep.subr.mxu0 %v3158_v62  ;;  %v3331_v61 = vld [vmem:[%s4846_s21 + $0xee0] sm:$0xff]  ;;  %v3264_v62 = vld [vmem:[%s4846_s21 + $0xcc8] sm:$0xff] }
 0x1f8   : > { %2227 = vmatprep.subr.mxu1 %v3224_v63  ;;  %2075 = vmatpush2.msra.mxu0 %v3157_v0  ;;  %v3330_v63 = vld [vmem:[%s4846_s21 + $0xed8] sm:$0xff]  ;;  %v3263_v0 = vld [vmem:[%s4846_s21 + $0xcc0] sm:$0xff] }
 0x1f9   : > { %2228 = vmatpush2.msra.mxu1 %v3223_v1  ;;  %2076 = vmatprep.subr.mxu0 %v3156_v2  ;;  %v3329_v1 = vld [vmem:[%s4846_s21 + $0xed0] sm:$0xff]  ;;  %v3262_v2 = vld [vmem:[%s4846_s21 + $0xcb8] sm:$0xff] }
 0x1fa   : > { %2229 = vmatprep.subr.mxu1 %v3222_v3  ;;  %2077 = vmatpush2.msra.mxu0 %v3155_v4  ;;  %v3328_v3 = vld [vmem:[%s4846_s21 + $0xec8] sm:$0xff]  ;;  %v3261_v4 = vld [vmem:[%s4846_s21 + $0xcb0] sm:$0xff] }
 0x1fb   : > { %2230 = vmatpush2.msra.mxu1 %v3221_v5  ;;  %2078 = vmatprep.subr.mxu0 %v3154_v6  ;;  %v3327_v5 = vld [vmem:[%s4846_s21 + $0xec0] sm:$0xff]  ;;  %v3260_v6 = vld [vmem:[%s4846_s21 + $0xca8] sm:$0xff] }
 0x1fc   : > { %2231 = vmatprep.subr.mxu1 %v3220_v7  ;;  %2079 = vmatpush2.msra.mxu0 %v3153_v8  ;;  %v3326_v7 = vld [vmem:[%s4846_s21 + $0xeb8] sm:$0xff]  ;;  %v3259_v8 = vld [vmem:[%s4846_s21 + $0xca0] sm:$0xff] }
 0x1fd   : > { %2232 = vmatpush2.msra.mxu1 %v3219_v9  ;;  %2080 = vmatprep.subr.mxu0 %v3152_v10  ;;  %v3325_v9 = vld [vmem:[%s4846_s21 + $0xeb0] sm:$0xff]  ;;  %v3258_v10 = vld [vmem:[%s4846_s21 + $0xc98] sm:$0xff] }
 0x1fe   : > { %2233 = vmatprep.subr.mxu1 %v3218_v11  ;;  %2081 = vmatpush2.msra.mxu0 %v3151_v12  ;;  %v3324_v11 = vld [vmem:[%s4846_s21 + $0xea8] sm:$0xff]  ;;  %v3257_v12 = vld [vmem:[%s4846_s21 + $0xc90] sm:$0xff] }
 0x1ff   : > { %2234 = vmatpush2.msra.mxu1 %v3217_v13  ;;  %2082 = vmatprep.subr.mxu0 %v3150_v14  ;;  %v3323_v13 = vld [vmem:[%s4846_s21 + $0xea0] sm:$0xff]  ;;  %v3256_v14 = vld [vmem:[%s4846_s21 + $0xc88] sm:$0xff] }
 0x200   : > { %2235 = vmatprep.subr.mxu1 %v3216_v15  ;;  %2083 = vmatpush2.msra.mxu0 %v3149_v16  ;;  %v3322_v15 = vld [vmem:[%s4846_s21 + $0xe98] sm:$0xff]  ;;  %v3255_v16 = vld [vmem:[%s4846_s21 + $0xc80] sm:$0xff] }
 0x201   : > { %2236 = vmatpush2.msra.mxu1 %v3215_v17  ;;  %2084 = vmatprep.subr.mxu0 %v3148_v18  ;;  %v3321_v17 = vld [vmem:[%s4846_s21 + $0xe90] sm:$0xff]  ;;  %v3254_v18 = vld [vmem:[%s4846_s21 + $0xc78] sm:$0xff] }
 0x202   : > { %2237 = vmatprep.subr.mxu1 %v3214_v19  ;;  %2085 = vmatpush2.msra.mxu0 %v3147_v22  ;;  %v3320_v19 = vld [vmem:[%s4846_s21 + $0xe88] sm:$0xff] }
 0x203   : > { %2238 = vmatpush2.msra.mxu1 %v3213_v25  ;;  %2086 = vmatprep.subr.mxu0 %v3146_v26  ;;  %v3252_v22 = vld [vmem:[%s4846_s21 + $0xc68] sm:$0xff]  ;;  %v3317_v25 = vld [vmem:[%s4846_s21 + $0xe70] sm:$0xff]  ;;  %v3250_v26 = vld [vmem:[%s4846_s21 + $0xc58] sm:$0xff] }
 0x204   : > { %2239 = vmatprep.subr.mxu1 %v3212_v27  ;;  %2087 = vmatpush2.msra.mxu0 %v3145_v36  ;;  %v3316_v27 = vld [vmem:[%s4846_s21 + $0xe68] sm:$0xff]  ;;  %v3245_v36 = vld [vmem:[%s4846_s21 + $0xc30] sm:$0xff] }
 0x205   : > { %2240 = vmatpush2.msra.mxu1 %v3211_v37  ;;  %2088 = vmatprep.subr.mxu0 %v3144_v38  ;;  %v3311_v37 = vld [vmem:[%s4846_s21 + $0xe40] sm:$0xff]  ;;  %v3244_v38 = vld [vmem:[%s4846_s21 + $0xc28] sm:$0xff] }
 0x206   : > { %2241 = vmatprep.subr.mxu1 %v3210_v39  ;;  %2089 = vmatpush2.msra.mxu0 %v3143_v42  ;;  %v3310_v39 = vld [vmem:[%s4846_s21 + $0xe38] sm:$0xff] }
 0x207   : > { %2090 = vmatprep.mubr.f32.mxu0 %v2023_v43  ;;  %2242 = vmatpush2.msra.mxu1 %v3209_v46  ;;  %v3242_v42 = vld [vmem:[%s4846_s21 + $0xc18] sm:$0xff]  ;;  %v3308_v43 = vld [vmem:[%s4846_s21 + $0xe28] sm:$0xff] }
 0x208   : > { %2091 = vmatmul.mubr.f32.vlgmr.msra.gmra.mxu0 %v2020_v47  ;;  %2243 = vmatprep.subr.mxu1 %v3208_v48  ;;  %v3240_v46 = vld [vmem:[%s4846_s21 + $0xc08] sm:$0xff]  ;;  %v3306_v47 = vld [vmem:[%s4846_s21 + $0xe18] sm:$0xff]  ;;  %v3239_v48 = vld [vmem:[%s4846_s21 + $0xc00] sm:$0xff] }
 0x209   : > { %2321 = vmatprep.subr.mxu0 %v3270_v49  ;;  %2244 = vmatpush2.msra.mxu1 %v3207_v50  ;;  %v3305_v49 = vld [vmem:[%s4846_s21 + $0xe10] sm:$0xff]  ;;  %v3302_v50 = vld [vmem:[%s4846_s21 + $0xdf8] sm:$0xff] }
 0x20a   : > { %2245 = vmatprep.mubr.f32.mxu1 %v2178_v51  ;;  %2322 = vmatpush1.msra.mxu0 %v3269_v52  ;;  %v3304_v51 = vld [vmem:[%s4846_s21 + $0xe08] sm:$0xff]  ;;  %v3301_v52 = vld [vmem:[%s4846_s21 + $0xdf0] sm:$0xff] }
 0x20b   : > { %2246 = vmatmul.mubr.f32.vlgmr.msra.gmra.mxu1 %v2175_v53  ;;  %2323 = vmatprep.subr.mxu0 %v3268_v54  ;;  %v3303_v53 = vld [vmem:[%s4846_s21 + $0xe00] sm:$0xff]  ;;  %v3300_v54 = vld [vmem:[%s4846_s21 + $0xde8] sm:$0xff] }
 0x20c   : > { %2475 = vmatprep.subr.mxu1 %v3334_v55  ;;  %2324 = vmatpush1.msra.mxu0 %v3267_v56  ;;  %v3366_v55 = vld [vmem:[%s4846_s21 + $0xff8] sm:$0xff]  ;;  %v3299_v56 = vld [vmem:[%s4846_s21 + $0xde0] sm:$0xff] }
 0x20d   : > { %2476 = vmatpush1.msra.mxu1 %v3333_v57  ;;  %2325 = vmatprep.subr.mxu0 %v3266_v58  ;;  %v3365_v57 = vld [vmem:[%s4846_s21 + $0xff0] sm:$0xff]  ;;  %v3298_v58 = vld [vmem:[%s4846_s21 + $0xdd8] sm:$0xff] }
 0x20e   : > { %2477 = vmatprep.subr.mxu1 %v3332_v59  ;;  %2326 = vmatpush1.msra.mxu0 %v3265_v60  ;;  %v3364_v59 = vld [vmem:[%s4846_s21 + $0xfe8] sm:$0xff]  ;;  %v3297_v60 = vld [vmem:[%s4846_s21 + $0xdd0] sm:$0xff] }
 0x20f   : > { %2478 = vmatpush1.msra.mxu1 %v3331_v61  ;;  %2327 = vmatprep.subr.mxu0 %v3264_v62  ;;  %v3363_v61 = vld [vmem:[%s4846_s21 + $0xfe0] sm:$0xff]  ;;  %v3296_v62 = vld [vmem:[%s4846_s21 + $0xdc8] sm:$0xff] }
 0x210   : > { %2479 = vmatprep.subr.mxu1 %v3330_v63  ;;  %2328 = vmatpush1.msra.mxu0 %v3263_v0  ;;  %v3362_v63 = vld [vmem:[%s4846_s21 + $0xfd8] sm:$0xff]  ;;  %v3295_v0 = vld [vmem:[%s4846_s21 + $0xdc0] sm:$0xff] }
 0x211   : > { %2480 = vmatpush1.msra.mxu1 %v3329_v1  ;;  %2329 = vmatprep.subr.mxu0 %v3262_v2  ;;  %v3361_v1 = vld [vmem:[%s4846_s21 + $0xfd0] sm:$0xff]  ;;  %v3294_v2 = vld [vmem:[%s4846_s21 + $0xdb8] sm:$0xff] }
 0x212   : > { %2481 = vmatprep.subr.mxu1 %v3328_v3  ;;  %2330 = vmatpush1.msra.mxu0 %v3261_v4  ;;  %v3360_v3 = vld [vmem:[%s4846_s21 + $0xfc8] sm:$0xff]  ;;  %v3293_v4 = vld [vmem:[%s4846_s21 + $0xdb0] sm:$0xff] }
 0x213   : > { %2482 = vmatpush1.msra.mxu1 %v3327_v5  ;;  %2331 = vmatprep.subr.mxu0 %v3260_v6  ;;  %v3359_v5 = vld [vmem:[%s4846_s21 + $0xfc0] sm:$0xff]  ;;  %v3292_v6 = vld [vmem:[%s4846_s21 + $0xda8] sm:$0xff] }
 0x214   : > { %2483 = vmatprep.subr.mxu1 %v3326_v7  ;;  %2332 = vmatpush1.msra.mxu0 %v3259_v8  ;;  %v3358_v7 = vld [vmem:[%s4846_s21 + $0xfb8] sm:$0xff]  ;;  %v3291_v8 = vld [vmem:[%s4846_s21 + $0xda0] sm:$0xff] }
 0x215   : > { %2484 = vmatpush1.msra.mxu1 %v3325_v9  ;;  %2333 = vmatprep.subr.mxu0 %v3258_v10  ;;  %v3357_v9 = vld [vmem:[%s4846_s21 + $0xfb0] sm:$0xff]  ;;  %v3290_v10 = vld [vmem:[%s4846_s21 + $0xd98] sm:$0xff] }
 0x216   : > { %2485 = vmatprep.subr.mxu1 %v3324_v11  ;;  %2334 = vmatpush1.msra.mxu0 %v3257_v12  ;;  %v3356_v11 = vld [vmem:[%s4846_s21 + $0xfa8] sm:$0xff]  ;;  %v3289_v12 = vld [vmem:[%s4846_s21 + $0xd90] sm:$0xff] }
 0x217   : > { %2486 = vmatpush1.msra.mxu1 %v3323_v13  ;;  %2335 = vmatprep.subr.mxu0 %v3256_v14  ;;  %v3355_v13 = vld [vmem:[%s4846_s21 + $0xfa0] sm:$0xff]  ;;  %v3288_v14 = vld [vmem:[%s4846_s21 + $0xd88] sm:$0xff] }
 0x218   : > { %2487 = vmatprep.subr.mxu1 %v3322_v15  ;;  %2336 = vmatpush1.msra.mxu0 %v3255_v16  ;;  %v3354_v15 = vld [vmem:[%s4846_s21 + $0xf98] sm:$0xff]  ;;  %v3287_v16 = vld [vmem:[%s4846_s21 + $0xd80] sm:$0xff] }
 0x219   : > { %2488 = vmatpush1.msra.mxu1 %v3321_v17  ;;  %2337 = vmatprep.subr.mxu0 %v3254_v18  ;;  %v3353_v17 = vld [vmem:[%s4846_s21 + $0xf90] sm:$0xff]  ;;  %v3286_v18 = vld [vmem:[%s4846_s21 + $0xd78] sm:$0xff] }
 0x21a   : > { %2489 = vmatprep.subr.mxu1 %v3320_v19  ;;  %2338 = vmatpush1.msra.mxu0 %v3253_v20  ;;  %v3352_v19 = vld [vmem:[%s4846_s21 + $0xf88] sm:$0xff]  ;;  %v3285_v20 = vld [vmem:[%s4846_s21 + $0xd70] sm:$0xff] }
 0x21b   : > { %2490 = vmatpush1.msra.mxu1 %v3319_v21  ;;  %2339 = vmatprep.subr.mxu0 %v3252_v22  ;;  %v3351_v21 = vld [vmem:[%s4846_s21 + $0xf80] sm:$0xff]  ;;  %v3284_v22 = vld [vmem:[%s4846_s21 + $0xd68] sm:$0xff] }
 0x21c   : > { %2491 = vmatprep.subr.mxu1 %v3318_v23  ;;  %2340 = vmatpush1.msra.mxu0 %v3251_v24  ;;  %v3350_v23 = vld [vmem:[%s4846_s21 + $0xf78] sm:$0xff]  ;;  %v3283_v24 = vld [vmem:[%s4846_s21 + $0xd60] sm:$0xff] }
 0x21d   : > { %2492 = vmatpush1.msra.mxu1 %v3317_v25  ;;  %2341 = vmatprep.subr.mxu0 %v3250_v26  ;;  %v3349_v25 = vld [vmem:[%s4846_s21 + $0xf70] sm:$0xff]  ;;  %v3282_v26 = vld [vmem:[%s4846_s21 + $0xd58] sm:$0xff] }
 0x21e   : > { %2493 = vmatprep.subr.mxu1 %v3316_v27  ;;  %2342 = vmatpush1.msra.mxu0 %v3249_v28  ;;  %v3348_v27 = vld [vmem:[%s4846_s21 + $0xf68] sm:$0xff]  ;;  %v3281_v28 = vld [vmem:[%s4846_s21 + $0xd50] sm:$0xff] }
 0x21f   : > { %2494 = vmatpush1.msra.mxu1 %v3315_v29  ;;  %2343 = vmatprep.subr.mxu0 %v3248_v30  ;;  %v3347_v29 = vld [vmem:[%s4846_s21 + $0xf60] sm:$0xff]  ;;  %v3280_v30 = vld [vmem:[%s4846_s21 + $0xd48] sm:$0xff] }
 0x220   : > { %2495 = vmatprep.subr.mxu1 %v3314_v31  ;;  %2344 = vmatpush1.msra.mxu0 %v3247_v32  ;;  %v3346_v31 = vld [vmem:[%s4846_s21 + $0xf58] sm:$0xff]  ;;  %v3279_v32 = vld [vmem:[%s4846_s21 + $0xd40] sm:$0xff] }
 0x221   : > { %2496 = vmatpush1.msra.mxu1 %v3313_v33  ;;  %2345 = vmatprep.subr.mxu0 %v3246_v34  ;;  %v3345_v33 = vld [vmem:[%s4846_s21 + $0xf50] sm:$0xff]  ;;  %v3278_v34 = vld [vmem:[%s4846_s21 + $0xd38] sm:$0xff] }
 0x222   : > { %2497 = vmatprep.subr.mxu1 %v3312_v35  ;;  %2346 = vmatpush1.msra.mxu0 %v3245_v36  ;;  %v3344_v35 = vld [vmem:[%s4846_s21 + $0xf48] sm:$0xff]  ;;  %v3277_v36 = vld [vmem:[%s4846_s21 + $0xd30] sm:$0xff] }
 0x223   : > { %2498 = vmatpush1.msra.mxu1 %v3311_v37  ;;  %2347 = vmatprep.subr.mxu0 %v3244_v38  ;;  %v3343_v37 = vld [vmem:[%s4846_s21 + $0xf40] sm:$0xff]  ;;  %v3276_v38 = vld [vmem:[%s4846_s21 + $0xd28] sm:$0xff] }
 0x224   : > { %2499 = vmatprep.subr.mxu1 %v3310_v39  ;;  %2348 = vmatpush1.msra.mxu0 %v3243_v40  ;;  %v3342_v39 = vld [vmem:[%s4846_s21 + $0xf38] sm:$0xff]  ;;  %v3275_v40 = vld [vmem:[%s4846_s21 + $0xd20] sm:$0xff] }
 0x225   : > { %2500 = vmatpush1.msra.mxu1 %v3309_v41  ;;  %2349 = vmatprep.subr.mxu0 %v3242_v42  ;;  %v3341_v41 = vld [vmem:[%s4846_s21 + $0xf30] sm:$0xff]  ;;  %v3274_v42 = vld [vmem:[%s4846_s21 + $0xd18] sm:$0xff] }
 0x226   : > { %2501 = vmatprep.subr.mxu1 %v3308_v43  ;;  %2350 = vmatpush1.msra.mxu0 %v3241_v44  ;;  %v3340_v43 = vld [vmem:[%s4846_s21 + $0xf28] sm:$0xff]  ;;  %v2395_v44 = vld [vmem:[%s4966_s26 + $0x18] sm:$0xfe] }
 0x227   : > { %2502 = vmatpush1.msra.mxu1 %v3307_v45  ;;  %2351 = vmatprep.subr.mxu0 %v3240_v46  ;;  %v2397_v45 = vld [vmem:[%s4966_s26 + $0x28] sm:$0x1]  ;;  %v3273_v46 = vld [vmem:[%s4846_s21 + $0xd10] sm:$0xff] }
 0x228   : > { %2503 = vmatprep.subr.mxu1 %v3306_v47  ;;  %2352 = vmatpush1.msra.mxu0 %v3239_v48  ;;  %v2394_v47 = vld [vmem:[%s4966_s26 + $0x10] sm:$0xfe]  ;;  %v2396_v48 = vld [vmem:[%s4966_s26 + $0x20] sm:$0x1] }
 0x229   : > { %2504 = vmatpush1.msra.mxu1 %v3305_v49  ;;  %2353 = vmatprep.subr.mxu0 %v3302_v50  ;;  %v3339_v49 = vld [vmem:[%s4846_s21 + $0xf20] sm:$0xff]  ;;  %v2549_v50 = vld [vmem:[%s4966_s26 + $0x18] sm:$0xfc] }
 0x22a   : > { %2505 = vmatprep.subr.mxu1 %v3304_v51  ;;  %2354 = vmatpush2.msra.mxu0 %v3301_v52  ;;  %v2551_v51 = vld [vmem:[%s4966_s26 + $0x28] sm:$0x3] }
 0x22b   : > { %2506 = vmatpush1.msra.mxu1 %v3303_v53  ;;  %2355 = vmatprep.subr.mxu0 %v3300_v54  ;;  %v3272_v52 = vld [vmem:[%s4846_s21 + $0xd08] sm:$0xff]  ;;  %v3338_v53 = vld [vmem:[%s4846_s21 + $0xf18] sm:$0xff]  ;;  %v2470_v54 = vrot.slane %v2395_v44, 1  ;;  %v3423_v44 = vld [vmem:[%s4846_s21 + $0x11c0] sm:$0xff] }
 0x22c   : > { %2507 = vmatprep.subr.mxu1 %v3366_v55  ;;  %2356 = vmatpush2.msra.mxu0 %v3299_v56  ;;  %v2471_v55 = vrot.slane %v2397_v45, 1  ;;  %v3271_v56 = vld [vmem:[%s4846_s21 + $0xd00] sm:$0xff]  ;;  %v3422_v45 = vld [vmem:[%s4846_s21 + $0x11b8] sm:$0xff] }
 0x22d   : > { %2508 = vmatpush2.msra.mxu1 %v3365_v57  ;;  %2357 = vmatprep.subr.mxu0 %v3298_v58  ;;  %v2255_v57 = vld [vmem:[%s4966_s26 + $0x18] sm:$0xff]  ;;  %v2467_v58 = vrot.slane %v2394_v47, 1  ;;  %v3420_v47 = vld [vmem:[%s4846_s21 + $0x11a8] sm:$0xff] }
 0x22e   : > { %2509 = vmatprep.subr.mxu1 %v3364_v59  ;;  %2358 = vmatpush2.msra.mxu0 %v3297_v60  ;;  %v2468_v59 = vrot.slane %v2396_v48, 1  ;;  %v3337_v60 = vld [vmem:[%s4846_s21 + $0xf10] sm:$0xff]  ;;  %v3419_v48 = vld [vmem:[%s4846_s21 + $0x11a0] sm:$0xff] }
 0x22f   : > { %2510 = vmatpush2.msra.mxu1 %v3363_v61  ;;  %2359 = vmatprep.subr.mxu0 %v3296_v62  ;;  %v2254_v61 = vld [vmem:[%s4966_s26 + $0x10] sm:$0xff]  ;;  %v2624_v62 = vrot.slane %v2549_v50, 2 }
 0x230   : > { %2511 = vmatprep.subr.mxu1 %v3362_v63  ;;  %2360 = vmatpush2.msra.mxu0 %v3295_v0  ;;  %v2625_v63 = vrot.slane %v2551_v51, 2  ;;  %v3336_v0 = vld [vmem:[%s4846_s21 + $0xf08] sm:$0xff]  ;;  %v3417_v50 = vld [vmem:[%s4846_s21 + $0x1190] sm:$0xff] }
 0x231   : > { %2512 = vmatpush2.msra.mxu1 %v3361_v1  ;;  %2361 = vmatprep.subr.mxu0 %v3294_v2  ;;  %v3398_v1 = vld [vmem:[%s4846_s21 + $0x10f8] sm:$0xff]  ;;  %v3335_v2 = vld [vmem:[%s4846_s21 + $0xf00] sm:$0xff]  ;;  %v3416_v51 = vld [vmem:[%s4846_s21 + $0x1188] sm:$0xff] }
 0x232   : > { %2513 = vmatprep.subr.mxu1 %v3360_v3  ;;  %2362 = vmatpush2.msra.mxu0 %v3293_v4  ;;  %v2472_v3 = vsel %vm1483_vm0, %v2470_v54, %v2471_v55  ;;  %v3397_v4 = vld [vmem:[%s4846_s21 + $0x10f0] sm:$0xff]  ;;  %v3412_v55 = vld [vmem:[%s4846_s21 + $0x1168] sm:$0xff] }
 0x233   : > { %2514 = vmatpush2.msra.mxu1 %v3359_v5  ;;  %2363 = vmatprep.subr.mxu0 %v3292_v6  ;;  %v2469_v5 = vsel %vm1483_vm0, %v2467_v58, %v2468_v59  ;;  %v3396_v6 = vld [vmem:[%s4846_s21 + $0x10e8] sm:$0xff]  ;;  %v3413_v54 = vld [vmem:[%s4846_s21 + $0x1170] sm:$0xff] }
 0x234   : > { %2515 = vmatprep.subr.mxu1 %v3358_v7  ;;  %2364 = vmatpush2.msra.mxu0 %v3291_v8  ;;  %v2626_v7 = vsel %vm1707_vm1, %v2624_v62, %v2625_v63  ;;  %v3395_v8 = vld [vmem:[%s4846_s21 + $0x10e0] sm:$0xff]  ;;  %v3409_v58 = vld [vmem:[%s4846_s21 + $0x1150] sm:$0xff]  ;;  %v3408_v59 = vld [vmem:[%s4846_s21 + $0x1148] sm:$0xff] }
 0x235   : > { %2516 = vmatpush2.msra.mxu1 %v3357_v9  ;;  %2365 = vmatprep.subr.mxu0 %v3290_v10  ;;  %v3394_v9 = vld [vmem:[%s4846_s21 + $0x10d8] sm:$0xff]  ;;  %v3393_v10 = vld [vmem:[%s4846_s21 + $0x10d0] sm:$0xff] }
 0x236   : > { %2517 = vmatprep.subr.mxu1 %v3356_v11  ;;  %2366 = vmatpush2.msra.mxu0 %v3289_v12  ;;  %v3392_v11 = vld [vmem:[%s4846_s21 + $0x10c8] sm:$0xff]  ;;  %v3391_v12 = vld [vmem:[%s4846_s21 + $0x10c0] sm:$0xff]  ;;  %v3405_v62 = vld [vmem:[%s4846_s21 + $0x1130] sm:$0xff] }
 0x237   : > { %2518 = vmatpush2.msra.mxu1 %v3355_v13  ;;  %2367 = vmatprep.subr.mxu0 %v3288_v14  ;;  %v3390_v13 = vld [vmem:[%s4846_s21 + $0x10b8] sm:$0xff]  ;;  %v3389_v14 = vld [vmem:[%s4846_s21 + $0x10b0] sm:$0xff] }
 0x238   : > { %2519 = vmatprep.subr.mxu1 %v3354_v15  ;;  %2368 = vmatpush2.msra.mxu0 %v3287_v16  ;;  %v3388_v15 = vld [vmem:[%s4846_s21 + $0x10a8] sm:$0xff]  ;;  %v3387_v16 = vld [vmem:[%s4846_s21 + $0x10a0] sm:$0xff]  ;;  %v2548_v63 = vld [vmem:[%s4966_s26 + $0x10] sm:$0xfc] }
 0x239   : > { %2520 = vmatpush2.msra.mxu1 %v3353_v17  ;;  %2369 = vmatprep.subr.mxu0 %v3286_v18  ;;  %v3386_v17 = vld [vmem:[%s4846_s21 + $0x1098] sm:$0xff]  ;;  %v3385_v18 = vld [vmem:[%s4846_s21 + $0x1090] sm:$0xff] }
 0x23a   : > { %2521 = vmatprep.subr.mxu1 %v3352_v19  ;;  %2370 = vmatpush2.msra.mxu0 %v3285_v20  ;;  %v3384_v19 = vld [vmem:[%s4846_s21 + $0x1088] sm:$0xff]  ;;  %v3383_v20 = vld [vmem:[%s4846_s21 + $0x1080] sm:$0xff] }
 0x23b   : > { %2522 = vmatpush2.msra.mxu1 %v3351_v21  ;;  %2371 = vmatprep.subr.mxu0 %v3284_v22  ;;  %v3382_v21 = vld [vmem:[%s4846_s21 + $0x1078] sm:$0xff]  ;;  %v3381_v22 = vld [vmem:[%s4846_s21 + $0x1070] sm:$0xff] }
 0x23c   : > { %2523 = vmatprep.subr.mxu1 %v3350_v23  ;;  %2372 = vmatpush2.msra.mxu0 %v3283_v24  ;;  %v3380_v23 = vld [vmem:[%s4846_s21 + $0x1068] sm:$0xff]  ;;  %v3379_v24 = vld [vmem:[%s4846_s21 + $0x1060] sm:$0xff] }
 0x23d   : > { %2524 = vmatpush2.msra.mxu1 %v3349_v25  ;;  %2373 = vmatprep.subr.mxu0 %v3282_v26  ;;  %v3378_v25 = vld [vmem:[%s4846_s21 + $0x1058] sm:$0xff]  ;;  %v3377_v26 = vld [vmem:[%s4846_s21 + $0x1050] sm:$0xff] }
 0x23e   : > { %2525 = vmatprep.subr.mxu1 %v3348_v27  ;;  %2374 = vmatpush2.msra.mxu0 %v3281_v28  ;;  %v3376_v27 = vld [vmem:[%s4846_s21 + $0x1048] sm:$0xff]  ;;  %v3375_v28 = vld [vmem:[%s4846_s21 + $0x1040] sm:$0xff] }
 0x23f   : > { %2526 = vmatpush2.msra.mxu1 %v3347_v29  ;;  %2375 = vmatprep.subr.mxu0 %v3280_v30  ;;  %v3374_v29 = vld [vmem:[%s4846_s21 + $0x1038] sm:$0xff]  ;;  %v3373_v30 = vld [vmem:[%s4846_s21 + $0x1030] sm:$0xff] }
 0x240   : > { %2527 = vmatprep.subr.mxu1 %v3346_v31  ;;  %2376 = vmatpush2.msra.mxu0 %v3279_v32  ;;  %v3372_v31 = vld [vmem:[%s4846_s21 + $0x1028] sm:$0xff]  ;;  %v3371_v32 = vld [vmem:[%s4846_s21 + $0x1020] sm:$0xff] }
 0x241   : > { %2528 = vmatpush2.msra.mxu1 %v3345_v33  ;;  %2377 = vmatprep.subr.mxu0 %v3278_v34  ;;  %v3370_v33 = vld [vmem:[%s4846_s21 + $0x1018] sm:$0xff]  ;;  %v3369_v34 = vld [vmem:[%s4846_s21 + $0x1010] sm:$0xff] }
 0x242   : > { %2529 = vmatprep.subr.mxu1 %v3344_v35  ;;  %2378 = vmatpush2.msra.mxu0 %v3277_v36  ;;  %v3368_v35 = vld [vmem:[%s4846_s21 + $0x1008] sm:$0xff]  ;;  %v3367_v36 = vld [vmem:[%s4846_s21 + $0x1000] sm:$0xff] }
 0x243   : > { %2530 = vmatpush2.msra.mxu1 %v3343_v37  ;;  %2379 = vmatprep.subr.mxu0 %v3276_v38  ;;  %v3430_v37 = vld [vmem:[%s4846_s21 + $0x11f8] sm:$0xff]  ;;  %v3429_v38 = vld [vmem:[%s4846_s21 + $0x11f0] sm:$0xff] }
 0x244   : > { %2531 = vmatprep.subr.mxu1 %v3342_v39  ;;  %2380 = vmatpush2.msra.mxu0 %v3275_v40  ;;  %v3428_v39 = vld [vmem:[%s4846_s21 + $0x11e8] sm:$0xff]  ;;  %v3427_v40 = vld [vmem:[%s4846_s21 + $0x11e0] sm:$0xff] }
 0x245   : > { %2532 = vmatpush2.msra.mxu1 %v3341_v41  ;;  %2381 = vmatprep.subr.mxu0 %v3274_v42  ;;  %v3426_v41 = vld [vmem:[%s4846_s21 + $0x11d8] sm:$0xff]  ;;  %v3425_v42 = vld [vmem:[%s4846_s21 + $0x11d0] sm:$0xff] }
 0x246   : > { %2533 = vmatprep.subr.mxu1 %v3340_v43  ;;  %2382 = vmatpush2.msra.mxu0 %v3273_v46  ;;  %v3424_v43 = vld [vmem:[%s4846_s21 + $0x11c8] sm:$0xff]  ;;  %v3421_v46 = vld [vmem:[%s4846_s21 + $0x11b0] sm:$0xff] }
 0x247   : > { %2534 = vmatpush2.msra.mxu1 %v3339_v49  ;;  %2383 = vmatprep.subr.mxu0 %v3272_v52  ;;  %v3418_v49 = vld [vmem:[%s4846_s21 + $0x1198] sm:$0xff]  ;;  %v3415_v52 = vld [vmem:[%s4846_s21 + $0x1180] sm:$0xff] }
 0x248   : > { %2535 = vmatprep.subr.mxu1 %v3338_v53  ;;  %2384 = vmatpush2.msra.mxu0 %v3271_v56  ;;  %v3414_v53 = vld [vmem:[%s4846_s21 + $0x1178] sm:$0xff]  ;;  %v3411_v56 = vld [vmem:[%s4846_s21 + $0x1160] sm:$0xff] }
 0x249   : > { %2385 = vmatprep.mubr.f32.mxu0 %v2255_v57  ;;  %2536 = vmatpush2.msra.mxu1 %v3337_v60  ;;  %v3410_v57 = vld [vmem:[%s4846_s21 + $0x1158] sm:$0xff]  ;;  %v3407_v60 = vld [vmem:[%s4846_s21 + $0x1140] sm:$0xff] }
 0x24a   : > { %2386 = vmatmul.mubr.f32.vlgmr.msra.gmra.mxu0 %v2254_v61  ;;  %2537 = vmatprep.subr.mxu1 %v3336_v0  ;;  %v3406_v61 = vld [vmem:[%s4846_s21 + $0x1138] sm:$0xff]  ;;  %v2550_v0 = vld [vmem:[%s4966_s26 + $0x20] sm:$0x3] }
 0x24b   : > { %2629 = vmatprep.subr.mxu0 %v3398_v1  ;;  %2538 = vmatpush2.msra.mxu1 %v3335_v2  ;;  %v3404_v1 = vld [vmem:[%s4846_s21 + $0x1128] sm:$0xff]  ;;  %v3403_v2 = vld [vmem:[%s4846_s21 + $0x1120] sm:$0xff] }
 0x24c   : > { %2539 = vmatprep.mubr.f32.mxu1 %v2472_v3  ;;  %2630 = vmatpush1.msra.mxu0 %v3397_v4  ;;  %v3402_v3 = vld [vmem:[%s4846_s21 + $0x1118] sm:$0xff]  ;;  %v2621_v4 = vrot.slane %v2548_v63, 2 }
 0x24d   : > { %2540 = vmatmul.mubr.f32.vlgmr.msra.gmra.mxu1 %v2469_v5  ;;  %2631 = vmatprep.subr.mxu0 %v3396_v6  ;;  %v2622_v5 = vrot.slane %v2550_v0, 2  ;;  %v3401_v6 = vld [vmem:[%s4846_s21 + $0x1110] sm:$0xff] }
 0x24e   : > { %2693 = vmatprep.mubr.f32.mxu0 %v2626_v7  ;;  %2632 = vmatpush1.msra.mxu0 %v3395_v8  ;;  %v3400_v7 = vld [vmem:[%s4846_s21 + $0x1108] sm:$0xff]  ;;  %v3399_v8 = vld [vmem:[%s4846_s21 + $0x1100] sm:$0xff] }
 0x24f   : > { %2633 = vmatprep.subr.mxu0 %v3394_v9  ;;  %v2623_v9 = vsel %vm1707_vm1, %v2621_v4, %v2622_v5 }
 0x250   : > { %2634 = vmatpush1.msra.mxu0 %v3393_v10  ;;  %v3591_v10 = vmov 0.0  }
 0x251   : > { %2635 = vmatprep.subr.mxu0 %v3392_v11  ;;  %2773 = vst [vmem:[%s5483_s3] sm:$0x1f] %v3591_v10  ;;  %2774 = vst [vmem:[%s5483_s3 + $0x8] sm:$0x1f] %v3591_v10  ;;  %v1558_v11 = vpop.f32.mrf.mxu0 }
 0x252   : > { %2636 = vmatpush1.msra.mxu0 %v3391_v12  ;;  %2785 = vst [vmem:[%s5483_s3 + $0x10] sm:$0xe0] %v3591_v10  ;;  %2786 = vst [vmem:[%s5483_s3 + $0x18] sm:$0xe0] %v3591_v10  ;;  %v1629_v12 = vpop.f32.mrf.mxu1 }
 0x253   : > { %2637 = vmatprep.subr.mxu0 %v3390_v13  ;;  %2787 = vst [vmem:[%s5483_s3 + $0x20] sm:$0xf] %v3591_v10  ;;  %2788 = vst [vmem:[%s5483_s3 + $0x28] sm:$0xf] %v3591_v10  ;;  %v1560_v13 = vpop.f32.mrf.mxu0 }
 0x254   : > { %2638 = vmatpush1.msra.mxu0 %v3389_v14 }
 0x255   : > { %2639 = vmatprep.subr.mxu0 %v3388_v15  ;;  %v1631_v15 = vpop.f32.mrf.mxu1 }
 0x256   : > { %2640 = vmatpush1.msra.mxu0 %v3387_v16  ;;  %v1630_v16 = vadd.f32 %v1629_v12, %v1558_v11 }
 0x257   : > { %2641 = vmatprep.subr.mxu0 %v3386_v17 }
 0x258   : > { %2642 = vmatpush1.msra.mxu0 %v3385_v18 }
 0x259   : > { %2643 = vmatprep.subr.mxu0 %v3384_v19  ;;  %v1632_v19 = vadd.f32 %v1631_v15, %v1560_v13 }
 0x25a   : > { %2644 = vmatpush1.msra.mxu0 %v3383_v20 }
 0x25b   : > { %2645 = vmatprep.subr.mxu0 %v3382_v21 }
 0x25c   : > { %2646 = vmatpush1.msra.mxu0 %v3381_v22 }
 0x25d   : > { %2647 = vmatprep.subr.mxu0 %v3380_v23  ;;  %v2702_v23 = vlaneseq }
 0x25e   : > { %2648 = vmatpush1.msra.mxu0 %v3379_v24 }
 0x25f   : > { %2649 = vmatprep.subr.mxu0 %v3378_v25 }
 0x260   : > { %2650 = vmatpush1.msra.mxu0 %v3377_v26 }
 0x261   : > { %2651 = vmatprep.subr.mxu0 %v3376_v27 }
 0x262   : > { %2652 = vmatpush1.msra.mxu0 %v3375_v28 }
 0x263   : > { %2653 = vmatprep.subr.mxu0 %v3374_v29 }
 0x264   : > { %2654 = vmatpush1.msra.mxu0 %v3373_v30  ;;  %v2703_v30 = vshrl.u32 %v2702_v23, 7 }
 0x265   : > { %2655 = vmatprep.subr.mxu0 %v3372_v31 }
 0x266   : > { %2656 = vmatpush1.msra.mxu0 %v3371_v32 }
 0x267   : > { %2657 = vmatprep.subr.mxu0 %v3370_v33 }
 0x268   : > { %2658 = vmatpush1.msra.mxu0 %v3369_v34 }
 0x269   : > { %2659 = vmatprep.subr.mxu0 %v3368_v35  ;;  %v2708_v35 = vand.u32 3, %v2703_v30 }
 0x26a   : > { %2660 = vmatpush1.msra.mxu0 %v3367_v36 }
 0x26b   : > { %2661 = vmatprep.subr.mxu0 %v3430_v37  ;;  %vm2716_vm5 = vcmp.lt.s32.totalorder %v2708_v35, 2 }
 0x26c   : > { %2662 = vmatpush2.msra.mxu0 %v3429_v38 }
 0x26d   : > { %2663 = vmatprep.subr.mxu0 %v3428_v39 }
 0x26e   : > { %2664 = vmatpush2.msra.mxu0 %v3427_v40 }
 0x26f   : > { %2665 = vmatprep.subr.mxu0 %v3426_v41 }
 0x270   : > { %2666 = vmatpush2.msra.mxu0 %v3425_v42 }
 0x271   : > { %2667 = vmatprep.subr.mxu0 %v3424_v43 }
 0x272   : > { %2668 = vmatpush2.msra.mxu0 %v3423_v44  ;;  %v3431_v44 = vsel %vm2716_vm5, 1.0, %v3591_v10 }
 0x273   : > { %2669 = vmatprep.subr.mxu0 %v3422_v45 }
 0x274   : > { %2670 = vmatpush2.msra.mxu0 %v3421_v46 }
 0x275   : > { %2671 = vmatprep.subr.mxu0 %v3420_v47 }
 0x276   : > { %2672 = vmatpush2.msra.mxu0 %v3419_v48 }
 0x277   : > { %2673 = vmatprep.subr.mxu0 %v3418_v49 }
 0x278   : > { %2674 = vmatpush2.msra.mxu0 %v3417_v50 }
 0x279   : > { %2675 = vmatprep.subr.mxu0 %v3416_v51 }
 0x27a   : > { %2676 = vmatpush2.msra.mxu0 %v3415_v52 }
 0x27b   : > { %2677 = vmatprep.subr.mxu0 %v3414_v53 }
 0x27c   : > { %2678 = vmatpush2.msra.mxu0 %v3413_v54 }
 0x27d   : > { %2679 = vmatprep.subr.mxu0 %v3412_v55 }
 0x27e   : > { %2680 = vmatpush2.msra.mxu0 %v3411_v56 }
 0x27f   : > { %2681 = vmatprep.subr.mxu0 %v3410_v57 }
 0x280   : > { %2682 = vmatpush2.msra.mxu0 %v3409_v58 }
 0x281   : > { %2683 = vmatprep.subr.mxu0 %v3408_v59 }
 0x282   : > { %2684 = vmatpush2.msra.mxu0 %v3407_v60 }
 0x283   : > { %2685 = vmatprep.subr.mxu0 %v3406_v61 }
 0x284   : > { %2686 = vmatpush2.msra.mxu0 %v3405_v62 }
 0x285   : > { %2687 = vmatprep.subr.mxu0 %v3404_v1 }
 0x286   : > { %2688 = vmatpush2.msra.mxu0 %v3403_v2  ;;  %v1782_v14 = vpop.f32.mrf.mxu0 }
 0x287   : > { %2689 = vmatprep.subr.mxu0 %v3402_v3  ;;  %v1787_v20 = vadd.f32 %v1782_v14, %v1630_v16 }
 0x288   : > { %2690 = vmatpush2.msra.mxu0 %v3401_v6  ;;  %v1784_v17 = vpop.f32.mrf.mxu0 }
 0x289   : > { %2691 = vmatprep.subr.mxu0 %v3400_v7  ;;  %v1937_v18 = vpop.f32.mrf.mxu1  ;;  %v1788_v22 = vadd.f32 %v1784_v17, %v1632_v19 }
 0x28a   : > { %2692 = vmatpush2.msra.mxu0 %v3399_v8  ;;  %v1942_v25 = vadd.f32 %v1937_v18, %v1787_v20 }
 0x28b   : > { %2694 = vmatmul.mubr.f32.vlgmr.msra.gmra.mxu0 %v2623_v9  ;;  %v1939_v24 = vpop.f32.mrf.mxu1 }
 0x28c   : > { %v1943_v28 = vadd.f32 %v1939_v24, %v1788_v22 }
 0x2c8   : > { %v2092_v21 = vpop.f32.mrf.mxu0 }
 0x2c9   : > { %v2097_v29 = vadd.f32 %v2092_v21, %v1942_v25 }
 0x2ca   : > { %v2094_v26 = vpop.f32.mrf.mxu0 }
 0x2cb   : > { %v2247_v27 = vpop.f32.mrf.mxu1  ;;  %v2098_v32 = vadd.f32 %v2094_v26, %v1943_v28 }
 0x2cc   : > { %v2252_v34 = vadd.f32 %v2247_v27, %v2097_v29 }
 0x2cd   : > { %v2249_v33 = vpop.f32.mrf.mxu1 }
 0x2ce   : > { %v2253_v38 = vadd.f32 %v2249_v33, %v2098_v32 }
 0x30a   : > { %v2387_v31 = vpop.f32.mrf.mxu0 }
 0x30b   : > { %v2392_v39 = vadd.f32 %v2387_v31, %v2252_v34 }
 0x30c   : > { %v2389_v36 = vpop.f32.mrf.mxu0 }
 0x30d   : > { %v2541_v37 = vpop.f32.mrf.mxu1  ;;  %v2393_v40 = vadd.f32 %v2389_v36, %v2253_v38 }
 0x30e   : > { %v2546_v42 = vadd.f32 %v2541_v37, %v2392_v39 }
 0x30f   : > { %v2543_v41 = vpop.f32.mrf.mxu1 }
 0x310   : > { %v2547_v45 = vadd.f32 %v2543_v41, %v2393_v40 }
 0x34b   : > { %v2695_v43 = vpop.f32.mrf.mxu0 }
 0x34c   : > { %v2700_v46 = vadd.f32 %v2695_v43, %v2546_v42  ;;  %v2821_v43 = vld [vmem:[%s5483_s3 + $0x20] sm:$0xff] (%p3674_p9) }
 0x34d   : > { %v2697_v47 = vpop.f32.mrf.mxu0  ;;  %2822 = vst [vmem:[%s2800_s8 + $0x40] sm:$0xff] (%p3674_p9), %v2821_v43 }
 0x34e   : > { %v2719_v48 = vmul.f32 %v3431_v44, %v2700_v46  ;;  %v2701_v49 = vadd.f32 %v2697_v47, %v2547_v45 }
 0x350   : > { %v2721_v50 = vrot.slane %v2719_v48, 4  ;;  %v2733_v51 = vmul.f32 %v2719_v48, %v2719_v48  ;;  %v2720_v52 = vmul.f32 %v3431_v44, %v2701_v49 }
 0x352   : > { %v2722_v53 = vadd.f32 %v2721_v50, %v2719_v48  ;;  %v2735_v54 = vrot.slane %v2733_v51, 4  ;;  %v2727_v55 = vrot.slane %v2720_v52, 4  ;;  %v2734_v56 = vmul.f32 %v2720_v52, %v2720_v52 }
 0x354   : > { %v2723_v57 = vrot.slane %v2722_v53, 2  ;;  %v2736_v58 = vadd.f32 %v2735_v54, %v2733_v51  ;;  %v2728_v59 = vadd.f32 %v2727_v55, %v2720_v52  ;;  %v2741_v60 = vrot.slane %v2734_v56, 4 }
 0x356   : > { %v2724_v61 = vadd.f32 %v2723_v57, %v2722_v53  ;;  %v2737_v62 = vrot.slane %v2736_v58, 2  ;;  %v2729_v63 = vrot.slane %v2728_v59, 2  ;;  %v2742_v0 = vadd.f32 %v2741_v60, %v2734_v56 }
 0x358   : > { %v2725_v1 = vrot.slane %v2724_v61, 1  ;;  %v2738_v2 = vadd.f32 %v2737_v62, %v2736_v58  ;;  %v2730_v3 = vadd.f32 %v2729_v63, %v2728_v59  ;;  %v2743_v4 = vrot.slane %v2742_v0, 2 }
 0x35a   : > { %v2726_v5 = vadd.f32 %v2725_v1, %v2724_v61  ;;  %v2739_v6 = vrot.slane %v2738_v2, 1  ;;  %v2731_v7 = vrot.slane %v2730_v3, 1  ;;  %v2744_v8 = vadd.f32 %v2743_v4, %v2742_v0 }
 0x35c   : > { %v2740_v9 = vadd.f32 %v2739_v6, %v2738_v2  ;;  %v2747_v10 = vmul.f32 0.25, %v2726_v5  ;;  %v2732_v11 = vadd.f32 %v2731_v7, %v2730_v3  ;;  %v2745_v12 = vrot.slane %v2744_v8, 1 }
 0x35e   : > { %v2749_v13 = vmul.f32 0.25, %v2740_v9  ;;  %v2751_v14 = vmul.f32 %v2747_v10, %v2747_v10  ;;  %v2746_v15 = vadd.f32 %v2745_v12, %v2744_v8  ;;  %v2748_v16 = vmul.f32 0.25, %v2732_v11 }
 0x35f   : > { %v2757_v25 = vsub.f32 %v2700_v46, %v2747_v10 }
 0x360   : > { %v2753_v17 = vsub.f32 %v2749_v13, %v2751_v14  ;;  %v2750_v18 = vmul.f32 0.25, %v2746_v15  ;;  %v2752_v19 = vmul.f32 %v2748_v16, %v2748_v16  ;;  %v2758_v28 = vsub.f32 %v2701_v49, %v2748_v16 }
 0x362   : > { %v2755_v20 = vmax.f32 %v2753_v17, 0.0  ;;  %v2754_v21 = vsub.f32 %v2750_v18, %v2752_v19 }
 0x364   : > { %v2759_v22 = vadd.f32 1e-05, %v2755_v20  ;;  %v2756_v23 = vmax.f32 %v2754_v21, 0.0 }
 0x366   : > { %3515 = vrsqrt.f32 %v2759_v22  ;;  %v2760_v24 = vadd.f32 1e-05, %v2756_v23 }
 0x368   : > { %3517 = vrsqrt.f32 %v2760_v24 }
 0x373   : > { %v3516_v26 = vpop.eup %3515 }
 0x374   : > { %v2763_v27 = vmul.f32 %v3516_v26, %v2757_v25 }
 0x375   : > { %v3518_v29 = vpop.eup %3517 }
 0x376   : > { %vm2765_vm6 = vcmp.ge.f32.partialorder %v2763_v27, 0.0  ;;  %v2767_v30 = vmul.f32 0.2, %v2763_v27  ;;  %v2764_v31 = vmul.f32 %v3518_v29, %v2758_v28 }
 0x378   : > { %v2769_v32 = vsel %vm2765_vm6, %v2763_v27, %v2767_v30  ;;  %vm2766_vm7 = vcmp.ge.f32.partialorder %v2764_v31, 0.0  ;;  %v2768_v34 = vmul.f32 0.2, %v2764_v31 }
 0x379   : > { %v2771_v33 = vmul.f32 %v3431_v44, %v2769_v32 }
 0x37a   : > { %v2770_v36 = vsel %vm2766_vm7, %v2764_v31, %v2768_v34 }
 0x37b   : > { %v2777_v35 = vrot.slane %v2771_v33, 3  ;;  %v2772_v37 = vmul.f32 %v3431_v44, %v2770_v36  ;;  %2795 = sbr.rel (!%p3674_p9) target bundleno = 904 (0x388), region = 55  ;;  %v2823_v44 = vld [vmem:[%s5483_s3 + $0x28] sm:$0xff] (%p3674_p9) }
 0x37c   : > { %2824 = vst [vmem:[%s2800_s8 + $0x48] sm:$0xff] (%p3674_p9), %v2823_v44 }
 0x37d   : > { %2781 = vst [vmem:[%s5483_s3] sm:$0xe0] %v2777_v35  ;;  %2783 = vst [vmem:[%s5483_s3 + $0x10] sm:$0x1f] %v2777_v35  ;;  %v2778_v38 = vrot.slane %v2772_v37, 3 }
 0x37f   : > { %2782 = vst [vmem:[%s5483_s3 + $0x8] sm:$0xe0] %v2778_v38  ;;  %2784 = vst [vmem:[%s5483_s3 + $0x18] sm:$0x1f] %v2778_v38 }
 0x384   : > { %v2813_v39 = vld [vmem:[%s5483_s3] sm:$0xff]  ;;  %v2817_v41 = vld [vmem:[%s5483_s3 + $0x10] sm:$0xff] }
 0x385   : > { %2814 = vst [vmem:[%s2800_s8] sm:$0xff] %v2813_v39  ;;  %2818 = vst [vmem:[%s2800_s8 + $0x20] sm:$0xff] %v2817_v41 }
 0x386   : > { %v2815_v40 = vld [vmem:[%s5483_s3 + $0x8] sm:$0xff]  ;;  %v2819_v42 = vld [vmem:[%s5483_s3 + $0x18] sm:$0xff] }
 0x387   : > { %2816 = vst [vmem:[%s2800_s8 + $0x8] sm:$0xff] %v2815_v40  ;;  %2820 = vst [vmem:[%s2800_s8 + $0x28] sm:$0xff] %v2819_v42 }
 0x388 PF: > { %s12_s17 = sadd.s32 1, %s3589_s17   ;;  %s5539_s9 = smov %s3561_s10 }
 0x389   : > { %p9_p1 = scmp.ge.s32.totalorder %s12_s17, 6   ;;  %s5540_s10 = smov %s3679_s28 }
 0x38a   : > { %s5541_s11 = smov %s3569_s12  ;;  %s5542_s12 = smov %s3668_s24 }
 0x38b   : > { %s5543_s13 = smov %s3581_s15  ;;  %s5544_s14 = smov %s3585_s16 }
 0x38c   : > { %s5545_s15 = smov %s5548_s19  ;;  %s5546_s16 = smov %s5552_s20 }
 0x38d   :  { %11 = sbr.rel (!%p9_p1) target bundleno = 5 (0x5), region = 120 }

// kernel: discriminator_forward.9
= control target key start
LH: loop header
LB: loop body
LE: loop exit
PB: predicated region body
PF: predicated region fallthrough
CT: control target
= control target key end

     0   :  { %s3639_s12 = smov 0   ;;  %s3641_s13 = smov 0   ;;  %s5507_s0 = inlined_call_operand.vmem [shape: f32[2,20,512], index: 0, kind: input, shape index: {}]   ;;  %s5508_s1 = inlined_call_operand.vmem [shape: f32[9,512,128], index: 1, kind: input, shape index: {}]   ;;  %s5509_s2 = inlined_call_operand.vmem [shape: f32[1,128], index: 2, kind: input, shape index: {}]   ;;  %s5510_s3 = inlined_call_operand.vmem [shape: f32[2,8,128], index: 3, kind: output, shape index: {}]  }
   0x1   :  { %s3643_s14 = smov 0  }
   0x2 LB: > { %s25_s15 = sadd.s32 1, %s3613_s13  ;;  %p2422_p0 = scmp.ge.s32.totalorder %s3617_s14, 1  ;;  %s3617_s14 = sphi %s3643_s14, %s13_s14   ;;  %s3613_s13 = sphi %s3641_s13, %s5512_s13   ;;  %s3609_s12 = sphi %s3639_s12, %s5511_s12  }
   0x3   : > { %p27_p1 = scmp.ge.s32.totalorder %s25_s15, 2  ;;  %p168_p2 = scmp.lt.s32.totalorder %s3617_s14, 3 }
   0x5   : > { %s5514_s15 = smov (%p27_p1, %s25_s15), 0  ;;  %p169_p3 = pnand %p2422_p0, %p168_p2 }
   0x6   : > { %p201_p4 = scmp.lt.s32.totalorder (!%p169_p3), %s3609_s12, 1 }
   0x7   : > { %172 = sbr.rel (%p169_p3) target bundleno = 524 (0x20c), region = 32 }
   0xc   : > { %v2456_v0 = vld [vmem:[%s5508_s1 + $0x2f8] sm:$0xff]  ;;  %v2455_v4 = vld [vmem:[%s5508_s1 + $0x2f0] sm:$0xff]  ;;  %v2454_v8 = vld [vmem:[%s5508_s1 + $0x2e8] sm:$0xff]  ;;  %s5516_s12 = smov (!%p201_p4, %s3609_s12), 1  ;;  %vm369_vm0 = vcmask 1046528   ;;  %vm747_vm1 = vcmask 1045504  }
   0xd   : > { %v2488_v1 = vld [vmem:[%s5508_s1 + $0x3f8] sm:$0xff]  ;;  %2940 = vmatprep.subr.mxu0 %v2456_v0  ;;  %v2487_v5 = vld [vmem:[%s5508_s1 + $0x3f0] sm:$0xff]  ;;  %v2486_v9 = vld [vmem:[%s5508_s1 + $0x3e8] sm:$0xff]  ;;  %s3570_s19 = smul.u32 96, %s5516_s12  ;;  %vm986_vm2 = vcmask 1043456   ;;  %vm1225_vm3 = vcmask 1042432  }
   0xe   : > { %v2440_v2 = vld [vmem:[%s5508_s1 + $0x278] sm:$0xff]  ;;  %2975 = vmatprep.subr.mxu1 %v2488_v1  ;;  %v2439_v6 = vld [vmem:[%s5508_s1 + $0x270] sm:$0xff]  ;;  %v2438_v10 = vld [vmem:[%s5508_s1 + $0x268] sm:$0xff]  ;;  %vm1464_vm4 = vcmask 1041408   ;;  %s2424_s24 = sshll.u32 %s5516_s12, 3 }
   0xf   : > { %v2472_v3 = vld [vmem:[%s5508_s1 + $0x378] sm:$0xff]  ;;  %2941 = vmatpush3.msra.mxu0 %v2440_v2  ;;  %v2471_v7 = vld [vmem:[%s5508_s1 + $0x370] sm:$0xff]  ;;  %v2470_v11 = vld [vmem:[%s5508_s1 + $0x368] sm:$0xff]  ;;  %s3807_s20 = scalar_lea.vmem %s5507_s0, %s3570_s19  ;;  %s219_s28 = scalar_lea.vmem %s5510_s3, %s2424_s24 }
  0x10   : > { %2976 = vmatpush3.msra.mxu1 %v2472_v3  ;;  %2942 = vmatprep.subr.mxu0 %v2455_v4  ;;  %v2453_v12 = vld [vmem:[%s5508_s1 + $0x2e0] sm:$0xff]  ;;  %v2452_v16 = vld [vmem:[%s5508_s1 + $0x2d8] sm:$0xff]  ;;  %v2451_v20 = vld [vmem:[%s5508_s1 + $0x2d0] sm:$0xff] }
  0x11   : > { %2977 = vmatprep.subr.mxu1 %v2487_v5  ;;  %2943 = vmatpush3.msra.mxu0 %v2439_v6  ;;  %v2485_v13 = vld [vmem:[%s5508_s1 + $0x3e0] sm:$0xff]  ;;  %v2484_v17 = vld [vmem:[%s5508_s1 + $0x3d8] sm:$0xff]  ;;  %v2483_v21 = vld [vmem:[%s5508_s1 + $0x3d0] sm:$0xff] }
  0x12   : > { %2978 = vmatpush3.msra.mxu1 %v2471_v7  ;;  %2944 = vmatprep.subr.mxu0 %v2454_v8  ;;  %v2437_v14 = vld [vmem:[%s5508_s1 + $0x260] sm:$0xff]  ;;  %v2436_v18 = vld [vmem:[%s5508_s1 + $0x258] sm:$0xff]  ;;  %v2435_v22 = vld [vmem:[%s5508_s1 + $0x250] sm:$0xff] }
  0x13   : > { %2979 = vmatprep.subr.mxu1 %v2486_v9  ;;  %v2469_v15 = vld [vmem:[%s5508_s1 + $0x360] sm:$0xff]  ;;  %2945 = vmatpush3.msra.mxu0 %v2438_v10  ;;  %v2468_v19 = vld [vmem:[%s5508_s1 + $0x358] sm:$0xff]  ;;  %v2467_v23 = vld [vmem:[%s5508_s1 + $0x350] sm:$0xff] }
  0x14   : > { %2980 = vmatpush3.msra.mxu1 %v2470_v11  ;;  %2946 = vmatprep.subr.mxu0 %v2453_v12  ;;  %v2450_v24 = vld [vmem:[%s5508_s1 + $0x2c8] sm:$0xff]  ;;  %v2449_v28 = vld [vmem:[%s5508_s1 + $0x2c0] sm:$0xff]  ;;  %v2448_v32 = vld [vmem:[%s5508_s1 + $0x2b8] sm:$0xff] }
  0x15   : > { %2981 = vmatprep.subr.mxu1 %v2485_v13  ;;  %2947 = vmatpush3.msra.mxu0 %v2437_v14  ;;  %v2482_v25 = vld [vmem:[%s5508_s1 + $0x3c8] sm:$0xff]  ;;  %v2481_v29 = vld [vmem:[%s5508_s1 + $0x3c0] sm:$0xff]  ;;  %v2480_v33 = vld [vmem:[%s5508_s1 + $0x3b8] sm:$0xff] }
  0x16   : > { %2982 = vmatpush3.msra.mxu1 %v2469_v15  ;;  %2948 = vmatprep.subr.mxu0 %v2452_v16  ;;  %v2434_v26 = vld [vmem:[%s5508_s1 + $0x248] sm:$0xff]  ;;  %v2433_v30 = vld [vmem:[%s5508_s1 + $0x240] sm:$0xff]  ;;  %v2432_v34 = vld [vmem:[%s5508_s1 + $0x238] sm:$0xff] }
  0x17   : > { %2983 = vmatprep.subr.mxu1 %v2484_v17  ;;  %2949 = vmatpush3.msra.mxu0 %v2436_v18  ;;  %v2466_v27 = vld [vmem:[%s5508_s1 + $0x348] sm:$0xff]  ;;  %v2465_v31 = vld [vmem:[%s5508_s1 + $0x340] sm:$0xff]  ;;  %v2464_v35 = vld [vmem:[%s5508_s1 + $0x338] sm:$0xff] }
  0x18   : > { %2984 = vmatpush3.msra.mxu1 %v2468_v19  ;;  %2950 = vmatprep.subr.mxu0 %v2451_v20  ;;  %v2447_v36 = vld [vmem:[%s5508_s1 + $0x2b0] sm:$0xff]  ;;  %v2446_v40 = vld [vmem:[%s5508_s1 + $0x2a8] sm:$0xff]  ;;  %v2445_v44 = vld [vmem:[%s5508_s1 + $0x2a0] sm:$0xff] }
  0x19   : > { %2985 = vmatprep.subr.mxu1 %v2483_v21  ;;  %2951 = vmatpush3.msra.mxu0 %v2435_v22  ;;  %v2479_v37 = vld [vmem:[%s5508_s1 + $0x3b0] sm:$0xff]  ;;  %v2478_v41 = vld [vmem:[%s5508_s1 + $0x3a8] sm:$0xff]  ;;  %v2477_v45 = vld [vmem:[%s5508_s1 + $0x3a0] sm:$0xff] }
  0x1a   : > { %2986 = vmatpush3.msra.mxu1 %v2467_v23  ;;  %2952 = vmatprep.subr.mxu0 %v2450_v24  ;;  %v2431_v38 = vld [vmem:[%s5508_s1 + $0x230] sm:$0xff]  ;;  %v2430_v42 = vld [vmem:[%s5508_s1 + $0x228] sm:$0xff]  ;;  %v2429_v46 = vld [vmem:[%s5508_s1 + $0x220] sm:$0xff] }
  0x1b   : > { %2987 = vmatprep.subr.mxu1 %v2482_v25  ;;  %2953 = vmatpush3.msra.mxu0 %v2434_v26  ;;  %v2463_v39 = vld [vmem:[%s5508_s1 + $0x330] sm:$0xff]  ;;  %v2462_v43 = vld [vmem:[%s5508_s1 + $0x328] sm:$0xff]  ;;  %v2461_v47 = vld [vmem:[%s5508_s1 + $0x320] sm:$0xff] }
  0x1c   : > { %2988 = vmatpush3.msra.mxu1 %v2466_v27  ;;  %2954 = vmatprep.subr.mxu0 %v2449_v28  ;;  %v2444_v48 = vld [vmem:[%s5508_s1 + $0x298] sm:$0xff]  ;;  %v2443_v52 = vld [vmem:[%s5508_s1 + $0x290] sm:$0xff]  ;;  %v289_v54 = vld [vmem:[%s3807_s20 + $0x8] sm:$0xfe] }
  0x1d   : > { %2989 = vmatprep.subr.mxu1 %v2481_v29  ;;  %2955 = vmatpush3.msra.mxu0 %v2433_v30  ;;  %v2476_v49 = vld [vmem:[%s5508_s1 + $0x398] sm:$0xff]  ;;  %v2475_v53 = vld [vmem:[%s5508_s1 + $0x390] sm:$0xff]  ;;  %v293_v55 = vld [vmem:[%s3807_s20 + $0x28] sm:$0x1]  ;;  %v373_v0 = vrot.slane %v289_v54, 1 }
  0x1e   : > { %2990 = vmatpush3.msra.mxu1 %v2465_v31  ;;  %2956 = vmatprep.subr.mxu0 %v2448_v32  ;;  %v2428_v50 = vld [vmem:[%s5508_s1 + $0x218] sm:$0xff]  ;;  %v288_v58 = vld [vmem:[%s3807_s20] sm:$0xfe]  ;;  %v292_v59 = vld [vmem:[%s3807_s20 + $0x20] sm:$0x1]  ;;  %v374_v1 = vrot.slane %v293_v55, 1 }
  0x1f   : > { %2991 = vmatprep.subr.mxu1 %v2480_v33  ;;  %2957 = vmatpush3.msra.mxu0 %v2432_v34  ;;  %v2460_v51 = vld [vmem:[%s5508_s1 + $0x318] sm:$0xff]  ;;  %v290_v60 = vld [vmem:[%s3807_s20 + $0x10] sm:$0xfe]  ;;  %v294_v61 = vld [vmem:[%s3807_s20 + $0x30] sm:$0x1]  ;;  %v370_v8 = vrot.slane %v288_v58, 1 }
  0x20   : > { %2992 = vmatpush3.msra.mxu1 %v2464_v35  ;;  %2958 = vmatprep.subr.mxu0 %v2447_v36  ;;  %v291_v56 = vld [vmem:[%s3807_s20 + $0x18] sm:$0xfe]  ;;  %v295_v57 = vld [vmem:[%s3807_s20 + $0x38] sm:$0x1]  ;;  %v2427_v62 = vld [vmem:[%s5508_s1 + $0x210] sm:$0xff]  ;;  %v371_v9 = vrot.slane %v292_v59, 1  ;;  %v375_v15 = vsel %vm369_vm0, %v373_v0, %v374_v1 }
  0x21   : > { %2993 = vmatprep.subr.mxu1 %v2479_v37  ;;  %2959 = vmatpush3.msra.mxu0 %v2431_v38  ;;  %v2459_v63 = vld [vmem:[%s5508_s1 + $0x310] sm:$0xff]  ;;  %v2442_v2 = vld [vmem:[%s5508_s1 + $0x288] sm:$0xff]  ;;  %v379_v4 = vrot.slane %v291_v56, 1  ;;  %v380_v5 = vrot.slane %v295_v57, 1  ;;  %v376_v10 = vrot.slane %v290_v60, 1  ;;  %v377_v11 = vrot.slane %v294_v61, 1 }
  0x22   : > { %2994 = vmatpush3.msra.mxu1 %v2463_v39  ;;  %2960 = vmatprep.subr.mxu0 %v2446_v40  ;;  %v2474_v3 = vld [vmem:[%s5508_s1 + $0x388] sm:$0xff]  ;;  %v2441_v12 = vld [vmem:[%s5508_s1 + $0x280] sm:$0xff]  ;;  %v372_v18 = vsel %vm369_vm0, %v370_v8, %v371_v9  ;;  %v255_v20 = vld [vmem:[%s5508_s1 + $0xf8] sm:$0xff] }
  0x23   : > { %2995 = vmatprep.subr.mxu1 %v2478_v41  ;;  %2961 = vmatpush3.msra.mxu0 %v2430_v42  ;;  %v2426_v6 = vld [vmem:[%s5508_s1 + $0x208] sm:$0xff]  ;;  %v2473_v13 = vld [vmem:[%s5508_s1 + $0x380] sm:$0xff]  ;;  %v381_v17 = vsel %vm369_vm0, %v379_v4, %v380_v5  ;;  %v378_v19 = vsel %vm369_vm0, %v376_v10, %v377_v11  ;;  %v287_v21 = vld [vmem:[%s5508_s1 + $0x1f8] sm:$0xff] }
  0x24   : > { %2996 = vmatpush3.msra.mxu1 %v2462_v43  ;;  %2962 = vmatprep.subr.mxu0 %v2445_v44  ;;  %v2458_v7 = vld [vmem:[%s5508_s1 + $0x308] sm:$0xff]  ;;  %v2425_v14 = vld [vmem:[%s5508_s1 + $0x200] sm:$0xff]  ;;  %v239_v22 = vld [vmem:[%s5508_s1 + $0x78] sm:$0xff] }
  0x25   : > { %2997 = vmatprep.subr.mxu1 %v2477_v45  ;;  %2963 = vmatpush3.msra.mxu0 %v2429_v46  ;;  %v2457_v16 = vld [vmem:[%s5508_s1 + $0x300] sm:$0xff]  ;;  %v271_v23 = vld [vmem:[%s5508_s1 + $0x178] sm:$0xff]  ;;  %v254_v24 = vld [vmem:[%s5508_s1 + $0xf0] sm:$0xff] }
  0x26   : > { %2998 = vmatpush3.msra.mxu1 %v2461_v47  ;;  %2964 = vmatprep.subr.mxu0 %v2444_v48  ;;  %v286_v25 = vld [vmem:[%s5508_s1 + $0x1f0] sm:$0xff]  ;;  %v253_v28 = vld [vmem:[%s5508_s1 + $0xe8] sm:$0xff]  ;;  %v252_v32 = vld [vmem:[%s5508_s1 + $0xe0] sm:$0xff] }
  0x27   : > { %2999 = vmatprep.subr.mxu1 %v2476_v49  ;;  %2965 = vmatpush3.msra.mxu0 %v2428_v50  ;;  %v238_v26 = vld [vmem:[%s5508_s1 + $0x70] sm:$0xff]  ;;  %v285_v29 = vld [vmem:[%s5508_s1 + $0x1e8] sm:$0xff]  ;;  %v284_v33 = vld [vmem:[%s5508_s1 + $0x1e0] sm:$0xff] }
  0x28   : > { %3000 = vmatpush3.msra.mxu1 %v2460_v51  ;;  %2966 = vmatprep.subr.mxu0 %v2443_v52  ;;  %v270_v27 = vld [vmem:[%s5508_s1 + $0x170] sm:$0xff]  ;;  %v237_v30 = vld [vmem:[%s5508_s1 + $0x68] sm:$0xff]  ;;  %v236_v34 = vld [vmem:[%s5508_s1 + $0x60] sm:$0xff] }
  0x29   : > { %3001 = vmatprep.subr.mxu1 %v2475_v53  ;;  %2967 = vmatpush3.msra.mxu0 %v2427_v62  ;;  %v269_v31 = vld [vmem:[%s5508_s1 + $0x168] sm:$0xff]  ;;  %v268_v35 = vld [vmem:[%s5508_s1 + $0x160] sm:$0xff]  ;;  %v251_v36 = vld [vmem:[%s5508_s1 + $0xd8] sm:$0xff] }
  0x2a   : > { %3002 = vmatpush3.msra.mxu1 %v2459_v63  ;;  %2968 = vmatprep.subr.mxu0 %v2442_v2  ;;  %v283_v37 = vld [vmem:[%s5508_s1 + $0x1d8] sm:$0xff]  ;;  %v250_v40 = vld [vmem:[%s5508_s1 + $0xd0] sm:$0xff]  ;;  %v249_v44 = vld [vmem:[%s5508_s1 + $0xc8] sm:$0xff] }
  0x2b   : > { %3003 = vmatprep.subr.mxu1 %v2474_v3  ;;  %2969 = vmatpush3.msra.mxu0 %v2426_v6  ;;  %v235_v38 = vld [vmem:[%s5508_s1 + $0x58] sm:$0xff]  ;;  %v282_v41 = vld [vmem:[%s5508_s1 + $0x1d0] sm:$0xff]  ;;  %v281_v45 = vld [vmem:[%s5508_s1 + $0x1c8] sm:$0xff] }
  0x2c   : > { %3004 = vmatpush3.msra.mxu1 %v2458_v7  ;;  %2970 = vmatprep.subr.mxu0 %v2441_v12  ;;  %v267_v39 = vld [vmem:[%s5508_s1 + $0x158] sm:$0xff]  ;;  %v234_v42 = vld [vmem:[%s5508_s1 + $0x50] sm:$0xff]  ;;  %v233_v46 = vld [vmem:[%s5508_s1 + $0x48] sm:$0xff] }
  0x2d   : > { %3005 = vmatprep.subr.mxu1 %v2473_v13  ;;  %2971 = vmatpush3.msra.mxu0 %v2425_v14  ;;  %v266_v43 = vld [vmem:[%s5508_s1 + $0x150] sm:$0xff]  ;;  %v265_v47 = vld [vmem:[%s5508_s1 + $0x148] sm:$0xff]  ;;  %v248_v48 = vld [vmem:[%s5508_s1 + $0xc0] sm:$0xff] }
  0x2e   : > { %450 = vmatprep.mubr.f32.mxu0 %v375_v15  ;;  %3006 = vmatpush3.msra.mxu1 %v2457_v16  ;;  %v280_v49 = vld [vmem:[%s5508_s1 + $0x1c0] sm:$0xff]  ;;  %v247_v52 = vld [vmem:[%s5508_s1 + $0xb8] sm:$0xff]  ;;  %v246_v56 = vld [vmem:[%s5508_s1 + $0xb0] sm:$0xff] }
  0x2f   : > { %520 = vmatprep.mubr.f32.mxu1 %v381_v17  ;;  %451 = vmatmul.mubr.f32.vlgmr.msra.gmra.mxu0 %v372_v18  ;;  %v232_v50 = vld [vmem:[%s5508_s1 + $0x40] sm:$0xff]  ;;  %v279_v53 = vld [vmem:[%s5508_s1 + $0x1b8] sm:$0xff]  ;;  %v278_v57 = vld [vmem:[%s5508_s1 + $0x1b0] sm:$0xff] }
  0x30   : > { %521 = vmatmul.mubr.f32.vlgmr.msra.gmra.mxu1 %v378_v19  ;;  %3010 = vmatprep.subr.mxu0 %v255_v20  ;;  %v264_v51 = vld [vmem:[%s5508_s1 + $0x140] sm:$0xff]  ;;  %v231_v54 = vld [vmem:[%s5508_s1 + $0x38] sm:$0xff]  ;;  %v230_v58 = vld [vmem:[%s5508_s1 + $0x30] sm:$0xff] }
  0x31   : > { %3045 = vmatprep.subr.mxu1 %v287_v21  ;;  %3011 = vmatpush3.msra.mxu0 %v239_v22  ;;  %v263_v55 = vld [vmem:[%s5508_s1 + $0x138] sm:$0xff]  ;;  %v262_v59 = vld [vmem:[%s5508_s1 + $0x130] sm:$0xff]  ;;  %v245_v60 = vld [vmem:[%s5508_s1 + $0xa8] sm:$0xff] }
  0x32   : > { %3046 = vmatpush3.msra.mxu1 %v271_v23  ;;  %3012 = vmatprep.subr.mxu0 %v254_v24  ;;  %v277_v61 = vld [vmem:[%s5508_s1 + $0x1a8] sm:$0xff]  ;;  %v244_v0 = vld [vmem:[%s5508_s1 + $0xa0] sm:$0xff]  ;;  %v243_v4 = vld [vmem:[%s5508_s1 + $0x98] sm:$0xff] }
  0x33   : > { %3047 = vmatprep.subr.mxu1 %v286_v25  ;;  %3013 = vmatpush3.msra.mxu0 %v238_v26  ;;  %v229_v62 = vld [vmem:[%s5508_s1 + $0x28] sm:$0xff]  ;;  %v276_v1 = vld [vmem:[%s5508_s1 + $0x1a0] sm:$0xff]  ;;  %v275_v5 = vld [vmem:[%s5508_s1 + $0x198] sm:$0xff] }
  0x34   : > { %3048 = vmatpush3.msra.mxu1 %v270_v27  ;;  %3014 = vmatprep.subr.mxu0 %v253_v28  ;;  %v261_v63 = vld [vmem:[%s5508_s1 + $0x128] sm:$0xff]  ;;  %v228_v2 = vld [vmem:[%s5508_s1 + $0x20] sm:$0xff]  ;;  %v227_v6 = vld [vmem:[%s5508_s1 + $0x18] sm:$0xff] }
  0x35   : > { %3049 = vmatprep.subr.mxu1 %v285_v29  ;;  %3015 = vmatpush3.msra.mxu0 %v237_v30  ;;  %v260_v3 = vld [vmem:[%s5508_s1 + $0x120] sm:$0xff]  ;;  %v259_v7 = vld [vmem:[%s5508_s1 + $0x118] sm:$0xff]  ;;  %v242_v8 = vld [vmem:[%s5508_s1 + $0x90] sm:$0xff] }
  0x36   : > { %3050 = vmatpush3.msra.mxu1 %v269_v31  ;;  %3016 = vmatprep.subr.mxu0 %v252_v32  ;;  %v274_v9 = vld [vmem:[%s5508_s1 + $0x190] sm:$0xff]  ;;  %v241_v12 = vld [vmem:[%s5508_s1 + $0x88] sm:$0xff]  ;;  %v240_v16 = vld [vmem:[%s5508_s1 + $0x80] sm:$0xff] }
  0x37   : > { %3051 = vmatprep.subr.mxu1 %v284_v33  ;;  %3017 = vmatpush3.msra.mxu0 %v236_v34  ;;  %v226_v10 = vld [vmem:[%s5508_s1 + $0x10] sm:$0xff]  ;;  %v273_v13 = vld [vmem:[%s5508_s1 + $0x188] sm:$0xff]  ;;  %v272_v17 = vld [vmem:[%s5508_s1 + $0x180] sm:$0xff] }
  0x38   : > { %3052 = vmatpush3.msra.mxu1 %v268_v35  ;;  %3018 = vmatprep.subr.mxu0 %v251_v36  ;;  %v258_v11 = vld [vmem:[%s5508_s1 + $0x110] sm:$0xff]  ;;  %v225_v14 = vld [vmem:[%s5508_s1 + $0x8] sm:$0xff]  ;;  %v224_v18 = vld [vmem:[%s5508_s1] sm:$0xff] }
  0x39   : > { %3053 = vmatprep.subr.mxu1 %v283_v37  ;;  %3019 = vmatpush3.msra.mxu0 %v235_v38  ;;  %v257_v15 = vld [vmem:[%s5508_s1 + $0x108] sm:$0xff]  ;;  %v256_v20 = vld [vmem:[%s5508_s1 + $0x100] sm:$0xff]  ;;  %v223_v21 = vld [vmem:[%s3807_s20 + $0x18] sm:$0xff] }
  0x3a   : > { %3054 = vmatpush3.msra.mxu1 %v267_v39  ;;  %3020 = vmatprep.subr.mxu0 %v250_v40  ;;  %v221_v19 = vld [vmem:[%s3807_s20 + $0x8] sm:$0xff]  ;;  %v220_v22 = vld [vmem:[%s3807_s20] sm:$0xff]  ;;  %v222_v23 = vld [vmem:[%s3807_s20 + $0x10] sm:$0xff] }
  0x3b   : > { %3055 = vmatprep.subr.mxu1 %v282_v41  ;;  %3021 = vmatpush3.msra.mxu0 %v234_v42  ;;  %v2520_v24 = vld [vmem:[%s5508_s1 + $0x4f8] sm:$0xff]  ;;  %v2519_v28 = vld [vmem:[%s5508_s1 + $0x4f0] sm:$0xff]  ;;  %v2518_v32 = vld [vmem:[%s5508_s1 + $0x4e8] sm:$0xff] }
  0x3c   : > { %3056 = vmatpush3.msra.mxu1 %v266_v43  ;;  %3022 = vmatprep.subr.mxu0 %v249_v44  ;;  %v2552_v25 = vld [vmem:[%s5508_s1 + $0x5f8] sm:$0xff]  ;;  %v2551_v29 = vld [vmem:[%s5508_s1 + $0x5f0] sm:$0xff]  ;;  %v2550_v33 = vld [vmem:[%s5508_s1 + $0x5e8] sm:$0xff] }
  0x3d   : > { %3057 = vmatprep.subr.mxu1 %v281_v45  ;;  %3023 = vmatpush3.msra.mxu0 %v233_v46  ;;  %v2504_v26 = vld [vmem:[%s5508_s1 + $0x478] sm:$0xff]  ;;  %v2503_v30 = vld [vmem:[%s5508_s1 + $0x470] sm:$0xff]  ;;  %v2502_v34 = vld [vmem:[%s5508_s1 + $0x468] sm:$0xff] }
  0x3e   : > { %3058 = vmatpush3.msra.mxu1 %v265_v47  ;;  %3024 = vmatprep.subr.mxu0 %v248_v48  ;;  %v2536_v27 = vld [vmem:[%s5508_s1 + $0x578] sm:$0xff]  ;;  %v2535_v31 = vld [vmem:[%s5508_s1 + $0x570] sm:$0xff]  ;;  %v2534_v35 = vld [vmem:[%s5508_s1 + $0x568] sm:$0xff] }
  0x3f   : > { %3059 = vmatprep.subr.mxu1 %v280_v49  ;;  %3025 = vmatpush3.msra.mxu0 %v232_v50  ;;  %v2517_v36 = vld [vmem:[%s5508_s1 + $0x4e0] sm:$0xff]  ;;  %v2516_v40 = vld [vmem:[%s5508_s1 + $0x4d8] sm:$0xff]  ;;  %v2515_v44 = vld [vmem:[%s5508_s1 + $0x4d0] sm:$0xff] }
  0x40   : > { %3060 = vmatpush3.msra.mxu1 %v264_v51  ;;  %3026 = vmatprep.subr.mxu0 %v247_v52  ;;  %v2549_v37 = vld [vmem:[%s5508_s1 + $0x5e0] sm:$0xff]  ;;  %v2548_v41 = vld [vmem:[%s5508_s1 + $0x5d8] sm:$0xff]  ;;  %v2547_v45 = vld [vmem:[%s5508_s1 + $0x5d0] sm:$0xff] }
  0x41   : > { %3061 = vmatprep.subr.mxu1 %v279_v53  ;;  %3027 = vmatpush3.msra.mxu0 %v231_v54  ;;  %v2501_v38 = vld [vmem:[%s5508_s1 + $0x460] sm:$0xff]  ;;  %v2500_v42 = vld [vmem:[%s5508_s1 + $0x458] sm:$0xff]  ;;  %v2499_v46 = vld [vmem:[%s5508_s1 + $0x450] sm:$0xff] }
  0x42   : > { %3062 = vmatpush3.msra.mxu1 %v263_v55  ;;  %3028 = vmatprep.subr.mxu0 %v246_v56  ;;  %v2533_v39 = vld [vmem:[%s5508_s1 + $0x560] sm:$0xff]  ;;  %v2532_v43 = vld [vmem:[%s5508_s1 + $0x558] sm:$0xff]  ;;  %v2531_v47 = vld [vmem:[%s5508_s1 + $0x550] sm:$0xff] }
  0x43   : > { %3063 = vmatprep.subr.mxu1 %v278_v57  ;;  %3029 = vmatpush3.msra.mxu0 %v230_v58  ;;  %v2514_v48 = vld [vmem:[%s5508_s1 + $0x4c8] sm:$0xff]  ;;  %v2513_v52 = vld [vmem:[%s5508_s1 + $0x4c0] sm:$0xff]  ;;  %v2512_v56 = vld [vmem:[%s5508_s1 + $0x4b8] sm:$0xff] }
  0x44   : > { %3064 = vmatpush3.msra.mxu1 %v262_v59  ;;  %3030 = vmatprep.subr.mxu0 %v245_v60  ;;  %v2546_v49 = vld [vmem:[%s5508_s1 + $0x5c8] sm:$0xff]  ;;  %v2545_v53 = vld [vmem:[%s5508_s1 + $0x5c0] sm:$0xff]  ;;  %v2544_v57 = vld [vmem:[%s5508_s1 + $0x5b8] sm:$0xff] }
  0x45   : > { %3065 = vmatprep.subr.mxu1 %v277_v61  ;;  %3031 = vmatpush3.msra.mxu0 %v229_v62  ;;  %v2498_v50 = vld [vmem:[%s5508_s1 + $0x448] sm:$0xff]  ;;  %v2497_v54 = vld [vmem:[%s5508_s1 + $0x440] sm:$0xff]  ;;  %v2496_v58 = vld [vmem:[%s5508_s1 + $0x438] sm:$0xff] }
  0x46   : > { %3066 = vmatpush3.msra.mxu1 %v261_v63  ;;  %3032 = vmatprep.subr.mxu0 %v244_v0  ;;  %v2530_v51 = vld [vmem:[%s5508_s1 + $0x548] sm:$0xff]  ;;  %v2529_v55 = vld [vmem:[%s5508_s1 + $0x540] sm:$0xff]  ;;  %v2528_v59 = vld [vmem:[%s5508_s1 + $0x538] sm:$0xff] }
  0x47   : > { %3067 = vmatprep.subr.mxu1 %v276_v1  ;;  %3033 = vmatpush3.msra.mxu0 %v228_v2  ;;  %v2511_v60 = vld [vmem:[%s5508_s1 + $0x4b0] sm:$0xff]  ;;  %v2510_v0 = vld [vmem:[%s5508_s1 + $0x4a8] sm:$0xff] }
  0x48   : > { %3068 = vmatpush3.msra.mxu1 %v260_v3  ;;  %3034 = vmatprep.subr.mxu0 %v243_v4  ;;  %v2543_v61 = vld [vmem:[%s5508_s1 + $0x5b0] sm:$0xff]  ;;  %v2542_v1 = vld [vmem:[%s5508_s1 + $0x5a8] sm:$0xff]  ;;  %v2509_v4 = vld [vmem:[%s5508_s1 + $0x4a0] sm:$0xff] }
  0x49   : > { %3069 = vmatprep.subr.mxu1 %v275_v5  ;;  %3035 = vmatpush3.msra.mxu0 %v227_v6  ;;  %v2495_v62 = vld [vmem:[%s5508_s1 + $0x430] sm:$0xff]  ;;  %v2494_v2 = vld [vmem:[%s5508_s1 + $0x428] sm:$0xff]  ;;  %v2541_v5 = vld [vmem:[%s5508_s1 + $0x5a0] sm:$0xff] }
  0x4a   : > { %3070 = vmatpush3.msra.mxu1 %v259_v7  ;;  %3036 = vmatprep.subr.mxu0 %v242_v8  ;;  %v2527_v63 = vld [vmem:[%s5508_s1 + $0x530] sm:$0xff]  ;;  %v2526_v3 = vld [vmem:[%s5508_s1 + $0x528] sm:$0xff]  ;;  %v2493_v6 = vld [vmem:[%s5508_s1 + $0x420] sm:$0xff] }
  0x4b   : > { %3071 = vmatprep.subr.mxu1 %v274_v9  ;;  %3037 = vmatpush3.msra.mxu0 %v226_v10  ;;  %v2525_v7 = vld [vmem:[%s5508_s1 + $0x520] sm:$0xff]  ;;  %v2508_v8 = vld [vmem:[%s5508_s1 + $0x498] sm:$0xff] }
  0x4c   : > { %3072 = vmatpush3.msra.mxu1 %v258_v11  ;;  %3038 = vmatprep.subr.mxu0 %v241_v12  ;;  %v2540_v9 = vld [vmem:[%s5508_s1 + $0x598] sm:$0xff]  ;;  %v2507_v12 = vld [vmem:[%s5508_s1 + $0x490] sm:$0xff] }
  0x4d   : > { %3073 = vmatprep.subr.mxu1 %v273_v13  ;;  %3039 = vmatpush3.msra.mxu0 %v225_v14  ;;  %v2492_v10 = vld [vmem:[%s5508_s1 + $0x418] sm:$0xff]  ;;  %v2539_v13 = vld [vmem:[%s5508_s1 + $0x590] sm:$0xff]  ;;  %v667_v14 = vld [vmem:[%s3807_s20 + $0x8] sm:$0xfc] }
  0x4e   : > { %3074 = vmatpush3.msra.mxu1 %v257_v15  ;;  %3040 = vmatprep.subr.mxu0 %v240_v16  ;;  %v2524_v11 = vld [vmem:[%s5508_s1 + $0x518] sm:$0xff]  ;;  %v671_v15 = vld [vmem:[%s3807_s20 + $0x28] sm:$0x3] }
  0x4f   : > { %3075 = vmatprep.subr.mxu1 %v272_v17  ;;  %3041 = vmatpush3.msra.mxu0 %v224_v18  ;;  %v669_v16 = vld [vmem:[%s3807_s20 + $0x18] sm:$0xfc]  ;;  %v673_v17 = vld [vmem:[%s3807_s20 + $0x38] sm:$0x3]  ;;  %v666_v18 = vld [vmem:[%s3807_s20] sm:$0xfc] }
  0x50   : > { %590 = vmatprep.mubr.f32.mxu0 %v221_v19  ;;  %3076 = vmatpush3.msra.mxu1 %v256_v20  ;;  %v670_v19 = vld [vmem:[%s3807_s20 + $0x20] sm:$0x3]  ;;  %v668_v20 = vld [vmem:[%s3807_s20 + $0x10] sm:$0xfc] }
  0x51   : > { %660 = vmatprep.mubr.f32.mxu1 %v223_v21  ;;  %591 = vmatmul.mubr.f32.vlgmr.msra.gmra.mxu0 %v220_v22  ;;  %v672_v21 = vld [vmem:[%s3807_s20 + $0x30] sm:$0x3] }
  0x52   : > { %661 = vmatmul.mubr.f32.vlgmr.msra.gmra.mxu1 %v222_v23  ;;  %3080 = vmatprep.subr.mxu0 %v2520_v24  ;;  %v2491_v22 = vld [vmem:[%s5508_s1 + $0x410] sm:$0xff]  ;;  %v751_v24 = vrot.slane %v667_v14, 2  ;;  %v2560_v14 = vld [vmem:[%s5508_s1 + $0x638] sm:$0xff] }
  0x53   : > { %3115 = vmatprep.subr.mxu1 %v2552_v25  ;;  %3081 = vmatpush3.msra.mxu0 %v2504_v26  ;;  %v2523_v23 = vld [vmem:[%s5508_s1 + $0x510] sm:$0xff]  ;;  %v752_v25 = vrot.slane %v671_v15, 2  ;;  %v2506_v26 = vld [vmem:[%s5508_s1 + $0x488] sm:$0xff]  ;;  %v2592_v15 = vld [vmem:[%s5508_s1 + $0x738] sm:$0xff] }
  0x54   : > { %3116 = vmatpush3.msra.mxu1 %v2536_v27  ;;  %3082 = vmatprep.subr.mxu0 %v2519_v28  ;;  %v2538_v27 = vld [vmem:[%s5508_s1 + $0x588] sm:$0xff]  ;;  %v757_v28 = vrot.slane %v669_v16, 2  ;;  %v2575_v16 = vld [vmem:[%s5508_s1 + $0x6b0] sm:$0xff] }
  0x55   : > { %3117 = vmatprep.subr.mxu1 %v2551_v29  ;;  %3083 = vmatpush3.msra.mxu0 %v2503_v30  ;;  %v758_v29 = vrot.slane %v673_v17, 2  ;;  %v2490_v30 = vld [vmem:[%s5508_s1 + $0x408] sm:$0xff]  ;;  %v2607_v17 = vld [vmem:[%s5508_s1 + $0x7b0] sm:$0xff] }
  0x56   : > { %3118 = vmatpush3.msra.mxu1 %v2535_v31  ;;  %3084 = vmatprep.subr.mxu0 %v2518_v32  ;;  %v2522_v31 = vld [vmem:[%s5508_s1 + $0x508] sm:$0xff]  ;;  %v748_v32 = vrot.slane %v666_v18, 2  ;;  %v2559_v18 = vld [vmem:[%s5508_s1 + $0x630] sm:$0xff] }
  0x57   : > { %3119 = vmatprep.subr.mxu1 %v2550_v33  ;;  %3085 = vmatpush3.msra.mxu0 %v2502_v34  ;;  %v749_v33 = vrot.slane %v670_v19, 2  ;;  %v754_v34 = vrot.slane %v668_v20, 2  ;;  %v2591_v19 = vld [vmem:[%s5508_s1 + $0x730] sm:$0xff]  ;;  %v2574_v20 = vld [vmem:[%s5508_s1 + $0x6a8] sm:$0xff] }
  0x58   : > { %3120 = vmatpush3.msra.mxu1 %v2534_v35  ;;  %3086 = vmatprep.subr.mxu0 %v2517_v36  ;;  %v755_v35 = vrot.slane %v672_v21, 2  ;;  %v2505_v36 = vld [vmem:[%s5508_s1 + $0x480] sm:$0xff]  ;;  %v2606_v21 = vld [vmem:[%s5508_s1 + $0x7a8] sm:$0xff] }
  0x59   : > { %3121 = vmatprep.subr.mxu1 %v2549_v37  ;;  %3087 = vmatpush3.msra.mxu0 %v2501_v38  ;;  %v2537_v37 = vld [vmem:[%s5508_s1 + $0x580] sm:$0xff] }
  0x5a   : > { %3122 = vmatpush3.msra.mxu1 %v2533_v39  ;;  %3088 = vmatprep.subr.mxu0 %v2516_v40  ;;  %v2489_v38 = vld [vmem:[%s5508_s1 + $0x400] sm:$0xff]  ;;  %v753_v39 = vsel %vm747_vm1, %v751_v24, %v752_v25 }
  0x5b   : > { %3123 = vmatprep.subr.mxu1 %v2548_v41  ;;  %3089 = vmatpush3.msra.mxu0 %v2500_v42  ;;  %v2521_v40 = vld [vmem:[%s5508_s1 + $0x500] sm:$0xff]  ;;  %v759_v41 = vsel %vm747_vm1, %v757_v28, %v758_v29  ;;  %v750_v42 = vsel %vm747_vm1, %v748_v32, %v749_v33  ;;  %v2572_v28 = vld [vmem:[%s5508_s1 + $0x698] sm:$0xff]  ;;  %v2571_v32 = vld [vmem:[%s5508_s1 + $0x690] sm:$0xff] }
  0x5c   : > { %3124 = vmatpush3.msra.mxu1 %v2532_v43  ;;  %3090 = vmatprep.subr.mxu0 %v2515_v44  ;;  %v756_v43 = vsel %vm747_vm1, %v754_v34, %v755_v35  ;;  %v2584_v44 = vld [vmem:[%s5508_s1 + $0x6f8] sm:$0xff]  ;;  %v2573_v24 = vld [vmem:[%s5508_s1 + $0x6a0] sm:$0xff]  ;;  %v2603_v33 = vld [vmem:[%s5508_s1 + $0x790] sm:$0xff] }
  0x5d   : > { %3125 = vmatprep.subr.mxu1 %v2547_v45  ;;  %3091 = vmatpush3.msra.mxu0 %v2499_v46  ;;  %v2616_v45 = vld [vmem:[%s5508_s1 + $0x7f8] sm:$0xff]  ;;  %v2605_v25 = vld [vmem:[%s5508_s1 + $0x7a0] sm:$0xff]  ;;  %v906_v34 = vld [vmem:[%s3807_s20 + $0x8] sm:$0xf0] }
  0x5e   : > { %3126 = vmatpush3.msra.mxu1 %v2531_v47  ;;  %3092 = vmatprep.subr.mxu0 %v2514_v48  ;;  %v2568_v46 = vld [vmem:[%s5508_s1 + $0x678] sm:$0xff]  ;;  %v2583_v48 = vld [vmem:[%s5508_s1 + $0x6f0] sm:$0xff]  ;;  %v910_v35 = vld [vmem:[%s3807_s20 + $0x28] sm:$0xf] }
  0x5f   : > { %3127 = vmatprep.subr.mxu1 %v2546_v49  ;;  %3093 = vmatpush3.msra.mxu0 %v2498_v50  ;;  %v2600_v47 = vld [vmem:[%s5508_s1 + $0x778] sm:$0xff]  ;;  %v2615_v49 = vld [vmem:[%s5508_s1 + $0x7f0] sm:$0xff] }
  0x60   : > { %3128 = vmatpush3.msra.mxu1 %v2530_v51  ;;  %3094 = vmatprep.subr.mxu0 %v2513_v52  ;;  %v2567_v50 = vld [vmem:[%s5508_s1 + $0x670] sm:$0xff]  ;;  %v2582_v52 = vld [vmem:[%s5508_s1 + $0x6e8] sm:$0xff]  ;;  %v2604_v29 = vld [vmem:[%s5508_s1 + $0x798] sm:$0xff] }
  0x61   : > { %3129 = vmatprep.subr.mxu1 %v2545_v53  ;;  %3095 = vmatpush3.msra.mxu0 %v2497_v54  ;;  %v2599_v51 = vld [vmem:[%s5508_s1 + $0x770] sm:$0xff]  ;;  %v2614_v53 = vld [vmem:[%s5508_s1 + $0x7e8] sm:$0xff] }
  0x62   : > { %3130 = vmatpush3.msra.mxu1 %v2529_v55  ;;  %3096 = vmatprep.subr.mxu0 %v2512_v56  ;;  %v2566_v54 = vld [vmem:[%s5508_s1 + $0x668] sm:$0xff]  ;;  %v2581_v56 = vld [vmem:[%s5508_s1 + $0x6e0] sm:$0xff] }
  0x63   : > { %3131 = vmatprep.subr.mxu1 %v2544_v57  ;;  %3097 = vmatpush3.msra.mxu0 %v2496_v58  ;;  %v2598_v55 = vld [vmem:[%s5508_s1 + $0x768] sm:$0xff]  ;;  %v2613_v57 = vld [vmem:[%s5508_s1 + $0x7e0] sm:$0xff] }
  0x64   : > { %3132 = vmatpush3.msra.mxu1 %v2528_v59  ;;  %3098 = vmatprep.subr.mxu0 %v2511_v60  ;;  %v2565_v58 = vld [vmem:[%s5508_s1 + $0x660] sm:$0xff]  ;;  %v2580_v60 = vld [vmem:[%s5508_s1 + $0x6d8] sm:$0xff] }
  0x65   : > { %3133 = vmatprep.subr.mxu1 %v2543_v61  ;;  %3099 = vmatpush3.msra.mxu0 %v2495_v62  ;;  %v2597_v59 = vld [vmem:[%s5508_s1 + $0x760] sm:$0xff]  ;;  %v2612_v61 = vld [vmem:[%s5508_s1 + $0x7d8] sm:$0xff] }
  0x66   : > { %3134 = vmatpush3.msra.mxu1 %v2527_v63  ;;  %3100 = vmatprep.subr.mxu0 %v2510_v0  ;;  %v2564_v62 = vld [vmem:[%s5508_s1 + $0x658] sm:$0xff]  ;;  %v2579_v0 = vld [vmem:[%s5508_s1 + $0x6d0] sm:$0xff] }
  0x67   : > { %3135 = vmatprep.subr.mxu1 %v2542_v1  ;;  %3101 = vmatpush3.msra.mxu0 %v2494_v2  ;;  %v2596_v63 = vld [vmem:[%s5508_s1 + $0x758] sm:$0xff]  ;;  %v2611_v1 = vld [vmem:[%s5508_s1 + $0x7d0] sm:$0xff] }
  0x68   : > { %3136 = vmatpush3.msra.mxu1 %v2526_v3  ;;  %3102 = vmatprep.subr.mxu0 %v2509_v4  ;;  %v2563_v2 = vld [vmem:[%s5508_s1 + $0x650] sm:$0xff]  ;;  %v2578_v4 = vld [vmem:[%s5508_s1 + $0x6c8] sm:$0xff] }
  0x69   : > { %3137 = vmatprep.subr.mxu1 %v2541_v5  ;;  %3103 = vmatpush3.msra.mxu0 %v2493_v6  ;;  %v2595_v3 = vld [vmem:[%s5508_s1 + $0x750] sm:$0xff]  ;;  %v2610_v5 = vld [vmem:[%s5508_s1 + $0x7c8] sm:$0xff] }
  0x6a   : > { %3138 = vmatpush3.msra.mxu1 %v2525_v7  ;;  %3104 = vmatprep.subr.mxu0 %v2508_v8  ;;  %v2562_v6 = vld [vmem:[%s5508_s1 + $0x648] sm:$0xff]  ;;  %v2577_v8 = vld [vmem:[%s5508_s1 + $0x6c0] sm:$0xff] }
  0x6b   : > { %3139 = vmatprep.subr.mxu1 %v2540_v9  ;;  %3105 = vmatpush3.msra.mxu0 %v2492_v10  ;;  %v2594_v7 = vld [vmem:[%s5508_s1 + $0x748] sm:$0xff]  ;;  %v2609_v9 = vld [vmem:[%s5508_s1 + $0x7c0] sm:$0xff] }
  0x6c   : > { %3140 = vmatpush3.msra.mxu1 %v2524_v11  ;;  %3106 = vmatprep.subr.mxu0 %v2507_v12  ;;  %v2561_v10 = vld [vmem:[%s5508_s1 + $0x640] sm:$0xff]  ;;  %v2576_v12 = vld [vmem:[%s5508_s1 + $0x6b8] sm:$0xff] }
  0x6d   : > { %3141 = vmatprep.subr.mxu1 %v2539_v13  ;;  %3107 = vmatpush3.msra.mxu0 %v2491_v22  ;;  %v2593_v11 = vld [vmem:[%s5508_s1 + $0x740] sm:$0xff]  ;;  %v2608_v13 = vld [vmem:[%s5508_s1 + $0x7b8] sm:$0xff]  ;;  %v2558_v22 = vld [vmem:[%s5508_s1 + $0x628] sm:$0xff] }
  0x6e   : > { %3142 = vmatpush3.msra.mxu1 %v2523_v23  ;;  %3108 = vmatprep.subr.mxu0 %v2506_v26  ;;  %v2590_v23 = vld [vmem:[%s5508_s1 + $0x728] sm:$0xff]  ;;  %v2557_v26 = vld [vmem:[%s5508_s1 + $0x620] sm:$0xff] }
  0x6f   : > { %3143 = vmatprep.subr.mxu1 %v2538_v27  ;;  %3109 = vmatpush3.msra.mxu0 %v2490_v30  ;;  %v2589_v27 = vld [vmem:[%s5508_s1 + $0x720] sm:$0xff]  ;;  %v2556_v30 = vld [vmem:[%s5508_s1 + $0x618] sm:$0xff] }
  0x70   : > { %3144 = vmatpush3.msra.mxu1 %v2522_v31  ;;  %3110 = vmatprep.subr.mxu0 %v2505_v36  ;;  %v2588_v31 = vld [vmem:[%s5508_s1 + $0x718] sm:$0xff] }
  0x71   : > { %3145 = vmatprep.subr.mxu1 %v2537_v37  ;;  %3111 = vmatpush3.msra.mxu0 %v2489_v38  ;;  %v908_v36 = vld [vmem:[%s3807_s20 + $0x18] sm:$0xf0]  ;;  %v912_v37 = vld [vmem:[%s3807_s20 + $0x38] sm:$0xf]  ;;  %v905_v38 = vld [vmem:[%s3807_s20] sm:$0xf0] }
  0x72   : > { %828 = vmatprep.mubr.f32.mxu0 %v753_v39  ;;  %3146 = vmatpush3.msra.mxu1 %v2521_v40  ;;  %v909_v39 = vld [vmem:[%s3807_s20 + $0x20] sm:$0xf]  ;;  %v907_v40 = vld [vmem:[%s3807_s20 + $0x10] sm:$0xf0] }
  0x73   : > { %898 = vmatprep.mubr.f32.mxu1 %v759_v41  ;;  %829 = vmatmul.mubr.f32.vlgmr.msra.gmra.mxu0 %v750_v42  ;;  %v911_v41 = vld [vmem:[%s3807_s20 + $0x30] sm:$0xf] }
  0x74   : > { %899 = vmatmul.mubr.f32.vlgmr.msra.gmra.mxu1 %v756_v43  ;;  %3150 = vmatprep.subr.mxu0 %v2584_v44  ;;  %v2555_v42 = vld [vmem:[%s5508_s1 + $0x610] sm:$0xff]  ;;  %v990_v44 = vrot.slane %v906_v34, 4  ;;  %v2624_v34 = vld [vmem:[%s5508_s1 + $0x838] sm:$0xff] }
  0x75   : > { %3185 = vmatprep.subr.mxu1 %v2616_v45  ;;  %3151 = vmatpush3.msra.mxu0 %v2568_v46  ;;  %v2587_v43 = vld [vmem:[%s5508_s1 + $0x710] sm:$0xff]  ;;  %v991_v45 = vrot.slane %v910_v35, 4  ;;  %v2570_v46 = vld [vmem:[%s5508_s1 + $0x688] sm:$0xff]  ;;  %v2656_v35 = vld [vmem:[%s5508_s1 + $0x938] sm:$0xff] }
  0x76   : > { %3186 = vmatpush3.msra.mxu1 %v2600_v47  ;;  %3152 = vmatprep.subr.mxu0 %v2583_v48  ;;  %v2602_v47 = vld [vmem:[%s5508_s1 + $0x788] sm:$0xff]  ;;  %v996_v48 = vrot.slane %v908_v36, 4  ;;  %v2639_v36 = vld [vmem:[%s5508_s1 + $0x8b0] sm:$0xff] }
  0x77   : > { %3187 = vmatprep.subr.mxu1 %v2615_v49  ;;  %3153 = vmatpush3.msra.mxu0 %v2567_v50  ;;  %v997_v49 = vrot.slane %v912_v37, 4  ;;  %v2554_v50 = vld [vmem:[%s5508_s1 + $0x608] sm:$0xff]  ;;  %v2671_v37 = vld [vmem:[%s5508_s1 + $0x9b0] sm:$0xff] }
  0x78   : > { %3188 = vmatpush3.msra.mxu1 %v2599_v51  ;;  %3154 = vmatprep.subr.mxu0 %v2582_v52  ;;  %v2586_v51 = vld [vmem:[%s5508_s1 + $0x708] sm:$0xff]  ;;  %v987_v52 = vrot.slane %v905_v38, 4  ;;  %v2623_v38 = vld [vmem:[%s5508_s1 + $0x830] sm:$0xff] }
  0x79   : > { %3189 = vmatprep.subr.mxu1 %v2614_v53  ;;  %3155 = vmatpush3.msra.mxu0 %v2566_v54  ;;  %v988_v53 = vrot.slane %v909_v39, 4  ;;  %v993_v54 = vrot.slane %v907_v40, 4  ;;  %v2655_v39 = vld [vmem:[%s5508_s1 + $0x930] sm:$0xff]  ;;  %v2638_v40 = vld [vmem:[%s5508_s1 + $0x8a8] sm:$0xff] }
  0x7a   : > { %3190 = vmatpush3.msra.mxu1 %v2598_v55  ;;  %3156 = vmatprep.subr.mxu0 %v2581_v56  ;;  %v994_v55 = vrot.slane %v911_v41, 4  ;;  %v2569_v56 = vld [vmem:[%s5508_s1 + $0x680] sm:$0xff]  ;;  %v2670_v41 = vld [vmem:[%s5508_s1 + $0x9a8] sm:$0xff] }
  0x7b   : > { %3191 = vmatprep.subr.mxu1 %v2613_v57  ;;  %3157 = vmatpush3.msra.mxu0 %v2565_v58  ;;  %v2601_v57 = vld [vmem:[%s5508_s1 + $0x780] sm:$0xff] }
  0x7c   : > { %3192 = vmatpush3.msra.mxu1 %v2597_v59  ;;  %3158 = vmatprep.subr.mxu0 %v2580_v60  ;;  %v2553_v58 = vld [vmem:[%s5508_s1 + $0x600] sm:$0xff]  ;;  %v992_v59 = vsel %vm986_vm2, %v990_v44, %v991_v45 }
  0x7d   : > { %3193 = vmatprep.subr.mxu1 %v2612_v61  ;;  %3159 = vmatpush3.msra.mxu0 %v2564_v62  ;;  %v2585_v60 = vld [vmem:[%s5508_s1 + $0x700] sm:$0xff]  ;;  %v998_v61 = vsel %vm986_vm2, %v996_v48, %v997_v49  ;;  %v989_v62 = vsel %vm986_vm2, %v987_v52, %v988_v53  ;;  %v2636_v48 = vld [vmem:[%s5508_s1 + $0x898] sm:$0xff]  ;;  %v2635_v52 = vld [vmem:[%s5508_s1 + $0x890] sm:$0xff] }
  0x7e   : > { %3194 = vmatpush3.msra.mxu1 %v2596_v63  ;;  %3160 = vmatprep.subr.mxu0 %v2579_v0  ;;  %v995_v63 = vsel %vm986_vm2, %v993_v54, %v994_v55  ;;  %v2648_v0 = vld [vmem:[%s5508_s1 + $0x8f8] sm:$0xff]  ;;  %v2637_v44 = vld [vmem:[%s5508_s1 + $0x8a0] sm:$0xff]  ;;  %v2667_v53 = vld [vmem:[%s5508_s1 + $0x990] sm:$0xff] }
  0x7f   : > { %3195 = vmatprep.subr.mxu1 %v2611_v1  ;;  %3161 = vmatpush3.msra.mxu0 %v2563_v2  ;;  %v2680_v1 = vld [vmem:[%s5508_s1 + $0x9f8] sm:$0xff]  ;;  %v2669_v45 = vld [vmem:[%s5508_s1 + $0x9a0] sm:$0xff]  ;;  %v1145_v54 = vld [vmem:[%s3807_s20 + $0x8] sm:$0xe0] }
  0x80   : > { %3196 = vmatpush3.msra.mxu1 %v2595_v3  ;;  %3162 = vmatprep.subr.mxu0 %v2578_v4  ;;  %v2632_v2 = vld [vmem:[%s5508_s1 + $0x878] sm:$0xff]  ;;  %v2647_v4 = vld [vmem:[%s5508_s1 + $0x8f0] sm:$0xff]  ;;  %v1149_v55 = vld [vmem:[%s3807_s20 + $0x28] sm:$0x1f] }
  0x81   : > { %3197 = vmatprep.subr.mxu1 %v2610_v5  ;;  %3163 = vmatpush3.msra.mxu0 %v2562_v6  ;;  %v2664_v3 = vld [vmem:[%s5508_s1 + $0x978] sm:$0xff]  ;;  %v2679_v5 = vld [vmem:[%s5508_s1 + $0x9f0] sm:$0xff] }
  0x82   : > { %3198 = vmatpush3.msra.mxu1 %v2594_v7  ;;  %3164 = vmatprep.subr.mxu0 %v2577_v8  ;;  %v2631_v6 = vld [vmem:[%s5508_s1 + $0x870] sm:$0xff]  ;;  %v2646_v8 = vld [vmem:[%s5508_s1 + $0x8e8] sm:$0xff]  ;;  %v2668_v49 = vld [vmem:[%s5508_s1 + $0x998] sm:$0xff] }
  0x83   : > { %3199 = vmatprep.subr.mxu1 %v2609_v9  ;;  %3165 = vmatpush3.msra.mxu0 %v2561_v10  ;;  %v2663_v7 = vld [vmem:[%s5508_s1 + $0x970] sm:$0xff]  ;;  %v2678_v9 = vld [vmem:[%s5508_s1 + $0x9e8] sm:$0xff] }
  0x84   : > { %3200 = vmatpush3.msra.mxu1 %v2593_v11  ;;  %3166 = vmatprep.subr.mxu0 %v2576_v12  ;;  %v2630_v10 = vld [vmem:[%s5508_s1 + $0x868] sm:$0xff]  ;;  %v2645_v12 = vld [vmem:[%s5508_s1 + $0x8e0] sm:$0xff] }
  0x85   : > { %3201 = vmatprep.subr.mxu1 %v2608_v13  ;;  %3167 = vmatpush3.msra.mxu0 %v2560_v14  ;;  %v2662_v11 = vld [vmem:[%s5508_s1 + $0x968] sm:$0xff]  ;;  %v2677_v13 = vld [vmem:[%s5508_s1 + $0x9e0] sm:$0xff] }
  0x86   : > { %3202 = vmatpush3.msra.mxu1 %v2592_v15  ;;  %3168 = vmatprep.subr.mxu0 %v2575_v16  ;;  %v2629_v14 = vld [vmem:[%s5508_s1 + $0x860] sm:$0xff]  ;;  %v2644_v16 = vld [vmem:[%s5508_s1 + $0x8d8] sm:$0xff] }
  0x87   : > { %3203 = vmatprep.subr.mxu1 %v2607_v17  ;;  %3169 = vmatpush3.msra.mxu0 %v2559_v18  ;;  %v2661_v15 = vld [vmem:[%s5508_s1 + $0x960] sm:$0xff]  ;;  %v2676_v17 = vld [vmem:[%s5508_s1 + $0x9d8] sm:$0xff] }
  0x88   : > { %3204 = vmatpush3.msra.mxu1 %v2591_v19  ;;  %3170 = vmatprep.subr.mxu0 %v2574_v20  ;;  %v2628_v18 = vld [vmem:[%s5508_s1 + $0x858] sm:$0xff]  ;;  %v2643_v20 = vld [vmem:[%s5508_s1 + $0x8d0] sm:$0xff] }
  0x89   : > { %3205 = vmatprep.subr.mxu1 %v2606_v21  ;;  %3171 = vmatpush3.msra.mxu0 %v2558_v22  ;;  %v2660_v19 = vld [vmem:[%s5508_s1 + $0x958] sm:$0xff]  ;;  %v2675_v21 = vld [vmem:[%s5508_s1 + $0x9d0] sm:$0xff] }
  0x8a   : > { %3206 = vmatpush3.msra.mxu1 %v2590_v23  ;;  %3172 = vmatprep.subr.mxu0 %v2573_v24  ;;  %v2627_v22 = vld [vmem:[%s5508_s1 + $0x850] sm:$0xff]  ;;  %v2642_v24 = vld [vmem:[%s5508_s1 + $0x8c8] sm:$0xff] }
  0x8b   : > { %3207 = vmatprep.subr.mxu1 %v2605_v25  ;;  %3173 = vmatpush3.msra.mxu0 %v2557_v26  ;;  %v2659_v23 = vld [vmem:[%s5508_s1 + $0x950] sm:$0xff]  ;;  %v2674_v25 = vld [vmem:[%s5508_s1 + $0x9c8] sm:$0xff] }
  0x8c   : > { %3208 = vmatpush3.msra.mxu1 %v2589_v27  ;;  %3174 = vmatprep.subr.mxu0 %v2572_v28  ;;  %v2626_v26 = vld [vmem:[%s5508_s1 + $0x848] sm:$0xff]  ;;  %v2641_v28 = vld [vmem:[%s5508_s1 + $0x8c0] sm:$0xff] }
  0x8d   : > { %3209 = vmatprep.subr.mxu1 %v2604_v29  ;;  %3175 = vmatpush3.msra.mxu0 %v2556_v30  ;;  %v2658_v27 = vld [vmem:[%s5508_s1 + $0x948] sm:$0xff]  ;;  %v2673_v29 = vld [vmem:[%s5508_s1 + $0x9c0] sm:$0xff] }
  0x8e   : > { %3210 = vmatpush3.msra.mxu1 %v2588_v31  ;;  %3176 = vmatprep.subr.mxu0 %v2571_v32  ;;  %v2625_v30 = vld [vmem:[%s5508_s1 + $0x840] sm:$0xff]  ;;  %v2640_v32 = vld [vmem:[%s5508_s1 + $0x8b8] sm:$0xff] }
  0x8f   : > { %3211 = vmatprep.subr.mxu1 %v2603_v33  ;;  %3177 = vmatpush3.msra.mxu0 %v2555_v42  ;;  %v2657_v31 = vld [vmem:[%s5508_s1 + $0x940] sm:$0xff]  ;;  %v2672_v33 = vld [vmem:[%s5508_s1 + $0x9b8] sm:$0xff]  ;;  %v2622_v42 = vld [vmem:[%s5508_s1 + $0x828] sm:$0xff] }
  0x90   : > { %3212 = vmatpush3.msra.mxu1 %v2587_v43  ;;  %3178 = vmatprep.subr.mxu0 %v2570_v46  ;;  %v2654_v43 = vld [vmem:[%s5508_s1 + $0x928] sm:$0xff]  ;;  %v2621_v46 = vld [vmem:[%s5508_s1 + $0x820] sm:$0xff] }
  0x91   : > { %3213 = vmatprep.subr.mxu1 %v2602_v47  ;;  %3179 = vmatpush3.msra.mxu0 %v2554_v50  ;;  %v2653_v47 = vld [vmem:[%s5508_s1 + $0x920] sm:$0xff]  ;;  %v2620_v50 = vld [vmem:[%s5508_s1 + $0x818] sm:$0xff] }
  0x92   : > { %3214 = vmatpush3.msra.mxu1 %v2586_v51  ;;  %3180 = vmatprep.subr.mxu0 %v2569_v56  ;;  %v2652_v51 = vld [vmem:[%s5508_s1 + $0x918] sm:$0xff] }
  0x93   : > { %3215 = vmatprep.subr.mxu1 %v2601_v57  ;;  %3181 = vmatpush3.msra.mxu0 %v2553_v58  ;;  %v1147_v56 = vld [vmem:[%s3807_s20 + $0x18] sm:$0xe0]  ;;  %v1151_v57 = vld [vmem:[%s3807_s20 + $0x38] sm:$0x1f]  ;;  %v1144_v58 = vld [vmem:[%s3807_s20] sm:$0xe0] }
  0x94   : > { %1067 = vmatprep.mubr.f32.mxu0 %v992_v59  ;;  %3216 = vmatpush3.msra.mxu1 %v2585_v60  ;;  %v1148_v59 = vld [vmem:[%s3807_s20 + $0x20] sm:$0x1f]  ;;  %v1146_v60 = vld [vmem:[%s3807_s20 + $0x10] sm:$0xe0] }
  0x95   : > { %1137 = vmatprep.mubr.f32.mxu1 %v998_v61  ;;  %1068 = vmatmul.mubr.f32.vlgmr.msra.gmra.mxu0 %v989_v62  ;;  %v1150_v61 = vld [vmem:[%s3807_s20 + $0x30] sm:$0x1f] }
  0x96   : > { %1138 = vmatmul.mubr.f32.vlgmr.msra.gmra.mxu1 %v995_v63  ;;  %3220 = vmatprep.subr.mxu0 %v2648_v0  ;;  %v2619_v62 = vld [vmem:[%s5508_s1 + $0x810] sm:$0xff]  ;;  %v1229_v0 = vrot.slane %v1145_v54, 5  ;;  %v2688_v54 = vld [vmem:[%s5508_s1 + $0xa38] sm:$0xff] }
  0x97   : > { %3255 = vmatprep.subr.mxu1 %v2680_v1  ;;  %3221 = vmatpush3.msra.mxu0 %v2632_v2  ;;  %v2651_v63 = vld [vmem:[%s5508_s1 + $0x910] sm:$0xff]  ;;  %v1230_v1 = vrot.slane %v1149_v55, 5  ;;  %v2634_v2 = vld [vmem:[%s5508_s1 + $0x888] sm:$0xff]  ;;  %v2720_v55 = vld [vmem:[%s5508_s1 + $0xb38] sm:$0xff] }
  0x98   : > { %3256 = vmatpush3.msra.mxu1 %v2664_v3  ;;  %3222 = vmatprep.subr.mxu0 %v2647_v4  ;;  %v2666_v3 = vld [vmem:[%s5508_s1 + $0x988] sm:$0xff]  ;;  %v1235_v4 = vrot.slane %v1147_v56, 5  ;;  %v2703_v56 = vld [vmem:[%s5508_s1 + $0xab0] sm:$0xff] }
  0x99   : > { %3257 = vmatprep.subr.mxu1 %v2679_v5  ;;  %3223 = vmatpush3.msra.mxu0 %v2631_v6  ;;  %v1236_v5 = vrot.slane %v1151_v57, 5  ;;  %v2618_v6 = vld [vmem:[%s5508_s1 + $0x808] sm:$0xff]  ;;  %v2735_v57 = vld [vmem:[%s5508_s1 + $0xbb0] sm:$0xff] }
  0x9a   : > { %3258 = vmatpush3.msra.mxu1 %v2663_v7  ;;  %3224 = vmatprep.subr.mxu0 %v2646_v8  ;;  %v2650_v7 = vld [vmem:[%s5508_s1 + $0x908] sm:$0xff]  ;;  %v1226_v8 = vrot.slane %v1144_v58, 5  ;;  %v2687_v58 = vld [vmem:[%s5508_s1 + $0xa30] sm:$0xff] }
  0x9b   : > { %3259 = vmatprep.subr.mxu1 %v2678_v9  ;;  %3225 = vmatpush3.msra.mxu0 %v2630_v10  ;;  %v1227_v9 = vrot.slane %v1148_v59, 5  ;;  %v1232_v10 = vrot.slane %v1146_v60, 5  ;;  %v2719_v59 = vld [vmem:[%s5508_s1 + $0xb30] sm:$0xff]  ;;  %v2702_v60 = vld [vmem:[%s5508_s1 + $0xaa8] sm:$0xff] }
  0x9c   : > { %3260 = vmatpush3.msra.mxu1 %v2662_v11  ;;  %3226 = vmatprep.subr.mxu0 %v2645_v12  ;;  %v1233_v11 = vrot.slane %v1150_v61, 5  ;;  %v2633_v12 = vld [vmem:[%s5508_s1 + $0x880] sm:$0xff]  ;;  %v2734_v61 = vld [vmem:[%s5508_s1 + $0xba8] sm:$0xff] }
  0x9d   : > { %3261 = vmatprep.subr.mxu1 %v2677_v13  ;;  %3227 = vmatpush3.msra.mxu0 %v2629_v14  ;;  %v2665_v13 = vld [vmem:[%s5508_s1 + $0x980] sm:$0xff] }
  0x9e   : > { %3262 = vmatpush3.msra.mxu1 %v2661_v15  ;;  %3228 = vmatprep.subr.mxu0 %v2644_v16  ;;  %v2617_v14 = vld [vmem:[%s5508_s1 + $0x800] sm:$0xff]  ;;  %v1231_v15 = vsel %vm1225_vm3, %v1229_v0, %v1230_v1 }
  0x9f   : > { %3263 = vmatprep.subr.mxu1 %v2676_v17  ;;  %3229 = vmatpush3.msra.mxu0 %v2628_v18  ;;  %v2649_v16 = vld [vmem:[%s5508_s1 + $0x900] sm:$0xff]  ;;  %v1237_v17 = vsel %vm1225_vm3, %v1235_v4, %v1236_v5  ;;  %v1228_v18 = vsel %vm1225_vm3, %v1226_v8, %v1227_v9  ;;  %v2700_v4 = vld [vmem:[%s5508_s1 + $0xa98] sm:$0xff]  ;;  %v2699_v8 = vld [vmem:[%s5508_s1 + $0xa90] sm:$0xff] }
  0xa0   : > { %3264 = vmatpush3.msra.mxu1 %v2660_v19  ;;  %3230 = vmatprep.subr.mxu0 %v2643_v20  ;;  %v1234_v19 = vsel %vm1225_vm3, %v1232_v10, %v1233_v11  ;;  %v2712_v20 = vld [vmem:[%s5508_s1 + $0xaf8] sm:$0xff]  ;;  %v2701_v0 = vld [vmem:[%s5508_s1 + $0xaa0] sm:$0xff]  ;;  %v2731_v9 = vld [vmem:[%s5508_s1 + $0xb90] sm:$0xff] }
  0xa1   : > { %3265 = vmatprep.subr.mxu1 %v2675_v21  ;;  %3231 = vmatpush3.msra.mxu0 %v2627_v22  ;;  %v2744_v21 = vld [vmem:[%s5508_s1 + $0xbf8] sm:$0xff]  ;;  %v2733_v1 = vld [vmem:[%s5508_s1 + $0xba0] sm:$0xff]  ;;  %v1384_v10 = vld [vmem:[%s3807_s20 + $0x8] sm:$0xc0] }
  0xa2   : > { %3266 = vmatpush3.msra.mxu1 %v2659_v23  ;;  %3232 = vmatprep.subr.mxu0 %v2642_v24  ;;  %v2696_v22 = vld [vmem:[%s5508_s1 + $0xa78] sm:$0xff]  ;;  %v2711_v24 = vld [vmem:[%s5508_s1 + $0xaf0] sm:$0xff]  ;;  %v1388_v11 = vld [vmem:[%s3807_s20 + $0x28] sm:$0x3f] }
  0xa3   : > { %3267 = vmatprep.subr.mxu1 %v2674_v25  ;;  %3233 = vmatpush3.msra.mxu0 %v2626_v26  ;;  %v2728_v23 = vld [vmem:[%s5508_s1 + $0xb78] sm:$0xff]  ;;  %v2743_v25 = vld [vmem:[%s5508_s1 + $0xbf0] sm:$0xff] }
  0xa4   : > { %3268 = vmatpush3.msra.mxu1 %v2658_v27  ;;  %3234 = vmatprep.subr.mxu0 %v2641_v28  ;;  %v2695_v26 = vld [vmem:[%s5508_s1 + $0xa70] sm:$0xff]  ;;  %v2710_v28 = vld [vmem:[%s5508_s1 + $0xae8] sm:$0xff]  ;;  %v2732_v5 = vld [vmem:[%s5508_s1 + $0xb98] sm:$0xff] }
  0xa5   : > { %3269 = vmatprep.subr.mxu1 %v2673_v29  ;;  %3235 = vmatpush3.msra.mxu0 %v2625_v30  ;;  %v2727_v27 = vld [vmem:[%s5508_s1 + $0xb70] sm:$0xff]  ;;  %v2742_v29 = vld [vmem:[%s5508_s1 + $0xbe8] sm:$0xff] }
  0xa6   : > { %3270 = vmatpush3.msra.mxu1 %v2657_v31  ;;  %3236 = vmatprep.subr.mxu0 %v2640_v32  ;;  %v2694_v30 = vld [vmem:[%s5508_s1 + $0xa68] sm:$0xff]  ;;  %v2709_v32 = vld [vmem:[%s5508_s1 + $0xae0] sm:$0xff] }
  0xa7   : > { %3271 = vmatprep.subr.mxu1 %v2672_v33  ;;  %3237 = vmatpush3.msra.mxu0 %v2624_v34  ;;  %v2726_v31 = vld [vmem:[%s5508_s1 + $0xb68] sm:$0xff]  ;;  %v2741_v33 = vld [vmem:[%s5508_s1 + $0xbe0] sm:$0xff] }
  0xa8   : > { %3272 = vmatpush3.msra.mxu1 %v2656_v35  ;;  %3238 = vmatprep.subr.mxu0 %v2639_v36  ;;  %v2693_v34 = vld [vmem:[%s5508_s1 + $0xa60] sm:$0xff]  ;;  %v2708_v36 = vld [vmem:[%s5508_s1 + $0xad8] sm:$0xff] }
  0xa9   : > { %3273 = vmatprep.subr.mxu1 %v2671_v37  ;;  %3239 = vmatpush3.msra.mxu0 %v2623_v38  ;;  %v2725_v35 = vld [vmem:[%s5508_s1 + $0xb60] sm:$0xff]  ;;  %v2740_v37 = vld [vmem:[%s5508_s1 + $0xbd8] sm:$0xff] }
  0xaa   : > { %3274 = vmatpush3.msra.mxu1 %v2655_v39  ;;  %3240 = vmatprep.subr.mxu0 %v2638_v40  ;;  %v2692_v38 = vld [vmem:[%s5508_s1 + $0xa58] sm:$0xff]  ;;  %v2707_v40 = vld [vmem:[%s5508_s1 + $0xad0] sm:$0xff] }
  0xab   : > { %3275 = vmatprep.subr.mxu1 %v2670_v41  ;;  %3241 = vmatpush3.msra.mxu0 %v2622_v42  ;;  %v2724_v39 = vld [vmem:[%s5508_s1 + $0xb58] sm:$0xff]  ;;  %v2739_v41 = vld [vmem:[%s5508_s1 + $0xbd0] sm:$0xff] }
  0xac   : > { %3276 = vmatpush3.msra.mxu1 %v2654_v43  ;;  %3242 = vmatprep.subr.mxu0 %v2637_v44  ;;  %v2691_v42 = vld [vmem:[%s5508_s1 + $0xa50] sm:$0xff]  ;;  %v2706_v44 = vld [vmem:[%s5508_s1 + $0xac8] sm:$0xff] }
  0xad   : > { %3277 = vmatprep.subr.mxu1 %v2669_v45  ;;  %3243 = vmatpush3.msra.mxu0 %v2621_v46  ;;  %v2723_v43 = vld [vmem:[%s5508_s1 + $0xb50] sm:$0xff]  ;;  %v2738_v45 = vld [vmem:[%s5508_s1 + $0xbc8] sm:$0xff] }
  0xae   : > { %3278 = vmatpush3.msra.mxu1 %v2653_v47  ;;  %3244 = vmatprep.subr.mxu0 %v2636_v48  ;;  %v2690_v46 = vld [vmem:[%s5508_s1 + $0xa48] sm:$0xff]  ;;  %v2705_v48 = vld [vmem:[%s5508_s1 + $0xac0] sm:$0xff] }
  0xaf   : > { %3279 = vmatprep.subr.mxu1 %v2668_v49  ;;  %3245 = vmatpush3.msra.mxu0 %v2620_v50  ;;  %v2722_v47 = vld [vmem:[%s5508_s1 + $0xb48] sm:$0xff]  ;;  %v2737_v49 = vld [vmem:[%s5508_s1 + $0xbc0] sm:$0xff] }
  0xb0   : > { %3280 = vmatpush3.msra.mxu1 %v2652_v51  ;;  %3246 = vmatprep.subr.mxu0 %v2635_v52  ;;  %v2689_v50 = vld [vmem:[%s5508_s1 + $0xa40] sm:$0xff]  ;;  %v2704_v52 = vld [vmem:[%s5508_s1 + $0xab8] sm:$0xff] }
  0xb1   : > { %3281 = vmatprep.subr.mxu1 %v2667_v53  ;;  %3247 = vmatpush3.msra.mxu0 %v2619_v62  ;;  %v2721_v51 = vld [vmem:[%s5508_s1 + $0xb40] sm:$0xff]  ;;  %v2736_v53 = vld [vmem:[%s5508_s1 + $0xbb8] sm:$0xff]  ;;  %v2686_v62 = vld [vmem:[%s5508_s1 + $0xa28] sm:$0xff] }
  0xb2   : > { %3282 = vmatpush3.msra.mxu1 %v2651_v63  ;;  %3248 = vmatprep.subr.mxu0 %v2634_v2  ;;  %v2718_v63 = vld [vmem:[%s5508_s1 + $0xb28] sm:$0xff]  ;;  %v2685_v2 = vld [vmem:[%s5508_s1 + $0xa20] sm:$0xff] }
  0xb3   : > { %3283 = vmatprep.subr.mxu1 %v2666_v3  ;;  %3249 = vmatpush3.msra.mxu0 %v2618_v6  ;;  %v2717_v3 = vld [vmem:[%s5508_s1 + $0xb20] sm:$0xff]  ;;  %v2684_v6 = vld [vmem:[%s5508_s1 + $0xa18] sm:$0xff] }
  0xb4   : > { %3284 = vmatpush3.msra.mxu1 %v2650_v7  ;;  %3250 = vmatprep.subr.mxu0 %v2633_v12  ;;  %v2716_v7 = vld [vmem:[%s5508_s1 + $0xb18] sm:$0xff] }
  0xb5   : > { %3285 = vmatprep.subr.mxu1 %v2665_v13  ;;  %3251 = vmatpush3.msra.mxu0 %v2617_v14  ;;  %v1386_v12 = vld [vmem:[%s3807_s20 + $0x18] sm:$0xc0]  ;;  %v1390_v13 = vld [vmem:[%s3807_s20 + $0x38] sm:$0x3f]  ;;  %v1383_v14 = vld [vmem:[%s3807_s20] sm:$0xc0] }
  0xb6   : > { %1306 = vmatprep.mubr.f32.mxu0 %v1231_v15  ;;  %3286 = vmatpush3.msra.mxu1 %v2649_v16  ;;  %v1387_v15 = vld [vmem:[%s3807_s20 + $0x20] sm:$0x3f]  ;;  %v1385_v16 = vld [vmem:[%s3807_s20 + $0x10] sm:$0xc0] }
  0xb7   : > { %1376 = vmatprep.mubr.f32.mxu1 %v1237_v17  ;;  %1307 = vmatmul.mubr.f32.vlgmr.msra.gmra.mxu0 %v1228_v18  ;;  %v1389_v17 = vld [vmem:[%s3807_s20 + $0x30] sm:$0x3f] }
  0xb8   : > { %1377 = vmatmul.mubr.f32.vlgmr.msra.gmra.mxu1 %v1234_v19  ;;  %3290 = vmatprep.subr.mxu0 %v2712_v20  ;;  %v2683_v18 = vld [vmem:[%s5508_s1 + $0xa10] sm:$0xff]  ;;  %v1468_v20 = vrot.slane %v1384_v10, 6  ;;  %v2752_v10 = vld [vmem:[%s5508_s1 + $0xc38] sm:$0xff] }
  0xb9   : > { %3325 = vmatprep.subr.mxu1 %v2744_v21  ;;  %3291 = vmatpush3.msra.mxu0 %v2696_v22  ;;  %v2715_v19 = vld [vmem:[%s5508_s1 + $0xb10] sm:$0xff]  ;;  %v1469_v21 = vrot.slane %v1388_v11, 6  ;;  %v2698_v22 = vld [vmem:[%s5508_s1 + $0xa88] sm:$0xff]  ;;  %v2784_v11 = vld [vmem:[%s5508_s1 + $0xd38] sm:$0xff] }
  0xba   : > { %3326 = vmatpush3.msra.mxu1 %v2728_v23  ;;  %3292 = vmatprep.subr.mxu0 %v2711_v24  ;;  %v2730_v23 = vld [vmem:[%s5508_s1 + $0xb88] sm:$0xff]  ;;  %v1474_v24 = vrot.slane %v1386_v12, 6  ;;  %v2767_v12 = vld [vmem:[%s5508_s1 + $0xcb0] sm:$0xff] }
  0xbb   : > { %3327 = vmatprep.subr.mxu1 %v2743_v25  ;;  %3293 = vmatpush3.msra.mxu0 %v2695_v26  ;;  %v1475_v25 = vrot.slane %v1390_v13, 6  ;;  %v2682_v26 = vld [vmem:[%s5508_s1 + $0xa08] sm:$0xff]  ;;  %v2799_v13 = vld [vmem:[%s5508_s1 + $0xdb0] sm:$0xff] }
  0xbc   : > { %3328 = vmatpush3.msra.mxu1 %v2727_v27  ;;  %3294 = vmatprep.subr.mxu0 %v2710_v28  ;;  %v2714_v27 = vld [vmem:[%s5508_s1 + $0xb08] sm:$0xff]  ;;  %v1465_v28 = vrot.slane %v1383_v14, 6  ;;  %v2751_v14 = vld [vmem:[%s5508_s1 + $0xc30] sm:$0xff] }
  0xbd   : > { %3329 = vmatprep.subr.mxu1 %v2742_v29  ;;  %3295 = vmatpush3.msra.mxu0 %v2694_v30  ;;  %v1466_v29 = vrot.slane %v1387_v15, 6  ;;  %v1471_v30 = vrot.slane %v1385_v16, 6  ;;  %v2783_v15 = vld [vmem:[%s5508_s1 + $0xd30] sm:$0xff]  ;;  %v2766_v16 = vld [vmem:[%s5508_s1 + $0xca8] sm:$0xff] }
  0xbe   : > { %3330 = vmatpush3.msra.mxu1 %v2726_v31  ;;  %3296 = vmatprep.subr.mxu0 %v2709_v32  ;;  %v1472_v31 = vrot.slane %v1389_v17, 6  ;;  %v2697_v32 = vld [vmem:[%s5508_s1 + $0xa80] sm:$0xff]  ;;  %v2798_v17 = vld [vmem:[%s5508_s1 + $0xda8] sm:$0xff] }
  0xbf   : > { %3331 = vmatprep.subr.mxu1 %v2741_v33  ;;  %3297 = vmatpush3.msra.mxu0 %v2693_v34  ;;  %v2729_v33 = vld [vmem:[%s5508_s1 + $0xb80] sm:$0xff] }
  0xc0   : > { %3332 = vmatpush3.msra.mxu1 %v2725_v35  ;;  %3298 = vmatprep.subr.mxu0 %v2708_v36  ;;  %v2681_v34 = vld [vmem:[%s5508_s1 + $0xa00] sm:$0xff]  ;;  %v1470_v35 = vsel %vm1464_vm4, %v1468_v20, %v1469_v21 }
  0xc1   : > { %3333 = vmatprep.subr.mxu1 %v2740_v37  ;;  %3299 = vmatpush3.msra.mxu0 %v2692_v38  ;;  %v2713_v36 = vld [vmem:[%s5508_s1 + $0xb00] sm:$0xff]  ;;  %v1476_v37 = vsel %vm1464_vm4, %v1474_v24, %v1475_v25  ;;  %v1467_v38 = vsel %vm1464_vm4, %v1465_v28, %v1466_v29  ;;  %v2764_v24 = vld [vmem:[%s5508_s1 + $0xc98] sm:$0xff]  ;;  %v2763_v28 = vld [vmem:[%s5508_s1 + $0xc90] sm:$0xff] }
  0xc2   : > { %3334 = vmatpush3.msra.mxu1 %v2724_v39  ;;  %3300 = vmatprep.subr.mxu0 %v2707_v40  ;;  %v1473_v39 = vsel %vm1464_vm4, %v1471_v30, %v1472_v31  ;;  %v2776_v40 = vld [vmem:[%s5508_s1 + $0xcf8] sm:$0xff]  ;;  %v2765_v20 = vld [vmem:[%s5508_s1 + $0xca0] sm:$0xff]  ;;  %v2795_v29 = vld [vmem:[%s5508_s1 + $0xd90] sm:$0xff] }
  0xc3   : > { %3335 = vmatprep.subr.mxu1 %v2739_v41  ;;  %3301 = vmatpush3.msra.mxu0 %v2691_v42  ;;  %v2808_v41 = vld [vmem:[%s5508_s1 + $0xdf8] sm:$0xff]  ;;  %v2797_v21 = vld [vmem:[%s5508_s1 + $0xda0] sm:$0xff]  ;;  %v2747_v30 = vld [vmem:[%s5508_s1 + $0xc10] sm:$0xff] }
  0xc4   : > { %3336 = vmatpush3.msra.mxu1 %v2723_v43  ;;  %3302 = vmatprep.subr.mxu0 %v2706_v44  ;;  %v2760_v42 = vld [vmem:[%s5508_s1 + $0xc78] sm:$0xff]  ;;  %v2775_v44 = vld [vmem:[%s5508_s1 + $0xcf0] sm:$0xff] }
  0xc5   : > { %3337 = vmatprep.subr.mxu1 %v2738_v45  ;;  %3303 = vmatpush3.msra.mxu0 %v2690_v46  ;;  %v2792_v43 = vld [vmem:[%s5508_s1 + $0xd78] sm:$0xff]  ;;  %v2807_v45 = vld [vmem:[%s5508_s1 + $0xdf0] sm:$0xff] }
  0xc6   : > { %3338 = vmatpush3.msra.mxu1 %v2722_v47  ;;  %3304 = vmatprep.subr.mxu0 %v2705_v48  ;;  %v2759_v46 = vld [vmem:[%s5508_s1 + $0xc70] sm:$0xff]  ;;  %v2774_v48 = vld [vmem:[%s5508_s1 + $0xce8] sm:$0xff]  ;;  %v2796_v25 = vld [vmem:[%s5508_s1 + $0xd98] sm:$0xff] }
  0xc7   : > { %3339 = vmatprep.subr.mxu1 %v2737_v49  ;;  %3305 = vmatpush3.msra.mxu0 %v2689_v50  ;;  %v2791_v47 = vld [vmem:[%s5508_s1 + $0xd70] sm:$0xff]  ;;  %v2806_v49 = vld [vmem:[%s5508_s1 + $0xde8] sm:$0xff] }
  0xc8   : > { %3340 = vmatpush3.msra.mxu1 %v2721_v51  ;;  %3306 = vmatprep.subr.mxu0 %v2704_v52  ;;  %v2758_v50 = vld [vmem:[%s5508_s1 + $0xc68] sm:$0xff]  ;;  %v2773_v52 = vld [vmem:[%s5508_s1 + $0xce0] sm:$0xff]  ;;  %v2779_v31 = vld [vmem:[%s5508_s1 + $0xd10] sm:$0xff] }
  0xc9   : > { %3341 = vmatprep.subr.mxu1 %v2736_v53  ;;  %3307 = vmatpush3.msra.mxu0 %v2688_v54  ;;  %v2790_v51 = vld [vmem:[%s5508_s1 + $0xd68] sm:$0xff]  ;;  %v2805_v53 = vld [vmem:[%s5508_s1 + $0xde0] sm:$0xff] }
  0xca   : > { %3342 = vmatpush3.msra.mxu1 %v2720_v55  ;;  %3308 = vmatprep.subr.mxu0 %v2703_v56  ;;  %v2757_v54 = vld [vmem:[%s5508_s1 + $0xc60] sm:$0xff]  ;;  %v2772_v56 = vld [vmem:[%s5508_s1 + $0xcd8] sm:$0xff] }
  0xcb   : > { %3343 = vmatprep.subr.mxu1 %v2735_v57  ;;  %3309 = vmatpush3.msra.mxu0 %v2687_v58  ;;  %v2789_v55 = vld [vmem:[%s5508_s1 + $0xd60] sm:$0xff]  ;;  %v2804_v57 = vld [vmem:[%s5508_s1 + $0xdd8] sm:$0xff] }
  0xcc   : > { %3344 = vmatpush3.msra.mxu1 %v2719_v59  ;;  %3310 = vmatprep.subr.mxu0 %v2702_v60  ;;  %v2756_v58 = vld [vmem:[%s5508_s1 + $0xc58] sm:$0xff]  ;;  %v2771_v60 = vld [vmem:[%s5508_s1 + $0xcd0] sm:$0xff] }
  0xcd   : > { %3345 = vmatprep.subr.mxu1 %v2734_v61  ;;  %3311 = vmatpush3.msra.mxu0 %v2686_v62  ;;  %v2788_v59 = vld [vmem:[%s5508_s1 + $0xd58] sm:$0xff]  ;;  %v2803_v61 = vld [vmem:[%s5508_s1 + $0xdd0] sm:$0xff] }
  0xce   : > { %3346 = vmatpush3.msra.mxu1 %v2718_v63  ;;  %3312 = vmatprep.subr.mxu0 %v2701_v0  ;;  %v2755_v62 = vld [vmem:[%s5508_s1 + $0xc50] sm:$0xff]  ;;  %v2770_v0 = vld [vmem:[%s5508_s1 + $0xcc8] sm:$0xff] }
  0xcf   : > { %3347 = vmatprep.subr.mxu1 %v2733_v1  ;;  %3313 = vmatpush3.msra.mxu0 %v2685_v2  ;;  %v2787_v63 = vld [vmem:[%s5508_s1 + $0xd50] sm:$0xff]  ;;  %v2802_v1 = vld [vmem:[%s5508_s1 + $0xdc8] sm:$0xff] }
  0xd0   : > { %3348 = vmatpush3.msra.mxu1 %v2717_v3  ;;  %3314 = vmatprep.subr.mxu0 %v2700_v4  ;;  %v2754_v2 = vld [vmem:[%s5508_s1 + $0xc48] sm:$0xff]  ;;  %v2769_v4 = vld [vmem:[%s5508_s1 + $0xcc0] sm:$0xff] }
  0xd1   : > { %3349 = vmatprep.subr.mxu1 %v2732_v5  ;;  %3315 = vmatpush3.msra.mxu0 %v2684_v6  ;;  %v2786_v3 = vld [vmem:[%s5508_s1 + $0xd48] sm:$0xff]  ;;  %v2801_v5 = vld [vmem:[%s5508_s1 + $0xdc0] sm:$0xff] }
  0xd2   : > { %3350 = vmatpush3.msra.mxu1 %v2716_v7  ;;  %3316 = vmatprep.subr.mxu0 %v2699_v8  ;;  %v2753_v6 = vld [vmem:[%s5508_s1 + $0xc40] sm:$0xff]  ;;  %v2768_v8 = vld [vmem:[%s5508_s1 + $0xcb8] sm:$0xff] }
  0xd3   : > { %3351 = vmatprep.subr.mxu1 %v2731_v9  ;;  %3317 = vmatpush3.msra.mxu0 %v2683_v18  ;;  %v2785_v7 = vld [vmem:[%s5508_s1 + $0xd40] sm:$0xff]  ;;  %v2800_v9 = vld [vmem:[%s5508_s1 + $0xdb8] sm:$0xff]  ;;  %v2750_v18 = vld [vmem:[%s5508_s1 + $0xc28] sm:$0xff] }
  0xd4   : > { %3352 = vmatpush3.msra.mxu1 %v2715_v19  ;;  %3318 = vmatprep.subr.mxu0 %v2698_v22  ;;  %v2782_v19 = vld [vmem:[%s5508_s1 + $0xd28] sm:$0xff]  ;;  %v2749_v22 = vld [vmem:[%s5508_s1 + $0xc20] sm:$0xff] }
  0xd5   : > { %3353 = vmatprep.subr.mxu1 %v2730_v23  ;;  %3319 = vmatpush3.msra.mxu0 %v2682_v26  ;;  %v2781_v23 = vld [vmem:[%s5508_s1 + $0xd20] sm:$0xff]  ;;  %v2748_v26 = vld [vmem:[%s5508_s1 + $0xc18] sm:$0xff] }
  0xd6   : > { %3354 = vmatpush3.msra.mxu1 %v2714_v27  ;;  %3320 = vmatprep.subr.mxu0 %v2697_v32  ;;  %v2780_v27 = vld [vmem:[%s5508_s1 + $0xd18] sm:$0xff]  ;;  %v2762_v32 = vld [vmem:[%s5508_s1 + $0xc88] sm:$0xff] }
  0xd7   : > { %3355 = vmatprep.subr.mxu1 %v2729_v33  ;;  %3321 = vmatpush3.msra.mxu0 %v2681_v34  ;;  %v2794_v33 = vld [vmem:[%s5508_s1 + $0xd88] sm:$0xff] }
  0xd8   : > { %1545 = vmatprep.mubr.f32.mxu0 %v1470_v35  ;;  %3356 = vmatpush3.msra.mxu1 %v2713_v36  ;;  %v2746_v34 = vld [vmem:[%s5508_s1 + $0xc08] sm:$0xff]  ;;  %v2761_v36 = vld [vmem:[%s5508_s1 + $0xc80] sm:$0xff] }
  0xd9   : > { %1615 = vmatprep.mubr.f32.mxu1 %v1476_v37  ;;  %1546 = vmatmul.mubr.f32.vlgmr.msra.gmra.mxu0 %v1467_v38  ;;  %v2778_v35 = vld [vmem:[%s5508_s1 + $0xd08] sm:$0xff]  ;;  %v2793_v37 = vld [vmem:[%s5508_s1 + $0xd80] sm:$0xff] }
  0xda   : > { %1616 = vmatmul.mubr.f32.vlgmr.msra.gmra.mxu1 %v1473_v39  ;;  %3360 = vmatprep.subr.mxu0 %v2776_v40  ;;  %v2745_v38 = vld [vmem:[%s5508_s1 + $0xc00] sm:$0xff]  ;;  %v1623_v39 = vld [vmem:[%s3807_s20 + $0x28] sm:$0xff] }
  0xdb   : > { %3395 = vmatprep.subr.mxu1 %v2808_v41  ;;  %3361 = vmatpush3.msra.mxu0 %v2760_v42  ;;  %v2777_v40 = vld [vmem:[%s5508_s1 + $0xd00] sm:$0xff]  ;;  %v1625_v41 = vld [vmem:[%s3807_s20 + $0x38] sm:$0xff] }
  0xdc   : > { %3396 = vmatpush3.msra.mxu1 %v2792_v43  ;;  %3362 = vmatprep.subr.mxu0 %v2775_v44  ;;  %v1622_v42 = vld [vmem:[%s3807_s20 + $0x20] sm:$0xff]  ;;  %v1624_v43 = vld [vmem:[%s3807_s20 + $0x30] sm:$0xff]  ;;  %v2840_v44 = vld [vmem:[%s5508_s1 + $0xef8] sm:$0xff] }
  0xdd   : > { %3397 = vmatprep.subr.mxu1 %v2807_v45  ;;  %3363 = vmatpush3.msra.mxu0 %v2759_v46  ;;  %v2872_v45 = vld [vmem:[%s5508_s1 + $0xff8] sm:$0xff] }
  0xde   : > { %3398 = vmatpush3.msra.mxu1 %v2791_v47  ;;  %3364 = vmatprep.subr.mxu0 %v2774_v48  ;;  %v2824_v46 = vld [vmem:[%s5508_s1 + $0xe78] sm:$0xff]  ;;  %v2839_v48 = vld [vmem:[%s5508_s1 + $0xef0] sm:$0xff] }
  0xdf   : > { %3399 = vmatprep.subr.mxu1 %v2806_v49  ;;  %3365 = vmatpush3.msra.mxu0 %v2758_v50  ;;  %v2856_v47 = vld [vmem:[%s5508_s1 + $0xf78] sm:$0xff]  ;;  %v2871_v49 = vld [vmem:[%s5508_s1 + $0xff0] sm:$0xff] }
  0xe0   : > { %3400 = vmatpush3.msra.mxu1 %v2790_v51  ;;  %3366 = vmatprep.subr.mxu0 %v2773_v52  ;;  %v2823_v50 = vld [vmem:[%s5508_s1 + $0xe70] sm:$0xff]  ;;  %v2838_v52 = vld [vmem:[%s5508_s1 + $0xee8] sm:$0xff] }
  0xe1   : > { %3401 = vmatprep.subr.mxu1 %v2805_v53  ;;  %3367 = vmatpush3.msra.mxu0 %v2757_v54  ;;  %v2855_v51 = vld [vmem:[%s5508_s1 + $0xf70] sm:$0xff]  ;;  %v2870_v53 = vld [vmem:[%s5508_s1 + $0xfe8] sm:$0xff] }
  0xe2   : > { %3402 = vmatpush3.msra.mxu1 %v2789_v55  ;;  %3368 = vmatprep.subr.mxu0 %v2772_v56  ;;  %v2822_v54 = vld [vmem:[%s5508_s1 + $0xe68] sm:$0xff]  ;;  %v2837_v56 = vld [vmem:[%s5508_s1 + $0xee0] sm:$0xff] }
  0xe3   : > { %3403 = vmatprep.subr.mxu1 %v2804_v57  ;;  %3369 = vmatpush3.msra.mxu0 %v2756_v58  ;;  %v2854_v55 = vld [vmem:[%s5508_s1 + $0xf68] sm:$0xff]  ;;  %v2869_v57 = vld [vmem:[%s5508_s1 + $0xfe0] sm:$0xff] }
  0xe4   : > { %3404 = vmatpush3.msra.mxu1 %v2788_v59  ;;  %3370 = vmatprep.subr.mxu0 %v2771_v60  ;;  %v2821_v58 = vld [vmem:[%s5508_s1 + $0xe60] sm:$0xff]  ;;  %v2836_v60 = vld [vmem:[%s5508_s1 + $0xed8] sm:$0xff] }
  0xe5   : > { %3405 = vmatprep.subr.mxu1 %v2803_v61  ;;  %3371 = vmatpush3.msra.mxu0 %v2755_v62  ;;  %v2853_v59 = vld [vmem:[%s5508_s1 + $0xf60] sm:$0xff]  ;;  %v2868_v61 = vld [vmem:[%s5508_s1 + $0xfd8] sm:$0xff] }
  0xe6   : > { %3406 = vmatpush3.msra.mxu1 %v2787_v63  ;;  %3372 = vmatprep.subr.mxu0 %v2770_v0  ;;  %v2820_v62 = vld [vmem:[%s5508_s1 + $0xe58] sm:$0xff]  ;;  %v2835_v0 = vld [vmem:[%s5508_s1 + $0xed0] sm:$0xff] }
  0xe7   : > { %3407 = vmatprep.subr.mxu1 %v2802_v1  ;;  %3373 = vmatpush3.msra.mxu0 %v2754_v2  ;;  %v2852_v63 = vld [vmem:[%s5508_s1 + $0xf58] sm:$0xff]  ;;  %v2867_v1 = vld [vmem:[%s5508_s1 + $0xfd0] sm:$0xff] }
  0xe8   : > { %3408 = vmatpush3.msra.mxu1 %v2786_v3  ;;  %3374 = vmatprep.subr.mxu0 %v2769_v4  ;;  %v2819_v2 = vld [vmem:[%s5508_s1 + $0xe50] sm:$0xff]  ;;  %v2834_v4 = vld [vmem:[%s5508_s1 + $0xec8] sm:$0xff] }
  0xe9   : > { %3409 = vmatprep.subr.mxu1 %v2801_v5  ;;  %3375 = vmatpush3.msra.mxu0 %v2753_v6  ;;  %v2851_v3 = vld [vmem:[%s5508_s1 + $0xf50] sm:$0xff]  ;;  %v2866_v5 = vld [vmem:[%s5508_s1 + $0xfc8] sm:$0xff] }
  0xea   : > { %3410 = vmatpush3.msra.mxu1 %v2785_v7  ;;  %3376 = vmatprep.subr.mxu0 %v2768_v8  ;;  %v2818_v6 = vld [vmem:[%s5508_s1 + $0xe48] sm:$0xff]  ;;  %v2833_v8 = vld [vmem:[%s5508_s1 + $0xec0] sm:$0xff] }
  0xeb   : > { %3411 = vmatprep.subr.mxu1 %v2800_v9  ;;  %3377 = vmatpush3.msra.mxu0 %v2752_v10  ;;  %v2850_v7 = vld [vmem:[%s5508_s1 + $0xf48] sm:$0xff]  ;;  %v2865_v9 = vld [vmem:[%s5508_s1 + $0xfc0] sm:$0xff] }
  0xec   : > { %3412 = vmatpush3.msra.mxu1 %v2784_v11  ;;  %3378 = vmatprep.subr.mxu0 %v2767_v12  ;;  %v2817_v10 = vld [vmem:[%s5508_s1 + $0xe40] sm:$0xff]  ;;  %v2832_v12 = vld [vmem:[%s5508_s1 + $0xeb8] sm:$0xff] }
  0xed   : > { %3413 = vmatprep.subr.mxu1 %v2799_v13  ;;  %3379 = vmatpush3.msra.mxu0 %v2751_v14  ;;  %v2849_v11 = vld [vmem:[%s5508_s1 + $0xf40] sm:$0xff]  ;;  %v2864_v13 = vld [vmem:[%s5508_s1 + $0xfb8] sm:$0xff] }
  0xee   : > { %3414 = vmatpush3.msra.mxu1 %v2783_v15  ;;  %3380 = vmatprep.subr.mxu0 %v2766_v16  ;;  %v2816_v14 = vld [vmem:[%s5508_s1 + $0xe38] sm:$0xff]  ;;  %v2831_v16 = vld [vmem:[%s5508_s1 + $0xeb0] sm:$0xff] }
  0xef   : > { %3415 = vmatprep.subr.mxu1 %v2798_v17  ;;  %3381 = vmatpush3.msra.mxu0 %v2750_v18  ;;  %v2848_v15 = vld [vmem:[%s5508_s1 + $0xf38] sm:$0xff]  ;;  %v2863_v17 = vld [vmem:[%s5508_s1 + $0xfb0] sm:$0xff] }
  0xf0   : > { %3416 = vmatpush3.msra.mxu1 %v2782_v19  ;;  %3382 = vmatprep.subr.mxu0 %v2765_v20  ;;  %v2815_v18 = vld [vmem:[%s5508_s1 + $0xe30] sm:$0xff]  ;;  %v2830_v20 = vld [vmem:[%s5508_s1 + $0xea8] sm:$0xff] }
  0xf1   : > { %3417 = vmatprep.subr.mxu1 %v2797_v21  ;;  %3383 = vmatpush3.msra.mxu0 %v2749_v22  ;;  %v2847_v19 = vld [vmem:[%s5508_s1 + $0xf30] sm:$0xff]  ;;  %v2862_v21 = vld [vmem:[%s5508_s1 + $0xfa8] sm:$0xff] }
  0xf2   : > { %3418 = vmatpush3.msra.mxu1 %v2781_v23  ;;  %3384 = vmatprep.subr.mxu0 %v2764_v24  ;;  %v2814_v22 = vld [vmem:[%s5508_s1 + $0xe28] sm:$0xff]  ;;  %v2829_v24 = vld [vmem:[%s5508_s1 + $0xea0] sm:$0xff] }
  0xf3   : > { %3419 = vmatprep.subr.mxu1 %v2796_v25  ;;  %3385 = vmatpush3.msra.mxu0 %v2748_v26  ;;  %v2846_v23 = vld [vmem:[%s5508_s1 + $0xf28] sm:$0xff]  ;;  %v2861_v25 = vld [vmem:[%s5508_s1 + $0xfa0] sm:$0xff] }
  0xf4   : > { %3420 = vmatpush3.msra.mxu1 %v2780_v27  ;;  %3386 = vmatprep.subr.mxu0 %v2763_v28  ;;  %v2813_v26 = vld [vmem:[%s5508_s1 + $0xe20] sm:$0xff]  ;;  %v2828_v28 = vld [vmem:[%s5508_s1 + $0xe98] sm:$0xff] }
  0xf5   : > { %3421 = vmatprep.subr.mxu1 %v2795_v29  ;;  %3387 = vmatpush3.msra.mxu0 %v2747_v30  ;;  %v2845_v27 = vld [vmem:[%s5508_s1 + $0xf20] sm:$0xff]  ;;  %v2860_v29 = vld [vmem:[%s5508_s1 + $0xf98] sm:$0xff] }
  0xf6   : > { %3422 = vmatpush3.msra.mxu1 %v2779_v31  ;;  %3388 = vmatprep.subr.mxu0 %v2762_v32  ;;  %v2812_v30 = vld [vmem:[%s5508_s1 + $0xe18] sm:$0xff]  ;;  %v2827_v32 = vld [vmem:[%s5508_s1 + $0xe90] sm:$0xff] }
  0xf7   : > { %3423 = vmatprep.subr.mxu1 %v2794_v33  ;;  %3389 = vmatpush3.msra.mxu0 %v2746_v34  ;;  %v2844_v31 = vld [vmem:[%s5508_s1 + $0xf18] sm:$0xff]  ;;  %v2859_v33 = vld [vmem:[%s5508_s1 + $0xf90] sm:$0xff]  ;;  %v1833_v34 = vld [vmem:[%s3807_s20 + $0x28] sm:$0xfe] }
  0xf8   : > { %3424 = vmatpush3.msra.mxu1 %v2778_v35  ;;  %3390 = vmatprep.subr.mxu0 %v2761_v36  ;;  %v1837_v35 = vld [vmem:[%s3807_s20 + $0x48] sm:$0x1]  ;;  %v1835_v36 = vld [vmem:[%s3807_s20 + $0x38] sm:$0xfe] }
  0xf9   : > { %3425 = vmatprep.subr.mxu1 %v2793_v37  ;;  %3391 = vmatpush3.msra.mxu0 %v2745_v38  ;;  %v1839_v37 = vld [vmem:[%s3807_s20 + $0x58] sm:$0x1]  ;;  %v1832_v38 = vld [vmem:[%s3807_s20 + $0x20] sm:$0xfe] }
  0xfa   : > { %1755 = vmatprep.mubr.f32.mxu0 %v1623_v39  ;;  %3426 = vmatpush3.msra.mxu1 %v2777_v40  ;;  %v1836_v39 = vld [vmem:[%s3807_s20 + $0x40] sm:$0x1]  ;;  %v1834_v40 = vld [vmem:[%s3807_s20 + $0x30] sm:$0xfe] }
  0xfb   : > { %1825 = vmatprep.mubr.f32.mxu1 %v1625_v41  ;;  %1756 = vmatmul.mubr.f32.vlgmr.msra.gmra.mxu0 %v1622_v42  ;;  %v1838_v41 = vld [vmem:[%s3807_s20 + $0x50] sm:$0x1] }
  0xfc   : > { %1826 = vmatmul.mubr.f32.vlgmr.msra.gmra.mxu1 %v1624_v43  ;;  %3430 = vmatprep.subr.mxu0 %v2840_v44  ;;  %v2811_v42 = vld [vmem:[%s5508_s1 + $0xe10] sm:$0xff]  ;;  %v1916_v44 = vrot.slane %v1833_v34, 1  ;;  %v2880_v34 = vld [vmem:[%s5508_s1 + $0x1038] sm:$0xff] }
  0xfd   : > { %3465 = vmatprep.subr.mxu1 %v2872_v45  ;;  %3431 = vmatpush3.msra.mxu0 %v2824_v46  ;;  %v2843_v43 = vld [vmem:[%s5508_s1 + $0xf10] sm:$0xff]  ;;  %v1917_v45 = vrot.slane %v1837_v35, 1  ;;  %v2826_v46 = vld [vmem:[%s5508_s1 + $0xe88] sm:$0xff]  ;;  %v2912_v35 = vld [vmem:[%s5508_s1 + $0x1138] sm:$0xff] }
  0xfe   : > { %3466 = vmatpush3.msra.mxu1 %v2856_v47  ;;  %3432 = vmatprep.subr.mxu0 %v2839_v48  ;;  %v2858_v47 = vld [vmem:[%s5508_s1 + $0xf88] sm:$0xff]  ;;  %v1922_v48 = vrot.slane %v1835_v36, 1  ;;  %v2895_v36 = vld [vmem:[%s5508_s1 + $0x10b0] sm:$0xff] }
  0xff   : > { %3467 = vmatprep.subr.mxu1 %v2871_v49  ;;  %3433 = vmatpush3.msra.mxu0 %v2823_v50  ;;  %v1923_v49 = vrot.slane %v1839_v37, 1  ;;  %v2810_v50 = vld [vmem:[%s5508_s1 + $0xe08] sm:$0xff]  ;;  %v2927_v37 = vld [vmem:[%s5508_s1 + $0x11b0] sm:$0xff] }
 0x100   : > { %3468 = vmatpush3.msra.mxu1 %v2855_v51  ;;  %3434 = vmatprep.subr.mxu0 %v2838_v52  ;;  %v2842_v51 = vld [vmem:[%s5508_s1 + $0xf08] sm:$0xff]  ;;  %v1913_v52 = vrot.slane %v1832_v38, 1  ;;  %v2879_v38 = vld [vmem:[%s5508_s1 + $0x1030] sm:$0xff] }
 0x101   : > { %3469 = vmatprep.subr.mxu1 %v2870_v53  ;;  %3435 = vmatpush3.msra.mxu0 %v2822_v54  ;;  %v1914_v53 = vrot.slane %v1836_v39, 1  ;;  %v1919_v54 = vrot.slane %v1834_v40, 1  ;;  %v2911_v39 = vld [vmem:[%s5508_s1 + $0x1130] sm:$0xff]  ;;  %v2894_v40 = vld [vmem:[%s5508_s1 + $0x10a8] sm:$0xff] }
 0x102   : > { %3470 = vmatpush3.msra.mxu1 %v2854_v55  ;;  %3436 = vmatprep.subr.mxu0 %v2837_v56  ;;  %v1920_v55 = vrot.slane %v1838_v41, 1  ;;  %v2825_v56 = vld [vmem:[%s5508_s1 + $0xe80] sm:$0xff]  ;;  %v2926_v41 = vld [vmem:[%s5508_s1 + $0x11a8] sm:$0xff] }
 0x103   : > { %3471 = vmatprep.subr.mxu1 %v2869_v57  ;;  %3437 = vmatpush3.msra.mxu0 %v2821_v58  ;;  %v2857_v57 = vld [vmem:[%s5508_s1 + $0xf80] sm:$0xff] }
 0x104   : > { %3472 = vmatpush3.msra.mxu1 %v2853_v59  ;;  %3438 = vmatprep.subr.mxu0 %v2836_v60  ;;  %v2809_v58 = vld [vmem:[%s5508_s1 + $0xe00] sm:$0xff]  ;;  %v1918_v59 = vsel %vm369_vm0, %v1916_v44, %v1917_v45 }
 0x105   : > { %3473 = vmatprep.subr.mxu1 %v2868_v61  ;;  %3439 = vmatpush3.msra.mxu0 %v2820_v62  ;;  %v2841_v60 = vld [vmem:[%s5508_s1 + $0xf00] sm:$0xff]  ;;  %v1924_v61 = vsel %vm369_vm0, %v1922_v48, %v1923_v49  ;;  %v1915_v62 = vsel %vm369_vm0, %v1913_v52, %v1914_v53  ;;  %v2892_v48 = vld [vmem:[%s5508_s1 + $0x1098] sm:$0xff]  ;;  %v2891_v52 = vld [vmem:[%s5508_s1 + $0x1090] sm:$0xff] }
 0x106   : > { %3474 = vmatpush3.msra.mxu1 %v2852_v63  ;;  %3440 = vmatprep.subr.mxu0 %v2835_v0  ;;  %v1921_v63 = vsel %vm369_vm0, %v1919_v54, %v1920_v55  ;;  %v2904_v0 = vld [vmem:[%s5508_s1 + $0x10f8] sm:$0xff]  ;;  %v2893_v44 = vld [vmem:[%s5508_s1 + $0x10a0] sm:$0xff]  ;;  %v2923_v53 = vld [vmem:[%s5508_s1 + $0x1190] sm:$0xff] }
 0x107   : > { %3475 = vmatprep.subr.mxu1 %v2867_v1  ;;  %3441 = vmatpush3.msra.mxu0 %v2819_v2  ;;  %v2936_v1 = vld [vmem:[%s5508_s1 + $0x11f8] sm:$0xff]  ;;  %v2925_v45 = vld [vmem:[%s5508_s1 + $0x11a0] sm:$0xff]  ;;  %v2071_v54 = vld [vmem:[%s3807_s20 + $0x28] sm:$0xfc] }
 0x108   : > { %3476 = vmatpush3.msra.mxu1 %v2851_v3  ;;  %3442 = vmatprep.subr.mxu0 %v2834_v4  ;;  %v2888_v2 = vld [vmem:[%s5508_s1 + $0x1078] sm:$0xff]  ;;  %v2903_v4 = vld [vmem:[%s5508_s1 + $0x10f0] sm:$0xff]  ;;  %v2075_v55 = vld [vmem:[%s3807_s20 + $0x48] sm:$0x3] }
 0x109   : > { %3477 = vmatprep.subr.mxu1 %v2866_v5  ;;  %3443 = vmatpush3.msra.mxu0 %v2818_v6  ;;  %v2920_v3 = vld [vmem:[%s5508_s1 + $0x1178] sm:$0xff]  ;;  %v2935_v5 = vld [vmem:[%s5508_s1 + $0x11f0] sm:$0xff] }
 0x10a   : > { %3478 = vmatpush3.msra.mxu1 %v2850_v7  ;;  %3444 = vmatprep.subr.mxu0 %v2833_v8  ;;  %v2887_v6 = vld [vmem:[%s5508_s1 + $0x1070] sm:$0xff]  ;;  %v2902_v8 = vld [vmem:[%s5508_s1 + $0x10e8] sm:$0xff]  ;;  %v2924_v49 = vld [vmem:[%s5508_s1 + $0x1198] sm:$0xff] }
 0x10b   : > { %3479 = vmatprep.subr.mxu1 %v2865_v9  ;;  %3445 = vmatpush3.msra.mxu0 %v2817_v10  ;;  %v2919_v7 = vld [vmem:[%s5508_s1 + $0x1170] sm:$0xff]  ;;  %v2934_v9 = vld [vmem:[%s5508_s1 + $0x11e8] sm:$0xff] }
 0x10c   : > { %3480 = vmatpush3.msra.mxu1 %v2849_v11  ;;  %3446 = vmatprep.subr.mxu0 %v2832_v12  ;;  %v2886_v10 = vld [vmem:[%s5508_s1 + $0x1068] sm:$0xff]  ;;  %v2901_v12 = vld [vmem:[%s5508_s1 + $0x10e0] sm:$0xff] }
 0x10d   : > { %3481 = vmatprep.subr.mxu1 %v2864_v13  ;;  %3447 = vmatpush3.msra.mxu0 %v2816_v14  ;;  %v2918_v11 = vld [vmem:[%s5508_s1 + $0x1168] sm:$0xff]  ;;  %v2933_v13 = vld [vmem:[%s5508_s1 + $0x11e0] sm:$0xff] }
 0x10e   : > { %3482 = vmatpush3.msra.mxu1 %v2848_v15  ;;  %3448 = vmatprep.subr.mxu0 %v2831_v16  ;;  %v2885_v14 = vld [vmem:[%s5508_s1 + $0x1060] sm:$0xff]  ;;  %v2900_v16 = vld [vmem:[%s5508_s1 + $0x10d8] sm:$0xff] }
 0x10f   : > { %3483 = vmatprep.subr.mxu1 %v2863_v17  ;;  %3449 = vmatpush3.msra.mxu0 %v2815_v18  ;;  %v2917_v15 = vld [vmem:[%s5508_s1 + $0x1160] sm:$0xff]  ;;  %v2932_v17 = vld [vmem:[%s5508_s1 + $0x11d8] sm:$0xff] }
 0x110   : > { %3484 = vmatpush3.msra.mxu1 %v2847_v19  ;;  %3450 = vmatprep.subr.mxu0 %v2830_v20  ;;  %v2884_v18 = vld [vmem:[%s5508_s1 + $0x1058] sm:$0xff]  ;;  %v2899_v20 = vld [vmem:[%s5508_s1 + $0x10d0] sm:$0xff] }
 0x111   : > { %3485 = vmatprep.subr.mxu1 %v2862_v21  ;;  %3451 = vmatpush3.msra.mxu0 %v2814_v22  ;;  %v2916_v19 = vld [vmem:[%s5508_s1 + $0x1158] sm:$0xff]  ;;  %v2931_v21 = vld [vmem:[%s5508_s1 + $0x11d0] sm:$0xff] }
 0x112   : > { %3486 = vmatpush3.msra.mxu1 %v2846_v23  ;;  %3452 = vmatprep.subr.mxu0 %v2829_v24  ;;  %v2883_v22 = vld [vmem:[%s5508_s1 + $0x1050] sm:$0xff]  ;;  %v2898_v24 = vld [vmem:[%s5508_s1 + $0x10c8] sm:$0xff] }
 0x113   : > { %3487 = vmatprep.subr.mxu1 %v2861_v25  ;;  %3453 = vmatpush3.msra.mxu0 %v2813_v26  ;;  %v2915_v23 = vld [vmem:[%s5508_s1 + $0x1150] sm:$0xff]  ;;  %v2930_v25 = vld [vmem:[%s5508_s1 + $0x11c8] sm:$0xff] }
 0x114   : > { %3488 = vmatpush3.msra.mxu1 %v2845_v27  ;;  %3454 = vmatprep.subr.mxu0 %v2828_v28  ;;  %v2882_v26 = vld [vmem:[%s5508_s1 + $0x1048] sm:$0xff]  ;;  %v2897_v28 = vld [vmem:[%s5508_s1 + $0x10c0] sm:$0xff] }
 0x115   : > { %3489 = vmatprep.subr.mxu1 %v2860_v29  ;;  %3455 = vmatpush3.msra.mxu0 %v2812_v30  ;;  %v2914_v27 = vld [vmem:[%s5508_s1 + $0x1148] sm:$0xff]  ;;  %v2929_v29 = vld [vmem:[%s5508_s1 + $0x11c0] sm:$0xff] }
 0x116   : > { %3490 = vmatpush3.msra.mxu1 %v2844_v31  ;;  %3456 = vmatprep.subr.mxu0 %v2827_v32  ;;  %v2881_v30 = vld [vmem:[%s5508_s1 + $0x1040] sm:$0xff]  ;;  %v2896_v32 = vld [vmem:[%s5508_s1 + $0x10b8] sm:$0xff] }
 0x117   : > { %3491 = vmatprep.subr.mxu1 %v2859_v33  ;;  %3457 = vmatpush3.msra.mxu0 %v2811_v42  ;;  %v2913_v31 = vld [vmem:[%s5508_s1 + $0x1140] sm:$0xff]  ;;  %v2928_v33 = vld [vmem:[%s5508_s1 + $0x11b8] sm:$0xff]  ;;  %v2878_v42 = vld [vmem:[%s5508_s1 + $0x1028] sm:$0xff] }
 0x118   : > { %3492 = vmatpush3.msra.mxu1 %v2843_v43  ;;  %3458 = vmatprep.subr.mxu0 %v2826_v46  ;;  %v2910_v43 = vld [vmem:[%s5508_s1 + $0x1128] sm:$0xff]  ;;  %v2877_v46 = vld [vmem:[%s5508_s1 + $0x1020] sm:$0xff] }
 0x119   : > { %3493 = vmatprep.subr.mxu1 %v2858_v47  ;;  %3459 = vmatpush3.msra.mxu0 %v2810_v50  ;;  %v2909_v47 = vld [vmem:[%s5508_s1 + $0x1120] sm:$0xff]  ;;  %v2876_v50 = vld [vmem:[%s5508_s1 + $0x1018] sm:$0xff] }
 0x11a   : > { %3494 = vmatpush3.msra.mxu1 %v2842_v51  ;;  %3460 = vmatprep.subr.mxu0 %v2825_v56  ;;  %v2908_v51 = vld [vmem:[%s5508_s1 + $0x1118] sm:$0xff] }
 0x11b   : > { %3495 = vmatprep.subr.mxu1 %v2857_v57  ;;  %3461 = vmatpush3.msra.mxu0 %v2809_v58  ;;  %v2073_v56 = vld [vmem:[%s3807_s20 + $0x38] sm:$0xfc]  ;;  %v2077_v57 = vld [vmem:[%s3807_s20 + $0x58] sm:$0x3]  ;;  %v2070_v58 = vld [vmem:[%s3807_s20 + $0x20] sm:$0xfc] }
 0x11c   : > { %1993 = vmatprep.mubr.f32.mxu0 %v1918_v59  ;;  %3496 = vmatpush3.msra.mxu1 %v2841_v60  ;;  %v2074_v59 = vld [vmem:[%s3807_s20 + $0x40] sm:$0x3]  ;;  %v2072_v60 = vld [vmem:[%s3807_s20 + $0x30] sm:$0xfc] }
 0x11d   : > { %2063 = vmatprep.mubr.f32.mxu1 %v1924_v61  ;;  %1994 = vmatmul.mubr.f32.vlgmr.msra.gmra.mxu0 %v1915_v62  ;;  %v2076_v61 = vld [vmem:[%s3807_s20 + $0x50] sm:$0x3] }
 0x11e   : > { %2064 = vmatmul.mubr.f32.vlgmr.msra.gmra.mxu1 %v1921_v63  ;;  %3500 = vmatprep.subr.mxu0 %v2904_v0  ;;  %v2875_v62 = vld [vmem:[%s5508_s1 + $0x1010] sm:$0xff]  ;;  %v2154_v0 = vrot.slane %v2071_v54, 2 }
 0x11f   : > { %3535 = vmatprep.subr.mxu1 %v2936_v1  ;;  %3501 = vmatpush3.msra.mxu0 %v2888_v2  ;;  %v2907_v63 = vld [vmem:[%s5508_s1 + $0x1110] sm:$0xff]  ;;  %v2155_v1 = vrot.slane %v2075_v55, 2  ;;  %v2890_v2 = vld [vmem:[%s5508_s1 + $0x1088] sm:$0xff] }
 0x120   : > { %3536 = vmatpush3.msra.mxu1 %v2920_v3  ;;  %3502 = vmatprep.subr.mxu0 %v2903_v4  ;;  %v2922_v3 = vld [vmem:[%s5508_s1 + $0x1188] sm:$0xff]  ;;  %v2160_v4 = vrot.slane %v2073_v56, 2 }
 0x121   : > { %3537 = vmatprep.subr.mxu1 %v2935_v5  ;;  %3503 = vmatpush3.msra.mxu0 %v2887_v6  ;;  %v2161_v5 = vrot.slane %v2077_v57, 2  ;;  %v2874_v6 = vld [vmem:[%s5508_s1 + $0x1008] sm:$0xff] }
 0x122   : > { %3538 = vmatpush3.msra.mxu1 %v2919_v7  ;;  %3504 = vmatprep.subr.mxu0 %v2902_v8  ;;  %v2906_v7 = vld [vmem:[%s5508_s1 + $0x1108] sm:$0xff]  ;;  %v2151_v8 = vrot.slane %v2070_v58, 2 }
 0x123   : > { %3539 = vmatprep.subr.mxu1 %v2934_v9  ;;  %3505 = vmatpush3.msra.mxu0 %v2886_v10  ;;  %v2152_v9 = vrot.slane %v2074_v59, 2  ;;  %v2157_v10 = vrot.slane %v2072_v60, 2 }
 0x124   : > { %3540 = vmatpush3.msra.mxu1 %v2918_v11  ;;  %3506 = vmatprep.subr.mxu0 %v2901_v12  ;;  %v2158_v11 = vrot.slane %v2076_v61, 2  ;;  %v2889_v12 = vld [vmem:[%s5508_s1 + $0x1080] sm:$0xff] }
 0x125   : > { %3541 = vmatprep.subr.mxu1 %v2933_v13  ;;  %3507 = vmatpush3.msra.mxu0 %v2885_v14  ;;  %v2921_v13 = vld [vmem:[%s5508_s1 + $0x1180] sm:$0xff] }
 0x126   : > { %3542 = vmatpush3.msra.mxu1 %v2917_v15  ;;  %3508 = vmatprep.subr.mxu0 %v2900_v16  ;;  %v2873_v14 = vld [vmem:[%s5508_s1 + $0x1000] sm:$0xff]  ;;  %v2156_v15 = vsel %vm747_vm1, %v2154_v0, %v2155_v1 }
 0x127   : > { %3543 = vmatprep.subr.mxu1 %v2932_v17  ;;  %3509 = vmatpush3.msra.mxu0 %v2884_v18  ;;  %v2905_v16 = vld [vmem:[%s5508_s1 + $0x1100] sm:$0xff]  ;;  %v2162_v17 = vsel %vm747_vm1, %v2160_v4, %v2161_v5  ;;  %v2153_v18 = vsel %vm747_vm1, %v2151_v8, %v2152_v9 }
 0x128   : > { %3544 = vmatpush3.msra.mxu1 %v2916_v19  ;;  %3510 = vmatprep.subr.mxu0 %v2899_v20  ;;  %v2159_v19 = vsel %vm747_vm1, %v2157_v10, %v2158_v11  ;;  %v2972_v20 = vpop.f32.mrf.mxu0 }
 0x129   : > { %3545 = vmatprep.subr.mxu1 %v2931_v21  ;;  %3511 = vmatpush3.msra.mxu0 %v2883_v22  ;;  %v3007_v21 = vpop.f32.mrf.mxu1 }
 0x12a   : > { %3546 = vmatpush3.msra.mxu1 %v2915_v23  ;;  %3512 = vmatprep.subr.mxu0 %v2898_v24  ;;  %v2973_v22 = vpop.f32.mrf.mxu0 }
 0x12b   : > { %3547 = vmatprep.subr.mxu1 %v2930_v25  ;;  %3513 = vmatpush3.msra.mxu0 %v2882_v26  ;;  %v3008_v23 = vpop.f32.mrf.mxu1 }
 0x12c   : > { %3548 = vmatpush3.msra.mxu1 %v2914_v27  ;;  %3514 = vmatprep.subr.mxu0 %v2897_v28  ;;  %v3042_v24 = vpop.f32.mrf.mxu0 }
 0x12d   : > { %3549 = vmatprep.subr.mxu1 %v2929_v29  ;;  %3515 = vmatpush3.msra.mxu0 %v2881_v30  ;;  %v3077_v25 = vpop.f32.mrf.mxu1 }
 0x12e   : > { %3550 = vmatpush3.msra.mxu1 %v2913_v31  ;;  %3516 = vmatprep.subr.mxu0 %v2896_v32  ;;  %v3043_v26 = vpop.f32.mrf.mxu0 }
 0x12f   : > { %3551 = vmatprep.subr.mxu1 %v2928_v33  ;;  %3517 = vmatpush3.msra.mxu0 %v2880_v34  ;;  %v3078_v27 = vpop.f32.mrf.mxu1 }
 0x130   : > { %3552 = vmatpush3.msra.mxu1 %v2912_v35  ;;  %3518 = vmatprep.subr.mxu0 %v2895_v36  ;;  %v3079_v59 = vadd.f32 %v3078_v27, %v3077_v25 }
 0x131   : > { %3553 = vmatprep.subr.mxu1 %v2927_v37  ;;  %3519 = vmatpush3.msra.mxu0 %v2879_v38 }
 0x132   : > { %3554 = vmatpush3.msra.mxu1 %v2911_v39  ;;  %3520 = vmatprep.subr.mxu0 %v2894_v40 }
 0x133   : > { %3555 = vmatprep.subr.mxu1 %v2926_v41  ;;  %3521 = vmatpush3.msra.mxu0 %v2878_v42  ;;  %v3112_v28 = vpop.f32.mrf.mxu0 }
 0x134   : > { %3556 = vmatpush3.msra.mxu1 %v2910_v43  ;;  %3522 = vmatprep.subr.mxu0 %v2893_v44  ;;  %v3147_v29 = vpop.f32.mrf.mxu1  ;;  %v2974_v44 = vadd.f32 %v2973_v22, %v2972_v20 }
 0x135   : > { %3557 = vmatprep.subr.mxu1 %v2925_v45  ;;  %3523 = vmatpush3.msra.mxu0 %v2877_v46  ;;  %v3113_v30 = vpop.f32.mrf.mxu0  ;;  %v3009_v45 = vadd.f32 %v3008_v23, %v3007_v21 }
 0x136   : > { %3558 = vmatpush3.msra.mxu1 %v2909_v47  ;;  %3524 = vmatprep.subr.mxu0 %v2892_v48  ;;  %v3148_v31 = vpop.f32.mrf.mxu1  ;;  %v3044_v48 = vadd.f32 %v3043_v26, %v3042_v24  ;;  %v2937_v26 = vld [vmem:[%s5509_s2] ss:$0 sm:$0xff] }
 0x137   : > { %3559 = vmatprep.subr.mxu1 %v2924_v49  ;;  %3525 = vmatpush3.msra.mxu0 %v2876_v50  ;;  %v523_v49 = vadd.f32 %v3009_v45, %v2974_v44  ;;  %v3114_v50 = vadd.f32 %v3113_v30, %v3112_v28 }
 0x138   : > { %3560 = vmatpush3.msra.mxu1 %v2908_v51  ;;  %3526 = vmatprep.subr.mxu0 %v2891_v52  ;;  %v3149_v51 = vadd.f32 %v3148_v31, %v3147_v29 }
 0x139   : > { %3561 = vmatprep.subr.mxu1 %v2923_v53  ;;  %3527 = vmatpush3.msra.mxu0 %v2875_v62  ;;  %v593_v54 = vadd.f32 %v3044_v48, %v523_v49 }
 0x13a   : > { %3562 = vmatpush3.msra.mxu1 %v2907_v63  ;;  %3528 = vmatprep.subr.mxu0 %v2890_v2  ;;  %v901_v60 = vadd.f32 %v3149_v51, %v3114_v50 }
 0x13b   : > { %3563 = vmatprep.subr.mxu1 %v2922_v3  ;;  %3529 = vmatpush3.msra.mxu0 %v2874_v6  ;;  %v663_v63 = vadd.f32 %v3079_v59, %v593_v54 }
 0x13c   : > { %3564 = vmatpush3.msra.mxu1 %v2906_v7  ;;  %3530 = vmatprep.subr.mxu0 %v2889_v12 }
 0x13d   : > { %3565 = vmatprep.subr.mxu1 %v2921_v13  ;;  %3531 = vmatpush3.msra.mxu0 %v2873_v14  ;;  %v904_v5 = vadd.f32 %v901_v60, %v663_v63 }
 0x13e   : > { %2231 = vmatprep.mubr.f32.mxu0 %v2156_v15  ;;  %3566 = vmatpush3.msra.mxu1 %v2905_v16 }
 0x13f   : > { %2301 = vmatprep.mubr.f32.mxu1 %v2162_v17  ;;  %2232 = vmatmul.mubr.f32.vlgmr.msra.gmra.mxu0 %v2153_v18 }
 0x140   : > { %2302 = vmatmul.mubr.f32.vlgmr.msra.gmra.mxu1 %v2159_v19 }
 0x155   : > { %v3182_v32 = vpop.f32.mrf.mxu0 }
 0x156   : > { %v3217_v33 = vpop.f32.mrf.mxu1 }
 0x157   : > { %v3183_v34 = vpop.f32.mrf.mxu0 }
 0x158   : > { %v3218_v35 = vpop.f32.mrf.mxu1  ;;  %v3184_v55 = vadd.f32 %v3183_v34, %v3182_v32 }
 0x159   : > { %v3219_v56 = vadd.f32 %v3218_v35, %v3217_v33 }
 0x15b   : > { %v1140_v0 = vadd.f32 %v3219_v56, %v3184_v55 }
 0x15d   : > { %v1143_v9 = vadd.f32 %v1140_v0, %v904_v5 }
 0x177   : > { %v3252_v36 = vpop.f32.mrf.mxu0 }
 0x178   : > { %v3287_v37 = vpop.f32.mrf.mxu1 }
 0x179   : > { %v3253_v38 = vpop.f32.mrf.mxu0 }
 0x17a   : > { %v3288_v39 = vpop.f32.mrf.mxu1  ;;  %v3254_v61 = vadd.f32 %v3253_v38, %v3252_v36 }
 0x17b   : > { %v3289_v62 = vadd.f32 %v3288_v39, %v3287_v37 }
 0x17d   : > { %v1379_v6 = vadd.f32 %v3289_v62, %v3254_v61 }
 0x17f   : > { %v1382_v13 = vadd.f32 %v1379_v6, %v1143_v9 }
 0x199   : > { %v3322_v40 = vpop.f32.mrf.mxu0 }
 0x19a   : > { %v3357_v41 = vpop.f32.mrf.mxu1 }
 0x19b   : > { %v3323_v42 = vpop.f32.mrf.mxu0 }
 0x19c   : > { %v3358_v43 = vpop.f32.mrf.mxu1  ;;  %v3324_v1 = vadd.f32 %v3323_v42, %v3322_v40 }
 0x19d   : > { %v3359_v2 = vadd.f32 %v3358_v43, %v3357_v41 }
 0x19f   : > { %v1618_v10 = vadd.f32 %v3359_v2, %v3324_v1 }
 0x1a1   : > { %v1621_v17 = vadd.f32 %v1618_v10, %v1382_v13 }
 0x1bb   : > { %v3392_v46 = vpop.f32.mrf.mxu0 }
 0x1bc   : > { %v3427_v47 = vpop.f32.mrf.mxu1 }
 0x1bd   : > { %v3393_v52 = vpop.f32.mrf.mxu0 }
 0x1be   : > { %v3428_v53 = vpop.f32.mrf.mxu1  ;;  %v3394_v7 = vadd.f32 %v3393_v52, %v3392_v46 }
 0x1bf   : > { %v3429_v8 = vadd.f32 %v3428_v53, %v3427_v47 }
 0x1c1   : > { %v1828_v14 = vadd.f32 %v3429_v8, %v3394_v7 }
 0x1c3   : > { %v1831_v21 = vadd.f32 %v1828_v14, %v1621_v17 }
 0x1dd   : > { %v3462_v57 = vpop.f32.mrf.mxu0 }
 0x1de   : > { %v3497_v58 = vpop.f32.mrf.mxu1 }
 0x1df   : > { %v3463_v3 = vpop.f32.mrf.mxu0 }
 0x1e0   : > { %v3498_v4 = vpop.f32.mrf.mxu1  ;;  %v3464_v11 = vadd.f32 %v3463_v3, %v3462_v57 }
 0x1e1   : > { %v3499_v12 = vadd.f32 %v3498_v4, %v3497_v58 }
 0x1e3   : > { %v2066_v18 = vadd.f32 %v3499_v12, %v3464_v11 }
 0x1e5   : > { %v2069_v24 = vadd.f32 %v2066_v18, %v1831_v21 }
 0x1ff   : > { %v3532_v15 = vpop.f32.mrf.mxu0 }
 0x200   : > { %v3567_v16 = vpop.f32.mrf.mxu1 }
 0x201   : > { %v3533_v19 = vpop.f32.mrf.mxu0 }
 0x202   : > { %v3568_v20 = vpop.f32.mrf.mxu1  ;;  %v3534_v22 = vadd.f32 %v3533_v19, %v3532_v15 }
 0x203   : > { %v3569_v23 = vadd.f32 %v3568_v20, %v3567_v16 }
 0x205   : > { %v2304_v25 = vadd.f32 %v3569_v23, %v3534_v22 }
 0x207   : > { %v2307_v27 = vadd.f32 %v2304_v25, %v2069_v24 }
 0x209   : > { %v2315_v28 = vadd.f32 %v2937_v26, %v2307_v27 }
 0x20b   : > { %2316 = vst [vmem:[%s219_s28] sm:$0xff] %v2315_v28 }
 0x20c PF: > { %s13_s14 = sadd.s32 1, %s3617_s14   ;;  %s5511_s12 = smov %s3613_s13 }
 0x20d   : > { %p10_p5 = scmp.ge.s32.totalorder %s13_s14, 4   ;;  %s5512_s13 = smov %s5514_s15 }
 0x20f   :  { %12 = sbr.rel (!%p10_p5) target bundleno = 2 (0x2), region = 76 }

</bundles_post_ra>
